<compile_context>
chip_gen: v7x
topology: tpu7x:2x2x1
jax: 0.10.0
libtpu: 0.0.40
codegen_flags: <defaults>
</compile_context>

<pallas_src>
import functools
import math

import jax
import jax.numpy as jnp
import numpy as np
from jax.experimental import pallas as pl
from jax.experimental.pallas import tpu as pltpu


_VMEM_LIMIT = 32 * 1024 * 1024      # safe scoped-VMEM request on v5e/v6e/v7x
_MAX_BLOCK_ROWS = 512               # per review: 256-512 output rows per block
_MAX_ACC_BYTES = 64 * 1024          # keep the per-block f32 accumulator small


def _pick_bh(hout, wp, cout, max_rows=_MAX_BLOCK_ROWS, max_acc_bytes=_MAX_ACC_BYTES):
    """Largest divisor bh of hout whose bh*wp row block fits the row / f32
    accumulator budgets (falls back to bh = 1)."""
    best = 1
    for bh in range(1, hout + 1):
        if hout % bh:
            continue
        block_m = bh * wp
        if block_m <= max_rows and block_m * cout * 4 <= max_acc_bytes:
            best = bh
    return best


# ----------------------------------------------------------------------------
# In-kernel helpers
# ----------------------------------------------------------------------------
def _accum_taps(xs, w_ref, *, kh, kw, cin, wp, block_m, group_kw):
    """Sum of per-tap shifted-slab matmuls on the flat padded activation span.
    With group_kw, the kw column taps of each kernel row are lane-concatenated
    into one K = kw*cin operand (better MXU depth, fewer accumulator adds).
    The accumulator is initialized from the first dot (no zeros + extra add)."""
    acc = None
    for i in range(kh):
        if group_kw and kw > 1:
            a = jnp.concatenate(
                [xs[i * wp + j: i * wp + j + block_m, :] for j in range(kw)],
                axis=-1)
            d = jnp.dot(a, w_ref[i * kw * cin:(i + 1) * kw * cin, :],
                        preferred_element_type=jnp.float32)
            acc = d if acc is None else acc + d
        else:
            for j in range(kw):
                t = i * kw + j
                a = xs[i * wp + j: i * wp + j + block_m, :]
                d = jnp.dot(a, w_ref[t * cin:(t + 1) * cin, :],
                            preferred_element_type=jnp.float32)
                acc = d if acc is None else acc + d
    return acc


def _store_rows(o_ref, y, *, bh, wp, wout):
    """Strip the junk padding columns in-kernel: keep the first wout of every
    wp flat rows and store into the clean (bh, wout, C) output block."""
    # TODO(synk): a transposed (channels-in-sublanes) compute layout would make
    # these sub-128-lane stores fully lane-dense; kept channels-last for now.
    for r in range(bh):
        o_ref[r, :, :] = y[r * wp: r * wp + wout, :]


# ----------------------------------------------------------------------------
# Pallas kernels
# ----------------------------------------------------------------------------
def _conv_kernel(x_ref, w_ref, b_ref, o_ref, *, kh, kw, cin, wp, wout, bh,
                 block_m, span_m, group_kw, pre_relu, post_relu):
    base = pl.program_id(1) * block_m
    if block_m % 8 == 0:
        base = pl.multiple_of(base, 8)
    xs = x_ref[pl.ds(base, span_m), :]               # one dynamic load per block
    if pre_relu:
        xs = jnp.maximum(xs, 0)                      # hoisted: once per element
    acc = _accum_taps(xs, w_ref, kh=kh, kw=kw, cin=cin, wp=wp,
                      block_m=block_m, group_kw=group_kw)
    y = acc + b_ref[...]
    if post_relu:
        y = jnp.maximum(y, 0.0)
    _store_rows(o_ref, y.astype(o_ref.dtype), bh=bh, wp=wp, wout=wout)


def _resblock_kernel(x_ref, w3_ref, b3_ref, w1_ref, b1_ref, o_ref, *, cin, wp,
                     wout, bh, block_m, span_m, post_relu):
    """Fused ResidualBlock: y = x + conv1x1(relu(conv3x3(relu(x)))).
    The intermediate h (block_m x res_channels) never touches HBM."""
    base = pl.program_id(1) * block_m
    if block_m % 8 == 0:
        base = pl.multiple_of(base, 8)
    xs = x_ref[pl.ds(base, span_m), :]
    xr = jnp.maximum(xs, 0)                          # pre-ReLU of the 3x3, hoisted
    h = _accum_taps(xr, w3_ref, kh=3, kw=3, cin=cin, wp=wp,
                    block_m=block_m, group_kw=True)
    h = jnp.maximum(h + b3_ref[...], 0.0)            # (block_m, res_ch) f32
    y = jnp.dot(h.astype(jnp.bfloat16), w1_ref[...],
                preferred_element_type=jnp.float32) + b1_ref[...]
    # residual: the original (un-ReLU'd) x at the centre tap of each output row
    y = y + xs[wp + 1: wp + 1 + block_m, :].astype(jnp.float32)
    if post_relu:                                    # fused standalone pre-deconv ReLU
        y = jnp.maximum(y, 0.0)
    _store_rows(o_ref, y.astype(o_ref.dtype), bh=bh, wp=wp, wout=wout)


# ----------------------------------------------------------------------------
# Wrappers
# ----------------------------------------------------------------------------
def _compiler_params():
    return pltpu.CompilerParams(dimension_semantics=("parallel", "parallel"),
                                vmem_limit_bytes=_VMEM_LIMIT)


def _pad_flat(x_nhwc, pad, extra):
    N, H, W, C = x_nhwc.shape
    Hp, Wp = H + 2 * pad + extra, W + 2 * pad
    if pad > 0 or extra:
        x_nhwc = jnp.pad(x_nhwc, ((0, 0), (pad, pad + extra), (pad, pad), (0, 0)))
    return x_nhwc.reshape(N, Hp * Wp, C).astype(jnp.bfloat16), Hp, Wp


def taps_conv(x_nhwc, w_mat, bias2, *, kh, kw, pad, pre_relu=False,
              post_relu=False, out_dtype=jnp.bfloat16):
    """Stride-1 conv as a single Pallas kernel: per-tap slab matmuls on the
    flattened padded activation, M-blocked over a parallel grid axis, with
    junk padding columns stripped in-kernel.

    x_nhwc : (N, H, W, Cin)
    w_mat  : (kh*kw*Cin, Cout), row order ((i*kw + j)*Cin + ci), bf16
    bias2  : (1, Cout) f32
    """
    N, H, W, Cin = x_nhwc.shape
    Cout = w_mat.shape[1]
    Hout = H + 2 * pad - kh + 1
    Wout = W + 2 * pad - kw + 1
    extra = 1 if kw > 1 else 0          # guard row so the last block's span stays in-bounds
    x_flat, Hp, Wp = _pad_flat(x_nhwc, pad, extra)

    bh = _pick_bh(Hout, Wp, Cout)
    block_m = bh * Wp
    nmb = Hout // bh
    span_m = block_m + (kh - 1) * Wp + (kw - 1)
    group_kw = Cin >= 8                 # skip lane-concat K-grouping for tiny Cin

    kernel = functools.partial(
        _conv_kernel, kh=kh, kw=kw, cin=Cin, wp=Wp, wout=Wout, bh=bh,
        block_m=block_m, span_m=span_m, group_kw=group_kw,
        pre_relu=pre_relu, post_relu=post_relu)

    return pl.pallas_call(
        kernel,
        out_shape=jax.ShapeDtypeStruct((N, Hout, Wout, Cout), out_dtype),
        grid=(N, nmb),
        in_specs=[
            pl.BlockSpec((None, Hp * Wp, Cin), lambda n, m: (n, 0, 0)),
            pl.BlockSpec((kh * kw * Cin, Cout), lambda n, m: (0, 0)),
            pl.BlockSpec((1, Cout), lambda n, m: (0, 0)),
        ],
        out_specs=pl.BlockSpec((None, bh, Wout, Cout), lambda n, m: (n, m, 0, 0)),
        compiler_params=_compiler_params(),
    )(x_flat, w_mat, bias2)


def residual_block(x_nhwc, w3_mat, b3, w1_mat, b1, *, post_relu=False):
    """One fused ResidualBlock pallas_call (3x3 -> ReLU -> 1x1 -> +x)."""
    N, H, W, C = x_nhwc.shape
    res_ch = w3_mat.shape[1]
    Hout, Wout = H, W
    x_flat, Hp, Wp = _pad_flat(x_nhwc, 1, 1)

    bh = _pick_bh(Hout, Wp, C)
    block_m = bh * Wp
    nmb = Hout // bh
    span_m = block_m + 2 * Wp + 2

    kernel = functools.partial(
        _resblock_kernel, cin=C, wp=Wp, wout=Wout, bh=bh,
        block_m=block_m, span_m=span_m, post_relu=post_relu)

    return pl.pallas_call(
        kernel,
        out_shape=jax.ShapeDtypeStruct((N, Hout, Wout, C), jnp.bfloat16),
        grid=(N, nmb),
        in_specs=[
            pl.BlockSpec((None, Hp * Wp, C), lambda n, m: (n, 0, 0)),
            pl.BlockSpec((9 * C, res_ch), lambda n, m: (0, 0)),
            pl.BlockSpec((1, res_ch), lambda n, m: (0, 0)),
            pl.BlockSpec((res_ch, C), lambda n, m: (0, 0)),
            pl.BlockSpec((1, C), lambda n, m: (0, 0)),
        ],
        out_specs=pl.BlockSpec((None, bh, Wout, C), lambda n, m: (n, m, 0, 0)),
        compiler_params=_compiler_params(),
    )(x_flat, w3_mat, b3, w1_mat, b1)


def conv_transpose2d_s2(x_nhwc, w_mat4, b4, *, pre_relu=False, post_relu=False,
                        out_dtype=jnp.bfloat16):
    """nn.ConvTranspose2d(k=4, s=2, p=1) via sub-pixel phase decomposition:
    one fused 3x3/pad-1 taps-conv producing the (2,2,Cout) phases, then a
    depth-to-space reshuffle (kept in XLA; it is a pure layout op)."""
    cout = w_mat4.shape[1] // 4
    y4 = taps_conv(x_nhwc, w_mat4, b4, kh=3, kw=3, pad=1, pre_relu=pre_relu,
                   post_relu=post_relu, out_dtype=out_dtype)
    N, H, W, _ = y4.shape
    y = y4.reshape(N, H, W, 2, 2, cout)
    return jnp.transpose(y, (0, 1, 3, 2, 4, 5)).reshape(N, 2 * H, 2 * W, cout)


# ----------------------------------------------------------------------------
# BottomDecoder forward
# ----------------------------------------------------------------------------
def bottom_decoder_forward(x_nchw, prepared):
    x = jnp.transpose(x_nchw, (0, 2, 3, 1)).astype(jnp.bfloat16)   # NCHW -> NHWC

    # Conv2d(in, hidden, 3, 1, 1)
    x = taps_conv(x, prepared["conv_in_w"], prepared["conv_in_b"],
                  kh=3, kw=3, pad=1)

    # ResidualBlock: x + Conv1x1(ReLU(Conv3x3(ReLU(x)))) -- fully fused.
    # TODO(synk): ResidualBlock internals are not in the provided spec; the
    # standard VQ-VAE block (as in the XLA reference below) is assumed.
    n_res = len(prepared["res"])
    for idx, (w3, b3, w1, b1) in enumerate(prepared["res"]):
        # the standalone pre-deconv nn.ReLU is fused into the LAST block's epilogue
        x = residual_block(x, w3, b3, w1, b1, post_relu=(idx == n_res - 1))

    x = conv_transpose2d_s2(x, prepared["deconv1_w"], prepared["deconv1_b"],
                            pre_relu=(n_res == 0), post_relu=True)
    y = conv_transpose2d_s2(x, prepared["deconv2_w"], prepared["deconv2_b"],
                            out_dtype=jnp.float32)
    # TODO(synk): a transposed (channels-in-sublanes) store in the final kernel
    # would make its 12-lane f32 writeback lane-dense and fold this NCHW
    # transpose away entirely.
    return jnp.transpose(y, (0, 3, 1, 2))                          # NHWC -> NCHW


# ----------------------------------------------------------------------------
# Eager parameter preparation (no per-forward weight reshuffling under jit)
# ----------------------------------------------------------------------------
def _fuse_deconv_weight(w_iohw):
    """(Cin, Cout, 4, 4) ConvTranspose2d(k4,s2,p1) weight -> (9*Cin, 4*Cout)
    fused 3x3 weight over the 4 sub-pixel phases (dy, dx)."""
    w = np.asarray(w_iohw, np.float32)
    cin, cout = w.shape[0], w.shape[1]
    wc = np.zeros((3, 3, cin, 2, 2, cout), np.float32)
    for it in range(3):
        for dy in range(2):
            ky = dy + 3 - 2 * it
            if not 0 <= ky < 4:
                continue
            for jt in range(3):
                for dx in range(2):
                    kx = dx + 3 - 2 * jt
                    if not 0 <= kx < 4:
                        continue
                    wc[it, jt, :, dy, dx, :] = w[:, :, ky, kx]
    return wc.reshape(9 * cin, 4 * cout)


def _conv_w_mat(w_oihw):
    """(Cout, Cin, kh, kw) -> (kh*kw*Cin, Cout), row order ((i*kw + j)*Cin + ci)."""
    w = np.asarray(w_oihw, np.float32)
    cout = w.shape[0]
    return np.transpose(w, (2, 3, 1, 0)).reshape(-1, cout)


def prepare_params(params):
    """Eager (outside jit) conversion of PyTorch-layout parameters into the
    kernel-ready layouts; deconv phase weights are fused exactly once here."""
    prep = {
        "conv_in_w": jnp.asarray(_conv_w_mat(params["conv_in_w"]), jnp.bfloat16),
        "conv_in_b": jnp.asarray(params["conv_in_b"], jnp.float32).reshape(1, -1),
    }
    res = []
    for (w3, b3, w1, b1) in params["res"]:
        res.append((jnp.asarray(_conv_w_mat(w3), jnp.bfloat16),
                    jnp.asarray(b3, jnp.float32).reshape(1, -1),
                    jnp.asarray(_conv_w_mat(w1), jnp.bfloat16),
                    jnp.asarray(b1, jnp.float32).reshape(1, -1)))
    prep["res"] = tuple(res)
    for name in ("deconv1", "deconv2"):
        prep[name + "_w"] = jnp.asarray(_fuse_deconv_weight(params[name + "_w"]),
                                        jnp.bfloat16)
        prep[name + "_b"] = jnp.asarray(
            np.tile(np.asarray(params[name + "_b"], np.float32), 4)).reshape(1, -1)
    return prep


# ----------------------------------------------------------------------------
# Pure-JAX (XLA) f32 reference for the numerical sanity check
# ----------------------------------------------------------------------------
def _ref_forward(x_nchw, params):
    dn = ("NHWC", "HWIO", "NHWC")
    x = jnp.transpose(x_nchw, (0, 2, 3, 1)).astype(jnp.float32)

    def conv(x, w_oihw, b, pad):
        w = jnp.transpose(w_oihw, (2, 3, 1, 0))
        y = jax.lax.conv_general_dilated(x, w, (1, 1), [(pad, pad), (pad, pad)],
                                         dimension_numbers=dn)
        return y + b

    def convT(x, w_iohw, b):  # ConvTranspose2d(k=4, s=2, p=1)
        w = jnp.transpose(jnp.flip(w_iohw, (2, 3)), (2, 3, 0, 1))
        y = jax.lax.conv_general_dilated(x, w, (1, 1), [(2, 2), (2, 2)],
                                         lhs_dilation=(2, 2), dimension_numbers=dn)
        return y + b

    x = conv(x, params["conv_in_w"], params["conv_in_b"], 1)
    for (w3, b3, w1, b1) in params["res"]:
        h = conv(jax.nn.relu(x), w3, b3, 1)
        h = conv(jax.nn.relu(h), w1, b1, 0)
        x = x + h
    x = jax.nn.relu(x)
    x = jax.nn.relu(convT(x, params["deconv1_w"], params["deconv1_b"]))
    x = convT(x, params["deconv2_w"], params["deconv2_b"])
    return jnp.transpose(x, (0, 3, 1, 2))


# ----------------------------------------------------------------------------
# Deterministic parameter init (PyTorch-default-like uniform bounds)
# ----------------------------------------------------------------------------
def _init_conv(key, cout, cin, kh, kw):
    k1, k2 = jax.random.split(key)
    bound = 1.0 / math.sqrt(cin * kh * kw)
    w = jax.random.uniform(k1, (cout, cin, kh, kw), jnp.float32, -bound, bound)
    b = jax.random.uniform(k2, (cout,), jnp.float32, -bound, bound)
    return w, b


def _init_conv_transpose(key, cin, cout, kh, kw):
    k1, k2 = jax.random.split(key)
    bound = 1.0 / math.sqrt(cout * kh * kw)
    w = jax.random.uniform(k1, (cin, cout, kh, kw), jnp.float32, -bound, bound)
    b = jax.random.uniform(k2, (cout,), jnp.float32, -bound, bound)
    return w, b


def make_params(key, in_channels, hidden, num_resblocks, res_channels, out_channels):
    keys = jax.random.split(key, 3 + 2 * num_resblocks)
    params = {}
    params["conv_in_w"], params["conv_in_b"] = _init_conv(keys[0], hidden, in_channels, 3, 3)
    res = []
    for r in range(num_resblocks):
        w3, b3 = _init_conv(keys[1 + 2 * r], res_channels, hidden, 3, 3)
        w1, b1 = _init_conv(keys[2 + 2 * r], hidden, res_channels, 1, 1)
        res.append((w3, b3, w1, b1))
    params["res"] = res
    params["deconv1_w"], params["deconv1_b"] = _init_conv_transpose(
        keys[-2], hidden, hidden // 2, 4, 4)
    params["deconv2_w"], params["deconv2_b"] = _init_conv_transpose(
        keys[-1], hidden // 2, out_channels, 4, 4)
    return params


if __name__ == "__main__":
    # small, module-consistent shapes
    N, C_IN, H, W = 2, 4, 16, 16
    HIDDEN, RES_CH, OUT_CH, N_RES = 32, 8, 3, 2

    key = jax.random.PRNGKey(0)
    kx, kp = jax.random.split(key)
    x = jax.random.normal(kx, (N, C_IN, H, W), jnp.float32)
    params = make_params(kp, C_IN, HIDDEN, N_RES, RES_CH, OUT_CH)
    prepared = prepare_params(params)

    fwd = jax.jit(bottom_decoder_forward)
    y = fwd(x, prepared)
    jax.block_until_ready(y)

    assert y.shape == (N, OUT_CH, 4 * H, 4 * W), y.shape
    assert y.dtype == jnp.float32

    # numerical sanity check vs. pure-XLA f32 reference (kernel = bf16 MXU / f32 acc)
    y_ref = jax.jit(_ref_forward)(x, params)
    jax.block_until_ready(y_ref)
    err = float(jnp.max(jnp.abs(y - y_ref)))
    scale = float(jnp.max(jnp.abs(y_ref)))
    assert err <= 0.1 * scale + 0.05, (err, scale)

    # odd-shape / batch-1 edge case (guard row, junk columns, row blocking)
    x2 = jax.random.normal(jax.random.PRNGKey(1), (1, C_IN, 5, 7), jnp.float32)
    y2 = fwd(x2, prepared)
    y2_ref = jax.jit(_ref_forward)(x2, params)
    jax.block_until_ready((y2, y2_ref))
    assert y2.shape == (1, OUT_CH, 20, 28), y2.shape
    err2 = float(jnp.max(jnp.abs(y2 - y2_ref)))
    scale2 = float(jnp.max(jnp.abs(y2_ref)))
    assert err2 <= 0.1 * scale2 + 0.05, (err2, scale2)

    print("KERNEL_OK")
</pallas_src>

<mosaic_0001>
module attributes {stable_mosaic.version = 11 : i64} {
  func.func @_conv_kernel(%arg0: i32, %arg1: i32, %arg2: memref<1x342x4xbf16, #tpu.memory_space<vmem>>, %arg3: memref<36x32xbf16, #tpu.memory_space<vmem>>, %arg4: memref<1x32xf32, #tpu.memory_space<vmem>>, %arg5: memref<1x16x16x32xbf16, #tpu.memory_space<vmem>>) attributes {dimension_semantics = [#tpu.dimension_semantics<parallel>, #tpu.dimension_semantics<parallel>], iteration_bounds = array<i64: 2, 1>, scalar_prefetch = 0 : i64, scratch_operands = 0 : i64, tpu.core_type = #tpu.core_type<tc>, window_params = [{transform_indices = @transform_0, window_bounds = array<i64: 1, 342, 4>}, {pipeline_mode = #tpu.pipeline_mode<synchronous>, transform_indices = @transform_1, window_bounds = array<i64: 36, 32>}, {pipeline_mode = #tpu.pipeline_mode<synchronous>, transform_indices = @transform_2, window_bounds = array<i64: 1, 32>}, {transform_indices = @transform_3, window_bounds = array<i64: 1, 16, 16, 32>}]} {
    %c288_i32 = arith.constant 288 : i32
    %0 = arith.muli %arg1, %c288_i32 : i32
    %1 = tpu.assume_multiple %0, 8 : i32
    %c0 = arith.constant 0 : index
    %2 = arith.index_cast %1 : i32 to index
    %c0_0 = arith.constant 0 : index
    %3 = vector.load %arg2[%c0, %2, %c0_0] : memref<1x342x4xbf16, #tpu.memory_space<vmem>>, vector<1x326x4xbf16>
    %4 = vector.shape_cast %3 : vector<1x326x4xbf16> to vector<326x4xbf16>
    %5 = vector.extract_strided_slice %4 {offsets = [0, 0], sizes = [288, 4], strides = [1, 1]} : vector<326x4xbf16> to vector<288x4xbf16>
    %c0_1 = arith.constant 0 : index
    %c0_2 = arith.constant 0 : index
    %6 = vector.load %arg3[%c0_1, %c0_2] : memref<36x32xbf16, #tpu.memory_space<vmem>>, vector<4x32xbf16>
    %cst = arith.constant dense<0.000000e+00> : vector<288x32xf32>
    %7 = tpu.matmul %5, %6, %cst {dimension_numbers = #tpu.dot_dimension_numbers<[1], [0], [0], [1], [0, 0, 1, 1], [], []>} : vector<288x4xbf16>, vector<4x32xbf16>, vector<288x32xf32> -> vector<288x32xf32>
    %8 = vector.extract_strided_slice %4 {offsets = [1, 0], sizes = [288, 4], strides = [1, 1]} : vector<326x4xbf16> to vector<288x4xbf16>
    %c4 = arith.constant 4 : index
    %c0_3 = arith.constant 0 : index
    %9 = vector.load %arg3[%c4, %c0_3] : memref<36x32xbf16, #tpu.memory_space<vmem>>, vector<4x32xbf16>
    %cst_4 = arith.constant dense<0.000000e+00> : vector<288x32xf32>
    %10 = tpu.matmul %8, %9, %cst_4 {dimension_numbers = #tpu.dot_dimension_numbers<[1], [0], [0], [1], [0, 0, 1, 1], [], []>} : vector<288x4xbf16>, vector<4x32xbf16>, vector<288x32xf32> -> vector<288x32xf32>
    %11 = arith.addf %7, %10 : vector<288x32xf32>
    %12 = vector.extract_strided_slice %4 {offsets = [2, 0], sizes = [288, 4], strides = [1, 1]} : vector<326x4xbf16> to vector<288x4xbf16>
    %c8 = arith.constant 8 : index
    %c0_5 = arith.constant 0 : index
    %13 = vector.load %arg3[%c8, %c0_5] : memref<36x32xbf16, #tpu.memory_space<vmem>>, vector<4x32xbf16>
    %cst_6 = arith.constant dense<0.000000e+00> : vector<288x32xf32>
    %14 = tpu.matmul %12, %13, %cst_6 {dimension_numbers = #tpu.dot_dimension_numbers<[1], [0], [0], [1], [0, 0, 1, 1], [], []>} : vector<288x4xbf16>, vector<4x32xbf16>, vector<288x32xf32> -> vector<288x32xf32>
    %15 = arith.addf %11, %14 : vector<288x32xf32>
    %16 = vector.extract_strided_slice %4 {offsets = [18, 0], sizes = [288, 4], strides = [1, 1]} : vector<326x4xbf16> to vector<288x4xbf16>
    %c12 = arith.constant 12 : index
    %c0_7 = arith.constant 0 : index
    %17 = vector.load %arg3[%c12, %c0_7] : memref<36x32xbf16, #tpu.memory_space<vmem>>, vector<4x32xbf16>
    %cst_8 = arith.constant dense<0.000000e+00> : vector<288x32xf32>
    %18 = tpu.matmul %16, %17, %cst_8 {dimension_numbers = #tpu.dot_dimension_numbers<[1], [0], [0], [1], [0, 0, 1, 1], [], []>} : vector<288x4xbf16>, vector<4x32xbf16>, vector<288x32xf32> -> vector<288x32xf32>
    %19 = arith.addf %15, %18 : vector<288x32xf32>
    %20 = vector.extract_strided_slice %4 {offsets = [19, 0], sizes = [288, 4], strides = [1, 1]} : vector<326x4xbf16> to vector<288x4xbf16>
    %c16 = arith.constant 16 : index
    %c0_9 = arith.constant 0 : index
    %21 = vector.load %arg3[%c16, %c0_9] : memref<36x32xbf16, #tpu.memory_space<vmem>>, vector<4x32xbf16>
    %cst_10 = arith.constant dense<0.000000e+00> : vector<288x32xf32>
    %22 = tpu.matmul %20, %21, %cst_10 {dimension_numbers = #tpu.dot_dimension_numbers<[1], [0], [0], [1], [0, 0, 1, 1], [], []>} : vector<288x4xbf16>, vector<4x32xbf16>, vector<288x32xf32> -> vector<288x32xf32>
    %23 = arith.addf %19, %22 : vector<288x32xf32>
    %24 = vector.extract_strided_slice %4 {offsets = [20, 0], sizes = [288, 4], strides = [1, 1]} : vector<326x4xbf16> to vector<288x4xbf16>
    %c20 = arith.constant 20 : index
    %c0_11 = arith.constant 0 : index
    %25 = vector.load %arg3[%c20, %c0_11] : memref<36x32xbf16, #tpu.memory_space<vmem>>, vector<4x32xbf16>
    %cst_12 = arith.constant dense<0.000000e+00> : vector<288x32xf32>
    %26 = tpu.matmul %24, %25, %cst_12 {dimension_numbers = #tpu.dot_dimension_numbers<[1], [0], [0], [1], [0, 0, 1, 1], [], []>} : vector<288x4xbf16>, vector<4x32xbf16>, vector<288x32xf32> -> vector<288x32xf32>
    %27 = arith.addf %23, %26 : vector<288x32xf32>
    %28 = vector.extract_strided_slice %4 {offsets = [36, 0], sizes = [288, 4], strides = [1, 1]} : vector<326x4xbf16> to vector<288x4xbf16>
    %c24 = arith.constant 24 : index
    %c0_13 = arith.constant 0 : index
    %29 = vector.load %arg3[%c24, %c0_13] : memref<36x32xbf16, #tpu.memory_space<vmem>>, vector<4x32xbf16>
    %cst_14 = arith.constant dense<0.000000e+00> : vector<288x32xf32>
    %30 = tpu.matmul %28, %29, %cst_14 {dimension_numbers = #tpu.dot_dimension_numbers<[1], [0], [0], [1], [0, 0, 1, 1], [], []>} : vector<288x4xbf16>, vector<4x32xbf16>, vector<288x32xf32> -> vector<288x32xf32>
    %31 = arith.addf %27, %30 : vector<288x32xf32>
    %32 = vector.extract_strided_slice %4 {offsets = [37, 0], sizes = [288, 4], strides = [1, 1]} : vector<326x4xbf16> to vector<288x4xbf16>
    %c28 = arith.constant 28 : index
    %c0_15 = arith.constant 0 : index
    %33 = vector.load %arg3[%c28, %c0_15] : memref<36x32xbf16, #tpu.memory_space<vmem>>, vector<4x32xbf16>
    %cst_16 = arith.constant dense<0.000000e+00> : vector<288x32xf32>
    %34 = tpu.matmul %32, %33, %cst_16 {dimension_numbers = #tpu.dot_dimension_numbers<[1], [0], [0], [1], [0, 0, 1, 1], [], []>} : vector<288x4xbf16>, vector<4x32xbf16>, vector<288x32xf32> -> vector<288x32xf32>
    %35 = arith.addf %31, %34 : vector<288x32xf32>
    %36 = vector.extract_strided_slice %4 {offsets = [38, 0], sizes = [288, 4], strides = [1, 1]} : vector<326x4xbf16> to vector<288x4xbf16>
    %c32 = arith.constant 32 : index
    %c0_17 = arith.constant 0 : index
    %37 = vector.load %arg3[%c32, %c0_17] : memref<36x32xbf16, #tpu.memory_space<vmem>>, vector<4x32xbf16>
    %cst_18 = arith.constant dense<0.000000e+00> : vector<288x32xf32>
    %38 = tpu.matmul %36, %37, %cst_18 {dimension_numbers = #tpu.dot_dimension_numbers<[1], [0], [0], [1], [0, 0, 1, 1], [], []>} : vector<288x4xbf16>, vector<4x32xbf16>, vector<288x32xf32> -> vector<288x32xf32>
    %39 = arith.addf %35, %38 : vector<288x32xf32>
    %c0_19 = arith.constant 0 : index
    %c0_20 = arith.constant 0 : index
    %40 = vector.load %arg4[%c0_19, %c0_20] : memref<1x32xf32, #tpu.memory_space<vmem>>, vector<1x32xf32>
    %41 = vector.broadcast %40 : vector<1x32xf32> to vector<288x32xf32>
    %42 = arith.addf %39, %41 : vector<288x32xf32>
    %43 = arith.truncf %42 : vector<288x32xf32> to vector<288x32xbf16>
    %44 = vector.extract_strided_slice %43 {offsets = [0, 0], sizes = [16, 32], strides = [1, 1]} : vector<288x32xbf16> to vector<16x32xbf16>
    %c0_21 = arith.constant 0 : index
    %c0_22 = arith.constant 0 : index
    %c0_23 = arith.constant 0 : index
    %c0_24 = arith.constant 0 : index
    %45 = vector.load %arg5[%c0_21, %c0_22, %c0_23, %c0_24] : memref<1x16x16x32xbf16, #tpu.memory_space<vmem>>, vector<1x1x16x32xbf16>
    %46 = vector.shape_cast %45 : vector<1x1x16x32xbf16> to vector<16x32xbf16>
    %47 = vector.shape_cast %44 : vector<16x32xbf16> to vector<1x1x16x32xbf16>
    tpu.vector_store %arg5[%c0_21, %c0_22, %c0_23, %c0_24], %47 {strides = array<i32>} : memref<1x16x16x32xbf16, #tpu.memory_space<vmem>>, vector<1x1x16x32xbf16>,
    %48 = vector.extract_strided_slice %43 {offsets = [18, 0], sizes = [16, 32], strides = [1, 1]} : vector<288x32xbf16> to vector<16x32xbf16>
    %c0_25 = arith.constant 0 : index
    %c1 = arith.constant 1 : index
    %c0_26 = arith.constant 0 : index
    %c0_27 = arith.constant 0 : index
    %49 = vector.load %arg5[%c0_25, %c1, %c0_26, %c0_27] : memref<1x16x16x32xbf16, #tpu.memory_space<vmem>>, vector<1x1x16x32xbf16>
    %50 = vector.shape_cast %49 : vector<1x1x16x32xbf16> to vector<16x32xbf16>
    %51 = vector.shape_cast %48 : vector<16x32xbf16> to vector<1x1x16x32xbf16>
    tpu.vector_store %arg5[%c0_25, %c1, %c0_26, %c0_27], %51 {strides = array<i32>} : memref<1x16x16x32xbf16, #tpu.memory_space<vmem>>, vector<1x1x16x32xbf16>,
    %52 = vector.extract_strided_slice %43 {offsets = [36, 0], sizes = [16, 32], strides = [1, 1]} : vector<288x32xbf16> to vector<16x32xbf16>
    %c0_28 = arith.constant 0 : index
    %c2 = arith.constant 2 : index
    %c0_29 = arith.constant 0 : index
    %c0_30 = arith.constant 0 : index
    %53 = vector.load %arg5[%c0_28, %c2, %c0_29, %c0_30] : memref<1x16x16x32xbf16, #tpu.memory_space<vmem>>, vector<1x1x16x32xbf16>
    %54 = vector.shape_cast %53 : vector<1x1x16x32xbf16> to vector<16x32xbf16>
    %55 = vector.shape_cast %52 : vector<16x32xbf16> to vector<1x1x16x32xbf16>
    tpu.vector_store %arg5[%c0_28, %c2, %c0_29, %c0_30], %55 {strides = array<i32>} : memref<1x16x16x32xbf16, #tpu.memory_space<vmem>>, vector<1x1x16x32xbf16>,
    %56 = vector.extract_strided_slice %43 {offsets = [54, 0], sizes = [16, 32], strides = [1, 1]} : vector<288x32xbf16> to vector<16x32xbf16>
    %c0_31 = arith.constant 0 : index
    %c3 = arith.constant 3 : index
    %c0_32 = arith.constant 0 : index
    %c0_33 = arith.constant 0 : index
    %57 = vector.load %arg5[%c0_31, %c3, %c0_32, %c0_33] : memref<1x16x16x32xbf16, #tpu.memory_space<vmem>>, vector<1x1x16x32xbf16>
    %58 = vector.shape_cast %57 : vector<1x1x16x32xbf16> to vector<16x32xbf16>
    %59 = vector.shape_cast %56 : vector<16x32xbf16> to vector<1x1x16x32xbf16>
    tpu.vector_store %arg5[%c0_31, %c3, %c0_32, %c0_33], %59 {strides = array<i32>} : memref<1x16x16x32xbf16, #tpu.memory_space<vmem>>, vector<1x1x16x32xbf16>,
    %60 = vector.extract_strided_slice %43 {offsets = [72, 0], sizes = [16, 32], strides = [1, 1]} : vector<288x32xbf16> to vector<16x32xbf16>
    %c0_34 = arith.constant 0 : index
    %c4_35 = arith.constant 4 : index
    %c0_36 = arith.constant 0 : index
    %c0_37 = arith.constant 0 : index
    %61 = vector.load %arg5[%c0_34, %c4_35, %c0_36, %c0_37] : memref<1x16x16x32xbf16, #tpu.memory_space<vmem>>, vector<1x1x16x32xbf16>
    %62 = vector.shape_cast %61 : vector<1x1x16x32xbf16> to vector<16x32xbf16>
    %63 = vector.shape_cast %60 : vector<16x32xbf16> to vector<1x1x16x32xbf16>
    tpu.vector_store %arg5[%c0_34, %c4_35, %c0_36, %c0_37], %63 {strides = array<i32>} : memref<1x16x16x32xbf16, #tpu.memory_space<vmem>>, vector<1x1x16x32xbf16>,
    %64 = vector.extract_strided_slice %43 {offsets = [90, 0], sizes = [16, 32], strides = [1, 1]} : vector<288x32xbf16> to vector<16x32xbf16>
    %c0_38 = arith.constant 0 : index
    %c5 = arith.constant 5 : index
    %c0_39 = arith.constant 0 : index
    %c0_40 = arith.constant 0 : index
    %65 = vector.load %arg5[%c0_38, %c5, %c0_39, %c0_40] : memref<1x16x16x32xbf16, #tpu.memory_space<vmem>>, vector<1x1x16x32xbf16>
    %66 = vector.shape_cast %65 : vector<1x1x16x32xbf16> to vector<16x32xbf16>
    %67 = vector.shape_cast %64 : vector<16x32xbf16> to vector<1x1x16x32xbf16>
    tpu.vector_store %arg5[%c0_38, %c5, %c0_39, %c0_40], %67 {strides = array<i32>} : memref<1x16x16x32xbf16, #tpu.memory_space<vmem>>, vector<1x1x16x32xbf16>,
    %68 = vector.extract_strided_slice %43 {offsets = [108, 0], sizes = [16, 32], strides = [1, 1]} : vector<288x32xbf16> to vector<16x32xbf16>
    %c0_41 = arith.constant 0 : index
    %c6 = arith.constant 6 : index
    %c0_42 = arith.constant 0 : index
    %c0_43 = arith.constant 0 : index
    %69 = vector.load %arg5[%c0_41, %c6, %c0_42, %c0_43] : memref<1x16x16x32xbf16, #tpu.memory_space<vmem>>, vector<1x1x16x32xbf16>
    %70 = vector.shape_cast %69 : vector<1x1x16x32xbf16> to vector<16x32xbf16>
    %71 = vector.shape_cast %68 : vector<16x32xbf16> to vector<1x1x16x32xbf16>
    tpu.vector_store %arg5[%c0_41, %c6, %c0_42, %c0_43], %71 {strides = array<i32>} : memref<1x16x16x32xbf16, #tpu.memory_space<vmem>>, vector<1x1x16x32xbf16>,
    %72 = vector.extract_strided_slice %43 {offsets = [126, 0], sizes = [16, 32], strides = [1, 1]} : vector<288x32xbf16> to vector<16x32xbf16>
    %c0_44 = arith.constant 0 : index
    %c7 = arith.constant 7 : index
    %c0_45 = arith.constant 0 : index
    %c0_46 = arith.constant 0 : index
    %73 = vector.load %arg5[%c0_44, %c7, %c0_45, %c0_46] : memref<1x16x16x32xbf16, #tpu.memory_space<vmem>>, vector<1x1x16x32xbf16>
    %74 = vector.shape_cast %73 : vector<1x1x16x32xbf16> to vector<16x32xbf16>
    %75 = vector.shape_cast %72 : vector<16x32xbf16> to vector<1x1x16x32xbf16>
    tpu.vector_store %arg5[%c0_44, %c7, %c0_45, %c0_46], %75 {strides = array<i32>} : memref<1x16x16x32xbf16, #tpu.memory_space<vmem>>, vector<1x1x16x32xbf16>,
    %76 = vector.extract_strided_slice %43 {offsets = [144, 0], sizes = [16, 32], strides = [1, 1]} : vector<288x32xbf16> to vector<16x32xbf16>
    %c0_47 = arith.constant 0 : index
    %c8_48 = arith.constant 8 : index
    %c0_49 = arith.constant 0 : index
    %c0_50 = arith.constant 0 : index
    %77 = vector.load %arg5[%c0_47, %c8_48, %c0_49, %c0_50] : memref<1x16x16x32xbf16, #tpu.memory_space<vmem>>, vector<1x1x16x32xbf16>
    %78 = vector.shape_cast %77 : vector<1x1x16x32xbf16> to vector<16x32xbf16>
    %79 = vector.shape_cast %76 : vector<16x32xbf16> to vector<1x1x16x32xbf16>
    tpu.vector_store %arg5[%c0_47, %c8_48, %c0_49, %c0_50], %79 {strides = array<i32>} : memref<1x16x16x32xbf16, #tpu.memory_space<vmem>>, vector<1x1x16x32xbf16>,
    %80 = vector.extract_strided_slice %43 {offsets = [162, 0], sizes = [16, 32], strides = [1, 1]} : vector<288x32xbf16> to vector<16x32xbf16>
    %c0_51 = arith.constant 0 : index
    %c9 = arith.constant 9 : index
    %c0_52 = arith.constant 0 : index
    %c0_53 = arith.constant 0 : index
    %81 = vector.load %arg5[%c0_51, %c9, %c0_52, %c0_53] : memref<1x16x16x32xbf16, #tpu.memory_space<vmem>>, vector<1x1x16x32xbf16>
    %82 = vector.shape_cast %81 : vector<1x1x16x32xbf16> to vector<16x32xbf16>
    %83 = vector.shape_cast %80 : vector<16x32xbf16> to vector<1x1x16x32xbf16>
    tpu.vector_store %arg5[%c0_51, %c9, %c0_52, %c0_53], %83 {strides = array<i32>} : memref<1x16x16x32xbf16, #tpu.memory_space<vmem>>, vector<1x1x16x32xbf16>,
    %84 = vector.extract_strided_slice %43 {offsets = [180, 0], sizes = [16, 32], strides = [1, 1]} : vector<288x32xbf16> to vector<16x32xbf16>
    %c0_54 = arith.constant 0 : index
    %c10 = arith.constant 10 : index
    %c0_55 = arith.constant 0 : index
    %c0_56 = arith.constant 0 : index
    %85 = vector.load %arg5[%c0_54, %c10, %c0_55, %c0_56] : memref<1x16x16x32xbf16, #tpu.memory_space<vmem>>, vector<1x1x16x32xbf16>
    %86 = vector.shape_cast %85 : vector<1x1x16x32xbf16> to vector<16x32xbf16>
    %87 = vector.shape_cast %84 : vector<16x32xbf16> to vector<1x1x16x32xbf16>
    tpu.vector_store %arg5[%c0_54, %c10, %c0_55, %c0_56], %87 {strides = array<i32>} : memref<1x16x16x32xbf16, #tpu.memory_space<vmem>>, vector<1x1x16x32xbf16>,
    %88 = vector.extract_strided_slice %43 {offsets = [198, 0], sizes = [16, 32], strides = [1, 1]} : vector<288x32xbf16> to vector<16x32xbf16>
    %c0_57 = arith.constant 0 : index
    %c11 = arith.constant 11 : index
    %c0_58 = arith.constant 0 : index
    %c0_59 = arith.constant 0 : index
    %89 = vector.load %arg5[%c0_57, %c11, %c0_58, %c0_59] : memref<1x16x16x32xbf16, #tpu.memory_space<vmem>>, vector<1x1x16x32xbf16>
    %90 = vector.shape_cast %89 : vector<1x1x16x32xbf16> to vector<16x32xbf16>
    %91 = vector.shape_cast %88 : vector<16x32xbf16> to vector<1x1x16x32xbf16>
    tpu.vector_store %arg5[%c0_57, %c11, %c0_58, %c0_59], %91 {strides = array<i32>} : memref<1x16x16x32xbf16, #tpu.memory_space<vmem>>, vector<1x1x16x32xbf16>,
    %92 = vector.extract_strided_slice %43 {offsets = [216, 0], sizes = [16, 32], strides = [1, 1]} : vector<288x32xbf16> to vector<16x32xbf16>
    %c0_60 = arith.constant 0 : index
    %c12_61 = arith.constant 12 : index
    %c0_62 = arith.constant 0 : index
    %c0_63 = arith.constant 0 : index
    %93 = vector.load %arg5[%c0_60, %c12_61, %c0_62, %c0_63] : memref<1x16x16x32xbf16, #tpu.memory_space<vmem>>, vector<1x1x16x32xbf16>
    %94 = vector.shape_cast %93 : vector<1x1x16x32xbf16> to vector<16x32xbf16>
    %95 = vector.shape_cast %92 : vector<16x32xbf16> to vector<1x1x16x32xbf16>
    tpu.vector_store %arg5[%c0_60, %c12_61, %c0_62, %c0_63], %95 {strides = array<i32>} : memref<1x16x16x32xbf16, #tpu.memory_space<vmem>>, vector<1x1x16x32xbf16>,
    %96 = vector.extract_strided_slice %43 {offsets = [234, 0], sizes = [16, 32], strides = [1, 1]} : vector<288x32xbf16> to vector<16x32xbf16>
    %c0_64 = arith.constant 0 : index
    %c13 = arith.constant 13 : index
    %c0_65 = arith.constant 0 : index
    %c0_66 = arith.constant 0 : index
    %97 = vector.load %arg5[%c0_64, %c13, %c0_65, %c0_66] : memref<1x16x16x32xbf16, #tpu.memory_space<vmem>>, vector<1x1x16x32xbf16>
    %98 = vector.shape_cast %97 : vector<1x1x16x32xbf16> to vector<16x32xbf16>
    %99 = vector.shape_cast %96 : vector<16x32xbf16> to vector<1x1x16x32xbf16>
    tpu.vector_store %arg5[%c0_64, %c13, %c0_65, %c0_66], %99 {strides = array<i32>} : memref<1x16x16x32xbf16, #tpu.memory_space<vmem>>, vector<1x1x16x32xbf16>,
    %100 = vector.extract_strided_slice %43 {offsets = [252, 0], sizes = [16, 32], strides = [1, 1]} : vector<288x32xbf16> to vector<16x32xbf16>
    %c0_67 = arith.constant 0 : index
    %c14 = arith.constant 14 : index
    %c0_68 = arith.constant 0 : index
    %c0_69 = arith.constant 0 : index
    %101 = vector.load %arg5[%c0_67, %c14, %c0_68, %c0_69] : memref<1x16x16x32xbf16, #tpu.memory_space<vmem>>, vector<1x1x16x32xbf16>
    %102 = vector.shape_cast %101 : vector<1x1x16x32xbf16> to vector<16x32xbf16>
    %103 = vector.shape_cast %100 : vector<16x32xbf16> to vector<1x1x16x32xbf16>
    tpu.vector_store %arg5[%c0_67, %c14, %c0_68, %c0_69], %103 {strides = array<i32>} : memref<1x16x16x32xbf16, #tpu.memory_space<vmem>>, vector<1x1x16x32xbf16>,
    %104 = vector.extract_strided_slice %43 {offsets = [270, 0], sizes = [16, 32], strides = [1, 1]} : vector<288x32xbf16> to vector<16x32xbf16>
    %c0_70 = arith.constant 0 : index
    %c15 = arith.constant 15 : index
    %c0_71 = arith.constant 0 : index
    %c0_72 = arith.constant 0 : index
    %105 = vector.load %arg5[%c0_70, %c15, %c0_71, %c0_72] : memref<1x16x16x32xbf16, #tpu.memory_space<vmem>>, vector<1x1x16x32xbf16>
    %106 = vector.shape_cast %105 : vector<1x1x16x32xbf16> to vector<16x32xbf16>
    %107 = vector.shape_cast %104 : vector<16x32xbf16> to vector<1x1x16x32xbf16>
    tpu.vector_store %arg5[%c0_70, %c15, %c0_71, %c0_72], %107 {strides = array<i32>} : memref<1x16x16x32xbf16, #tpu.memory_space<vmem>>, vector<1x1x16x32xbf16>,
    return
  }
  func.func @transform_0(%arg0: i32, %arg1: i32) -> (i32, i32, i32) {
    %c0_i32 = arith.constant 0 : i32
    %c0_i32_0 = arith.constant 0 : i32
    %c0_i32_1 = arith.constant 0 : i32
    return %arg0, %c0_i32, %c0_i32_0 : i32, i32, i32
  }
  func.func @transform_1(%arg0: i32, %arg1: i32) -> (i32, i32) {
    %c0_i32 = arith.constant 0 : i32
    %c0_i32_0 = arith.constant 0 : i32
    %c0_i32_1 = arith.constant 0 : i32
    return %c0_i32, %c0_i32_0 : i32, i32
  }
  func.func @transform_2(%arg0: i32, %arg1: i32) -> (i32, i32) {
    %c0_i32 = arith.constant 0 : i32
    %c0_i32_0 = arith.constant 0 : i32
    %c0_i32_1 = arith.constant 0 : i32
    return %c0_i32, %c0_i32_0 : i32, i32
  }
  func.func @transform_3(%arg0: i32, %arg1: i32) -> (i32, i32, i32, i32) {
    %c0_i32 = arith.constant 0 : i32
    %c0_i32_0 = arith.constant 0 : i32
    %c0_i32_1 = arith.constant 0 : i32
    return %arg0, %arg1, %c0_i32, %c0_i32_0 : i32, i32, i32, i32
  }
}

module attributes {stable_mosaic.version = 11 : i64} {
  func.func @_resblock_kernel(%arg0: i32, %arg1: i32, %arg2: memref<1x342x32xbf16, #tpu.memory_space<vmem>>, %arg3: memref<288x8xbf16, #tpu.memory_space<vmem>>, %arg4: memref<1x8xf32, #tpu.memory_space<vmem>>, %arg5: memref<8x32xbf16, #tpu.memory_space<vmem>>, %arg6: memref<1x32xf32, #tpu.memory_space<vmem>>, %arg7: memref<1x16x16x32xbf16, #tpu.memory_space<vmem>>) attributes {dimension_semantics = [#tpu.dimension_semantics<parallel>, #tpu.dimension_semantics<parallel>], iteration_bounds = array<i64: 2, 1>, scalar_prefetch = 0 : i64, scratch_operands = 0 : i64, tpu.core_type = #tpu.core_type<tc>, window_params = [{transform_indices = @transform_0, window_bounds = array<i64: 1, 342, 32>}, {pipeline_mode = #tpu.pipeline_mode<synchronous>, transform_indices = @transform_1, window_bounds = array<i64: 288, 8>}, {pipeline_mode = #tpu.pipeline_mode<synchronous>, transform_indices = @transform_2, window_bounds = array<i64: 1, 8>}, {pipeline_mode = #tpu.pipeline_mode<synchronous>, transform_indices = @transform_3, window_bounds = array<i64: 8, 32>}, {pipeline_mode = #tpu.pipeline_mode<synchronous>, transform_indices = @transform_4, window_bounds = array<i64: 1, 32>}, {transform_indices = @transform_5, window_bounds = array<i64: 1, 16, 16, 32>}]} {
    %c288_i32 = arith.constant 288 : i32
    %0 = arith.muli %arg1, %c288_i32 : i32
    %1 = tpu.assume_multiple %0, 8 : i32
    %c0 = arith.constant 0 : index
    %2 = arith.index_cast %1 : i32 to index
    %c0_0 = arith.constant 0 : index
    %3 = vector.load %arg2[%c0, %2, %c0_0] : memref<1x342x32xbf16, #tpu.memory_space<vmem>>, vector<1x326x32xbf16>
    %4 = vector.shape_cast %3 : vector<1x326x32xbf16> to vector<326x32xbf16>
    %cst = arith.constant 0.000000e+00 : bf16
    %5 = vector.broadcast %cst : bf16 to vector<326x32xbf16>
    %6 = arith.maximumf %4, %5 : vector<326x32xbf16>
    %7 = vector.extract_strided_slice %6 {offsets = [0, 0], sizes = [288, 32], strides = [1, 1]} : vector<326x32xbf16> to vector<288x32xbf16>
    %8 = vector.extract_strided_slice %6 {offsets = [1, 0], sizes = [288, 32], strides = [1, 1]} : vector<326x32xbf16> to vector<288x32xbf16>
    %9 = vector.extract_strided_slice %6 {offsets = [2, 0], sizes = [288, 32], strides = [1, 1]} : vector<326x32xbf16> to vector<288x32xbf16>
    %10 = tpu.concatenate %7, %8, %9 in 1 : vector<288x32xbf16>, vector<288x32xbf16>, vector<288x32xbf16> -> vector<288x96xbf16>
    %c0_1 = arith.constant 0 : index
    %c0_2 = arith.constant 0 : index
    %11 = vector.load %arg3[%c0_1, %c0_2] : memref<288x8xbf16, #tpu.memory_space<vmem>>, vector<96x8xbf16>
    %cst_3 = arith.constant dense<0.000000e+00> : vector<288x8xf32>
    %12 = tpu.matmul %10, %11, %cst_3 {dimension_numbers = #tpu.dot_dimension_numbers<[1], [0], [0], [1], [0, 0, 1, 1], [], []>} : vector<288x96xbf16>, vector<96x8xbf16>, vector<288x8xf32> -> vector<288x8xf32>
    %13 = vector.extract_strided_slice %6 {offsets = [18, 0], sizes = [288, 32], strides = [1, 1]} : vector<326x32xbf16> to vector<288x32xbf16>
    %14 = vector.extract_strided_slice %6 {offsets = [19, 0], sizes = [288, 32], strides = [1, 1]} : vector<326x32xbf16> to vector<288x32xbf16>
    %15 = vector.extract_strided_slice %6 {offsets = [20, 0], sizes = [288, 32], strides = [1, 1]} : vector<326x32xbf16> to vector<288x32xbf16>
    %16 = tpu.concatenate %13, %14, %15 in 1 : vector<288x32xbf16>, vector<288x32xbf16>, vector<288x32xbf16> -> vector<288x96xbf16>
    %c96 = arith.constant 96 : index
    %c0_4 = arith.constant 0 : index
    %17 = vector.load %arg3[%c96, %c0_4] : memref<288x8xbf16, #tpu.memory_space<vmem>>, vector<96x8xbf16>
    %cst_5 = arith.constant dense<0.000000e+00> : vector<288x8xf32>
    %18 = tpu.matmul %16, %17, %cst_5 {dimension_numbers = #tpu.dot_dimension_numbers<[1], [0], [0], [1], [0, 0, 1, 1], [], []>} : vector<288x96xbf16>, vector<96x8xbf16>, vector<288x8xf32> -> vector<288x8xf32>
    %19 = arith.addf %12, %18 : vector<288x8xf32>
    %20 = vector.extract_strided_slice %6 {offsets = [36, 0], sizes = [288, 32], strides = [1, 1]} : vector<326x32xbf16> to vector<288x32xbf16>
    %21 = vector.extract_strided_slice %6 {offsets = [37, 0], sizes = [288, 32], strides = [1, 1]} : vector<326x32xbf16> to vector<288x32xbf16>
    %22 = vector.extract_strided_slice %6 {offsets = [38, 0], sizes = [288, 32], strides = [1, 1]} : vector<326x32xbf16> to vector<288x32xbf16>
    %23 = tpu.concatenate %20, %21, %22 in 1 : vector<288x32xbf16>, vector<288x32xbf16>, vector<288x32xbf16> -> vector<288x96xbf16>
    %c192 = arith.constant 192 : index
    %c0_6 = arith.constant 0 : index
    %24 = vector.load %arg3[%c192, %c0_6] : memref<288x8xbf16, #tpu.memory_space<vmem>>, vector<96x8xbf16>
    %cst_7 = arith.constant dense<0.000000e+00> : vector<288x8xf32>
    %25 = tpu.matmul %23, %24, %cst_7 {dimension_numbers = #tpu.dot_dimension_numbers<[1], [0], [0], [1], [0, 0, 1, 1], [], []>} : vector<288x96xbf16>, vector<96x8xbf16>, vector<288x8xf32> -> vector<288x8xf32>
    %26 = arith.addf %19, %25 : vector<288x8xf32>
    %c0_8 = arith.constant 0 : index
    %c0_9 = arith.constant 0 : index
    %27 = vector.load %arg4[%c0_8, %c0_9] : memref<1x8xf32, #tpu.memory_space<vmem>>, vector<1x8xf32>
    %28 = vector.broadcast %27 : vector<1x8xf32> to vector<288x8xf32>
    %29 = arith.addf %26, %28 : vector<288x8xf32>
    %cst_10 = arith.constant 0.000000e+00 : f32
    %30 = vector.broadcast %cst_10 : f32 to vector<288x8xf32>
    %31 = arith.maximumf %29, %30 : vector<288x8xf32>
    %32 = arith.truncf %31 : vector<288x8xf32> to vector<288x8xbf16>
    %c0_11 = arith.constant 0 : index
    %c0_12 = arith.constant 0 : index
    %33 = vector.load %arg5[%c0_11, %c0_12] : memref<8x32xbf16, #tpu.memory_space<vmem>>, vector<8x32xbf16>
    %cst_13 = arith.constant dense<0.000000e+00> : vector<288x32xf32>
    %34 = tpu.matmul %32, %33, %cst_13 {dimension_numbers = #tpu.dot_dimension_numbers<[1], [0], [0], [1], [0, 0, 1, 1], [], []>} : vector<288x8xbf16>, vector<8x32xbf16>, vector<288x32xf32> -> vector<288x32xf32>
    %c0_14 = arith.constant 0 : index
    %c0_15 = arith.constant 0 : index
    %35 = vector.load %arg6[%c0_14, %c0_15] : memref<1x32xf32, #tpu.memory_space<vmem>>, vector<1x32xf32>
    %36 = vector.broadcast %35 : vector<1x32xf32> to vector<288x32xf32>
    %37 = arith.addf %34, %36 : vector<288x32xf32>
    %38 = vector.extract_strided_slice %4 {offsets = [19, 0], sizes = [288, 32], strides = [1, 1]} : vector<326x32xbf16> to vector<288x32xbf16>
    %39 = arith.extf %38 : vector<288x32xbf16> to vector<288x32xf32>
    %40 = arith.addf %37, %39 : vector<288x32xf32>
    %41 = arith.truncf %40 : vector<288x32xf32> to vector<288x32xbf16>
    %42 = vector.extract_strided_slice %41 {offsets = [0, 0], sizes = [16, 32], strides = [1, 1]} : vector<288x32xbf16> to vector<16x32xbf16>
    %c0_16 = arith.constant 0 : index
    %c0_17 = arith.constant 0 : index
    %c0_18 = arith.constant 0 : index
    %c0_19 = arith.constant 0 : index
    %43 = vector.load %arg7[%c0_16, %c0_17, %c0_18, %c0_19] : memref<1x16x16x32xbf16, #tpu.memory_space<vmem>>, vector<1x1x16x32xbf16>
    %44 = vector.shape_cast %43 : vector<1x1x16x32xbf16> to vector<16x32xbf16>
    %45 = vector.shape_cast %42 : vector<16x32xbf16> to vector<1x1x16x32xbf16>
    tpu.vector_store %arg7[%c0_16, %c0_17, %c0_18, %c0_19], %45 {strides = array<i32>} : memref<1x16x16x32xbf16, #tpu.memory_space<vmem>>, vector<1x1x16x32xbf16>,
    %46 = vector.extract_strided_slice %41 {offsets = [18, 0], sizes = [16, 32], strides = [1, 1]} : vector<288x32xbf16> to vector<16x32xbf16>
    %c0_20 = arith.constant 0 : index
    %c1 = arith.constant 1 : index
    %c0_21 = arith.constant 0 : index
    %c0_22 = arith.constant 0 : index
    %47 = vector.load %arg7[%c0_20, %c1, %c0_21, %c0_22] : memref<1x16x16x32xbf16, #tpu.memory_space<vmem>>, vector<1x1x16x32xbf16>
    %48 = vector.shape_cast %47 : vector<1x1x16x32xbf16> to vector<16x32xbf16>
    %49 = vector.shape_cast %46 : vector<16x32xbf16> to vector<1x1x16x32xbf16>
    tpu.vector_store %arg7[%c0_20, %c1, %c0_21, %c0_22], %49 {strides = array<i32>} : memref<1x16x16x32xbf16, #tpu.memory_space<vmem>>, vector<1x1x16x32xbf16>,
    %50 = vector.extract_strided_slice %41 {offsets = [36, 0], sizes = [16, 32], strides = [1, 1]} : vector<288x32xbf16> to vector<16x32xbf16>
    %c0_23 = arith.constant 0 : index
    %c2 = arith.constant 2 : index
    %c0_24 = arith.constant 0 : index
    %c0_25 = arith.constant 0 : index
    %51 = vector.load %arg7[%c0_23, %c2, %c0_24, %c0_25] : memref<1x16x16x32xbf16, #tpu.memory_space<vmem>>, vector<1x1x16x32xbf16>
    %52 = vector.shape_cast %51 : vector<1x1x16x32xbf16> to vector<16x32xbf16>
    %53 = vector.shape_cast %50 : vector<16x32xbf16> to vector<1x1x16x32xbf16>
    tpu.vector_store %arg7[%c0_23, %c2, %c0_24, %c0_25], %53 {strides = array<i32>} : memref<1x16x16x32xbf16, #tpu.memory_space<vmem>>, vector<1x1x16x32xbf16>,
    %54 = vector.extract_strided_slice %41 {offsets = [54, 0], sizes = [16, 32], strides = [1, 1]} : vector<288x32xbf16> to vector<16x32xbf16>
    %c0_26 = arith.constant 0 : index
    %c3 = arith.constant 3 : index
    %c0_27 = arith.constant 0 : index
    %c0_28 = arith.constant 0 : index
    %55 = vector.load %arg7[%c0_26, %c3, %c0_27, %c0_28] : memref<1x16x16x32xbf16, #tpu.memory_space<vmem>>, vector<1x1x16x32xbf16>
    %56 = vector.shape_cast %55 : vector<1x1x16x32xbf16> to vector<16x32xbf16>
    %57 = vector.shape_cast %54 : vector<16x32xbf16> to vector<1x1x16x32xbf16>
    tpu.vector_store %arg7[%c0_26, %c3, %c0_27, %c0_28], %57 {strides = array<i32>} : memref<1x16x16x32xbf16, #tpu.memory_space<vmem>>, vector<1x1x16x32xbf16>,
    %58 = vector.extract_strided_slice %41 {offsets = [72, 0], sizes = [16, 32], strides = [1, 1]} : vector<288x32xbf16> to vector<16x32xbf16>
    %c0_29 = arith.constant 0 : index
    %c4 = arith.constant 4 : index
    %c0_30 = arith.constant 0 : index
    %c0_31 = arith.constant 0 : index
    %59 = vector.load %arg7[%c0_29, %c4, %c0_30, %c0_31] : memref<1x16x16x32xbf16, #tpu.memory_space<vmem>>, vector<1x1x16x32xbf16>
    %60 = vector.shape_cast %59 : vector<1x1x16x32xbf16> to vector<16x32xbf16>
    %61 = vector.shape_cast %58 : vector<16x32xbf16> to vector<1x1x16x32xbf16>
    tpu.vector_store %arg7[%c0_29, %c4, %c0_30, %c0_31], %61 {strides = array<i32>} : memref<1x16x16x32xbf16, #tpu.memory_space<vmem>>, vector<1x1x16x32xbf16>,
    %62 = vector.extract_strided_slice %41 {offsets = [90, 0], sizes = [16, 32], strides = [1, 1]} : vector<288x32xbf16> to vector<16x32xbf16>
    %c0_32 = arith.constant 0 : index
    %c5 = arith.constant 5 : index
    %c0_33 = arith.constant 0 : index
    %c0_34 = arith.constant 0 : index
    %63 = vector.load %arg7[%c0_32, %c5, %c0_33, %c0_34] : memref<1x16x16x32xbf16, #tpu.memory_space<vmem>>, vector<1x1x16x32xbf16>
    %64 = vector.shape_cast %63 : vector<1x1x16x32xbf16> to vector<16x32xbf16>
    %65 = vector.shape_cast %62 : vector<16x32xbf16> to vector<1x1x16x32xbf16>
    tpu.vector_store %arg7[%c0_32, %c5, %c0_33, %c0_34], %65 {strides = array<i32>} : memref<1x16x16x32xbf16, #tpu.memory_space<vmem>>, vector<1x1x16x32xbf16>,
    %66 = vector.extract_strided_slice %41 {offsets = [108, 0], sizes = [16, 32], strides = [1, 1]} : vector<288x32xbf16> to vector<16x32xbf16>
    %c0_35 = arith.constant 0 : index
    %c6 = arith.constant 6 : index
    %c0_36 = arith.constant 0 : index
    %c0_37 = arith.constant 0 : index
    %67 = vector.load %arg7[%c0_35, %c6, %c0_36, %c0_37] : memref<1x16x16x32xbf16, #tpu.memory_space<vmem>>, vector<1x1x16x32xbf16>
    %68 = vector.shape_cast %67 : vector<1x1x16x32xbf16> to vector<16x32xbf16>
    %69 = vector.shape_cast %66 : vector<16x32xbf16> to vector<1x1x16x32xbf16>
    tpu.vector_store %arg7[%c0_35, %c6, %c0_36, %c0_37], %69 {strides = array<i32>} : memref<1x16x16x32xbf16, #tpu.memory_space<vmem>>, vector<1x1x16x32xbf16>,
    %70 = vector.extract_strided_slice %41 {offsets = [126, 0], sizes = [16, 32], strides = [1, 1]} : vector<288x32xbf16> to vector<16x32xbf16>
    %c0_38 = arith.constant 0 : index
    %c7 = arith.constant 7 : index
    %c0_39 = arith.constant 0 : index
    %c0_40 = arith.constant 0 : index
    %71 = vector.load %arg7[%c0_38, %c7, %c0_39, %c0_40] : memref<1x16x16x32xbf16, #tpu.memory_space<vmem>>, vector<1x1x16x32xbf16>
    %72 = vector.shape_cast %71 : vector<1x1x16x32xbf16> to vector<16x32xbf16>
    %73 = vector.shape_cast %70 : vector<16x32xbf16> to vector<1x1x16x32xbf16>
    tpu.vector_store %arg7[%c0_38, %c7, %c0_39, %c0_40], %73 {strides = array<i32>} : memref<1x16x16x32xbf16, #tpu.memory_space<vmem>>, vector<1x1x16x32xbf16>,
    %74 = vector.extract_strided_slice %41 {offsets = [144, 0], sizes = [16, 32], strides = [1, 1]} : vector<288x32xbf16> to vector<16x32xbf16>
    %c0_41 = arith.constant 0 : index
    %c8 = arith.constant 8 : index
    %c0_42 = arith.constant 0 : index
    %c0_43 = arith.constant 0 : index
    %75 = vector.load %arg7[%c0_41, %c8, %c0_42, %c0_43] : memref<1x16x16x32xbf16, #tpu.memory_space<vmem>>, vector<1x1x16x32xbf16>
    %76 = vector.shape_cast %75 : vector<1x1x16x32xbf16> to vector<16x32xbf16>
    %77 = vector.shape_cast %74 : vector<16x32xbf16> to vector<1x1x16x32xbf16>
    tpu.vector_store %arg7[%c0_41, %c8, %c0_42, %c0_43], %77 {strides = array<i32>} : memref<1x16x16x32xbf16, #tpu.memory_space<vmem>>, vector<1x1x16x32xbf16>,
    %78 = vector.extract_strided_slice %41 {offsets = [162, 0], sizes = [16, 32], strides = [1, 1]} : vector<288x32xbf16> to vector<16x32xbf16>
    %c0_44 = arith.constant 0 : index
    %c9 = arith.constant 9 : index
    %c0_45 = arith.constant 0 : index
    %c0_46 = arith.constant 0 : index
    %79 = vector.load %arg7[%c0_44, %c9, %c0_45, %c0_46] : memref<1x16x16x32xbf16, #tpu.memory_space<vmem>>, vector<1x1x16x32xbf16>
    %80 = vector.shape_cast %79 : vector<1x1x16x32xbf16> to vector<16x32xbf16>
    %81 = vector.shape_cast %78 : vector<16x32xbf16> to vector<1x1x16x32xbf16>
    tpu.vector_store %arg7[%c0_44, %c9, %c0_45, %c0_46], %81 {strides = array<i32>} : memref<1x16x16x32xbf16, #tpu.memory_space<vmem>>, vector<1x1x16x32xbf16>,
    %82 = vector.extract_strided_slice %41 {offsets = [180, 0], sizes = [16, 32], strides = [1, 1]} : vector<288x32xbf16> to vector<16x32xbf16>
    %c0_47 = arith.constant 0 : index
    %c10 = arith.constant 10 : index
    %c0_48 = arith.constant 0 : index
    %c0_49 = arith.constant 0 : index
    %83 = vector.load %arg7[%c0_47, %c10, %c0_48, %c0_49] : memref<1x16x16x32xbf16, #tpu.memory_space<vmem>>, vector<1x1x16x32xbf16>
    %84 = vector.shape_cast %83 : vector<1x1x16x32xbf16> to vector<16x32xbf16>
    %85 = vector.shape_cast %82 : vector<16x32xbf16> to vector<1x1x16x32xbf16>
    tpu.vector_store %arg7[%c0_47, %c10, %c0_48, %c0_49], %85 {strides = array<i32>} : memref<1x16x16x32xbf16, #tpu.memory_space<vmem>>, vector<1x1x16x32xbf16>,
    %86 = vector.extract_strided_slice %41 {offsets = [198, 0], sizes = [16, 32], strides = [1, 1]} : vector<288x32xbf16> to vector<16x32xbf16>
    %c0_50 = arith.constant 0 : index
    %c11 = arith.constant 11 : index
    %c0_51 = arith.constant 0 : index
    %c0_52 = arith.constant 0 : index
    %87 = vector.load %arg7[%c0_50, %c11, %c0_51, %c0_52] : memref<1x16x16x32xbf16, #tpu.memory_space<vmem>>, vector<1x1x16x32xbf16>
    %88 = vector.shape_cast %87 : vector<1x1x16x32xbf16> to vector<16x32xbf16>
    %89 = vector.shape_cast %86 : vector<16x32xbf16> to vector<1x1x16x32xbf16>
    tpu.vector_store %arg7[%c0_50, %c11, %c0_51, %c0_52], %89 {strides = array<i32>} : memref<1x16x16x32xbf16, #tpu.memory_space<vmem>>, vector<1x1x16x32xbf16>,
    %90 = vector.extract_strided_slice %41 {offsets = [216, 0], sizes = [16, 32], strides = [1, 1]} : vector<288x32xbf16> to vector<16x32xbf16>
    %c0_53 = arith.constant 0 : index
    %c12 = arith.constant 12 : index
    %c0_54 = arith.constant 0 : index
    %c0_55 = arith.constant 0 : index
    %91 = vector.load %arg7[%c0_53, %c12, %c0_54, %c0_55] : memref<1x16x16x32xbf16, #tpu.memory_space<vmem>>, vector<1x1x16x32xbf16>
    %92 = vector.shape_cast %91 : vector<1x1x16x32xbf16> to vector<16x32xbf16>
    %93 = vector.shape_cast %90 : vector<16x32xbf16> to vector<1x1x16x32xbf16>
    tpu.vector_store %arg7[%c0_53, %c12, %c0_54, %c0_55], %93 {strides = array<i32>} : memref<1x16x16x32xbf16, #tpu.memory_space<vmem>>, vector<1x1x16x32xbf16>,
    %94 = vector.extract_strided_slice %41 {offsets = [234, 0], sizes = [16, 32], strides = [1, 1]} : vector<288x32xbf16> to vector<16x32xbf16>
    %c0_56 = arith.constant 0 : index
    %c13 = arith.constant 13 : index
    %c0_57 = arith.constant 0 : index
    %c0_58 = arith.constant 0 : index
    %95 = vector.load %arg7[%c0_56, %c13, %c0_57, %c0_58] : memref<1x16x16x32xbf16, #tpu.memory_space<vmem>>, vector<1x1x16x32xbf16>
    %96 = vector.shape_cast %95 : vector<1x1x16x32xbf16> to vector<16x32xbf16>
    %97 = vector.shape_cast %94 : vector<16x32xbf16> to vector<1x1x16x32xbf16>
    tpu.vector_store %arg7[%c0_56, %c13, %c0_57, %c0_58], %97 {strides = array<i32>} : memref<1x16x16x32xbf16, #tpu.memory_space<vmem>>, vector<1x1x16x32xbf16>,
    %98 = vector.extract_strided_slice %41 {offsets = [252, 0], sizes = [16, 32], strides = [1, 1]} : vector<288x32xbf16> to vector<16x32xbf16>
    %c0_59 = arith.constant 0 : index
    %c14 = arith.constant 14 : index
    %c0_60 = arith.constant 0 : index
    %c0_61 = arith.constant 0 : index
    %99 = vector.load %arg7[%c0_59, %c14, %c0_60, %c0_61] : memref<1x16x16x32xbf16, #tpu.memory_space<vmem>>, vector<1x1x16x32xbf16>
    %100 = vector.shape_cast %99 : vector<1x1x16x32xbf16> to vector<16x32xbf16>
    %101 = vector.shape_cast %98 : vector<16x32xbf16> to vector<1x1x16x32xbf16>
    tpu.vector_store %arg7[%c0_59, %c14, %c0_60, %c0_61], %101 {strides = array<i32>} : memref<1x16x16x32xbf16, #tpu.memory_space<vmem>>, vector<1x1x16x32xbf16>,
    %102 = vector.extract_strided_slice %41 {offsets = [270, 0], sizes = [16, 32], strides = [1, 1]} : vector<288x32xbf16> to vector<16x32xbf16>
    %c0_62 = arith.constant 0 : index
    %c15 = arith.constant 15 : index
    %c0_63 = arith.constant 0 : index
    %c0_64 = arith.constant 0 : index
    %103 = vector.load %arg7[%c0_62, %c15, %c0_63, %c0_64] : memref<1x16x16x32xbf16, #tpu.memory_space<vmem>>, vector<1x1x16x32xbf16>
    %104 = vector.shape_cast %103 : vector<1x1x16x32xbf16> to vector<16x32xbf16>
    %105 = vector.shape_cast %102 : vector<16x32xbf16> to vector<1x1x16x32xbf16>
    tpu.vector_store %arg7[%c0_62, %c15, %c0_63, %c0_64], %105 {strides = array<i32>} : memref<1x16x16x32xbf16, #tpu.memory_space<vmem>>, vector<1x1x16x32xbf16>,
    return
  }
  func.func @transform_0(%arg0: i32, %arg1: i32) -> (i32, i32, i32) {
    %c0_i32 = arith.constant 0 : i32
    %c0_i32_0 = arith.constant 0 : i32
    %c0_i32_1 = arith.constant 0 : i32
    return %arg0, %c0_i32, %c0_i32_0 : i32, i32, i32
  }
  func.func @transform_1(%arg0: i32, %arg1: i32) -> (i32, i32) {
    %c0_i32 = arith.constant 0 : i32
    %c0_i32_0 = arith.constant 0 : i32
    %c0_i32_1 = arith.constant 0 : i32
    return %c0_i32, %c0_i32_0 : i32, i32
  }
  func.func @transform_2(%arg0: i32, %arg1: i32) -> (i32, i32) {
    %c0_i32 = arith.constant 0 : i32
    %c0_i32_0 = arith.constant 0 : i32
    %c0_i32_1 = arith.constant 0 : i32
    return %c0_i32, %c0_i32_0 : i32, i32
  }
  func.func @transform_3(%arg0: i32, %arg1: i32) -> (i32, i32) {
    %c0_i32 = arith.constant 0 : i32
    %c0_i32_0 = arith.constant 0 : i32
    %c0_i32_1 = arith.constant 0 : i32
    return %c0_i32, %c0_i32_0 : i32, i32
  }
  func.func @transform_4(%arg0: i32, %arg1: i32) -> (i32, i32) {
    %c0_i32 = arith.constant 0 : i32
    %c0_i32_0 = arith.constant 0 : i32
    %c0_i32_1 = arith.constant 0 : i32
    return %c0_i32, %c0_i32_0 : i32, i32
  }
  func.func @transform_5(%arg0: i32, %arg1: i32) -> (i32, i32, i32, i32) {
    %c0_i32 = arith.constant 0 : i32
    %c0_i32_0 = arith.constant 0 : i32
    %c0_i32_1 = arith.constant 0 : i32
    return %arg0, %arg1, %c0_i32, %c0_i32_0 : i32, i32, i32, i32
  }
}

module attributes {stable_mosaic.version = 11 : i64} {
  func.func @_resblock_kernel(%arg0: i32, %arg1: i32, %arg2: memref<1x342x32xbf16, #tpu.memory_space<vmem>>, %arg3: memref<288x8xbf16, #tpu.memory_space<vmem>>, %arg4: memref<1x8xf32, #tpu.memory_space<vmem>>, %arg5: memref<8x32xbf16, #tpu.memory_space<vmem>>, %arg6: memref<1x32xf32, #tpu.memory_space<vmem>>, %arg7: memref<1x16x16x32xbf16, #tpu.memory_space<vmem>>) attributes {dimension_semantics = [#tpu.dimension_semantics<parallel>, #tpu.dimension_semantics<parallel>], iteration_bounds = array<i64: 2, 1>, scalar_prefetch = 0 : i64, scratch_operands = 0 : i64, tpu.core_type = #tpu.core_type<tc>, window_params = [{transform_indices = @transform_0, window_bounds = array<i64: 1, 342, 32>}, {pipeline_mode = #tpu.pipeline_mode<synchronous>, transform_indices = @transform_1, window_bounds = array<i64: 288, 8>}, {pipeline_mode = #tpu.pipeline_mode<synchronous>, transform_indices = @transform_2, window_bounds = array<i64: 1, 8>}, {pipeline_mode = #tpu.pipeline_mode<synchronous>, transform_indices = @transform_3, window_bounds = array<i64: 8, 32>}, {pipeline_mode = #tpu.pipeline_mode<synchronous>, transform_indices = @transform_4, window_bounds = array<i64: 1, 32>}, {transform_indices = @transform_5, window_bounds = array<i64: 1, 16, 16, 32>}]} {
    %c288_i32 = arith.constant 288 : i32
    %0 = arith.muli %arg1, %c288_i32 : i32
    %1 = tpu.assume_multiple %0, 8 : i32
    %c0 = arith.constant 0 : index
    %2 = arith.index_cast %1 : i32 to index
    %c0_0 = arith.constant 0 : index
    %3 = vector.load %arg2[%c0, %2, %c0_0] : memref<1x342x32xbf16, #tpu.memory_space<vmem>>, vector<1x326x32xbf16>
    %4 = vector.shape_cast %3 : vector<1x326x32xbf16> to vector<326x32xbf16>
    %cst = arith.constant 0.000000e+00 : bf16
    %5 = vector.broadcast %cst : bf16 to vector<326x32xbf16>
    %6 = arith.maximumf %4, %5 : vector<326x32xbf16>
    %7 = vector.extract_strided_slice %6 {offsets = [0, 0], sizes = [288, 32], strides = [1, 1]} : vector<326x32xbf16> to vector<288x32xbf16>
    %8 = vector.extract_strided_slice %6 {offsets = [1, 0], sizes = [288, 32], strides = [1, 1]} : vector<326x32xbf16> to vector<288x32xbf16>
    %9 = vector.extract_strided_slice %6 {offsets = [2, 0], sizes = [288, 32], strides = [1, 1]} : vector<326x32xbf16> to vector<288x32xbf16>
    %10 = tpu.concatenate %7, %8, %9 in 1 : vector<288x32xbf16>, vector<288x32xbf16>, vector<288x32xbf16> -> vector<288x96xbf16>
    %c0_1 = arith.constant 0 : index
    %c0_2 = arith.constant 0 : index
    %11 = vector.load %arg3[%c0_1, %c0_2] : memref<288x8xbf16, #tpu.memory_space<vmem>>, vector<96x8xbf16>
    %cst_3 = arith.constant dense<0.000000e+00> : vector<288x8xf32>
    %12 = tpu.matmul %10, %11, %cst_3 {dimension_numbers = #tpu.dot_dimension_numbers<[1], [0], [0], [1], [0, 0, 1, 1], [], []>} : vector<288x96xbf16>, vector<96x8xbf16>, vector<288x8xf32> -> vector<288x8xf32>
    %13 = vector.extract_strided_slice %6 {offsets = [18, 0], sizes = [288, 32], strides = [1, 1]} : vector<326x32xbf16> to vector<288x32xbf16>
    %14 = vector.extract_strided_slice %6 {offsets = [19, 0], sizes = [288, 32], strides = [1, 1]} : vector<326x32xbf16> to vector<288x32xbf16>
    %15 = vector.extract_strided_slice %6 {offsets = [20, 0], sizes = [288, 32], strides = [1, 1]} : vector<326x32xbf16> to vector<288x32xbf16>
    %16 = tpu.concatenate %13, %14, %15 in 1 : vector<288x32xbf16>, vector<288x32xbf16>, vector<288x32xbf16> -> vector<288x96xbf16>
    %c96 = arith.constant 96 : index
    %c0_4 = arith.constant 0 : index
    %17 = vector.load %arg3[%c96, %c0_4] : memref<288x8xbf16, #tpu.memory_space<vmem>>, vector<96x8xbf16>
    %cst_5 = arith.constant dense<0.000000e+00> : vector<288x8xf32>
    %18 = tpu.matmul %16, %17, %cst_5 {dimension_numbers = #tpu.dot_dimension_numbers<[1], [0], [0], [1], [0, 0, 1, 1], [], []>} : vector<288x96xbf16>, vector<96x8xbf16>, vector<288x8xf32> -> vector<288x8xf32>
    %19 = arith.addf %12, %18 : vector<288x8xf32>
    %20 = vector.extract_strided_slice %6 {offsets = [36, 0], sizes = [288, 32], strides = [1, 1]} : vector<326x32xbf16> to vector<288x32xbf16>
    %21 = vector.extract_strided_slice %6 {offsets = [37, 0], sizes = [288, 32], strides = [1, 1]} : vector<326x32xbf16> to vector<288x32xbf16>
    %22 = vector.extract_strided_slice %6 {offsets = [38, 0], sizes = [288, 32], strides = [1, 1]} : vector<326x32xbf16> to vector<288x32xbf16>
    %23 = tpu.concatenate %20, %21, %22 in 1 : vector<288x32xbf16>, vector<288x32xbf16>, vector<288x32xbf16> -> vector<288x96xbf16>
    %c192 = arith.constant 192 : index
    %c0_6 = arith.constant 0 : index
    %24 = vector.load %arg3[%c192, %c0_6] : memref<288x8xbf16, #tpu.memory_space<vmem>>, vector<96x8xbf16>
    %cst_7 = arith.constant dense<0.000000e+00> : vector<288x8xf32>
    %25 = tpu.matmul %23, %24, %cst_7 {dimension_numbers = #tpu.dot_dimension_numbers<[1], [0], [0], [1], [0, 0, 1, 1], [], []>} : vector<288x96xbf16>, vector<96x8xbf16>, vector<288x8xf32> -> vector<288x8xf32>
    %26 = arith.addf %19, %25 : vector<288x8xf32>
    %c0_8 = arith.constant 0 : index
    %c0_9 = arith.constant 0 : index
    %27 = vector.load %arg4[%c0_8, %c0_9] : memref<1x8xf32, #tpu.memory_space<vmem>>, vector<1x8xf32>
    %28 = vector.broadcast %27 : vector<1x8xf32> to vector<288x8xf32>
    %29 = arith.addf %26, %28 : vector<288x8xf32>
    %cst_10 = arith.constant 0.000000e+00 : f32
    %30 = vector.broadcast %cst_10 : f32 to vector<288x8xf32>
    %31 = arith.maximumf %29, %30 : vector<288x8xf32>
    %32 = arith.truncf %31 : vector<288x8xf32> to vector<288x8xbf16>
    %c0_11 = arith.constant 0 : index
    %c0_12 = arith.constant 0 : index
    %33 = vector.load %arg5[%c0_11, %c0_12] : memref<8x32xbf16, #tpu.memory_space<vmem>>, vector<8x32xbf16>
    %cst_13 = arith.constant dense<0.000000e+00> : vector<288x32xf32>
    %34 = tpu.matmul %32, %33, %cst_13 {dimension_numbers = #tpu.dot_dimension_numbers<[1], [0], [0], [1], [0, 0, 1, 1], [], []>} : vector<288x8xbf16>, vector<8x32xbf16>, vector<288x32xf32> -> vector<288x32xf32>
    %c0_14 = arith.constant 0 : index
    %c0_15 = arith.constant 0 : index
    %35 = vector.load %arg6[%c0_14, %c0_15] : memref<1x32xf32, #tpu.memory_space<vmem>>, vector<1x32xf32>
    %36 = vector.broadcast %35 : vector<1x32xf32> to vector<288x32xf32>
    %37 = arith.addf %34, %36 : vector<288x32xf32>
    %38 = vector.extract_strided_slice %4 {offsets = [19, 0], sizes = [288, 32], strides = [1, 1]} : vector<326x32xbf16> to vector<288x32xbf16>
    %39 = arith.extf %38 : vector<288x32xbf16> to vector<288x32xf32>
    %40 = arith.addf %37, %39 : vector<288x32xf32>
    %cst_16 = arith.constant 0.000000e+00 : f32
    %41 = vector.broadcast %cst_16 : f32 to vector<288x32xf32>
    %42 = arith.maximumf %40, %41 : vector<288x32xf32>
    %43 = arith.truncf %42 : vector<288x32xf32> to vector<288x32xbf16>
    %44 = vector.extract_strided_slice %43 {offsets = [0, 0], sizes = [16, 32], strides = [1, 1]} : vector<288x32xbf16> to vector<16x32xbf16>
    %c0_17 = arith.constant 0 : index
    %c0_18 = arith.constant 0 : index
    %c0_19 = arith.constant 0 : index
    %c0_20 = arith.constant 0 : index
    %45 = vector.load %arg7[%c0_17, %c0_18, %c0_19, %c0_20] : memref<1x16x16x32xbf16, #tpu.memory_space<vmem>>, vector<1x1x16x32xbf16>
    %46 = vector.shape_cast %45 : vector<1x1x16x32xbf16> to vector<16x32xbf16>
    %47 = vector.shape_cast %44 : vector<16x32xbf16> to vector<1x1x16x32xbf16>
    tpu.vector_store %arg7[%c0_17, %c0_18, %c0_19, %c0_20], %47 {strides = array<i32>} : memref<1x16x16x32xbf16, #tpu.memory_space<vmem>>, vector<1x1x16x32xbf16>,
    %48 = vector.extract_strided_slice %43 {offsets = [18, 0], sizes = [16, 32], strides = [1, 1]} : vector<288x32xbf16> to vector<16x32xbf16>
    %c0_21 = arith.constant 0 : index
    %c1 = arith.constant 1 : index
    %c0_22 = arith.constant 0 : index
    %c0_23 = arith.constant 0 : index
    %49 = vector.load %arg7[%c0_21, %c1, %c0_22, %c0_23] : memref<1x16x16x32xbf16, #tpu.memory_space<vmem>>, vector<1x1x16x32xbf16>
    %50 = vector.shape_cast %49 : vector<1x1x16x32xbf16> to vector<16x32xbf16>
    %51 = vector.shape_cast %48 : vector<16x32xbf16> to vector<1x1x16x32xbf16>
    tpu.vector_store %arg7[%c0_21, %c1, %c0_22, %c0_23], %51 {strides = array<i32>} : memref<1x16x16x32xbf16, #tpu.memory_space<vmem>>, vector<1x1x16x32xbf16>,
    %52 = vector.extract_strided_slice %43 {offsets = [36, 0], sizes = [16, 32], strides = [1, 1]} : vector<288x32xbf16> to vector<16x32xbf16>
    %c0_24 = arith.constant 0 : index
    %c2 = arith.constant 2 : index
    %c0_25 = arith.constant 0 : index
    %c0_26 = arith.constant 0 : index
    %53 = vector.load %arg7[%c0_24, %c2, %c0_25, %c0_26] : memref<1x16x16x32xbf16, #tpu.memory_space<vmem>>, vector<1x1x16x32xbf16>
    %54 = vector.shape_cast %53 : vector<1x1x16x32xbf16> to vector<16x32xbf16>
    %55 = vector.shape_cast %52 : vector<16x32xbf16> to vector<1x1x16x32xbf16>
    tpu.vector_store %arg7[%c0_24, %c2, %c0_25, %c0_26], %55 {strides = array<i32>} : memref<1x16x16x32xbf16, #tpu.memory_space<vmem>>, vector<1x1x16x32xbf16>,
    %56 = vector.extract_strided_slice %43 {offsets = [54, 0], sizes = [16, 32], strides = [1, 1]} : vector<288x32xbf16> to vector<16x32xbf16>
    %c0_27 = arith.constant 0 : index
    %c3 = arith.constant 3 : index
    %c0_28 = arith.constant 0 : index
    %c0_29 = arith.constant 0 : index
    %57 = vector.load %arg7[%c0_27, %c3, %c0_28, %c0_29] : memref<1x16x16x32xbf16, #tpu.memory_space<vmem>>, vector<1x1x16x32xbf16>
    %58 = vector.shape_cast %57 : vector<1x1x16x32xbf16> to vector<16x32xbf16>
    %59 = vector.shape_cast %56 : vector<16x32xbf16> to vector<1x1x16x32xbf16>
    tpu.vector_store %arg7[%c0_27, %c3, %c0_28, %c0_29], %59 {strides = array<i32>} : memref<1x16x16x32xbf16, #tpu.memory_space<vmem>>, vector<1x1x16x32xbf16>,
    %60 = vector.extract_strided_slice %43 {offsets = [72, 0], sizes = [16, 32], strides = [1, 1]} : vector<288x32xbf16> to vector<16x32xbf16>
    %c0_30 = arith.constant 0 : index
    %c4 = arith.constant 4 : index
    %c0_31 = arith.constant 0 : index
    %c0_32 = arith.constant 0 : index
    %61 = vector.load %arg7[%c0_30, %c4, %c0_31, %c0_32] : memref<1x16x16x32xbf16, #tpu.memory_space<vmem>>, vector<1x1x16x32xbf16>
    %62 = vector.shape_cast %61 : vector<1x1x16x32xbf16> to vector<16x32xbf16>
    %63 = vector.shape_cast %60 : vector<16x32xbf16> to vector<1x1x16x32xbf16>
    tpu.vector_store %arg7[%c0_30, %c4, %c0_31, %c0_32], %63 {strides = array<i32>} : memref<1x16x16x32xbf16, #tpu.memory_space<vmem>>, vector<1x1x16x32xbf16>,
    %64 = vector.extract_strided_slice %43 {offsets = [90, 0], sizes = [16, 32], strides = [1, 1]} : vector<288x32xbf16> to vector<16x32xbf16>
    %c0_33 = arith.constant 0 : index
    %c5 = arith.constant 5 : index
    %c0_34 = arith.constant 0 : index
    %c0_35 = arith.constant 0 : index
    %65 = vector.load %arg7[%c0_33, %c5, %c0_34, %c0_35] : memref<1x16x16x32xbf16, #tpu.memory_space<vmem>>, vector<1x1x16x32xbf16>
    %66 = vector.shape_cast %65 : vector<1x1x16x32xbf16> to vector<16x32xbf16>
    %67 = vector.shape_cast %64 : vector<16x32xbf16> to vector<1x1x16x32xbf16>
    tpu.vector_store %arg7[%c0_33, %c5, %c0_34, %c0_35], %67 {strides = array<i32>} : memref<1x16x16x32xbf16, #tpu.memory_space<vmem>>, vector<1x1x16x32xbf16>,
    %68 = vector.extract_strided_slice %43 {offsets = [108, 0], sizes = [16, 32], strides = [1, 1]} : vector<288x32xbf16> to vector<16x32xbf16>
    %c0_36 = arith.constant 0 : index
    %c6 = arith.constant 6 : index
    %c0_37 = arith.constant 0 : index
    %c0_38 = arith.constant 0 : index
    %69 = vector.load %arg7[%c0_36, %c6, %c0_37, %c0_38] : memref<1x16x16x32xbf16, #tpu.memory_space<vmem>>, vector<1x1x16x32xbf16>
    %70 = vector.shape_cast %69 : vector<1x1x16x32xbf16> to vector<16x32xbf16>
    %71 = vector.shape_cast %68 : vector<16x32xbf16> to vector<1x1x16x32xbf16>
    tpu.vector_store %arg7[%c0_36, %c6, %c0_37, %c0_38], %71 {strides = array<i32>} : memref<1x16x16x32xbf16, #tpu.memory_space<vmem>>, vector<1x1x16x32xbf16>,
    %72 = vector.extract_strided_slice %43 {offsets = [126, 0], sizes = [16, 32], strides = [1, 1]} : vector<288x32xbf16> to vector<16x32xbf16>
    %c0_39 = arith.constant 0 : index
    %c7 = arith.constant 7 : index
    %c0_40 = arith.constant 0 : index
    %c0_41 = arith.constant 0 : index
    %73 = vector.load %arg7[%c0_39, %c7, %c0_40, %c0_41] : memref<1x16x16x32xbf16, #tpu.memory_space<vmem>>, vector<1x1x16x32xbf16>
    %74 = vector.shape_cast %73 : vector<1x1x16x32xbf16> to vector<16x32xbf16>
    %75 = vector.shape_cast %72 : vector<16x32xbf16> to vector<1x1x16x32xbf16>
    tpu.vector_store %arg7[%c0_39, %c7, %c0_40, %c0_41], %75 {strides = array<i32>} : memref<1x16x16x32xbf16, #tpu.memory_space<vmem>>, vector<1x1x16x32xbf16>,
    %76 = vector.extract_strided_slice %43 {offsets = [144, 0], sizes = [16, 32], strides = [1, 1]} : vector<288x32xbf16> to vector<16x32xbf16>
    %c0_42 = arith.constant 0 : index
    %c8 = arith.constant 8 : index
    %c0_43 = arith.constant 0 : index
    %c0_44 = arith.constant 0 : index
    %77 = vector.load %arg7[%c0_42, %c8, %c0_43, %c0_44] : memref<1x16x16x32xbf16, #tpu.memory_space<vmem>>, vector<1x1x16x32xbf16>
    %78 = vector.shape_cast %77 : vector<1x1x16x32xbf16> to vector<16x32xbf16>
    %79 = vector.shape_cast %76 : vector<16x32xbf16> to vector<1x1x16x32xbf16>
    tpu.vector_store %arg7[%c0_42, %c8, %c0_43, %c0_44], %79 {strides = array<i32>} : memref<1x16x16x32xbf16, #tpu.memory_space<vmem>>, vector<1x1x16x32xbf16>,
    %80 = vector.extract_strided_slice %43 {offsets = [162, 0], sizes = [16, 32], strides = [1, 1]} : vector<288x32xbf16> to vector<16x32xbf16>
    %c0_45 = arith.constant 0 : index
    %c9 = arith.constant 9 : index
    %c0_46 = arith.constant 0 : index
    %c0_47 = arith.constant 0 : index
    %81 = vector.load %arg7[%c0_45, %c9, %c0_46, %c0_47] : memref<1x16x16x32xbf16, #tpu.memory_space<vmem>>, vector<1x1x16x32xbf16>
    %82 = vector.shape_cast %81 : vector<1x1x16x32xbf16> to vector<16x32xbf16>
    %83 = vector.shape_cast %80 : vector<16x32xbf16> to vector<1x1x16x32xbf16>
    tpu.vector_store %arg7[%c0_45, %c9, %c0_46, %c0_47], %83 {strides = array<i32>} : memref<1x16x16x32xbf16, #tpu.memory_space<vmem>>, vector<1x1x16x32xbf16>,
    %84 = vector.extract_strided_slice %43 {offsets = [180, 0], sizes = [16, 32], strides = [1, 1]} : vector<288x32xbf16> to vector<16x32xbf16>
    %c0_48 = arith.constant 0 : index
    %c10 = arith.constant 10 : index
    %c0_49 = arith.constant 0 : index
    %c0_50 = arith.constant 0 : index
    %85 = vector.load %arg7[%c0_48, %c10, %c0_49, %c0_50] : memref<1x16x16x32xbf16, #tpu.memory_space<vmem>>, vector<1x1x16x32xbf16>
    %86 = vector.shape_cast %85 : vector<1x1x16x32xbf16> to vector<16x32xbf16>
    %87 = vector.shape_cast %84 : vector<16x32xbf16> to vector<1x1x16x32xbf16>
    tpu.vector_store %arg7[%c0_48, %c10, %c0_49, %c0_50], %87 {strides = array<i32>} : memref<1x16x16x32xbf16, #tpu.memory_space<vmem>>, vector<1x1x16x32xbf16>,
    %88 = vector.extract_strided_slice %43 {offsets = [198, 0], sizes = [16, 32], strides = [1, 1]} : vector<288x32xbf16> to vector<16x32xbf16>
    %c0_51 = arith.constant 0 : index
    %c11 = arith.constant 11 : index
    %c0_52 = arith.constant 0 : index
    %c0_53 = arith.constant 0 : index
    %89 = vector.load %arg7[%c0_51, %c11, %c0_52, %c0_53] : memref<1x16x16x32xbf16, #tpu.memory_space<vmem>>, vector<1x1x16x32xbf16>
    %90 = vector.shape_cast %89 : vector<1x1x16x32xbf16> to vector<16x32xbf16>
    %91 = vector.shape_cast %88 : vector<16x32xbf16> to vector<1x1x16x32xbf16>
    tpu.vector_store %arg7[%c0_51, %c11, %c0_52, %c0_53], %91 {strides = array<i32>} : memref<1x16x16x32xbf16, #tpu.memory_space<vmem>>, vector<1x1x16x32xbf16>,
    %92 = vector.extract_strided_slice %43 {offsets = [216, 0], sizes = [16, 32], strides = [1, 1]} : vector<288x32xbf16> to vector<16x32xbf16>
    %c0_54 = arith.constant 0 : index
    %c12 = arith.constant 12 : index
    %c0_55 = arith.constant 0 : index
    %c0_56 = arith.constant 0 : index
    %93 = vector.load %arg7[%c0_54, %c12, %c0_55, %c0_56] : memref<1x16x16x32xbf16, #tpu.memory_space<vmem>>, vector<1x1x16x32xbf16>
    %94 = vector.shape_cast %93 : vector<1x1x16x32xbf16> to vector<16x32xbf16>
    %95 = vector.shape_cast %92 : vector<16x32xbf16> to vector<1x1x16x32xbf16>
    tpu.vector_store %arg7[%c0_54, %c12, %c0_55, %c0_56], %95 {strides = array<i32>} : memref<1x16x16x32xbf16, #tpu.memory_space<vmem>>, vector<1x1x16x32xbf16>,
    %96 = vector.extract_strided_slice %43 {offsets = [234, 0], sizes = [16, 32], strides = [1, 1]} : vector<288x32xbf16> to vector<16x32xbf16>
    %c0_57 = arith.constant 0 : index
    %c13 = arith.constant 13 : index
    %c0_58 = arith.constant 0 : index
    %c0_59 = arith.constant 0 : index
    %97 = vector.load %arg7[%c0_57, %c13, %c0_58, %c0_59] : memref<1x16x16x32xbf16, #tpu.memory_space<vmem>>, vector<1x1x16x32xbf16>
    %98 = vector.shape_cast %97 : vector<1x1x16x32xbf16> to vector<16x32xbf16>
    %99 = vector.shape_cast %96 : vector<16x32xbf16> to vector<1x1x16x32xbf16>
    tpu.vector_store %arg7[%c0_57, %c13, %c0_58, %c0_59], %99 {strides = array<i32>} : memref<1x16x16x32xbf16, #tpu.memory_space<vmem>>, vector<1x1x16x32xbf16>,
    %100 = vector.extract_strided_slice %43 {offsets = [252, 0], sizes = [16, 32], strides = [1, 1]} : vector<288x32xbf16> to vector<16x32xbf16>
    %c0_60 = arith.constant 0 : index
    %c14 = arith.constant 14 : index
    %c0_61 = arith.constant 0 : index
    %c0_62 = arith.constant 0 : index
    %101 = vector.load %arg7[%c0_60, %c14, %c0_61, %c0_62] : memref<1x16x16x32xbf16, #tpu.memory_space<vmem>>, vector<1x1x16x32xbf16>
    %102 = vector.shape_cast %101 : vector<1x1x16x32xbf16> to vector<16x32xbf16>
    %103 = vector.shape_cast %100 : vector<16x32xbf16> to vector<1x1x16x32xbf16>
    tpu.vector_store %arg7[%c0_60, %c14, %c0_61, %c0_62], %103 {strides = array<i32>} : memref<1x16x16x32xbf16, #tpu.memory_space<vmem>>, vector<1x1x16x32xbf16>,
    %104 = vector.extract_strided_slice %43 {offsets = [270, 0], sizes = [16, 32], strides = [1, 1]} : vector<288x32xbf16> to vector<16x32xbf16>
    %c0_63 = arith.constant 0 : index
    %c15 = arith.constant 15 : index
    %c0_64 = arith.constant 0 : index
    %c0_65 = arith.constant 0 : index
    %105 = vector.load %arg7[%c0_63, %c15, %c0_64, %c0_65] : memref<1x16x16x32xbf16, #tpu.memory_space<vmem>>, vector<1x1x16x32xbf16>
    %106 = vector.shape_cast %105 : vector<1x1x16x32xbf16> to vector<16x32xbf16>
    %107 = vector.shape_cast %104 : vector<16x32xbf16> to vector<1x1x16x32xbf16>
    tpu.vector_store %arg7[%c0_63, %c15, %c0_64, %c0_65], %107 {strides = array<i32>} : memref<1x16x16x32xbf16, #tpu.memory_space<vmem>>, vector<1x1x16x32xbf16>,
    return
  }
  func.func @transform_0(%arg0: i32, %arg1: i32) -> (i32, i32, i32) {
    %c0_i32 = arith.constant 0 : i32
    %c0_i32_0 = arith.constant 0 : i32
    %c0_i32_1 = arith.constant 0 : i32
    return %arg0, %c0_i32, %c0_i32_0 : i32, i32, i32
  }
  func.func @transform_1(%arg0: i32, %arg1: i32) -> (i32, i32) {
    %c0_i32 = arith.constant 0 : i32
    %c0_i32_0 = arith.constant 0 : i32
    %c0_i32_1 = arith.constant 0 : i32
    return %c0_i32, %c0_i32_0 : i32, i32
  }
  func.func @transform_2(%arg0: i32, %arg1: i32) -> (i32, i32) {
    %c0_i32 = arith.constant 0 : i32
    %c0_i32_0 = arith.constant 0 : i32
    %c0_i32_1 = arith.constant 0 : i32
    return %c0_i32, %c0_i32_0 : i32, i32
  }
  func.func @transform_3(%arg0: i32, %arg1: i32) -> (i32, i32) {
    %c0_i32 = arith.constant 0 : i32
    %c0_i32_0 = arith.constant 0 : i32
    %c0_i32_1 = arith.constant 0 : i32
    return %c0_i32, %c0_i32_0 : i32, i32
  }
  func.func @transform_4(%arg0: i32, %arg1: i32) -> (i32, i32) {
    %c0_i32 = arith.constant 0 : i32
    %c0_i32_0 = arith.constant 0 : i32
    %c0_i32_1 = arith.constant 0 : i32
    return %c0_i32, %c0_i32_0 : i32, i32
  }
  func.func @transform_5(%arg0: i32, %arg1: i32) -> (i32, i32, i32, i32) {
    %c0_i32 = arith.constant 0 : i32
    %c0_i32_0 = arith.constant 0 : i32
    %c0_i32_1 = arith.constant 0 : i32
    return %arg0, %arg1, %c0_i32, %c0_i32_0 : i32, i32, i32, i32
  }
}

module attributes {stable_mosaic.version = 11 : i64} {
  func.func @_conv_kernel(%arg0: i32, %arg1: i32, %arg2: memref<1x342x32xbf16, #tpu.memory_space<vmem>>, %arg3: memref<288x64xbf16, #tpu.memory_space<vmem>>, %arg4: memref<1x64xf32, #tpu.memory_space<vmem>>, %arg5: memref<1x8x16x64xbf16, #tpu.memory_space<vmem>>) attributes {dimension_semantics = [#tpu.dimension_semantics<parallel>, #tpu.dimension_semantics<parallel>], iteration_bounds = array<i64: 2, 2>, scalar_prefetch = 0 : i64, scratch_operands = 0 : i64, tpu.core_type = #tpu.core_type<tc>, window_params = [{transform_indices = @transform_0, window_bounds = array<i64: 1, 342, 32>}, {pipeline_mode = #tpu.pipeline_mode<synchronous>, transform_indices = @transform_1, window_bounds = array<i64: 288, 64>}, {pipeline_mode = #tpu.pipeline_mode<synchronous>, transform_indices = @transform_2, window_bounds = array<i64: 1, 64>}, {transform_indices = @transform_3, window_bounds = array<i64: 1, 8, 16, 64>}]} {
    %c144_i32 = arith.constant 144 : i32
    %0 = arith.muli %arg1, %c144_i32 : i32
    %1 = tpu.assume_multiple %0, 8 : i32
    %c0 = arith.constant 0 : index
    %2 = arith.index_cast %1 : i32 to index
    %c0_0 = arith.constant 0 : index
    %3 = vector.load %arg2[%c0, %2, %c0_0] : memref<1x342x32xbf16, #tpu.memory_space<vmem>>, vector<1x182x32xbf16>
    %4 = vector.shape_cast %3 : vector<1x182x32xbf16> to vector<182x32xbf16>
    %5 = vector.extract_strided_slice %4 {offsets = [0, 0], sizes = [144, 32], strides = [1, 1]} : vector<182x32xbf16> to vector<144x32xbf16>
    %6 = vector.extract_strided_slice %4 {offsets = [1, 0], sizes = [144, 32], strides = [1, 1]} : vector<182x32xbf16> to vector<144x32xbf16>
    %7 = vector.extract_strided_slice %4 {offsets = [2, 0], sizes = [144, 32], strides = [1, 1]} : vector<182x32xbf16> to vector<144x32xbf16>
    %8 = tpu.concatenate %5, %6, %7 in 1 : vector<144x32xbf16>, vector<144x32xbf16>, vector<144x32xbf16> -> vector<144x96xbf16>
    %c0_1 = arith.constant 0 : index
    %c0_2 = arith.constant 0 : index
    %9 = vector.load %arg3[%c0_1, %c0_2] : memref<288x64xbf16, #tpu.memory_space<vmem>>, vector<96x64xbf16>
    %cst = arith.constant dense<0.000000e+00> : vector<144x64xf32>
    %10 = tpu.matmul %8, %9, %cst {dimension_numbers = #tpu.dot_dimension_numbers<[1], [0], [0], [1], [0, 0, 1, 1], [], []>} : vector<144x96xbf16>, vector<96x64xbf16>, vector<144x64xf32> -> vector<144x64xf32>
    %11 = vector.extract_strided_slice %4 {offsets = [18, 0], sizes = [144, 32], strides = [1, 1]} : vector<182x32xbf16> to vector<144x32xbf16>
    %12 = vector.extract_strided_slice %4 {offsets = [19, 0], sizes = [144, 32], strides = [1, 1]} : vector<182x32xbf16> to vector<144x32xbf16>
    %13 = vector.extract_strided_slice %4 {offsets = [20, 0], sizes = [144, 32], strides = [1, 1]} : vector<182x32xbf16> to vector<144x32xbf16>
    %14 = tpu.concatenate %11, %12, %13 in 1 : vector<144x32xbf16>, vector<144x32xbf16>, vector<144x32xbf16> -> vector<144x96xbf16>
    %c96 = arith.constant 96 : index
    %c0_3 = arith.constant 0 : index
    %15 = vector.load %arg3[%c96, %c0_3] : memref<288x64xbf16, #tpu.memory_space<vmem>>, vector<96x64xbf16>
    %cst_4 = arith.constant dense<0.000000e+00> : vector<144x64xf32>
    %16 = tpu.matmul %14, %15, %cst_4 {dimension_numbers = #tpu.dot_dimension_numbers<[1], [0], [0], [1], [0, 0, 1, 1], [], []>} : vector<144x96xbf16>, vector<96x64xbf16>, vector<144x64xf32> -> vector<144x64xf32>
    %17 = arith.addf %10, %16 : vector<144x64xf32>
    %18 = vector.extract_strided_slice %4 {offsets = [36, 0], sizes = [144, 32], strides = [1, 1]} : vector<182x32xbf16> to vector<144x32xbf16>
    %19 = vector.extract_strided_slice %4 {offsets = [37, 0], sizes = [144, 32], strides = [1, 1]} : vector<182x32xbf16> to vector<144x32xbf16>
    %20 = vector.extract_strided_slice %4 {offsets = [38, 0], sizes = [144, 32], strides = [1, 1]} : vector<182x32xbf16> to vector<144x32xbf16>
    %21 = tpu.concatenate %18, %19, %20 in 1 : vector<144x32xbf16>, vector<144x32xbf16>, vector<144x32xbf16> -> vector<144x96xbf16>
    %c192 = arith.constant 192 : index
    %c0_5 = arith.constant 0 : index
    %22 = vector.load %arg3[%c192, %c0_5] : memref<288x64xbf16, #tpu.memory_space<vmem>>, vector<96x64xbf16>
    %cst_6 = arith.constant dense<0.000000e+00> : vector<144x64xf32>
    %23 = tpu.matmul %21, %22, %cst_6 {dimension_numbers = #tpu.dot_dimension_numbers<[1], [0], [0], [1], [0, 0, 1, 1], [], []>} : vector<144x96xbf16>, vector<96x64xbf16>, vector<144x64xf32> -> vector<144x64xf32>
    %24 = arith.addf %17, %23 : vector<144x64xf32>
    %c0_7 = arith.constant 0 : index
    %c0_8 = arith.constant 0 : index
    %25 = vector.load %arg4[%c0_7, %c0_8] : memref<1x64xf32, #tpu.memory_space<vmem>>, vector<1x64xf32>
    %26 = vector.broadcast %25 : vector<1x64xf32> to vector<144x64xf32>
    %27 = arith.addf %24, %26 : vector<144x64xf32>
    %cst_9 = arith.constant 0.000000e+00 : f32
    %28 = vector.broadcast %cst_9 : f32 to vector<144x64xf32>
    %29 = arith.maximumf %27, %28 : vector<144x64xf32>
    %30 = arith.truncf %29 : vector<144x64xf32> to vector<144x64xbf16>
    %31 = vector.extract_strided_slice %30 {offsets = [0, 0], sizes = [16, 64], strides = [1, 1]} : vector<144x64xbf16> to vector<16x64xbf16>
    %c0_10 = arith.constant 0 : index
    %c0_11 = arith.constant 0 : index
    %c0_12 = arith.constant 0 : index
    %c0_13 = arith.constant 0 : index
    %32 = vector.load %arg5[%c0_10, %c0_11, %c0_12, %c0_13] : memref<1x8x16x64xbf16, #tpu.memory_space<vmem>>, vector<1x1x16x64xbf16>
    %33 = vector.shape_cast %32 : vector<1x1x16x64xbf16> to vector<16x64xbf16>
    %34 = vector.shape_cast %31 : vector<16x64xbf16> to vector<1x1x16x64xbf16>
    tpu.vector_store %arg5[%c0_10, %c0_11, %c0_12, %c0_13], %34 {strides = array<i32>} : memref<1x8x16x64xbf16, #tpu.memory_space<vmem>>, vector<1x1x16x64xbf16>,
    %35 = vector.extract_strided_slice %30 {offsets = [18, 0], sizes = [16, 64], strides = [1, 1]} : vector<144x64xbf16> to vector<16x64xbf16>
    %c0_14 = arith.constant 0 : index
    %c1 = arith.constant 1 : index
    %c0_15 = arith.constant 0 : index
    %c0_16 = arith.constant 0 : index
    %36 = vector.load %arg5[%c0_14, %c1, %c0_15, %c0_16] : memref<1x8x16x64xbf16, #tpu.memory_space<vmem>>, vector<1x1x16x64xbf16>
    %37 = vector.shape_cast %36 : vector<1x1x16x64xbf16> to vector<16x64xbf16>
    %38 = vector.shape_cast %35 : vector<16x64xbf16> to vector<1x1x16x64xbf16>
    tpu.vector_store %arg5[%c0_14, %c1, %c0_15, %c0_16], %38 {strides = array<i32>} : memref<1x8x16x64xbf16, #tpu.memory_space<vmem>>, vector<1x1x16x64xbf16>,
    %39 = vector.extract_strided_slice %30 {offsets = [36, 0], sizes = [16, 64], strides = [1, 1]} : vector<144x64xbf16> to vector<16x64xbf16>
    %c0_17 = arith.constant 0 : index
    %c2 = arith.constant 2 : index
    %c0_18 = arith.constant 0 : index
    %c0_19 = arith.constant 0 : index
    %40 = vector.load %arg5[%c0_17, %c2, %c0_18, %c0_19] : memref<1x8x16x64xbf16, #tpu.memory_space<vmem>>, vector<1x1x16x64xbf16>
    %41 = vector.shape_cast %40 : vector<1x1x16x64xbf16> to vector<16x64xbf16>
    %42 = vector.shape_cast %39 : vector<16x64xbf16> to vector<1x1x16x64xbf16>
    tpu.vector_store %arg5[%c0_17, %c2, %c0_18, %c0_19], %42 {strides = array<i32>} : memref<1x8x16x64xbf16, #tpu.memory_space<vmem>>, vector<1x1x16x64xbf16>,
    %43 = vector.extract_strided_slice %30 {offsets = [54, 0], sizes = [16, 64], strides = [1, 1]} : vector<144x64xbf16> to vector<16x64xbf16>
    %c0_20 = arith.constant 0 : index
    %c3 = arith.constant 3 : index
    %c0_21 = arith.constant 0 : index
    %c0_22 = arith.constant 0 : index
    %44 = vector.load %arg5[%c0_20, %c3, %c0_21, %c0_22] : memref<1x8x16x64xbf16, #tpu.memory_space<vmem>>, vector<1x1x16x64xbf16>
    %45 = vector.shape_cast %44 : vector<1x1x16x64xbf16> to vector<16x64xbf16>
    %46 = vector.shape_cast %43 : vector<16x64xbf16> to vector<1x1x16x64xbf16>
    tpu.vector_store %arg5[%c0_20, %c3, %c0_21, %c0_22], %46 {strides = array<i32>} : memref<1x8x16x64xbf16, #tpu.memory_space<vmem>>, vector<1x1x16x64xbf16>,
    %47 = vector.extract_strided_slice %30 {offsets = [72, 0], sizes = [16, 64], strides = [1, 1]} : vector<144x64xbf16> to vector<16x64xbf16>
    %c0_23 = arith.constant 0 : index
    %c4 = arith.constant 4 : index
    %c0_24 = arith.constant 0 : index
    %c0_25 = arith.constant 0 : index
    %48 = vector.load %arg5[%c0_23, %c4, %c0_24, %c0_25] : memref<1x8x16x64xbf16, #tpu.memory_space<vmem>>, vector<1x1x16x64xbf16>
    %49 = vector.shape_cast %48 : vector<1x1x16x64xbf16> to vector<16x64xbf16>
    %50 = vector.shape_cast %47 : vector<16x64xbf16> to vector<1x1x16x64xbf16>
    tpu.vector_store %arg5[%c0_23, %c4, %c0_24, %c0_25], %50 {strides = array<i32>} : memref<1x8x16x64xbf16, #tpu.memory_space<vmem>>, vector<1x1x16x64xbf16>,
    %51 = vector.extract_strided_slice %30 {offsets = [90, 0], sizes = [16, 64], strides = [1, 1]} : vector<144x64xbf16> to vector<16x64xbf16>
    %c0_26 = arith.constant 0 : index
    %c5 = arith.constant 5 : index
    %c0_27 = arith.constant 0 : index
    %c0_28 = arith.constant 0 : index
    %52 = vector.load %arg5[%c0_26, %c5, %c0_27, %c0_28] : memref<1x8x16x64xbf16, #tpu.memory_space<vmem>>, vector<1x1x16x64xbf16>
    %53 = vector.shape_cast %52 : vector<1x1x16x64xbf16> to vector<16x64xbf16>
    %54 = vector.shape_cast %51 : vector<16x64xbf16> to vector<1x1x16x64xbf16>
    tpu.vector_store %arg5[%c0_26, %c5, %c0_27, %c0_28], %54 {strides = array<i32>} : memref<1x8x16x64xbf16, #tpu.memory_space<vmem>>, vector<1x1x16x64xbf16>,
    %55 = vector.extract_strided_slice %30 {offsets = [108, 0], sizes = [16, 64], strides = [1, 1]} : vector<144x64xbf16> to vector<16x64xbf16>
    %c0_29 = arith.constant 0 : index
    %c6 = arith.constant 6 : index
    %c0_30 = arith.constant 0 : index
    %c0_31 = arith.constant 0 : index
    %56 = vector.load %arg5[%c0_29, %c6, %c0_30, %c0_31] : memref<1x8x16x64xbf16, #tpu.memory_space<vmem>>, vector<1x1x16x64xbf16>
    %57 = vector.shape_cast %56 : vector<1x1x16x64xbf16> to vector<16x64xbf16>
    %58 = vector.shape_cast %55 : vector<16x64xbf16> to vector<1x1x16x64xbf16>
    tpu.vector_store %arg5[%c0_29, %c6, %c0_30, %c0_31], %58 {strides = array<i32>} : memref<1x8x16x64xbf16, #tpu.memory_space<vmem>>, vector<1x1x16x64xbf16>,
    %59 = vector.extract_strided_slice %30 {offsets = [126, 0], sizes = [16, 64], strides = [1, 1]} : vector<144x64xbf16> to vector<16x64xbf16>
    %c0_32 = arith.constant 0 : index
    %c7 = arith.constant 7 : index
    %c0_33 = arith.constant 0 : index
    %c0_34 = arith.constant 0 : index
    %60 = vector.load %arg5[%c0_32, %c7, %c0_33, %c0_34] : memref<1x8x16x64xbf16, #tpu.memory_space<vmem>>, vector<1x1x16x64xbf16>
    %61 = vector.shape_cast %60 : vector<1x1x16x64xbf16> to vector<16x64xbf16>
    %62 = vector.shape_cast %59 : vector<16x64xbf16> to vector<1x1x16x64xbf16>
    tpu.vector_store %arg5[%c0_32, %c7, %c0_33, %c0_34], %62 {strides = array<i32>} : memref<1x8x16x64xbf16, #tpu.memory_space<vmem>>, vector<1x1x16x64xbf16>,
    return
  }
  func.func @transform_0(%arg0: i32, %arg1: i32) -> (i32, i32, i32) {
    %c0_i32 = arith.constant 0 : i32
    %c0_i32_0 = arith.constant 0 : i32
    %c0_i32_1 = arith.constant 0 : i32
    return %arg0, %c0_i32, %c0_i32_0 : i32, i32, i32
  }
  func.func @transform_1(%arg0: i32, %arg1: i32) -> (i32, i32) {
    %c0_i32 = arith.constant 0 : i32
    %c0_i32_0 = arith.constant 0 : i32
    %c0_i32_1 = arith.constant 0 : i32
    return %c0_i32, %c0_i32_0 : i32, i32
  }
  func.func @transform_2(%arg0: i32, %arg1: i32) -> (i32, i32) {
    %c0_i32 = arith.constant 0 : i32
    %c0_i32_0 = arith.constant 0 : i32
    %c0_i32_1 = arith.constant 0 : i32
    return %c0_i32, %c0_i32_0 : i32, i32
  }
  func.func @transform_3(%arg0: i32, %arg1: i32) -> (i32, i32, i32, i32) {
    %c0_i32 = arith.constant 0 : i32
    %c0_i32_0 = arith.constant 0 : i32
    %c0_i32_1 = arith.constant 0 : i32
    return %arg0, %arg1, %c0_i32, %c0_i32_0 : i32, i32, i32, i32
  }
}

module attributes {stable_mosaic.version = 11 : i64} {
  func.func @_conv_kernel(%arg0: i32, %arg1: i32, %arg2: memref<1x1190x16xbf16, #tpu.memory_space<vmem>>, %arg3: memref<144x12xbf16, #tpu.memory_space<vmem>>, %arg4: memref<1x12xf32, #tpu.memory_space<vmem>>, %arg5: memref<1x8x32x12xf32, #tpu.memory_space<vmem>>) attributes {dimension_semantics = [#tpu.dimension_semantics<parallel>, #tpu.dimension_semantics<parallel>], iteration_bounds = array<i64: 2, 4>, scalar_prefetch = 0 : i64, scratch_operands = 0 : i64, tpu.core_type = #tpu.core_type<tc>, window_params = [{transform_indices = @transform_0, window_bounds = array<i64: 1, 1190, 16>}, {pipeline_mode = #tpu.pipeline_mode<synchronous>, transform_indices = @transform_1, window_bounds = array<i64: 144, 12>}, {pipeline_mode = #tpu.pipeline_mode<synchronous>, transform_indices = @transform_2, window_bounds = array<i64: 1, 12>}, {transform_indices = @transform_3, window_bounds = array<i64: 1, 8, 32, 12>}]} {
    %c272_i32 = arith.constant 272 : i32
    %0 = arith.muli %arg1, %c272_i32 : i32
    %1 = tpu.assume_multiple %0, 8 : i32
    %c0 = arith.constant 0 : index
    %2 = arith.index_cast %1 : i32 to index
    %c0_0 = arith.constant 0 : index
    %3 = vector.load %arg2[%c0, %2, %c0_0] : memref<1x1190x16xbf16, #tpu.memory_space<vmem>>, vector<1x342x16xbf16>
    %4 = vector.shape_cast %3 : vector<1x342x16xbf16> to vector<342x16xbf16>
    %5 = vector.extract_strided_slice %4 {offsets = [0, 0], sizes = [272, 16], strides = [1, 1]} : vector<342x16xbf16> to vector<272x16xbf16>
    %6 = vector.extract_strided_slice %4 {offsets = [1, 0], sizes = [272, 16], strides = [1, 1]} : vector<342x16xbf16> to vector<272x16xbf16>
    %7 = vector.extract_strided_slice %4 {offsets = [2, 0], sizes = [272, 16], strides = [1, 1]} : vector<342x16xbf16> to vector<272x16xbf16>
    %8 = tpu.concatenate %5, %6, %7 in 1 : vector<272x16xbf16>, vector<272x16xbf16>, vector<272x16xbf16> -> vector<272x48xbf16>
    %c0_1 = arith.constant 0 : index
    %c0_2 = arith.constant 0 : index
    %9 = vector.load %arg3[%c0_1, %c0_2] : memref<144x12xbf16, #tpu.memory_space<vmem>>, vector<48x12xbf16>
    %cst = arith.constant dense<0.000000e+00> : vector<272x12xf32>
    %10 = tpu.matmul %8, %9, %cst {dimension_numbers = #tpu.dot_dimension_numbers<[1], [0], [0], [1], [0, 0, 1, 1], [], []>} : vector<272x48xbf16>, vector<48x12xbf16>, vector<272x12xf32> -> vector<272x12xf32>
    %11 = vector.extract_strided_slice %4 {offsets = [34, 0], sizes = [272, 16], strides = [1, 1]} : vector<342x16xbf16> to vector<272x16xbf16>
    %12 = vector.extract_strided_slice %4 {offsets = [35, 0], sizes = [272, 16], strides = [1, 1]} : vector<342x16xbf16> to vector<272x16xbf16>
    %13 = vector.extract_strided_slice %4 {offsets = [36, 0], sizes = [272, 16], strides = [1, 1]} : vector<342x16xbf16> to vector<272x16xbf16>
    %14 = tpu.concatenate %11, %12, %13 in 1 : vector<272x16xbf16>, vector<272x16xbf16>, vector<272x16xbf16> -> vector<272x48xbf16>
    %c48 = arith.constant 48 : index
    %c0_3 = arith.constant 0 : index
    %15 = vector.load %arg3[%c48, %c0_3] : memref<144x12xbf16, #tpu.memory_space<vmem>>, vector<48x12xbf16>
    %cst_4 = arith.constant dense<0.000000e+00> : vector<272x12xf32>
    %16 = tpu.matmul %14, %15, %cst_4 {dimension_numbers = #tpu.dot_dimension_numbers<[1], [0], [0], [1], [0, 0, 1, 1], [], []>} : vector<272x48xbf16>, vector<48x12xbf16>, vector<272x12xf32> -> vector<272x12xf32>
    %17 = arith.addf %10, %16 : vector<272x12xf32>
    %18 = vector.extract_strided_slice %4 {offsets = [68, 0], sizes = [272, 16], strides = [1, 1]} : vector<342x16xbf16> to vector<272x16xbf16>
    %19 = vector.extract_strided_slice %4 {offsets = [69, 0], sizes = [272, 16], strides = [1, 1]} : vector<342x16xbf16> to vector<272x16xbf16>
    %20 = vector.extract_strided_slice %4 {offsets = [70, 0], sizes = [272, 16], strides = [1, 1]} : vector<342x16xbf16> to vector<272x16xbf16>
    %21 = tpu.concatenate %18, %19, %20 in 1 : vector<272x16xbf16>, vector<272x16xbf16>, vector<272x16xbf16> -> vector<272x48xbf16>
    %c96 = arith.constant 96 : index
    %c0_5 = arith.constant 0 : index
    %22 = vector.load %arg3[%c96, %c0_5] : memref<144x12xbf16, #tpu.memory_space<vmem>>, vector<48x12xbf16>
    %cst_6 = arith.constant dense<0.000000e+00> : vector<272x12xf32>
    %23 = tpu.matmul %21, %22, %cst_6 {dimension_numbers = #tpu.dot_dimension_numbers<[1], [0], [0], [1], [0, 0, 1, 1], [], []>} : vector<272x48xbf16>, vector<48x12xbf16>, vector<272x12xf32> -> vector<272x12xf32>
    %24 = arith.addf %17, %23 : vector<272x12xf32>
    %c0_7 = arith.constant 0 : index
    %c0_8 = arith.constant 0 : index
    %25 = vector.load %arg4[%c0_7, %c0_8] : memref<1x12xf32, #tpu.memory_space<vmem>>, vector<1x12xf32>
    %26 = vector.broadcast %25 : vector<1x12xf32> to vector<272x12xf32>
    %27 = arith.addf %24, %26 : vector<272x12xf32>
    %28 = vector.extract_strided_slice %27 {offsets = [0, 0], sizes = [32, 12], strides = [1, 1]} : vector<272x12xf32> to vector<32x12xf32>
    %c0_9 = arith.constant 0 : index
    %c0_10 = arith.constant 0 : index
    %c0_11 = arith.constant 0 : index
    %c0_12 = arith.constant 0 : index
    %29 = vector.load %arg5[%c0_9, %c0_10, %c0_11, %c0_12] : memref<1x8x32x12xf32, #tpu.memory_space<vmem>>, vector<1x1x32x12xf32>
    %30 = vector.shape_cast %29 : vector<1x1x32x12xf32> to vector<32x12xf32>
    %31 = vector.shape_cast %28 : vector<32x12xf32> to vector<1x1x32x12xf32>
    tpu.vector_store %arg5[%c0_9, %c0_10, %c0_11, %c0_12], %31 {strides = array<i32>} : memref<1x8x32x12xf32, #tpu.memory_space<vmem>>, vector<1x1x32x12xf32>,
    %32 = vector.extract_strided_slice %27 {offsets = [34, 0], sizes = [32, 12], strides = [1, 1]} : vector<272x12xf32> to vector<32x12xf32>
    %c0_13 = arith.constant 0 : index
    %c1 = arith.constant 1 : index
    %c0_14 = arith.constant 0 : index
    %c0_15 = arith.constant 0 : index
    %33 = vector.load %arg5[%c0_13, %c1, %c0_14, %c0_15] : memref<1x8x32x12xf32, #tpu.memory_space<vmem>>, vector<1x1x32x12xf32>
    %34 = vector.shape_cast %33 : vector<1x1x32x12xf32> to vector<32x12xf32>
    %35 = vector.shape_cast %32 : vector<32x12xf32> to vector<1x1x32x12xf32>
    tpu.vector_store %arg5[%c0_13, %c1, %c0_14, %c0_15], %35 {strides = array<i32>} : memref<1x8x32x12xf32, #tpu.memory_space<vmem>>, vector<1x1x32x12xf32>,
    %36 = vector.extract_strided_slice %27 {offsets = [68, 0], sizes = [32, 12], strides = [1, 1]} : vector<272x12xf32> to vector<32x12xf32>
    %c0_16 = arith.constant 0 : index
    %c2 = arith.constant 2 : index
    %c0_17 = arith.constant 0 : index
    %c0_18 = arith.constant 0 : index
    %37 = vector.load %arg5[%c0_16, %c2, %c0_17, %c0_18] : memref<1x8x32x12xf32, #tpu.memory_space<vmem>>, vector<1x1x32x12xf32>
    %38 = vector.shape_cast %37 : vector<1x1x32x12xf32> to vector<32x12xf32>
    %39 = vector.shape_cast %36 : vector<32x12xf32> to vector<1x1x32x12xf32>
    tpu.vector_store %arg5[%c0_16, %c2, %c0_17, %c0_18], %39 {strides = array<i32>} : memref<1x8x32x12xf32, #tpu.memory_space<vmem>>, vector<1x1x32x12xf32>,
    %40 = vector.extract_strided_slice %27 {offsets = [102, 0], sizes = [32, 12], strides = [1, 1]} : vector<272x12xf32> to vector<32x12xf32>
    %c0_19 = arith.constant 0 : index
    %c3 = arith.constant 3 : index
    %c0_20 = arith.constant 0 : index
    %c0_21 = arith.constant 0 : index
    %41 = vector.load %arg5[%c0_19, %c3, %c0_20, %c0_21] : memref<1x8x32x12xf32, #tpu.memory_space<vmem>>, vector<1x1x32x12xf32>
    %42 = vector.shape_cast %41 : vector<1x1x32x12xf32> to vector<32x12xf32>
    %43 = vector.shape_cast %40 : vector<32x12xf32> to vector<1x1x32x12xf32>
    tpu.vector_store %arg5[%c0_19, %c3, %c0_20, %c0_21], %43 {strides = array<i32>} : memref<1x8x32x12xf32, #tpu.memory_space<vmem>>, vector<1x1x32x12xf32>,
    %44 = vector.extract_strided_slice %27 {offsets = [136, 0], sizes = [32, 12], strides = [1, 1]} : vector<272x12xf32> to vector<32x12xf32>
    %c0_22 = arith.constant 0 : index
    %c4 = arith.constant 4 : index
    %c0_23 = arith.constant 0 : index
    %c0_24 = arith.constant 0 : index
    %45 = vector.load %arg5[%c0_22, %c4, %c0_23, %c0_24] : memref<1x8x32x12xf32, #tpu.memory_space<vmem>>, vector<1x1x32x12xf32>
    %46 = vector.shape_cast %45 : vector<1x1x32x12xf32> to vector<32x12xf32>
    %47 = vector.shape_cast %44 : vector<32x12xf32> to vector<1x1x32x12xf32>
    tpu.vector_store %arg5[%c0_22, %c4, %c0_23, %c0_24], %47 {strides = array<i32>} : memref<1x8x32x12xf32, #tpu.memory_space<vmem>>, vector<1x1x32x12xf32>,
    %48 = vector.extract_strided_slice %27 {offsets = [170, 0], sizes = [32, 12], strides = [1, 1]} : vector<272x12xf32> to vector<32x12xf32>
    %c0_25 = arith.constant 0 : index
    %c5 = arith.constant 5 : index
    %c0_26 = arith.constant 0 : index
    %c0_27 = arith.constant 0 : index
    %49 = vector.load %arg5[%c0_25, %c5, %c0_26, %c0_27] : memref<1x8x32x12xf32, #tpu.memory_space<vmem>>, vector<1x1x32x12xf32>
    %50 = vector.shape_cast %49 : vector<1x1x32x12xf32> to vector<32x12xf32>
    %51 = vector.shape_cast %48 : vector<32x12xf32> to vector<1x1x32x12xf32>
    tpu.vector_store %arg5[%c0_25, %c5, %c0_26, %c0_27], %51 {strides = array<i32>} : memref<1x8x32x12xf32, #tpu.memory_space<vmem>>, vector<1x1x32x12xf32>,
    %52 = vector.extract_strided_slice %27 {offsets = [204, 0], sizes = [32, 12], strides = [1, 1]} : vector<272x12xf32> to vector<32x12xf32>
    %c0_28 = arith.constant 0 : index
    %c6 = arith.constant 6 : index
    %c0_29 = arith.constant 0 : index
    %c0_30 = arith.constant 0 : index
    %53 = vector.load %arg5[%c0_28, %c6, %c0_29, %c0_30] : memref<1x8x32x12xf32, #tpu.memory_space<vmem>>, vector<1x1x32x12xf32>
    %54 = vector.shape_cast %53 : vector<1x1x32x12xf32> to vector<32x12xf32>
    %55 = vector.shape_cast %52 : vector<32x12xf32> to vector<1x1x32x12xf32>
    tpu.vector_store %arg5[%c0_28, %c6, %c0_29, %c0_30], %55 {strides = array<i32>} : memref<1x8x32x12xf32, #tpu.memory_space<vmem>>, vector<1x1x32x12xf32>,
    %56 = vector.extract_strided_slice %27 {offsets = [238, 0], sizes = [32, 12], strides = [1, 1]} : vector<272x12xf32> to vector<32x12xf32>
    %c0_31 = arith.constant 0 : index
    %c7 = arith.constant 7 : index
    %c0_32 = arith.constant 0 : index
    %c0_33 = arith.constant 0 : index
    %57 = vector.load %arg5[%c0_31, %c7, %c0_32, %c0_33] : memref<1x8x32x12xf32, #tpu.memory_space<vmem>>, vector<1x1x32x12xf32>
    %58 = vector.shape_cast %57 : vector<1x1x32x12xf32> to vector<32x12xf32>
    %59 = vector.shape_cast %56 : vector<32x12xf32> to vector<1x1x32x12xf32>
    tpu.vector_store %arg5[%c0_31, %c7, %c0_32, %c0_33], %59 {strides = array<i32>} : memref<1x8x32x12xf32, #tpu.memory_space<vmem>>, vector<1x1x32x12xf32>,
    return
  }
  func.func @transform_0(%arg0: i32, %arg1: i32) -> (i32, i32, i32) {
    %c0_i32 = arith.constant 0 : i32
    %c0_i32_0 = arith.constant 0 : i32
    %c0_i32_1 = arith.constant 0 : i32
    return %arg0, %c0_i32, %c0_i32_0 : i32, i32, i32
  }
  func.func @transform_1(%arg0: i32, %arg1: i32) -> (i32, i32) {
    %c0_i32 = arith.constant 0 : i32
    %c0_i32_0 = arith.constant 0 : i32
    %c0_i32_1 = arith.constant 0 : i32
    return %c0_i32, %c0_i32_0 : i32, i32
  }
  func.func @transform_2(%arg0: i32, %arg1: i32) -> (i32, i32) {
    %c0_i32 = arith.constant 0 : i32
    %c0_i32_0 = arith.constant 0 : i32
    %c0_i32_1 = arith.constant 0 : i32
    return %c0_i32, %c0_i32_0 : i32, i32
  }
  func.func @transform_3(%arg0: i32, %arg1: i32) -> (i32, i32, i32, i32) {
    %c0_i32 = arith.constant 0 : i32
    %c0_i32_0 = arith.constant 0 : i32
    %c0_i32_1 = arith.constant 0 : i32
    return %arg0, %arg1, %c0_i32, %c0_i32_0 : i32, i32, i32, i32
  }
}

</mosaic_0001>

<bundles_post_ra>
// kernel: bottom_decoder_forward.5
= control target key start
LH: loop header
LB: loop body
LE: loop exit
PB: predicated region body
PF: predicated region fallthrough
CT: control target
= control target key end

     0   :  { %8 = vsyncpa [#allocation3], 0  ;;  %s4772_s12 = smov 0   ;;  %s4774_s13 = smov 0   ;;  %s5960_s0 = inlined_call_operand.vmem [shape: bf16[2,342,4], index: 0, kind: input, shape index: {}]   ;;  %s5961_s1 = inlined_call_operand.vmem [shape: bf16[36,32], index: 1, kind: input, shape index: {}]   ;;  %s5962_s2 = inlined_call_operand.hbm [shape: f32[1,32], index: 2, kind: input, shape index: {}]   ;;  %s5963_s3 = inlined_call_operand.vmem [shape: bf16[2,16,16,32], index: 3, kind: output, shape index: {}]  }
   0x1   :  { %s4776_s14 = smov 0  }
   0x2 LB: > { %s3500_s15 = sadd.s32 4294967295, %s4749_s14   ;;  %s26_s16 = sadd.s32 1, %s4745_s13  ;;  %s4749_s14 = sphi %s4776_s14, %s14_s14   ;;  %s4745_s13 = sphi %s4774_s13, %s6048_s13   ;;  %s4741_s12 = sphi %s4772_s12, %s6047_s12  }
   0x3   : > { %p28_p0 = scmp.ge.s32.totalorder %s26_s16, 2  ;;  %p3502_p1 = scmp.ge.s32.totalorder %s4749_s14, 1 }
   0x4   : > { %p127_p2 = scmp.lt.s32.totalorder %s4749_s14, 3  ;;  %p4797_p4 = scmp.eq.s32.totalorder %s3500_s15, 0 }
   0x5   : > { %s6050_s16 = smov (%p28_p0, %s26_s16), 0  ;;  %s4751_s19 = smov [#allocation2]  }
   0x6   : > { %p4793_p3 = pnand %p3502_p1, %p127_p2  ;;  %s143_s20 = sshll.u32 %s4751_s19, 4  ;;  %s144_s20 = int_to_ptr.vmem [resolvable:$true] %s143_s20 }
   0x7   : > { %s5999_s18 = scalar_select %p4797_p4, 1, 0 }
   0x8   : > { %s5998_s17 = scalar_select %p4793_p3, 1, 0 }
   0x9   : > { %p4635_p5 = pneg %p4793_p3  ;;  %s4695_s24 = scalar_lea.hbm %s5962_s2, 16 }
   0xa   : > { %p4696_p7 = scmp.ne.s32.totalorder %s5962_s2, %s4695_s24  ;;  %p4702_p11 = scmp.lt.u32.totalorder %s4695_s24, %s5962_s2 }
   0xb   : > { %p4805_p6 = pnand %p4797_p4, %p4635_p5 }
   0xd   : > { %p4697_p8 = pneg %p4805_p6 }
   0xf   : > { %p4698_p9 = pnand %p4697_p8, %p4696_p7 }
  0x11   : > { %p4699_p10 = pneg %p4698_p9 }
  0x13   : > { %p4704_p12 = pnand %p4702_p11, %p4699_p10 }
  0x15   : > { %4707 = shalt.err (!%p4704_p12)
}
  0x16   : > { %s4708_s29 = scalar_lea.vmem %s144_s20, 16  ;;  %s4715_s30 = scalar_lea.vmem %s144_s20, 32 }
  0x17   : > { %p4709_p13 = scmp.ne.s32.totalorder %s144_s20, %s4708_s29  ;;  %p4716_p2 = scmp.lt.s32.totalorder %s144_s20, %s144_s20 }
  0x18   : > { %p4717_p5 = scmp.lt.s32.totalorder %s4715_s30, %s4708_s29 }
  0x19   : > { %p4711_p0 = pnand %p4709_p13, %p4697_p8 }
  0x1a   : > { %p4718_p4 = por %p4717_p5, %p4716_p2 }
  0x1b   : > { %p4712_p1 = pneg %p4711_p0 }
  0x1d   : > { %p4719_p3 = pnand %p4718_p4, %p4712_p1 }
  0x1f   : > { %4722 = shalt.err (!%p4719_p3)
}
  0x20   : > { %4638 = dma.hbm_to_vmem [thread:$0]  (!%p4805_p6), %s5962_s2, 16, %s144_s20, [#allocation3]  }
  0x21   : > { %p6001_p7 = scmp.ne.s32.totalorder %s5998_s17, 0 }
  0x23   : > { %164 = sbr.rel (%p6001_p7) target bundleno = 607 (0x25f), region = 32 }
  0x2a   : > { %p6002_p9 = scmp.ne.s32.totalorder %s5999_s18, 0 }
  0x2c   : > { %4736 = dma.done.wait (%p6002_p9), [#allocation3], 16  }
  0x2d   : > { %4738 = vsyncadd (%p6002_p9), [#allocation3], 4294967280  ;;  %p193_p8 = scmp.lt.s32.totalorder %s4741_s12, 1  ;;  %vm559_vm0 = vcmask 1041408   ;;  %vm351_vm1 = vsmask.f32 7424 }
  0x2e   : > { %v4844_v0 = vld [vmem:[%s5961_s1 + $0x8] sm:$0x3]  ;;  %v4666_v1 = vld [vmem:[%s5961_s1] ss:$0 sps:$4 sm:$0xcc]   ;;  %vm504_vm3 = vcmask 31744  }
  0x2f   : > { %s6052_s12 = smov (!%p193_p8, %s4741_s12), 1  ;;  %4624 = vmatprep.subr.msk.bf16.mxu0 %vm559_vm0, %v4844_v0  ;;  %v4853_v2 = vsel %vm559_vm0, %v4844_v0, 0  ;;  %vm1503_vm2 = vsmask.f32 6400  ;;  %v503_v4 = vrot.slane %v4666_v1, 2  ;;  %vm1860_vm4 = vcmask 1045504  }
  0x30   : > { %s4630_s6 = smul.u32 172, %s6052_s12  ;;  %6003 = vst [vmem:[#allocation5_spill] sm:$0xff] %v4853_v2  ;;  %4141 = vmatpush3.bf16.msra.mxu0 %v4853_v2  ;;  %v4670_v13 = vld [vmem:[%s5961_s1 + $0x8] ss:$0 sps:$4 sm:$0xcc]   ;;  %vm957_vm6 = vcmask 1046528  }
  0x31   : > { %4620 = vmatprep.subr.msk.bf16.mxu1 %vm559_vm0, %v503_v4  ;;  %v561_v10 = vsel %vm559_vm0, %v503_v4, 0  ;;  %v1901_v21 = vrot.slane %v4670_v13, 2  ;;  %v256_v26 = vld [vmem:[%s5961_s1] sm:$0x3]  ;;  %vm2406_vm5 = vsmask.f32 5376 }
  0x32   : > { %s4839_s9 = scalar_lea.vmem %s5960_s0, %s4630_s6  ;;  %3989 = vmatpush3.bf16.msra.mxu1 %v561_v10  ;;  %v777_v44 = vsel %vm559_vm0, %v256_v26, 0  ;;  %vm2767_vm7 = vcmask 1044480   ;;  %s3780_s5 = sshll.u32 %s6052_s12, 7  ;;  %vm3143_vm8 = vcmask 257024   ;;  %vm3154_vm9 = vcmask 1042432  }
  0x33   : > { %v4857_v3 = vld [vmem:[%s4839_s9] sm:$0xff]   ;;  %v4860_v5 = vld [vmem:[%s4839_s9 + $0x8] sm:$0xff]   ;;  %v4865_v8 = vld [vmem:[%s4839_s9 + $0x10] sm:$0xff]   ;;  %4626 = vmatprep.subr.msk.bf16.mxu0 %vm559_vm0, %v1901_v21  ;;  %4621 = vmatprep.subr.msk.bf16.mxu1 %vm559_vm0, %v256_v26  ;;  %v1957_v34 = vsel %vm559_vm0, %v1901_v21, 0  ;;  %s5778_s8 = scalar_lea.vmem %s5963_s3, %s3780_s5  ;;  %vm3155_vm10 = vcmask 1046532   ;;  %vm3194_vm12 = vcmask 1040384  }
  0x34   : > { %v353_v6 = vshrl.u32 %v4857_v3, 16  ;;  %v355_v7 = vshll.u32 %v4857_v3, 16  ;;  %v4868_v9 = vld [vmem:[%s4839_s9 + $0x18] sm:$0xff]   ;;  %v360_v11 = vshll.u32 %v4860_v5, 16  ;;  %v364_v12 = vshrl.u32 %v4860_v5, 16  ;;  %v4893_v27 = vld [vmem:[%s4839_s9 + $0x20] sm:$0xff]   ;;  %vm5784_vm11 = vmor %vm3154_vm9, %vm3155_vm10 }
  0x35   : > { %v4878_v15 = vshll.u32 %v4865_v8, 16  ;;  %v4881_v16 = vshrl.u32 %v4865_v8, 16  ;;  %v4884_v17 = vshll.u32 %v4868_v9, 16  ;;  %v4897_v30 = vshrl.u32 %v4868_v9, 16  ;;  %v4905_v36 = vld [vmem:[%s4839_s9 + $0x28] sm:$0xff]   ;;  %v4915_v41 = vld [vmem:[%s4839_s9 + $0x30] sm:$0xff]  }
  0x36   : > { %v357_v14 = vrot.slane %v355_v7, 1  ;;  %v362_v18 = vrot.slane %v360_v11, 1  ;;  %v1504_v19 = vrot.slane %v364_v12, 1  ;;  %v1505_v20 = vrot.slane %v360_v11, 2  ;;  %v4931_v50 = vld [vmem:[%s4839_s9 + $0x38] sm:$0xff]   ;;  %v4952_v62 = vld [vmem:[%s4839_s9 + $0x40] sm:$0xff]  }
  0x37   : > { %v1507_v23 = vrot.slane %v4881_v16, 1  ;;  %v1508_v24 = vrot.slane %v4878_v15, 2  ;;  %v370_v25 = vrot.slane %v4878_v15, 1  ;;  %v1512_v31 = vrot.slane %v4884_v17, 2  ;;  %v4978_v21 = vld [vmem:[%s4839_s9 + $0x48] sm:$0xff]   ;;  %v4990_v26 = vld [vmem:[%s4839_s9 + $0x50] sm:$0xff]  }
  0x38   : > { %v358_v22 = vor.u32 %v357_v14, %v353_v6  ;;  %v366_v28 = vor.u32 %v364_v12, %v362_v18  ;;  %v1506_v29 = vor.u32 %v1505_v20, %v1504_v19  ;;  %v1511_v38 = vrot.slane %v4897_v30, 1  ;;  %v4969_v14 = vld [vmem:[%s5961_s1 + $0xc] sm:$0x3] }
  0x39   : > { %v1509_v33 = vor.u32 %v1508_v24, %v1507_v23  ;;  %v374_v35 = vor.u32 %v4881_v16, %v370_v25  ;;  %v378_v39 = vrot.slane %v4884_v17, 1  ;;  %v4912_v40 = vshll.u32 %v4893_v27, 16 }
  0x3a   : > { %v363_v32 = vsel %vm351_vm1, %v358_v22, %v362_v18  ;;  %v371_v37 = vsel %vm351_vm1, %v366_v28, %v370_v25  ;;  %v4920_v43 = vshrl.u32 %v4893_v27, 16  ;;  %v4924_v45 = vshll.u32 %v4905_v36, 16 }
  0x3b   : > { %3990 = vmatprep.mubr.msk.bf16.mxu1 %vm504_vm3, %v363_v32  ;;  %v1510_v42 = vsel %vm1503_vm2, %v1506_v29, %v1509_v33  ;;  %v1513_v46 = vor.u32 %v1512_v31, %v1511_v38  ;;  %v379_v47 = vsel %vm351_vm1, %v374_v35, %v378_v39  ;;  %v1516_v48 = vrot.slane %v4912_v40, 2 }
  0x3c   : > { %3991 = vmatmul.mubr.msk.bf16.vlgmr.msra.gmra.mrb[0].mxu1 %vm504_vm3, %v371_v37  ;;  %4142 = vmatprep.mubr.msk.bf16.mxu0 %vm504_vm3, %v1510_v42  ;;  %v382_v49 = vor.u32 %v4897_v30, %v378_v39  ;;  %v1515_v51 = vrot.slane %v4920_v43, 1  ;;  %v386_v52 = vrot.slane %v4912_v40, 1  ;;  %v4937_v53 = vshrl.u32 %v4905_v36, 16 }
  0x3d   : > { %4027 = vmatpush3.bf16.msra.mxu1 %v777_v44  ;;  %3994 = vmatprep.mubr.msk.bf16.mxu1 %vm504_vm3, %v379_v47  ;;  %v1520_v54 = vrot.slane %v4924_v45, 2  ;;  %v1514_v55 = vsel %vm1503_vm2, %v1509_v33, %v1513_v46  ;;  %v394_v56 = vrot.slane %v4924_v45, 1  ;;  %v4943_v57 = vshll.u32 %v4915_v41, 16 }
  0x3e   : > { %v4946_v58 = vshrl.u32 %v4915_v41, 16  ;;  %4143 = vmatmul.mubr.msk.bf16.vlgmr.msra.gmra.mrb[0].mxu0 %vm504_vm3, %v1514_v55  ;;  %v1517_v59 = vor.u32 %v1516_v48, %v1515_v51  ;;  %v1519_v60 = vrot.slane %v4937_v53, 1  ;;  %v390_v61 = vor.u32 %v4920_v43, %v386_v52  ;;  %v5022_v55 = vld [vmem:[%s4839_s9 + $0x58] sm:$0xff]  }
  0x3f   : > { %4179 = vmatpush3.bf16.msra.mxu0 %v1957_v34  ;;  %v387_v63 = vsel %vm351_vm1, %v382_v49, %v386_v52  ;;  %v1524_v4 = vrot.slane %v4943_v57, 2  ;;  %v4960_v11 = vshll.u32 %v4931_v50, 16  ;;  %v4964_v13 = vshrl.u32 %v4931_v50, 16 }
  0x40   : > { %v1523_v1 = vrot.slane %v4946_v58, 1  ;;  %v1518_v6 = vsel %vm1503_vm2, %v1513_v46, %v1517_v59  ;;  %v1521_v7 = vor.u32 %v1520_v54, %v1519_v60  ;;  %v395_v10 = vsel %vm351_vm1, %v390_v61, %v394_v56  ;;  %4627 = vmatprep.subr.msk.bf16.mxu0 %vm559_vm0, %v4969_v14 }
  0x41   : > { %4146 = vmatprep.mubr.msk.bf16.mxu0 %vm504_vm3, %v1518_v6  ;;  %v398_v18 = vor.u32 %v4937_v53, %v394_v56  ;;  %v402_v19 = vrot.slane %v4943_v57, 1  ;;  %v4975_v20 = vshll.u32 %v4952_v62, 16  ;;  %v1527_v23 = vrot.slane %v4964_v13, 1  ;;  %v5027_v56 = vld [vmem:[%s5961_s1 + $0x4] sm:$0x3] }
  0x42   : > { %v1525_v12 = vor.u32 %v1524_v4, %v1523_v1  ;;  %v1522_v22 = vsel %vm1503_vm2, %v1517_v59, %v1521_v7  ;;  %v1528_v24 = vrot.slane %v4960_v11, 2  ;;  %v4987_v25 = vshrl.u32 %v4952_v62, 16  ;;  %4622 = vmatprep.subr.msk.bf16.mxu1 %vm559_vm0, %v5027_v56 }
  0x43   : > { %v406_v29 = vor.u32 %v4946_v58, %v402_v19  ;;  %v410_v31 = vrot.slane %v4960_v11, 1  ;;  %v1532_v32 = vrot.slane %v4975_v20, 2  ;;  %v403_v34 = vsel %vm351_vm1, %v398_v18, %v402_v19  ;;  %v5046_v18 = vld [vmem:[%s4839_s9 + $0x88] sm:$0xff]  }
  0x44   : > { %3995 = vmatmul.mubr.msk.bf16.gmra.mrb[4].mxu1 %vm504_vm3, %v387_v63  ;;  %v1526_v28 = vsel %vm1503_vm2, %v1521_v7, %v1525_v12  ;;  %v1531_v33 = vrot.slane %v4987_v25, 1  ;;  %v1529_v35 = vor.u32 %v1528_v24, %v1527_v23  ;;  %v5001_v37 = vshll.u32 %v4978_v21, 16  ;;  %v5052_v23 = vld [vmem:[%s4839_s9 + $0x60] sm:$0xff]  }
  0x45   : > { %3998 = vmatprep.mubr.msk.bf16.mxu1 %vm504_vm3, %v395_v10  ;;  %v5004_v38 = vshrl.u32 %v4978_v21, 16  ;;  %v411_v39 = vsel %vm351_vm1, %v406_v29, %v410_v31  ;;  %v5008_v44 = vshll.u32 %v4990_v26, 16  ;;  %v5011_v46 = vshrl.u32 %v4990_v26, 16 }
  0x46   : > { %4147 = vmatmul.mubr.msk.bf16.gmra.mrb[4].mxu0 %vm504_vm3, %v1522_v22  ;;  %v1533_v42 = vor.u32 %v1532_v32, %v1531_v33  ;;  %v418_v47 = vrot.slane %v4975_v20, 1  ;;  %v414_v48 = vor.u32 %v4964_v13, %v410_v31  ;;  %v1530_v49 = vsel %vm1503_vm2, %v1525_v12, %v1529_v35 }
  0x47   : > { %4150 = vmatprep.mubr.msk.bf16.mxu0 %vm504_vm3, %v1526_v28  ;;  %v1535_v51 = vrot.slane %v5004_v38, 1  ;;  %v1536_v52 = vrot.slane %v5001_v37, 2  ;;  %v426_v60 = vrot.slane %v5001_v37, 1  ;;  %v1539_v61 = vrot.slane %v5011_v46, 1 }
  0x48   : > { %v422_v54 = vor.u32 %v4987_v25, %v418_v47  ;;  %v1534_v59 = vsel %vm1503_vm2, %v1529_v35, %v1533_v42  ;;  %v1540_v63 = vrot.slane %v5008_v44, 2  ;;  %v419_v1 = vsel %vm351_vm1, %v414_v48, %v418_v47  ;;  %v251_v35 = vld [vmem:[%s4839_s9 + $0x90] sm:$0xf] }
  0x49   : > { %v1537_v4 = vor.u32 %v1536_v52, %v1535_v51  ;;  %v5039_v6 = vshll.u32 %v5022_v55, 16  ;;  %v5042_v7 = vshrl.u32 %v5022_v55, 16  ;;  %v430_v19 = vor.u32 %v5004_v38, %v426_v60 }
  0x4a   : > { %v427_v10 = vsel %vm351_vm1, %v422_v54, %v426_v60  ;;  %v1541_v12 = vor.u32 %v1540_v63, %v1539_v61  ;;  %v434_v22 = vrot.slane %v5008_v44, 1  ;;  %v1861_v47 = vrot.slane %v4860_v5, 2 }
  0x4b   : > { %6004 = vst [vmem:[#allocation6_spill] sm:$0xff] %v5039_v6  ;;  %6005 = vst [vmem:[#allocation7_spill] sm:$0xff] %v5042_v7  ;;  %v1538_v24 = vsel %vm1503_vm2, %v1533_v42, %v1537_v4  ;;  %v1543_v28 = vrot.slane %v5042_v7, 1  ;;  %v1544_v29 = vrot.slane %v5039_v6, 2  ;;  %v442_v33 = vrot.slane %v5039_v6, 1 }
  0x4c   : > { %3999 = vmatmul.mubr.msk.bf16.gmra.mrb[8].mxu1 %vm504_vm3, %v403_v34  ;;  %v1542_v31 = vsel %vm1503_vm2, %v1537_v4, %v1541_v12  ;;  %v438_v32 = vor.u32 %v5011_v46, %v434_v22  ;;  %v5062_v34 = vld [vmem:[%s4839_s9 + $0x68] sm:$0xff]   ;;  %v435_v42 = vsel %vm351_vm1, %v430_v19, %v434_v22  ;;  %v5072_v48 = vshll.u32 %v5052_v23, 16  ;;  %v5098_v19 = vld [vmem:[%s4839_s9 + $0x70] sm:$0xff]  }
  0x4d   : > { %4002 = vmatprep.mubr.msk.bf16.mxu1 %vm504_vm3, %v411_v39  ;;  %v5066_v39 = vshll.u32 %v5046_v18, 16  ;;  %v5078_v52 = vcombine.low %v251_v35, %v251_v35  ;;  %v5081_v54 = vshrl.u32 %v5046_v18, 16  ;;  %v1862_v60 = vrot.slane %v4865_v8, 2 }
  0x4e   : > { %4151 = vmatmul.mubr.msk.bf16.gmra.mrb[8].mxu0 %vm504_vm3, %v1530_v49  ;;  %6006 = vst [vmem:[#allocation8_spill] sm:$0xff] %v5072_v48  ;;  %v5075_v49 = vor.u32 %v1544_v29, %v1543_v28  ;;  %v5086_v61 = vshrl.u32 %v5052_v23, 16  ;;  %v5089_v63 = vshll.u32 %v5062_v34, 16  ;;  %v1874_v6 = vrot.slane %v4952_v62, 2 }
  0x4f   : > { %4154 = vmatprep.mubr.msk.bf16.mxu0 %vm504_vm3, %v1534_v59  ;;  %v5967_v51 = vrot.slane %v5066_v39, 1  ;;  %6008 = vst [vmem:[#allocation10_spill] sm:$0xff] %v5078_v52  ;;  %6009 = vst [vmem:[#allocation11_spill] sm:$0xff] %v5081_v54  ;;  %v443_v59 = vsel %vm351_vm1, %v438_v32, %v442_v33  ;;  %v496_v4 = vshll.u32 %v5078_v52, 16  ;;  %v1863_v29 = vsel %vm1860_vm4, %v1861_v47, %v1862_v60 }
  0x50   : > { %6007 = vst [vmem:[#allocation9_spill] sm:$0xff] %v5075_v49  ;;  %6010 = vst [vmem:[#allocation12_spill] sm:$0xff] %v5086_v61  ;;  %v1546_v22 = vsel %vm1503_vm2, %v1541_v12, %v5075_v49  ;;  %v458_v32 = vrot.slane %v5089_v63, 1  ;;  %v5115_v12 = vshll.u32 %v5098_v19, 16  ;;  %v1864_v47 = vrot.slane %v4868_v9, 2 }
  0x51   : > { %6011 = vst [vmem:[#allocation13_spill] sm:$0xff] %v5089_v63  ;;  %v498_v28 = vrot.slane %v496_v4, 1  ;;  %v1866_v49 = vrot.slane %v4893_v27, 2  ;;  %v2415_v52 = vrot.slane %v4912_v40, 3  ;;  %v1876_v40 = vrot.slane %v4978_v21, 2 }
  0x52   : > { %6012 = vst [vmem:[#allocation14_spill] sm:$0xff] %v5115_v12  ;;  %vm3195_vm13 = vcmask 1044484   ;;  %vm3175_vm14 = vcmask 1045508  }
  0x53   : > { %v5150_v63 = vsel %vm1860_vm4, %v1864_v47, %v1866_v49  ;;  %vm5798_vm15 = vmor %vm3194_vm12, %vm3195_vm13 }
  0x54   : > { %4003 = vmatmul.mubr.msk.bf16.gmra.mrb[12].mxu1 %vm504_vm3, %v419_v1  ;;  %v494_v1 = vor.u32 %v5081_v54, %v5967_v51  ;;  %v2190_v54 = vsel %vm559_vm0, %v4969_v14, 0 }
  0x55   : > { %4006 = vmatprep.mubr.msk.bf16.mxu1 %vm504_vm3, %v427_v10  ;;  %v450_v10 = vrot.slane %v5072_v48, 1 }
  0x56   : > { %4155 = vmatmul.mubr.msk.bf16.gmra.mrb[12].mxu0 %vm504_vm3, %v1538_v24  ;;  %v446_v24 = vor.u32 %v5042_v7, %v442_v33  ;;  %v5111_v51 = vsel %vm351_vm1, %v494_v1, %v498_v28  ;;  %v5126_v1 = vshrl.u32 %v5098_v19, 16  ;;  %v5134_v28 = vld [vmem:[%s5961_s1 + $0xc] ss:$0 sps:$4 sm:$0xcc]   ;;  %v2414_v7 = vrot.slane %v4920_v43, 2 }
  0x57   : > { %4158 = vmatprep.mubr.msk.bf16.mxu0 %vm504_vm3, %v1542_v31  ;;  %v454_v31 = vor.u32 %v5086_v61, %v450_v10  ;;  %v2418_v43 = vrot.slane %v4937_v53, 2 }
  0x58   : > { %v451_v33 = vsel %vm351_vm1, %v446_v24, %v450_v10  ;;  %6014 = vst [vmem:[#allocation16_spill] sm:$0xff] %v5126_v1  ;;  %v466_v10 = vrot.slane %v5115_v12, 1  ;;  %v5139_v24 = vld [vmem:[%s4839_s9 + $0x80] sm:$0xff]  }
  0x59   : > { %v459_v4 = vsel %vm351_vm1, %v454_v31, %v458_v32  ;;  %v5143_v31 = vsel %vm1860_vm4, %v1862_v60, %v1864_v47  ;;  %v5160_v14 = vshll.u32 %v5139_v24, 16  ;;  %v5163_v60 = vld [vmem:[%s4839_s9 + $0x98] sm:$0xf] }
  0x5b   : > { %6017 = vst [vmem:[#allocation19_spill] sm:$0xff] %v5160_v14 }
  0x5c   : > { %4007 = vmatmul.mubr.msk.bf16.gmra.mrb[16].mxu1 %vm504_vm3, %v435_v42  ;;  %v5108_v42 = vld [vmem:[%s4839_s9 + $0x78] sm:$0xff]  }
  0x5d   : > { %4010 = vmatprep.mubr.msk.bf16.mxu1 %vm504_vm3, %v443_v59  ;;  %v5121_v59 = vshrl.u32 %v5062_v34, 16 }
  0x5e   : > { %4159 = vmatmul.mubr.msk.bf16.gmra.mrb[16].mxu0 %vm504_vm3, %v1546_v22  ;;  %v5129_v22 = vshll.u32 %v5108_v42, 16 }
  0x5f   : > { %4180 = vmatprep.mubr.msk.bf16.mxu0 %vm504_vm3, %v1863_v29  ;;  %6013 = vst [vmem:[#allocation15_spill] sm:$0xff] %v5121_v59  ;;  %v252_v29 = vld [vmem:[%s4839_s9 + $0x94] sm:$0xf]  ;;  %v462_v2 = vor.u32 %v5121_v59, %v458_v32  ;;  %v254_v32 = vld [vmem:[%s4839_s9 + $0x9c] sm:$0xf] }
  0x60   : > { %6015 = vst [vmem:[#allocation17_spill] sm:$0xff] %v5129_v22  ;;  %v474_v12 = vrot.slane %v5129_v22, 1  ;;  %v5155_v61 = vcombine.low %v251_v35, %v252_v29  ;;  %v5171_v35 = vshrl.u32 %v5108_v42, 16  ;;  %v5174_v29 = vcombine.low %v5163_v60, %v254_v32 }
  0x61   : > { %v467_v47 = vsel %vm351_vm1, %v462_v2, %v466_v10  ;;  %v1870_v22 = vrot.slane %v4915_v41, 2  ;;  %v482_v32 = vrot.slane %v5160_v14, 1  ;;  %v2410_v14 = vrot.slane %v4897_v30, 2 }
  0x62   : > { %6016 = vst [vmem:[#allocation18_spill] sm:$0xff] %v5155_v61  ;;  %6018 = vst [vmem:[#allocation20_spill] sm:$0xff] %v5171_v35  ;;  %v5185_v2 = vrot.slane %v5155_v61, 2  ;;  %v478_v59 = vor.u32 %v5171_v35, %v474_v12  ;;  %v2416_v30 = vor.u32 %v2415_v52, %v2414_v7  ;;  %v1878_v7 = vrot.slane %v4990_v26, 2 }
  0x64   : > { %4011 = vmatmul.mubr.msk.bf16.gmra.mrb[20].mxu1 %vm504_vm3, %v451_v33  ;;  %v470_v33 = vor.u32 %v5126_v1, %v466_v10  ;;  %v5179_v1 = vshrl.u32 %v5139_v24, 16  ;;  %v5988_v10 = vrot.slane %v5174_v29, 2 }
  0x65   : > { %4014 = vmatprep.mubr.msk.bf16.mxu1 %vm504_vm3, %v459_v4  ;;  %v1868_v4 = vrot.slane %v4905_v36, 2 }
  0x66   : > { %4181 = vmatmul.mubr.msk.bf16.vlgmr.msra.gmra.mrb[0].mxu0 %vm504_vm3, %v5143_v31  ;;  %v475_v48 = vsel %vm351_vm1, %v470_v33, %v474_v12  ;;  %6019 = vst [vmem:[#allocation21_spill] sm:$0xff] %v5179_v1  ;;  %v483_v12 = vsel %vm351_vm1, %v478_v59, %v482_v32 }
  0x67   : > { %4217 = vmatpush3.bf16.msra.mxu0 %v2190_v54  ;;  %4184 = vmatprep.mubr.msk.bf16.mxu0 %vm504_vm3, %v5150_v63  ;;  %v6020_v54 = vrot.slane %v5134_v28, 2  ;;  %v5191_v33 = vsel %vm1860_vm4, %v1866_v49, %v1868_v4  ;;  %v5202_v61 = vsel %vm1860_vm4, %v1868_v4, %v1870_v22  ;;  %v2407_v49 = vrot.slane %v4881_v16, 2 }
  0x68   : > { %v2411_v4 = vrot.slane %v4884_v17, 3 }
  0x69   : > { %4628 = vmatprep.subr.msk.bf16.mxu0 %vm559_vm0, %v6020_v54  ;;  %v5199_v54 = vsel %vm1860_vm4, %v5185_v2, %v5988_v10  ;;  %v1872_v10 = vrot.slane %v4931_v50, 2 }
  0x6b   : > { %v5223_v59 = vsel %vm1860_vm4, %v1870_v22, %v1872_v10  ;;  %v2419_v22 = vrot.slane %v4924_v45, 3  ;;  %v5256_v45 = vsel %vm1860_vm4, %v1876_v40, %v1878_v7 }
  0x6c   : > { %4015 = vmatmul.mubr.msk.bf16.gmra.mrb[24].mxu1 %vm504_vm3, %v467_v47  ;;  %v486_v47 = vor.u32 %v5179_v1, %v482_v32  ;;  %v6021_v1 = vrot.slane %v5066_v39, 1  ;;  %v5248_v32 = vsel %vm1860_vm4, %v1874_v6, %v1876_v40 }
  0x6d   : > { %4018 = vmatprep.mubr.msk.bf16.mxu1 %vm504_vm3, %v475_v48  ;;  %v2408_v48 = vrot.slane %v4878_v15, 3  ;;  %v2412_v15 = vor.u32 %v2411_v4, %v2410_v14  ;;  %v2420_v52 = vor.u32 %v2419_v22, %v2418_v43  ;;  %v2435_v43 = vrot.slane %v5001_v37, 3 }
  0x6e   : > { %4185 = vmatmul.mubr.msk.bf16.gmra.mrb[4].mxu0 %vm504_vm3, %v5191_v33  ;;  %v491_v35 = vsel %vm351_vm1, %v486_v47, %v6021_v1  ;;  %v5230_v1 = vsel %vm1860_vm4, %v1872_v10, %v1874_v6  ;;  %v2423_v10 = vrot.slane %v4943_v57, 3  ;;  %v2426_v6 = vrot.slane %v4964_v13, 2  ;;  %vm5803_vm1 = vmor %vm559_vm0, %vm3175_vm14 }
  0x6f   : > { %4188 = vmatprep.mubr.msk.bf16.mxu0 %vm504_vm3, %v5202_v61  ;;  %v2409_v16 = vor.u32 %v2408_v48, %v2407_v49  ;;  %v5233_v14 = vsel %vm2406_vm5, %v2412_v15, %v2416_v30  ;;  %v5253_v53 = vsel %vm2406_vm5, %v2416_v30, %v2420_v52  ;;  %v2427_v47 = vrot.slane %v4960_v11, 3 }
  0x70   : > { %v1880_v49 = vrot.slane %v5022_v55, 2  ;;  %v1882_v48 = vrot.slane %v5052_v23, 2  ;;  %v2431_v30 = vrot.slane %v4975_v20, 3  ;;  %v1884_v22 = vrot.slane %v5062_v34, 2 }
  0x71   : > { %v5227_v17 = vsel %vm2406_vm5, %v2409_v16, %v2412_v15  ;;  %v2428_v16 = vor.u32 %v2427_v47, %v2426_v6  ;;  %v2430_v15 = vrot.slane %v4987_v25, 2  ;;  %v2434_v25 = vrot.slane %v5004_v38, 2 }
  0x72   : > { %v5285_v13 = vsel %vm1860_vm4, %v1878_v7, %v1880_v49  ;;  %v5290_v40 = vsel %vm1860_vm4, %v1880_v49, %v1882_v48  ;;  %v1886_v7 = vrot.slane %v5098_v19, 2  ;;  %v5314_v37 = vsel %vm1860_vm4, %v1882_v48, %v1884_v22 }
  0x73   : > { %v1890_v47 = vrot.slane %v5139_v24, 2 }
  0x74   : > { %4019 = vmatmul.mubr.msk.bf16.gmra.mrb[28].mxu1 %vm504_vm3, %v483_v12  ;;  %v1050_v12 = vsel %vm559_vm0, %v5027_v56, 0  ;;  %v2432_v56 = vor.u32 %v2431_v30, %v2430_v15  ;;  %v5321_v6 = vsel %vm1860_vm4, %v1884_v22, %v1886_v7  ;;  %v5357_v15 = vcombine.low %v5163_v60, %v5163_v60 }
  0x75   : > { %4022 = vmatprep.mubr.msk.bf16.mxu1 %vm504_vm3, %v491_v35  ;;  %v2422_v35 = vrot.slane %v4946_v58, 2  ;;  %v5261_v58 = vld [vmem:[%s5961_s1 + $0x4] ss:$0 sps:$4 sm:$0xcc]   ;;  %v6022_v60 = vrot.slane %v5134_v28, 2  ;;  %v959_v28 = vrot.slane %v4860_v5, 1 }
  0x76   : > { %4189 = vmatmul.mubr.msk.bf16.gmra.mrb[8].mxu0 %vm504_vm3, %v5223_v59  ;;  %v1279_v4 = vrot.slane %v5261_v58, 2  ;;  %v5296_v20 = vsel %vm2406_vm5, %v2428_v16, %v2432_v56 }
  0x77   : > { %4192 = vmatprep.mubr.msk.bf16.mxu0 %vm504_vm3, %v5230_v1 }
  0x7c   : > { %4023 = vmatmul.mubr.msk.bf16.gmra.mrb[32].mxu1 %vm504_vm3, %v5111_v51  ;;  %v2424_v51 = vor.u32 %v2423_v10, %v2422_v35  ;;  %v2438_v35 = vrot.slane %v5011_v46, 2  ;;  %v2439_v10 = vrot.slane %v5008_v44, 3  ;;  %v1888_v46 = vrot.slane %v5108_v42, 2 }
  0x7d   : > { %4028 = vmatprep.mubr.msk.bf16.mxu1 %vm504_vm3, %v4857_v3 }
  0x7e   : > { %4193 = vmatmul.mubr.msk.bf16.gmra.mrb[12].mxu0 %vm504_vm3, %v5248_v32  ;;  %v5266_v57 = vsel %vm2406_vm5, %v2420_v52, %v2424_v51  ;;  %v5282_v11 = vsel %vm2406_vm5, %v2424_v51, %v2428_v16  ;;  %v2436_v52 = vor.u32 %v2435_v43, %v2434_v25  ;;  %v5318_v38 = vor.u32 %v2439_v10, %v2438_v35  ;;  %v5488_v35 = vld [vmem:[%s4839_s9 + $0xa0] ss:$0 sps:$4 sm:$0x77]  }
  0x7f   : > { %4196 = vmatprep.mubr.msk.bf16.mxu0 %vm504_vm3, %v5256_v45  ;;  %v5336_v49 = vsel %vm1860_vm4, %v1886_v7, %v1888_v46  ;;  %v5341_v48 = vsel %vm1860_vm4, %v1888_v46, %v1890_v47  ;;  %v2551_v43 = vsel %vm559_vm0, %v6022_v60, 0  ;;  %v979_v10 = vrot.slane %v5022_v55, 1 }
  0x80   : > { %v5311_v51 = vsel %vm2406_vm5, %v2432_v56, %v2436_v52  ;;  %v5325_v44 = vsel %vm2406_vm5, %v2436_v52, %v5318_v38  ;;  %v1896_v56 = vrot.slane %v5357_v15, 2  ;;  %v977_v52 = vrot.slane %v4990_v26, 1 }
  0x82   : > { %v1897_v25 = vsel %vm1860_vm4, %v5185_v2, %v1896_v56  ;;  %v5500_v46 = vsel %vm957_vm6, %v977_v52, %v979_v10 }
  0x84   : > { %4029 = vmatmul.mubr.msk.bf16.vlgmr.msra.gmra.mrb[0].mxu1 %vm504_vm3, %v4860_v5 }
  0x85   : > { %4032 = vmatprep.mubr.msk.bf16.mxu1 %vm504_vm3, %v4865_v8  ;;  %4065 = vmatpush3.bf16.msra.mxu1 %v1050_v12  ;;  %v1892_v12 = vrot.slane %v5046_v18, 2 }
  0x86   : > { %4623 = vmatprep.subr.msk.bf16.mxu1 %vm559_vm0, %v1279_v4  ;;  %4197 = vmatmul.mubr.msk.bf16.gmra.mrb[16].mxu0 %vm504_vm3, %v5285_v13 }
  0x87   : > { %4200 = vmatprep.mubr.msk.bf16.mxu0 %vm504_vm3, %v5290_v40  ;;  %v5351_v16 = vsel %vm1860_vm4, %v1890_v47, %v1892_v12  ;;  %v5361_v30 = vsel %vm1860_vm4, %v1892_v12, %v5185_v2  ;;  %v5387_v2 = vld [vmem:[%s5961_s1 + $0x10] sm:$0x3]  ;;  %v6023_v47 = vrot.slane %v5174_v29, 2 }
  0x88   : > { %v2860_v56 = vsel %vm559_vm0, %v5387_v2, 0 }
  0x8c   : > { %4033 = vmatmul.mubr.msk.bf16.gmra.mrb[4].mxu1 %vm504_vm3, %v4868_v9 }
  0x8d   : > { %4036 = vmatprep.mubr.msk.bf16.mxu1 %vm504_vm3, %v4893_v27 }
  0x8e   : > { %4201 = vmatmul.mubr.msk.bf16.gmra.mrb[20].mxu0 %vm504_vm3, %v5314_v37 }
  0x8f   : > { %4204 = vmatprep.mubr.msk.bf16.mxu0 %vm504_vm3, %v5321_v6 }
  0x94   : > { %4037 = vmatmul.mubr.msk.bf16.gmra.mrb[8].mxu1 %vm504_vm3, %v4905_v36 }
  0x95   : > { %4040 = vmatprep.mubr.msk.bf16.mxu1 %vm504_vm3, %v4915_v41 }
  0x96   : > { %4205 = vmatmul.mubr.msk.bf16.gmra.mrb[24].mxu0 %vm504_vm3, %v5336_v49 }
  0x97   : > { %4208 = vmatprep.mubr.msk.bf16.mxu0 %vm504_vm3, %v5341_v48 }
  0x9c   : > { %4041 = vmatmul.mubr.msk.bf16.gmra.mrb[12].mxu1 %vm504_vm3, %v4931_v50 }
  0x9d   : > { %4044 = vmatprep.mubr.msk.bf16.mxu1 %vm504_vm3, %v4952_v62 }
  0x9e   : > { %4209 = vmatmul.mubr.msk.bf16.gmra.mrb[28].mxu0 %vm504_vm3, %v5351_v16 }
  0x9f   : > { %4212 = vmatprep.mubr.msk.bf16.mxu0 %vm504_vm3, %v5361_v30 }
  0xa4   : > { %4045 = vmatmul.mubr.msk.bf16.gmra.mrb[16].mxu1 %vm504_vm3, %v4978_v21 }
  0xa5   : > { %4048 = vmatprep.mubr.msk.bf16.mxu1 %vm504_vm3, %v4990_v26 }
  0xa6   : > { %4213 = vmatmul.mubr.msk.bf16.gmra.mrb[32].mxu0 %vm504_vm3, %v1897_v25  ;;  %v987_v25 = vrot.slane %v5108_v42, 1 }
  0xa7   : > { %4218 = vmatprep.mubr.msk.bf16.mxu0 %vm504_vm3, %v5143_v31  ;;  %v961_v31 = vrot.slane %v4865_v8, 1  ;;  %v965_v8 = vrot.slane %v4893_v27, 1 }
  0xa9   : > { %v5424_v5 = vsel %vm957_vm6, %v959_v28, %v961_v31 }
  0xac   : > { %4049 = vmatmul.mubr.msk.bf16.gmra.mrb[20].mxu1 %vm504_vm3, %v5022_v55 }
  0xad   : > { %4052 = vmatprep.mubr.msk.bf16.mxu1 %vm504_vm3, %v5052_v23 }
  0xae   : > { %4219 = vmatmul.mubr.msk.bf16.vlgmr.msra.gmra.mrb[0].mxu0 %vm504_vm3, %v5150_v63  ;;  %v958_v63 = vrot.slane %v4857_v3, 1  ;;  %v963_v3 = vrot.slane %v4868_v9, 1  ;;  %v967_v9 = vrot.slane %v4905_v36, 1 }
  0xaf   : > { %4255 = vmatpush3.bf16.msra.mxu0 %v2551_v43  ;;  %4222 = vmatprep.mubr.msk.bf16.mxu0 %vm504_vm3, %v5191_v33  ;;  %v989_v43 = vrot.slane %v5139_v24, 1 }
  0xb0   : > { %4629 = vmatprep.subr.msk.bf16.mxu0 %vm559_vm0, %v5387_v2  ;;  %v5427_v33 = vsel %vm957_vm6, %v961_v31, %v963_v3  ;;  %v6026_v31 = vld [vmem:[#allocation6_spill] sm:$0xff] }
  0xb4   : > { %4053 = vmatmul.mubr.msk.bf16.gmra.mrb[24].mxu1 %vm504_vm3, %v5062_v34 }
  0xb5   : > { %4056 = vmatprep.mubr.msk.bf16.mxu1 %vm504_vm3, %v5098_v19 }
  0xb6   : > { %4223 = vmatmul.mubr.msk.bf16.gmra.mrb[4].mxu0 %vm504_vm3, %v5202_v61  ;;  %v960_v61 = vsel %vm957_vm6, %v958_v63, %v959_v28  ;;  %v6024_v63 = vld [vmem:[#allocation10_spill] sm:$0xff] }
  0xb7   : > { %4226 = vmatprep.mubr.msk.bf16.mxu0 %vm504_vm3, %v5223_v59  ;;  %v1287_v59 = vsel %vm559_vm0, %v1279_v4, 0  ;;  %v993_v28 = vrot.slane %v6024_v63, 1 }
  0xbc   : > { %4057 = vmatmul.mubr.msk.bf16.gmra.mrb[28].mxu1 %vm504_vm3, %v5108_v42 }
  0xbd   : > { %4060 = vmatprep.mubr.msk.bf16.mxu1 %vm504_vm3, %v5139_v24 }
  0xbe   : > { %4227 = vmatmul.mubr.msk.bf16.gmra.mrb[8].mxu0 %vm504_vm3, %v5230_v1  ;;  %v5445_v1 = vsel %vm957_vm6, %v963_v3, %v965_v8  ;;  %v2443_v3 = vrot.slane %v6026_v31, 3 }
  0xbf   : > { %4230 = vmatprep.mubr.msk.bf16.mxu0 %vm504_vm3, %v5248_v32  ;;  %v5448_v32 = vsel %vm957_vm6, %v965_v8, %v967_v9  ;;  %v6027_v8 = vld [vmem:[#allocation12_spill] sm:$0xff] }
  0xc4   : > { %4061 = vmatmul.mubr.msk.bf16.gmra.mrb[32].mxu1 %vm504_vm3, %v5046_v18 }
  0xc5   : > { %4066 = vmatprep.mubr.msk.bf16.mxu1 %vm504_vm3, %v960_v61  ;;  %v6025_v61 = vld [vmem:[#allocation7_spill] sm:$0xff] }
  0xc6   : > { %4231 = vmatmul.mubr.msk.bf16.gmra.mrb[12].mxu0 %vm504_vm3, %v5256_v45  ;;  %v971_v45 = vrot.slane %v4931_v50, 1 }
  0xc7   : > { %4234 = vmatprep.mubr.msk.bf16.mxu0 %vm504_vm3, %v5285_v13  ;;  %v973_v13 = vrot.slane %v4952_v62, 1 }
  0xc9   : > { %v5477_v22 = vsel %vm957_vm6, %v971_v45, %v973_v13 }
  0xcc   : > { %4067 = vmatmul.mubr.msk.bf16.vlgmr.msra.gmra.mrb[0].mxu1 %vm504_vm3, %v5424_v5 }
  0xcd   : > { %4070 = vmatprep.mubr.msk.bf16.mxu1 %vm504_vm3, %v5427_v33  ;;  %4103 = vmatpush3.bf16.msra.mxu1 %v1287_v59 }
  0xce   : > { %4625 = vmatprep.subr.msk.bf16.mxu1 %vm559_vm0, %v4844_v0  ;;  %4235 = vmatmul.mubr.msk.bf16.gmra.mrb[16].mxu0 %vm504_vm3, %v5290_v40  ;;  %v969_v0 = vrot.slane %v4915_v41, 1  ;;  %v975_v40 = vrot.slane %v4978_v21, 1 }
  0xcf   : > { %4238 = vmatprep.mubr.msk.bf16.mxu0 %vm504_vm3, %v5314_v37 }
  0xd0   : > { %v5461_v58 = vsel %vm957_vm6, %v967_v9, %v969_v0  ;;  %v5464_v4 = vsel %vm957_vm6, %v969_v0, %v971_v45  ;;  %v5480_v7 = vsel %vm957_vm6, %v973_v13, %v975_v40  ;;  %v5496_v37 = vsel %vm957_vm6, %v975_v40, %v977_v52  ;;  %v6028_v0 = vld [vmem:[#allocation8_spill] sm:$0xff]  ;;  %v6030_v52 = vld [vmem:[#allocation13_spill] sm:$0xff] }
  0xd1   : > { %v2446_v9 = vrot.slane %v6027_v8, 2  ;;  %v2447_v45 = vrot.slane %v6028_v0, 3 }
  0xd4   : > { %4071 = vmatmul.mubr.msk.bf16.gmra.mrb[4].mxu1 %vm504_vm3, %v5445_v1 }
  0xd5   : > { %4074 = vmatprep.mubr.msk.bf16.mxu1 %vm504_vm3, %v5448_v32 }
  0xd6   : > { %4239 = vmatmul.mubr.msk.bf16.gmra.mrb[20].mxu0 %vm504_vm3, %v5321_v6  ;;  %v2181_v6 = vrot.slane %v5488_v35, 2 }
  0xd7   : > { %4242 = vmatprep.mubr.msk.bf16.mxu0 %vm504_vm3, %v5336_v49 }
  0xd8   : > { %v2182_v49 = vsel %vm1860_vm4, %v6023_v47, %v2181_v6  ;;  %v6032_v47 = vld [vmem:[#allocation16_spill] sm:$0xff] }
  0xdc   : > { %4075 = vmatmul.mubr.msk.bf16.gmra.mrb[8].mxu1 %vm504_vm3, %v5461_v58 }
  0xdd   : > { %4078 = vmatprep.mubr.msk.bf16.mxu1 %vm504_vm3, %v5464_v4 }
  0xde   : > { %4243 = vmatmul.mubr.msk.bf16.gmra.mrb[24].mxu0 %vm504_vm3, %v5341_v48  ;;  %v983_v48 = vrot.slane %v5062_v34, 1 }
  0xdf   : > { %4246 = vmatprep.mubr.msk.bf16.mxu0 %vm504_vm3, %v5351_v16 }
  0xe4   : > { %4079 = vmatmul.mubr.msk.bf16.gmra.mrb[12].mxu1 %vm504_vm3, %v5477_v22 }
  0xe5   : > { %4082 = vmatprep.mubr.msk.bf16.mxu1 %vm504_vm3, %v5480_v7 }
  0xe6   : > { %4247 = vmatmul.mubr.msk.bf16.gmra.mrb[28].mxu0 %vm504_vm3, %v5361_v30  ;;  %v985_v30 = vrot.slane %v5098_v19, 1 }
  0xe7   : > { %4250 = vmatprep.mubr.msk.bf16.mxu0 %vm504_vm3, %v5199_v54  ;;  %v981_v54 = vrot.slane %v5052_v23, 1 }
  0xe8   : > { %v5536_v60 = vsel %vm957_vm6, %v985_v30, %v987_v25 }
  0xe9   : > { %v5515_v12 = vsel %vm957_vm6, %v979_v10, %v981_v54  ;;  %v5518_v16 = vsel %vm957_vm6, %v981_v54, %v983_v48  ;;  %v2448_v10 = vor.u32 %v2447_v45, %v2446_v9  ;;  %v6033_v54 = vld [vmem:[#allocation14_spill] sm:$0xff]  ;;  %v2467_v9 = vrot.slane %v5066_v39, 3 }
  0xea   : > { %v6039_v45 = vld [vmem:[#allocation18_spill] sm:$0xff] }
  0xec   : > { %4083 = vmatmul.mubr.msk.bf16.gmra.mrb[16].mxu1 %vm504_vm3, %v5496_v37 }
  0xed   : > { %4086 = vmatprep.mubr.msk.bf16.mxu1 %vm504_vm3, %v5500_v46 }
  0xee   : > { %4251 = vmatmul.mubr.msk.bf16.gmra.mrb[32].mxu0 %vm504_vm3, %v2182_v49  ;;  %v2454_v49 = vrot.slane %v6032_v47, 2 }
  0xef   : > { %4256 = vmatprep.mubr.msk.bf16.mxu0 %vm504_vm3, %v5227_v17  ;;  %v5533_v17 = vsel %vm957_vm6, %v983_v48, %v985_v30  ;;  %v2455_v48 = vrot.slane %v6033_v54, 3  ;;  %v6034_v30 = vld [vmem:[#allocation20_spill] sm:$0xff] }
  0xf4   : > { %4087 = vmatmul.mubr.msk.bf16.gmra.mrb[20].mxu1 %vm504_vm3, %v5515_v12 }
  0xf5   : > { %4090 = vmatprep.mubr.msk.bf16.mxu1 %vm504_vm3, %v5518_v16 }
  0xf6   : > { %4257 = vmatmul.mubr.msk.bf16.vlgmr.msra.gmra.mrb[0].mxu0 %vm504_vm3, %v5233_v14  ;;  %v5544_v14 = vrot.slane %v5046_v18, 1 }
  0xf7   : > { %4293 = vmatpush3.bf16.msra.mxu0 %v2860_v56  ;;  %4260 = vmatprep.mubr.msk.bf16.mxu0 %vm504_vm3, %v5253_v53  ;;  %v5551_v53 = vsel %vm957_vm6, %v987_v25, %v989_v43  ;;  %v2458_v56 = vrot.slane %v6034_v30, 2  ;;  %v6035_v25 = vld [vmem:[#allocation17_spill] sm:$0xff] }
  0xf8   : > { %v5555_v2 = vsel %vm957_vm6, %v989_v43, %v5544_v14  ;;  %v2459_v43 = vrot.slane %v6035_v25, 3 }
  0xfa   : > { %v2460_v63 = vor.u32 %v2459_v43, %v2458_v56  ;;  %v2484_v56 = vshrl.u32 %v5488_v35, 16 }
  0xfc   : > { %4091 = vmatmul.mubr.msk.bf16.gmra.mrb[24].mxu1 %vm504_vm3, %v5533_v17 }
  0xfd   : > { %4094 = vmatprep.mubr.msk.bf16.mxu1 %vm504_vm3, %v5536_v60 }
  0xfe   : > { %4261 = vmatmul.mubr.msk.bf16.gmra.mrb[4].mxu0 %vm504_vm3, %v5266_v57  ;;  %v2442_v57 = vrot.slane %v6025_v61, 2 }
  0xff   : > { %4264 = vmatprep.mubr.msk.bf16.mxu0 %vm504_vm3, %v5282_v11  ;;  %v994_v11 = vsel %vm957_vm6, %v5544_v14, %v993_v28  ;;  %v6036_v28 = vld [vmem:[#allocation21_spill] sm:$0xff] }
 0x100   : > { %v2444_v59 = vor.u32 %v2443_v3, %v2442_v57  ;;  %v2462_v61 = vrot.slane %v6036_v28, 2  ;;  %v6037_v57 = vld [vmem:[#allocation19_spill] sm:$0xff] }
 0x101   : > { %v2463_v31 = vrot.slane %v6037_v57, 3 }
 0x102   : > { %v2445_v13 = vsel %vm2406_vm5, %v5318_v38, %v2444_v59  ;;  %v6031_v38 = vld [vmem:[#allocation5_spill] sm:$0xff] }
 0x104   : > { %4095 = vmatmul.mubr.msk.bf16.gmra.mrb[28].mxu1 %vm504_vm3, %v5551_v53 }
 0x105   : > { %4098 = vmatprep.mubr.msk.bf16.mxu1 %vm504_vm3, %v5555_v2 }
 0x106   : > { %4265 = vmatmul.mubr.msk.bf16.gmra.mrb[8].mxu0 %vm504_vm3, %v5296_v20  ;;  %v6029_v20 = vld [vmem:[#allocation15_spill] sm:$0xff] }
 0x107   : > { %4268 = vmatprep.mubr.msk.bf16.mxu0 %vm504_vm3, %v5311_v51  ;;  %v2450_v40 = vrot.slane %v6029_v20, 2  ;;  %v2451_v51 = vrot.slane %v6030_v52, 3 }
 0x109   : > { %v2452_v6 = vor.u32 %v2451_v51, %v2450_v40  ;;  %v1575_v40 = vshll.u32 %v6039_v45, 16  ;;  %v2475_v51 = vshrl.u32 %v5174_v29, 16 }
 0x10c   : > { %4099 = vmatmul.mubr.msk.bf16.gmra.mrb[32].mxu1 %vm504_vm3, %v994_v11  ;;  %v6038_v11 = vld [vmem:[#allocation11_spill] sm:$0xff] }
 0x10d   : > { %4104 = vmatprep.mubr.msk.bf16.mxu1 %vm504_vm3, %v5424_v5  ;;  %v2449_v5 = vsel %vm2406_vm5, %v2444_v59, %v2448_v10  ;;  %v2466_v59 = vrot.slane %v6038_v11, 2 }
 0x10e   : > { %4269 = vmatmul.mubr.msk.bf16.gmra.mrb[12].mxu0 %vm504_vm3, %v5325_v44  ;;  %v2453_v44 = vsel %vm2406_vm5, %v2448_v10, %v2452_v6  ;;  %v2478_v10 = vshll.u32 %v5174_v29, 16 }
 0x10f   : > { %4272 = vmatprep.mubr.msk.bf16.mxu0 %vm504_vm3, %v2445_v13  ;;  %v1572_v13 = vshrl.u32 %v6039_v45, 16 }
 0x114   : > { %4105 = vmatmul.mubr.msk.bf16.vlgmr.msra.gmra.mrb[0].mxu1 %vm504_vm3, %v5427_v33  ;;  %v2456_v33 = vor.u32 %v2455_v48, %v2454_v49  ;;  %v2477_v48 = vrot.slane %v2475_v51, 2  ;;  %v2773_v51 = vrot.slane %v4905_v36, 3 }
 0x115   : > { %4108 = vmatprep.mubr.msk.bf16.mxu1 %vm504_vm3, %v5445_v1  ;;  %4331 = vmatpush3.bf16.msra.mxu1 %v6031_v38  ;;  %v2471_v38 = vrot.slane %v1575_v40, 3 }
 0x116   : > { %4273 = vmatmul.mubr.msk.bf16.gmra.mrb[16].mxu0 %vm504_vm3, %v2449_v5  ;;  %v2457_v1 = vsel %vm2406_vm5, %v2452_v6, %v2456_v33  ;;  %v2461_v3 = vsel %vm2406_vm5, %v2456_v33, %v2460_v63  ;;  %v2470_v5 = vrot.slane %v1572_v13, 2 }
 0x117   : > { %4276 = vmatprep.mubr.msk.bf16.mxu0 %vm504_vm3, %v2453_v44  ;;  %v2480_v44 = vrot.slane %v2478_v10, 3  ;;  %v2775_v10 = vrot.slane %v4915_v41, 3  ;;  %v2779_v41 = vrot.slane %v4952_v62, 3 }
 0x119   : > { %v2481_v43 = vor.u32 %v2480_v44, %v2477_v48  ;;  %v2776_v36 = vsel %vm2767_vm7, %v2773_v51, %v2775_v10  ;;  %v2785_v44 = vrot.slane %v5022_v55, 3 }
 0x11c   : > { %4109 = vmatmul.mubr.msk.bf16.gmra.mrb[4].mxu1 %vm504_vm3, %v5448_v32  ;;  %v2464_v32 = vor.u32 %v2463_v31, %v2462_v61 }
 0x11d   : > { %4112 = vmatprep.mubr.msk.bf16.mxu1 %vm504_vm3, %v5461_v58  ;;  %v2468_v58 = vor.u32 %v2467_v9, %v2466_v59  ;;  %v4694_v9 = vld [vmem:[%s4839_s9 + $0x18] sm:$0xff]  }
 0x11e   : > { %4277 = vmatmul.mubr.msk.bf16.gmra.mrb[20].mxu0 %vm504_vm3, %v2457_v1  ;;  %v2465_v6 = vsel %vm2406_vm5, %v2460_v63, %v2464_v32  ;;  %v2486_v63 = vrot.slane %v2484_v56, 2  ;;  %v1556_v56 = vrot.slane %v6033_v54, 2  ;;  %v1560_v54 = vrot.slane %v6035_v25, 2 }
 0x11f   : > { %4280 = vmatprep.mubr.msk.bf16.mxu0 %vm504_vm3, %v2461_v3  ;;  %v2469_v49 = vsel %vm2406_vm5, %v2464_v32, %v2468_v58  ;;  %v4693_v3 = vld [vmem:[%s4839_s9 + $0x10] sm:$0xff]   ;;  %v2769_v32 = vrot.slane %v4694_v9, 3  ;;  %v2791_v25 = vrot.slane %v5098_v19, 3  ;;  %v2793_v9 = vrot.slane %v5108_v42, 3 }
 0x120   : > { %v2768_v59 = vrot.slane %v4693_v3, 3 }
 0x124   : > { %4113 = vmatmul.mubr.msk.bf16.gmra.mrb[8].mxu1 %vm504_vm3, %v5464_v4  ;;  %v2472_v4 = vor.u32 %v2471_v38, %v2470_v5  ;;  %v1548_v5 = vrot.slane %v6028_v0, 2  ;;  %v1274_v38 = vrot.slane %v5357_v15, 1  ;;  %v6040_v0 = vld [vmem:[#allocation9_spill] sm:$0xff] }
 0x125   : > { %4116 = vmatprep.mubr.msk.bf16.mxu1 %vm504_vm3, %v5477_v22  ;;  %v2487_v22 = vshll.u32 %v5488_v35, 16 }
 0x126   : > { %4281 = vmatmul.mubr.msk.bf16.gmra.mrb[24].mxu0 %vm504_vm3, %v2465_v6  ;;  %v2473_v33 = vsel %vm2406_vm5, %v2468_v58, %v2472_v4  ;;  %v2482_v61 = vsel %vm2406_vm5, %v2472_v4, %v2481_v43  ;;  %v2771_v58 = vrot.slane %v4893_v27, 3  ;;  %v2777_v27 = vrot.slane %v4931_v50, 3 }
 0x127   : > { %4284 = vmatprep.mubr.msk.bf16.mxu0 %vm504_vm3, %v2469_v49  ;;  %v2489_v1 = vrot.slane %v2487_v22, 3  ;;  %v1547_v6 = vrot.slane %v6027_v8, 1  ;;  %v1551_v8 = vrot.slane %v6029_v20, 1  ;;  %v1555_v4 = vrot.slane %v6032_v47, 1 }
 0x128   : > { %v1559_v47 = vrot.slane %v6034_v30, 1 }
 0x129   : > { %v2490_v31 = vor.u32 %v2489_v1, %v2486_v63  ;;  %v1549_v49 = vor.u32 %v1548_v5, %v1547_v6  ;;  %v2789_v63 = vrot.slane %v5062_v34, 3  ;;  %v1563_v1 = vrot.slane %v6036_v28, 1 }
 0x12a   : > { %v1561_v3 = vor.u32 %v1560_v54, %v1559_v47  ;;  %v1567_v28 = vrot.slane %v6038_v11, 1  ;;  %v1581_v11 = vshrl.u32 %v5357_v15, 16 }
 0x12b   : > { %v1550_v48 = vsel %vm1503_vm2, %v6040_v0, %v1549_v49 }
 0x12c   : > { %4117 = vmatmul.mubr.msk.bf16.gmra.mrb[12].mxu1 %vm504_vm3, %v5480_v7  ;;  %v2491_v7 = vsel %vm2406_vm5, %v2481_v43, %v2490_v31  ;;  %v1557_v43 = vor.u32 %v1556_v56, %v1555_v4 }
 0x12d   : > { %4120 = vmatprep.mubr.msk.bf16.mxu1 %vm504_vm3, %v5496_v37  ;;  %v2770_v37 = vsel %vm2767_vm7, %v2768_v59, %v2769_v32 }
 0x12e   : > { %4285 = vmatmul.mubr.msk.bf16.gmra.mrb[28].mxu0 %vm504_vm3, %v2473_v33  ;;  %v1562_v34 = vsel %vm1503_vm2, %v1557_v43, %v1561_v3 }
 0x12f   : > { %4288 = vmatprep.mubr.msk.bf16.mxu0 %vm504_vm3, %v2482_v61  ;;  %v1564_v61 = vrot.slane %v6037_v57, 2  ;;  %v1568_v57 = vrot.slane %v5066_v39, 2  ;;  %v1584_v39 = vshll.u32 %v5357_v15, 16 }
 0x131   : > { %v1565_v30 = vor.u32 %v1564_v61, %v1563_v1  ;;  %v1569_v19 = vor.u32 %v1568_v57, %v1567_v28 }
 0x133   : > { %v1566_v59 = vsel %vm1503_vm2, %v1561_v3, %v1565_v30 }
 0x134   : > { %4121 = vmatmul.mubr.msk.bf16.gmra.mrb[16].mxu1 %vm504_vm3, %v5500_v46  ;;  %v2772_v46 = vsel %vm2767_vm7, %v2769_v32, %v2771_v58  ;;  %v1574_v32 = vrot.slane %v1572_v13, 1  ;;  %v1570_v13 = vsel %vm1503_vm2, %v1565_v30, %v1569_v19 }
 0x135   : > { %4124 = vmatprep.mubr.msk.bf16.mxu1 %vm504_vm3, %v5515_v12  ;;  %v2774_v12 = vsel %vm2767_vm7, %v2771_v58, %v2773_v51  ;;  %v2794_v58 = vsel %vm2767_vm7, %v2791_v25, %v2793_v9  ;;  %v1583_v51 = vrot.slane %v1581_v11, 1 }
 0x136   : > { %4289 = vmatmul.mubr.msk.bf16.gmra.mrb[32].mxu0 %vm504_vm3, %v2491_v7  ;;  %v1577_v7 = vrot.slane %v1575_v40, 2  ;;  %v2795_v40 = vrot.slane %v5139_v24, 3 }
 0x137   : > { %4294 = vmatprep.mubr.msk.bf16.mxu0 %vm504_vm3, %v2770_v37  ;;  %v2792_v37 = vsel %vm2767_vm7, %v2789_v63, %v2791_v25 }
 0x138   : > { %v1578_v42 = vor.u32 %v1577_v7, %v1574_v32  ;;  %v2796_v15 = vsel %vm2767_vm7, %v2793_v9, %v2795_v40 }
 0x13c   : > { %4125 = vmatmul.mubr.msk.bf16.gmra.mrb[20].mxu1 %vm504_vm3, %v5518_v16  ;;  %v2778_v16 = vsel %vm2767_vm7, %v2775_v10, %v2777_v27  ;;  %v2797_v10 = vrot.slane %v5046_v18, 3 }
 0x13d   : > { %4128 = vmatprep.mubr.msk.bf16.mxu1 %vm504_vm3, %v5533_v17  ;;  %v1272_v17 = vrot.slane %v6039_v45, 1 }
 0x13e   : > { %4295 = vmatmul.mubr.msk.bf16.vlgmr.msra.gmra.mrb[0].mxu0 %vm504_vm3, %v2772_v46  ;;  %v1586_v46 = vrot.slane %v1584_v39, 2 }
 0x13f   : > { %4298 = vmatprep.mubr.msk.bf16.mxu0 %vm504_vm3, %v2774_v12  ;;  %v1273_v50 = vsel %vm957_vm6, %v5544_v14, %v1272_v17  ;;  %v2783_v14 = vrot.slane %v4990_v26, 3  ;;  %v1579_v12 = vsel %vm1503_vm2, %v1569_v19, %v1578_v42 }
 0x141   : > { %v2786_v20 = vsel %vm2767_vm7, %v2783_v14, %v2785_v44 }
 0x144   : > { %4129 = vmatmul.mubr.msk.bf16.gmra.mrb[24].mxu1 %vm504_vm3, %v5536_v60  ;;  %v2781_v60 = vrot.slane %v4978_v21, 3  ;;  %v1275_v21 = vsel %vm957_vm6, %v1272_v17, %v1274_v38  ;;  %v2801_v17 = vrot.slane %v5174_v29, 3 }
 0x145   : > { %4132 = vmatprep.mubr.msk.bf16.mxu1 %vm504_vm3, %v5551_v53  ;;  %v2780_v53 = vsel %vm2767_vm7, %v2777_v27, %v2779_v41  ;;  %v1587_v27 = vor.u32 %v1586_v46, %v1583_v51 }
 0x146   : > { %4299 = vmatmul.mubr.msk.bf16.gmra.mrb[4].mxu0 %vm504_vm3, %v2776_v36  ;;  %v2782_v62 = vsel %vm2767_vm7, %v2779_v41, %v2781_v60  ;;  %v2784_v22 = vsel %vm2767_vm7, %v2781_v60, %v2783_v14  ;;  %v2798_v36 = vsel %vm2767_vm7, %v2795_v40, %v2797_v10 }
 0x147   : > { %4302 = vmatprep.mubr.msk.bf16.mxu0 %vm504_vm3, %v2778_v16  ;;  %v1588_v24 = vsel %vm1503_vm2, %v1578_v42, %v1587_v27  ;;  %v2799_v16 = vrot.slane %v6039_v45, 3 }
 0x149   : > { %v2800_v18 = vsel %vm2767_vm7, %v2797_v10, %v2799_v16  ;;  %v2802_v41 = vsel %vm2767_vm7, %v2799_v16, %v2801_v17 }
 0x14c   : > { %4133 = vmatmul.mubr.msk.bf16.gmra.mrb[28].mxu1 %vm504_vm3, %v5555_v2  ;;  %v1552_v2 = vrot.slane %v6030_v52, 2  ;;  %v2787_v52 = vrot.slane %v5052_v23, 3 }
 0x14d   : > { %4136 = vmatprep.mubr.msk.bf16.mxu1 %vm504_vm3, %v1273_v50  ;;  %v2803_v50 = vrot.slane %v5488_v35, 3 }
 0x14e   : > { %4303 = vmatmul.mubr.msk.bf16.gmra.mrb[8].mxu0 %vm504_vm3, %v2780_v53  ;;  %v1553_v26 = vor.u32 %v1552_v2, %v1551_v8  ;;  %v2788_v31 = vsel %vm2767_vm7, %v2785_v44, %v2787_v52  ;;  %v2790_v23 = vsel %vm2767_vm7, %v2787_v52, %v2789_v63 }
 0x14f   : > { %4306 = vmatprep.mubr.msk.bf16.mxu0 %vm504_vm3, %v2782_v62  ;;  %v2804_v60 = vsel %vm2767_vm7, %v2801_v17, %v2803_v50 }
 0x150   : > { %v1554_v55 = vsel %vm1503_vm2, %v1549_v49, %v1553_v26  ;;  %v1558_v33 = vsel %vm1503_vm2, %v1553_v26, %v1557_v43  ;;  %v5770_v43 = vld [vmem:[#allocation2] ss:$0 sm:$0xff] }
 0x154   : > { %4137 = vmatmul.mubr.msk.bf16.gmra.mrb[32].mxu1 %vm504_vm3, %v1275_v21 }
 0x155   : > { %4162 = vmatprep.mubr.msk.bf16.mxu1 %vm504_vm3, %v1550_v48 }
 0x156   : > { %4307 = vmatmul.mubr.msk.bf16.gmra.mrb[12].mxu0 %vm504_vm3, %v2784_v22 }
 0x157   : > { %4310 = vmatprep.mubr.msk.bf16.mxu0 %vm504_vm3, %v2786_v20 }
 0x15c   : > { %4163 = vmatmul.mubr.msk.bf16.vlgmr.msra.gmra.mrb[20].mxu1 %vm504_vm3, %v1554_v55 }
 0x15d   : > { %4166 = vmatprep.mubr.msk.bf16.mxu1 %vm504_vm3, %v1558_v33 }
 0x15e   : > { %4311 = vmatmul.mubr.msk.bf16.gmra.mrb[16].mxu0 %vm504_vm3, %v2788_v31 }
 0x15f   : > { %4314 = vmatprep.mubr.msk.bf16.mxu0 %vm504_vm3, %v2790_v23 }
 0x164   : > { %4167 = vmatmul.mubr.msk.bf16.gmra.mrb[24].mxu1 %vm504_vm3, %v1562_v34 }
 0x165   : > { %4170 = vmatprep.mubr.msk.bf16.mxu1 %vm504_vm3, %v1566_v59 }
 0x166   : > { %4315 = vmatmul.mubr.msk.bf16.gmra.mrb[20].mxu0 %vm504_vm3, %v2792_v37 }
 0x167   : > { %4318 = vmatprep.mubr.msk.bf16.mxu0 %vm504_vm3, %v2794_v58 }
 0x16c   : > { %4171 = vmatmul.mubr.msk.bf16.gmra.mrb[28].mxu1 %vm504_vm3, %v1570_v13 }
 0x16d   : > { %4174 = vmatprep.mubr.msk.bf16.mxu1 %vm504_vm3, %v1579_v12 }
 0x16e   : > { %4319 = vmatmul.mubr.msk.bf16.gmra.mrb[24].mxu0 %vm504_vm3, %v2796_v15 }
 0x16f   : > { %4322 = vmatprep.mubr.msk.bf16.mxu0 %vm504_vm3, %v2798_v36 }
 0x174   : > { %4175 = vmatmul.mubr.msk.bf16.gmra.mrb[32].mxu1 %vm504_vm3, %v1588_v24 }
 0x176   : > { %4323 = vmatmul.mubr.msk.bf16.gmra.mrb[28].mxu0 %vm504_vm3, %v2800_v18 }
 0x177   : > { %4326 = vmatprep.mubr.msk.bf16.mxu0 %vm504_vm3, %v2802_v41 }
 0x17e   : > { %4327 = vmatmul.mubr.msk.bf16.gmra.mrb[32].mxu0 %vm504_vm3, %v2804_v60 }
 0x1e7   : > { %v4106_v6 = vpop.f32.mrb[0].mxu1 }
 0x1e8   : > { %v1323_v45 = vpop.f32.mrb[1].mxu1 }
 0x1e9   : > { %v4107_v5 = vpop.f32.mrb[2].mxu1 }
 0x1ea   : > { %v1326_v29 = vpop.f32.mrb[3].mxu1 }
 0x1ef   : > { %v4110_v53 = vpop.f32.mrb[4].mxu1 }
 0x1f0   : > { %v1339_v38 = vpop.f32.mrb[5].mxu1 }
 0x1f1   : > { %v4111_v62 = vpop.f32.mrb[6].mxu1 }
 0x1f2   : > { %v1342_v49 = vpop.f32.mrb[7].mxu1 }
 0x1f7   : > { %v5746_v21 = vpop.f32.mrb[8].mxu1 }
 0x1f8   : > { %v5748_v14 = vpop.f32.mrb[9].mxu1 }
 0x1f9   : > { %v5750_v8 = vpop.f32.mrb[10].mxu1 }
 0x1fa   : > { %v5752_v35 = vpop.f32.mrb[11].mxu1 }
 0x1ff   : > { %v5754_v2 = vpop.f32.mrb[12].mxu1 }
 0x200   : > { %v5756_v0 = vpop.f32.mrb[13].mxu1 }
 0x201   : > { %v5758_v48 = vpop.f32.mrb[14].mxu1 }
 0x202   : > { %v5760_v44 = vpop.f32.mrb[15].mxu1 }
 0x207   : > { %v5762_v4 = vpop.f32.mrb[16].mxu1 }
 0x208   : > { %v5764_v56 = vpop.f32.mrb[17].mxu1 }
 0x209   : > { %v5766_v22 = vpop.f32.mrb[18].mxu1 }
 0x20a   : > { %v5768_v26 = vpop.f32.mrb[19].mxu1 }
 0x211   : > { %v4296_v20 = vpop.f32.mrb[0].mxu0 }
 0x212   : > { %v4332_v55 = vadd.f32 %v4296_v20, %v4106_v6  ;;  %v2896_v52 = vpop.f32.mrb[1].mxu0 }
 0x213   : > { %v4333_v47 = vadd.f32 %v2896_v52, %v1323_v45  ;;  %v4297_v54 = vpop.f32.mrb[2].mxu0 }
 0x214   : > { %v3084_v33 = vadd.f32 %v4332_v55, %v5770_v43  ;;  %v4334_v63 = vadd.f32 %v4297_v54, %v4107_v5  ;;  %v2899_v1 = vpop.f32.mrb[3].mxu0 }
 0x215   : > { %v3082_v61 = vadd.f32 %v4333_v47, %v5770_v43  ;;  %v4335_v31 = vadd.f32 %v2899_v1, %v1326_v29 }
 0x216   : > { %v3783_v3 = vpack.c.bf16 %v3084_v33, %v3084_v33  ;;  %v3085_v23 = vadd.f32 %v4334_v63, %v5770_v43 }
 0x217   : > { %v3781_v30 = vpack.c.bf16 %v3082_v61, %v3082_v61  ;;  %v3083_v34 = vadd.f32 %v4335_v31, %v5770_v43 }
 0x218   : > { %v3784_v25 = vpack.c.bf16 %v3085_v23, %v3085_v23  ;;  %v3705_v9 = vrot.slane %v3783_v3, 9 }
 0x219   : > { %3144 = vst.msk [vmem:[%s5778_s8] sm:$0xf] %vm3143_vm8, %v3781_v30  ;;  %v3782_v57 = vpack.c.bf16 %v3083_v34, %v3083_v34  ;;  %v4300_v59 = vpop.f32.mrb[4].mxu0 }
 0x21a   : > { %v3159_v32 = vrot.slane %v3784_v25, 5  ;;  %v4336_v7 = vadd.f32 %v4300_v59, %v4110_v53  ;;  %v2912_v37 = vpop.f32.mrb[5].mxu0 }
 0x21b   : > { %3145 = vst.msk [vmem:[%s5778_s8 + $0x4] sm:$0xf] %vm3143_vm8, %v3782_v57  ;;  %v4337_v19 = vadd.f32 %v2912_v37, %v1339_v38  ;;  %v4301_v11 = vpop.f32.mrb[6].mxu0 }
 0x21c   : > { %v3160_v39 = vsel %vm5784_vm11, %v3705_v9, %v3159_v32  ;;  %v3088_v58 = vadd.f32 %v4336_v7, %v5770_v43  ;;  %v4338_v42 = vadd.f32 %v4301_v11, %v4111_v62  ;;  %v2915_v13 = vpop.f32.mrb[7].mxu0  ;;  %v3161_v36 = vrot.slane %v3159_v32, 4 }
 0x21d   : > { %3706 = vst.msk [vmem:[%s5778_s8 + $0x8] sm:$0xf] %vm3143_vm8, %v3160_v39  ;;  %v3086_v40 = vadd.f32 %v4337_v19, %v5770_v43  ;;  %v4339_v51 = vadd.f32 %v2915_v13, %v1342_v49 }
 0x21e   : > { %v3787_v46 = vpack.c.bf16 %v3088_v58, %v3088_v58  ;;  %v3089_v12 = vadd.f32 %v4338_v42, %v5770_v43 }
 0x21f   : > { %v3785_v10 = vpack.c.bf16 %v3086_v40, %v3086_v40  ;;  %v3087_v15 = vadd.f32 %v4339_v51, %v5770_v43 }
 0x220   : > { %v3788_v27 = vpack.c.bf16 %v3089_v12, %v3089_v12  ;;  %v3715_v41 = vrot.slane %v3787_v46, 11  ;;  %v3182_v49 = vrot.slane %v3787_v46, 6 }
 0x221   : > { %v3162_v24 = vrot.slane %v3785_v10, 5  ;;  %v3786_v17 = vpack.c.bf16 %v3087_v15, %v3087_v15  ;;  %v4304_v18 = vpop.f32.mrb[8].mxu0  ;;  %v3710_v29 = vrot.slane %v3785_v10, 10 }
 0x222   : > { %v3199_v50 = vrot.slane %v3788_v27, 7  ;;  %v4340_v6 = vadd.f32 %v4304_v18, %v5746_v21  ;;  %v2928_v45 = vpop.f32.mrb[9].mxu0 }
 0x223   : > { %v3163_v5 = vsel %vm5784_vm11, %v3161_v36, %v3162_v24  ;;  %v3179_v53 = vrot.slane %v3786_v17, 6  ;;  %v4341_v38 = vadd.f32 %v2928_v45, %v5748_v14  ;;  %v4305_v62 = vpop.f32.mrb[10].mxu0 }
 0x224   : > { %3707 = vst.msk [vmem:[%s5778_s8 + $0xc] sm:$0xf] %vm3143_vm8, %v3163_v5  ;;  %v3200_v20 = vsel %vm5798_vm15, %v3715_v41, %v3199_v50  ;;  %v3092_v21 = vadd.f32 %v4340_v6, %v5770_v43  ;;  %v4342_v55 = vadd.f32 %v4305_v62, %v5750_v8  ;;  %v2931_v52 = vpop.f32.mrb[11].mxu0  ;;  %v3201_v31 = vrot.slane %v3199_v50, 4 }
 0x225   : > { %3716 = vst.msk [vmem:[%s5778_s8 + $0x18] sm:$0xf] %vm3143_vm8, %v3200_v20  ;;  %v3180_v47 = vsel %vm5803_vm1, %v3710_v29, %v3179_v53  ;;  %v3181_v14 = vrot.slane %v3179_v53, 4  ;;  %v3090_v54 = vadd.f32 %v4341_v38, %v5770_v43  ;;  %v4343_v33 = vadd.f32 %v2931_v52, %v5752_v35 }
 0x226   : > { %3711 = vst.msk [vmem:[%s5778_s8 + $0x10] sm:$0xf] %vm3143_vm8, %v3180_v47  ;;  %v3791_v63 = vpack.c.bf16 %v3092_v21, %v3092_v21  ;;  %v3093_v23 = vadd.f32 %v4342_v55, %v5770_v43 }
 0x227   : > { %v3183_v1 = vsel %vm5803_vm1, %v3181_v14, %v3182_v49  ;;  %v3789_v8 = vpack.c.bf16 %v3090_v54, %v3090_v54  ;;  %v3091_v61 = vadd.f32 %v4343_v33, %v5770_v43 }
 0x228   : > { %3712 = vst.msk [vmem:[%s5778_s8 + $0x14] sm:$0xf] %vm3143_vm8, %v3183_v1  ;;  %3721 = vst.msk [vmem:[%s5778_s8 + $0x24] sm:$0xf] %vm3143_vm8, %v3791_v63  ;;  %v3792_v19 = vpack.c.bf16 %v3093_v23, %v3093_v23 }
 0x229   : > { %v3202_v3 = vrot.slane %v3789_v8, 7  ;;  %v3790_v35 = vpack.c.bf16 %v3091_v61, %v3091_v61  ;;  %v4308_v30 = vpop.f32.mrb[12].mxu0 }
 0x22a   : > { %v4344_v34 = vadd.f32 %v4308_v30, %v5754_v2  ;;  %v2944_v25 = vpop.f32.mrb[13].mxu0 }
 0x22b   : > { %v3203_v57 = vsel %vm5798_vm15, %v3201_v31, %v3202_v3  ;;  %3720 = vst.msk [vmem:[%s5778_s8 + $0x20] sm:$0xf] %vm3143_vm8, %v3790_v35  ;;  %v4345_v59 = vadd.f32 %v2944_v25, %v5756_v0  ;;  %v4309_v9 = vpop.f32.mrb[14].mxu0 }
 0x22c   : > { %3717 = vst.msk [vmem:[%s5778_s8 + $0x1c] sm:$0xf] %vm3143_vm8, %v3203_v57  ;;  %v3096_v32 = vadd.f32 %v4344_v34, %v5770_v43  ;;  %v4346_v7 = vadd.f32 %v4309_v9, %v5758_v48  ;;  %v2947_v37 = vpop.f32.mrb[15].mxu0  ;;  %v3725_v48 = vrot.slane %v3792_v19, 9 }
 0x22d   : > { %v3094_v11 = vadd.f32 %v4345_v59, %v5770_v43  ;;  %v4347_v2 = vadd.f32 %v2947_v37, %v5760_v44 }
 0x22e   : > { %v3795_v58 = vpack.c.bf16 %v3096_v32, %v3096_v32  ;;  %v3097_v42 = vadd.f32 %v4346_v7, %v5770_v43 }
 0x22f   : > { %v4164_v39 = vpop.f32.mrb[20].mxu1  ;;  %v3793_v40 = vpack.c.bf16 %v3094_v11, %v3094_v11  ;;  %v3095_v0 = vadd.f32 %v4347_v2, %v5770_v43 }
 0x230   : > { %v1760_v13 = vpop.f32.mrb[21].mxu1  ;;  %v3245_v46 = vrot.slane %v3795_v58, 6  ;;  %v3796_v12 = vpack.c.bf16 %v3097_v42, %v3097_v42 }
 0x231   : > { %v4165_v51 = vpop.f32.mrb[22].mxu1  ;;  %v3228_v15 = vrot.slane %v3793_v40, 5  ;;  %v3794_v27 = vpack.c.bf16 %v3095_v0, %v3095_v0  ;;  %v4312_v36 = vpop.f32.mrb[16].mxu0 }
 0x232   : > { %v1763_v10 = vpop.f32.mrb[23].mxu1  ;;  %v3247_v24 = vrot.slane %v3245_v46, 4  ;;  %v3248_v44 = vrot.slane %v3796_v12, 6  ;;  %v4348_v17 = vadd.f32 %v4312_v36, %v5762_v4  ;;  %v2960_v18 = vpop.f32.mrb[17].mxu0  ;;  %v3735_v61 = vrot.slane %v3796_v12, 11 }
 0x233   : > { %v3229_v41 = vsel %vm5784_vm11, %v3725_v48, %v3228_v15  ;;  %v3230_v50 = vrot.slane %v3228_v15, 4  ;;  %v3231_v6 = vrot.slane %v3794_v27, 5  ;;  %v3730_v45 = vrot.slane %v3794_v27, 10  ;;  %v4313_v5 = vpop.f32.mrb[18].mxu0 }
 0x234   : > { %3726 = vst.msk [vmem:[%s5778_s8 + $0x28] sm:$0xf] %vm3143_vm8, %v3229_v41  ;;  %v3249_v29 = vsel %vm5803_vm1, %v3247_v24, %v3248_v44  ;;  %v3100_v53 = vadd.f32 %v4348_v17, %v5770_v43  ;;  %v4349_v38 = vadd.f32 %v2960_v18, %v5764_v56  ;;  %v4350_v4 = vadd.f32 %v4313_v5, %v5766_v22  ;;  %v2963_v62 = vpop.f32.mrb[19].mxu0 }
 0x235   : > { %3732 = vst.msk [vmem:[%s5778_s8 + $0x34] sm:$0xf] %vm3143_vm8, %v3249_v29  ;;  %v3232_v49 = vsel %vm5784_vm11, %v3230_v50, %v3231_v6  ;;  %v3246_v20 = vsel %vm5803_vm1, %v3730_v45, %v3245_v46  ;;  %v4351_v21 = vadd.f32 %v2963_v62, %v5768_v26 }
 0x236   : > { %3727 = vst.msk [vmem:[%s5778_s8 + $0x2c] sm:$0xf] %vm3143_vm8, %v3232_v49  ;;  %3731 = vst.msk [vmem:[%s5778_s8 + $0x30] sm:$0xf] %vm3143_vm8, %v3246_v20  ;;  %v3799_v56 = vpack.c.bf16 %v3100_v53, %v3100_v53  ;;  %v3098_v22 = vadd.f32 %v4349_v38, %v5770_v43  ;;  %v3101_v52 = vadd.f32 %v4350_v4, %v5770_v43 }
 0x237   : > { %v4168_v55 = vpop.f32.mrb[24].mxu1  ;;  %v3099_v14 = vadd.f32 %v4351_v21, %v5770_v43 }
 0x238   : > { %v1776_v47 = vpop.f32.mrb[25].mxu1  ;;  %3740 = vst.msk [vmem:[%s5778_s8 + $0x40] sm:$0xf] %vm3143_vm8, %v3799_v56  ;;  %v3797_v33 = vpack.c.bf16 %v3098_v22, %v3098_v22  ;;  %v3800_v63 = vpack.c.bf16 %v3101_v52, %v3101_v52 }
 0x239   : > { %v4169_v54 = vpop.f32.mrb[26].mxu1  ;;  %v3798_v1 = vpack.c.bf16 %v3099_v14, %v3099_v14  ;;  %v4316_v8 = vpop.f32.mrb[20].mxu0 }
 0x23a   : > { %v1779_v26 = vpop.f32.mrb[27].mxu1  ;;  %v3262_v31 = vrot.slane %v3797_v33, 7  ;;  %3741 = vst.msk [vmem:[%s5778_s8 + $0x44] sm:$0xf] %vm3143_vm8, %v3800_v63  ;;  %v4352_v3 = vadd.f32 %v4316_v8, %v4164_v39  ;;  %v2976_v23 = vpop.f32.mrb[21].mxu0 }
 0x23b   : > { %v3265_v35 = vrot.slane %v3798_v1, 7  ;;  %v4353_v30 = vadd.f32 %v2976_v23, %v1760_v13  ;;  %v4317_v34 = vpop.f32.mrb[22].mxu0 }
 0x23c   : > { %v3263_v25 = vsel %vm5798_vm15, %v3735_v61, %v3262_v31  ;;  %v3264_v57 = vrot.slane %v3262_v31, 4  ;;  %v3104_v59 = vadd.f32 %v4352_v3, %v5770_v43  ;;  %v4354_v9 = vadd.f32 %v4317_v34, %v4165_v51  ;;  %v2979_v32 = vpop.f32.mrb[23].mxu0 }
 0x23d   : > { %3736 = vst.msk [vmem:[%s5778_s8 + $0x38] sm:$0xf] %vm3143_vm8, %v3263_v25  ;;  %v3102_v7 = vadd.f32 %v4353_v30, %v5770_v43  ;;  %v4355_v37 = vadd.f32 %v2979_v32, %v1763_v10 }
 0x23e   : > { %v3266_v11 = vsel %vm5798_vm15, %v3264_v57, %v3265_v35  ;;  %v3803_v2 = vpack.c.bf16 %v3104_v59, %v3104_v59  ;;  %v3105_v39 = vadd.f32 %v4354_v9, %v5770_v43 }
 0x23f   : > { %v4172_v19 = vpop.f32.mrb[28].mxu1  ;;  %3737 = vst.msk [vmem:[%s5778_s8 + $0x3c] sm:$0xf] %vm3143_vm8, %v3266_v11  ;;  %v3801_v42 = vpack.c.bf16 %v3102_v7, %v3102_v7  ;;  %v3103_v13 = vadd.f32 %v4355_v37, %v5770_v43 }
 0x240   : > { %v1792_v58 = vpop.f32.mrb[29].mxu1  ;;  %v3804_v0 = vpack.c.bf16 %v3105_v39, %v3105_v39  ;;  %v3750_v10 = vrot.slane %v3803_v2, 10  ;;  %v3295_v18 = vrot.slane %v3803_v2, 5 }
 0x241   : > { %v4173_v40 = vpop.f32.mrb[30].mxu1  ;;  %v3802_v46 = vpack.c.bf16 %v3103_v13, %v3103_v13  ;;  %v4320_v12 = vpop.f32.mrb[24].mxu0  ;;  %v3745_v36 = vrot.slane %v3801_v42, 9 }
 0x242   : > { %v1795_v51 = vpop.f32.mrb[31].mxu1  ;;  %v3309_v48 = vrot.slane %v3804_v0, 6  ;;  %v4356_v15 = vadd.f32 %v4320_v12, %v4168_v55  ;;  %v2992_v27 = vpop.f32.mrb[25].mxu0 }
 0x243   : > { %v3292_v24 = vrot.slane %v3802_v46, 5  ;;  %v4357_v44 = vadd.f32 %v2992_v27, %v1776_v47  ;;  %v4321_v17 = vpop.f32.mrb[26].mxu0 }
 0x244   : > { %v3310_v41 = vsel %vm5803_vm1, %v3750_v10, %v3309_v48  ;;  %v3108_v50 = vadd.f32 %v4356_v15, %v5770_v43  ;;  %v4358_v6 = vadd.f32 %v4321_v17, %v4169_v54  ;;  %v2995_v45 = vpop.f32.mrb[27].mxu0  ;;  %v3311_v14 = vrot.slane %v3309_v48, 4 }
 0x245   : > { %3751 = vst.msk [vmem:[%s5778_s8 + $0x50] sm:$0xf] %vm3143_vm8, %v3310_v41  ;;  %v3293_v5 = vsel %vm5784_vm11, %v3745_v36, %v3292_v24  ;;  %v3294_v29 = vrot.slane %v3292_v24, 4  ;;  %v3106_v53 = vadd.f32 %v4357_v44, %v5770_v43  ;;  %v4359_v38 = vadd.f32 %v2995_v45, %v1779_v26 }
 0x246   : > { %3746 = vst.msk [vmem:[%s5778_s8 + $0x48] sm:$0xf] %vm3143_vm8, %v3293_v5  ;;  %v3109_v62 = vadd.f32 %v4358_v6, %v5770_v43  ;;  %v3807_v22 = vpack.c.bf16 %v3108_v50, %v3108_v50 }
 0x247   : > { %v4176_v4 = vpop.f32.mrb[32].mxu1  ;;  %v3296_v20 = vsel %vm5784_vm11, %v3294_v29, %v3295_v18  ;;  %v3805_v21 = vpack.c.bf16 %v3106_v53, %v3106_v53  ;;  %v3107_v55 = vadd.f32 %v4359_v38, %v5770_v43 }
 0x248   : > { %v1808_v49 = vpop.f32.mrb[33].mxu1  ;;  %3747 = vst.msk [vmem:[%s5778_s8 + $0x4c] sm:$0xf] %vm3143_vm8, %v3296_v20  ;;  %v3808_v52 = vpack.c.bf16 %v3109_v62, %v3109_v62  ;;  %v3329_v35 = vrot.slane %v3807_v22, 7 }
 0x249   : > { %v4177_v56 = vpop.f32.mrb[34].mxu1  ;;  %v3312_v54 = vrot.slane %v3805_v21, 6  ;;  %v3806_v33 = vpack.c.bf16 %v3107_v55, %v3107_v55  ;;  %v4324_v63 = vpop.f32.mrb[28].mxu0  ;;  %v3755_v61 = vrot.slane %v3805_v21, 11 }
 0x24a   : > { %v1811_v47 = vpop.f32.mrb[35].mxu1  ;;  %3760 = vst.msk [vmem:[%s5778_s8 + $0x60] sm:$0xf] %vm3143_vm8, %v3808_v52  ;;  %v4360_v26 = vadd.f32 %v4324_v63, %v4172_v19  ;;  %v3008_v1 = vpop.f32.mrb[29].mxu0 }
 0x24b   : > { %v3313_v8 = vsel %vm5803_vm1, %v3311_v14, %v3312_v54  ;;  %v3326_v31 = vrot.slane %v3806_v33, 7  ;;  %v4361_v3 = vadd.f32 %v3008_v1, %v1792_v58  ;;  %v4325_v23 = vpop.f32.mrb[30].mxu0 }
 0x24c   : > { %3752 = vst.msk [vmem:[%s5778_s8 + $0x54] sm:$0xf] %vm3143_vm8, %v3313_v8  ;;  %v3112_v30 = vadd.f32 %v4360_v26, %v5770_v43  ;;  %v4362_v34 = vadd.f32 %v4325_v23, %v4173_v40  ;;  %v3011_v25 = vpop.f32.mrb[31].mxu0 }
 0x24d   : > { %v3327_v57 = vsel %vm5798_vm15, %v3755_v61, %v3326_v31  ;;  %v3328_v59 = vrot.slane %v3326_v31, 4  ;;  %v3110_v9 = vadd.f32 %v4361_v3, %v5770_v43  ;;  %v4363_v32 = vadd.f32 %v3011_v25, %v1795_v51 }
 0x24e   : > { %3756 = vst.msk [vmem:[%s5778_s8 + $0x58] sm:$0xf] %vm3143_vm8, %v3327_v57  ;;  %v3811_v7 = vpack.c.bf16 %v3112_v30, %v3112_v30  ;;  %v3113_v37 = vadd.f32 %v4362_v34, %v5770_v43 }
 0x24f   : > { %v3330_v19 = vsel %vm5798_vm15, %v3328_v59, %v3329_v35  ;;  %v3809_v11 = vpack.c.bf16 %v3110_v9, %v3110_v9  ;;  %v3111_v2 = vadd.f32 %v4363_v32, %v5770_v43 }
 0x250   : > { %3757 = vst.msk [vmem:[%s5778_s8 + $0x5c] sm:$0xf] %vm3143_vm8, %v3330_v19  ;;  %v3355_v39 = vrot.slane %v3811_v7, 5  ;;  %v3812_v58 = vpack.c.bf16 %v3113_v37, %v3113_v37 }
 0x251   : > { %3761 = vst.msk [vmem:[%s5778_s8 + $0x64] sm:$0xf] %vm3143_vm8, %v3809_v11  ;;  %v3810_v42 = vpack.c.bf16 %v3111_v2, %v3111_v2  ;;  %v4328_v13 = vpop.f32.mrb[32].mxu0 }
 0x252   : > { %v3357_v40 = vrot.slane %v3355_v39, 4  ;;  %v3358_v0 = vrot.slane %v3812_v58, 5  ;;  %v4364_v51 = vadd.f32 %v4328_v13, %v4176_v4  ;;  %v3024_v46 = vpop.f32.mrb[33].mxu0  ;;  %v3770_v53 = vrot.slane %v3812_v58, 10 }
 0x253   : > { %v3765_v12 = vrot.slane %v3810_v42, 9  ;;  %v4365_v10 = vadd.f32 %v3024_v46, %v1808_v49  ;;  %v4329_v48 = vpop.f32.mrb[34].mxu0 }
 0x254   : > { %v3359_v15 = vsel %vm5784_vm11, %v3357_v40, %v3358_v0  ;;  %v3116_v27 = vadd.f32 %v4364_v51, %v5770_v43  ;;  %v4366_v36 = vadd.f32 %v4329_v48, %v4177_v56  ;;  %v3027_v24 = vpop.f32.mrb[35].mxu0 }
 0x255   : > { %3767 = vst.msk [vmem:[%s5778_s8 + $0x6c] sm:$0xf] %vm3143_vm8, %v3359_v15  ;;  %v3356_v44 = vsel %vm5784_vm11, %v3765_v12, %v3355_v39  ;;  %v3114_v17 = vadd.f32 %v4365_v10, %v5770_v43  ;;  %v4367_v18 = vadd.f32 %v3027_v24, %v1811_v47 }
 0x256   : > { %3766 = vst.msk [vmem:[%s5778_s8 + $0x68] sm:$0xf] %vm3143_vm8, %v3356_v44  ;;  %v3815_v41 = vpack.c.bf16 %v3116_v27, %v3116_v27  ;;  %v3117_v50 = vadd.f32 %v4366_v36, %v5770_v43 }
 0x257   : > { %v3813_v6 = vpack.c.bf16 %v3114_v17, %v3114_v17  ;;  %v3115_v45 = vadd.f32 %v4367_v18, %v5770_v43 }
 0x258   : > { %v3389_v5 = vrot.slane %v3815_v41, 7  ;;  %v3816_v29 = vpack.c.bf16 %v3117_v50, %v3117_v50 }
 0x259   : > { %v3372_v28 = vrot.slane %v3813_v6, 6  ;;  %v3814_v38 = vpack.c.bf16 %v3115_v45, %v3115_v45 }
 0x25a   : > { %v3391_v4 = vrot.slane %v3389_v5, 4  ;;  %v3392_v62 = vrot.slane %v3816_v29, 7 }
 0x25b   : > { %v3373_v49 = vsel %vm5803_vm1, %v3770_v53, %v3372_v28  ;;  %v3374_v20 = vrot.slane %v3372_v28, 4  ;;  %v3375_v21 = vrot.slane %v3814_v38, 6  ;;  %v3775_v55 = vrot.slane %v3814_v38, 11 }
 0x25c   : > { %3771 = vst.msk [vmem:[%s5778_s8 + $0x70] sm:$0xf] %vm3143_vm8, %v3373_v49  ;;  %v3393_v43 = vsel %vm5798_vm15, %v3391_v4, %v3392_v62 }
 0x25d   : > { %3777 = vst.msk [vmem:[%s5778_s8 + $0x7c] sm:$0xf] %vm3143_vm8, %v3393_v43  ;;  %v3376_v56 = vsel %vm5803_vm1, %v3374_v20, %v3375_v21  ;;  %v3390_v22 = vsel %vm5798_vm15, %v3775_v55, %v3389_v5 }
 0x25e   : > { %3772 = vst.msk [vmem:[%s5778_s8 + $0x74] sm:$0xf] %vm3143_vm8, %v3376_v56  ;;  %3776 = vst.msk [vmem:[%s5778_s8 + $0x78] sm:$0xf] %vm3143_vm8, %v3390_v22 }
 0x25f PF: > { %s14_s14 = sadd.s32 1, %s4749_s14   ;;  %s6047_s12 = smov %s4745_s13 }
 0x260   : > { %p11_p3 = scmp.ge.s32.totalorder %s14_s14, 4   ;;  %s6048_s13 = smov %s6050_s16 }
 0x262   :  { %13 = sbr.rel (!%p11_p3) target bundleno = 2 (0x2), region = 83 }
 0x269   :  { %3431 = vsyncpa [#allocation3], 1 }
 0x26a   :  { %3433 = vsyncpa [#allocation3 + $0x1], 1 }

// kernel: bottom_decoder_forward.6
= control target key start
LH: loop header
LB: loop body
LE: loop exit
PB: predicated region body
PF: predicated region fallthrough
CT: control target
= control target key end

     0   :  { %10 = vsyncpa [#allocation3], 0  ;;  %s4833_s0 = inlined_call_operand.vmem [shape: bf16[2,342,32], index: 0, kind: input, shape index: {}]   ;;  %s4834_s1 = inlined_call_operand.vmem [shape: bf16[288,8], index: 1, kind: input, shape index: {}]   ;;  %s4835_s2 = inlined_call_operand.hbm [shape: f32[1,8], index: 2, kind: input, shape index: {}]   ;;  %s4836_s3 = inlined_call_operand.hbm [shape: bf16[8,32], index: 3, kind: input, shape index: {}]   ;;  %s4837_s4 = inlined_call_operand.hbm [shape: f32[1,32], index: 4, kind: input, shape index: {}]   ;;  %s4838_s5 = inlined_call_operand.vmem [shape: bf16[2,16,16,32], index: 5, kind: output, shape index: {}]  }
   0x1   :  { %11 = vsyncpa [#allocation5], 0  ;;  %s3675_s18 = smov 0   ;;  %s3677_s19 = smov 0  }
   0x2   :  { %s3679_s20 = smov 0  }
   0x3 LB: > { %s3639_s21 = smov [#allocation4]   ;;  %s2817_s23 = sadd.s32 4294967295, %s3637_s20   ;;  %s3637_s20 = sphi %s3679_s20, %s17_s20   ;;  %s3633_s19 = sphi %s3677_s19, %s4857_s19   ;;  %s3629_s18 = sphi %s3675_s18, %s4856_s18  }
   0x4   : > { %s199_s22 = sshll.u32 %s3639_s21, 4  ;;  %p2819_p0 = scmp.ge.s32.totalorder %s3637_s20, 1  ;;  %s200_s22 = int_to_ptr.vmem [resolvable:$true] %s199_s22 }
   0x5   : > { %p172_p1 = scmp.lt.s32.totalorder %s3637_s20, 3  ;;  %p3693_p2 = scmp.eq.s32.totalorder %s2817_s23, 0 }
   0x6   : > { %s29_s26 = sadd.s32 1, %s3633_s19  ;;  %s3640_s29 = smov [#allocation2]  }
   0x7   : > { %s4842_s24 = scalar_select %p3693_p2, 1, 0 }
   0x8   : > { %p3697_p3 = pnand %p2819_p0, %p172_p1  ;;  %p3710_p6 = scmp.ge.s32.totalorder %s29_s26, 2 }
   0x9   : > { %s188_s30 = sshll.u32 %s3640_s29, 4  ;;  %s3523_s8 = scalar_lea.hbm %s4836_s3, 64  ;;  %s3714_s30 = int_to_ptr.vmem [resolvable:$true] %s188_s30 }
   0xa   : > { %s4843_s25 = scalar_select %p3697_p3, 1, 0 }
   0xb   : > { %p3422_p4 = pneg %p3697_p3  ;;  %p3524_p7 = scmp.ne.s32.totalorder %s4836_s3, %s3523_s8 }
   0xc   : > { %s4845_s28 = scalar_select %p3710_p6, 1, 0 }
   0xd   : > { %p3706_p5 = pnand %p3693_p2, %p3422_p4  ;;  %p3530_p11 = scmp.lt.u32.totalorder %s3523_s8, %s4836_s3 }
   0xf   : > { %p3724_p8 = pneg %p3706_p5 }
  0x11   : > { %p3526_p9 = pnand %p3724_p8, %p3524_p7 }
  0x13   : > { %p3527_p10 = pneg %p3526_p9 }
  0x15   : > { %p3532_p12 = pnand %p3530_p11, %p3527_p10 }
  0x17   : > { %3535 = shalt.err (!%p3532_p12)
}
  0x18   : > { %s3536_s14 = scalar_lea.vmem %s200_s22, 64  ;;  %p3544_p4 = scmp.lt.s32.totalorder %s200_s22, %s200_s22 }
  0x19   : > { %p3537_p13 = scmp.ne.s32.totalorder %s200_s22, %s3536_s14  ;;  %p3545_p2 = scmp.lt.s32.totalorder %s3536_s14, %s3536_s14 }
  0x1b   : > { %p3539_p0 = pnand %p3537_p13, %p3724_p8  ;;  %p3546_p3 = por %p3545_p2, %p3544_p4 }
  0x1d   : > { %p3540_p1 = pneg %p3539_p0 }
  0x1f   : > { %p3547_p6 = pnand %p3546_p3, %p3540_p1 }
  0x21   : > { %3550 = shalt.err (!%p3547_p6)
}
  0x22   : > { %3428 = dma.hbm_to_vmem [thread:$0]  (!%p3706_p5), %s4836_s3, 64, %s200_s22, [#allocation5]  }
  0x23   : > { %p4847_p7 = scmp.ne.s32.totalorder %s4845_s28, 0  ;;  %s3551_s23 = scalar_lea.hbm %s4835_s2, 16 }
  0x24   : > { %p3552_p2 = scmp.ne.s32.totalorder %s4835_s2, %s3551_s23  ;;  %p3558_p9 = scmp.lt.u32.totalorder %s3551_s23, %s4835_s2 }
  0x25   : > { %s4859_s26 = smov (%p4847_p7, %s29_s26), 0 }
  0x26   : > { %p3554_p3 = pnand %p3552_p2, %p3724_p8 }
  0x28   : > { %p3555_p6 = pneg %p3554_p3 }
  0x2a   : > { %p3560_p10 = pnand %p3558_p9, %p3555_p6 }
  0x2c   : > { %3563 = shalt.err (!%p3560_p10)
}
  0x2d   : > { %s3564_s22 = scalar_lea.vmem %s3714_s30, 16  ;;  %s3571_s28 = scalar_lea.vmem %s3714_s30, 32 }
  0x2e   : > { %p3565_p11 = scmp.ne.s32.totalorder %s3714_s30, %s3564_s22  ;;  %p3572_p0 = scmp.lt.s32.totalorder %s3714_s30, %s3714_s30 }
  0x2f   : > { %p3573_p1 = scmp.lt.s32.totalorder %s3571_s28, %s3564_s22 }
  0x30   : > { %p3567_p12 = pnand %p3565_p11, %p3724_p8 }
  0x31   : > { %p3574_p4 = por %p3573_p1, %p3572_p0 }
  0x32   : > { %p3568_p13 = pneg %p3567_p12 }
  0x34   : > { %p3575_p7 = pnand %p3574_p4, %p3568_p13 }
  0x36   : > { %3578 = shalt.err (!%p3575_p7)
}
  0x37   : > { %3425 = dma.hbm_to_vmem [thread:$0]  (!%p3706_p5), %s4835_s2, 16, %s3714_s30, [#allocation3]  }
  0x38   : > { %s3641_s12 = smov [#allocation6]   ;;  %s3579_s16 = scalar_lea.hbm %s4837_s4, 16 }
  0x39   : > { %s210_s13 = sshll.u32 %s3641_s12, 4  ;;  %p3580_p2 = scmp.ne.s32.totalorder %s4837_s4, %s3579_s16  ;;  %s211_s13 = int_to_ptr.vmem [resolvable:$true] %s210_s13 }
  0x3a   : > { %p3586_p9 = scmp.lt.u32.totalorder %s3579_s16, %s4837_s4 }
  0x3b   : > { %p3582_p3 = pnand %p3580_p2, %p3724_p8 }
  0x3d   : > { %p3583_p6 = pneg %p3582_p3 }
  0x3f   : > { %p3588_p10 = pnand %p3586_p9, %p3583_p6 }
  0x41   : > { %3591 = shalt.err (!%p3588_p10)
}
  0x42   : > { %s3592_s30 = scalar_lea.vmem %s211_s13, 16  ;;  %s3599_s6 = scalar_lea.vmem %s211_s13, 32 }
  0x43   : > { %p3593_p11 = scmp.ne.s32.totalorder %s211_s13, %s3592_s30  ;;  %p3600_p0 = scmp.lt.s32.totalorder %s211_s13, %s211_s13 }
  0x44   : > { %p3601_p1 = scmp.lt.s32.totalorder %s3599_s6, %s3592_s30 }
  0x45   : > { %p3595_p12 = pnand %p3593_p11, %p3724_p8 }
  0x46   : > { %p3602_p4 = por %p3601_p1, %p3600_p0 }
  0x47   : > { %p3596_p13 = pneg %p3595_p12 }
  0x49   : > { %p3603_p7 = pnand %p3602_p4, %p3596_p13 }
  0x4b   : > { %3606 = shalt.err (!%p3603_p7)
}
  0x4c   : > { %3431 = dma.hbm_to_vmem [thread:$0]  (!%p3706_p5), %s4837_s4, 16, %s211_s13, [#allocation5]  }
  0x4d   : > { %p4848_p2 = scmp.ne.s32.totalorder %s4843_s25, 0 }
  0x4e   : > { %p4849_p3 = scmp.ne.s32.totalorder (!%p4848_p2), %s4842_s24, 0 }
  0x4f   : > { %231 = sbr.rel (%p4848_p2) target bundleno = 813 (0x32d), region = 40 }
  0x56   : > { %3620 = dma.done.wait (%p4849_p3), [#allocation3], 16  }
  0x57   : > { %3622 = vsyncadd (%p4849_p3), [#allocation3], 4294967280 }
  0x58   : > { %3624 = dma.done.wait (%p4849_p3), [#allocation5], 80  }
  0x59   : > { %3626 = vsyncadd (%p4849_p3), [#allocation5], 4294967216  ;;  %p272_p8 = scmp.lt.s32.totalorder %s3629_s18, 1  ;;  %vm654_vm0 = vcmask 1046528   ;;  %v3642_v4 = vmov 0   ;;  %v3468_v29 = vld [vmem:[%s4834_s1] sm:$0xff]  }
  0x5a   : > { %vm469_vm1 = vsmask.f32 7424  ;;  %3202 = vmatprep.subr.bf16.mxu0 %v3468_v29  ;;  %v3469_v38 = vld [vmem:[%s4834_s1 + $0x8] sm:$0xff]   ;;  %s3643_s12 = smov 64   ;;  %v3471_v53 = vld [vmem:[%s4834_s1 + $0x30] sm:$0xff]   ;;  %s3644_s17 = smov 32  }
  0x5b   : > { %s4861_s18 = smov (!%p272_p8, %s3629_s18), 1  ;;  %3203 = vmatpush3.bf16.msra.mxu0 %v3468_v29  ;;  %v3470_v60 = vld [vmem:[%s4834_s1 + $0x10] sm:$0xff]   ;;  %3154 = vmatprep.subr.bf16.mxu1 %v3471_v53  ;;  %vm728_vm2 = vcmask 261120   ;;  %vm765_vm3 = vcmask 523264   ;;  %vm968_vm4 = vcmask 785408   ;;  %vm1514_vm5 = vcmask 1045504  }
  0x5c   : > { %s3409_s25 = smul.u32 172, %s4861_s18  ;;  %3204 = vmatprep.subr.bf16.mxu0 %v3469_v38  ;;  %3155 = vmatpush3.bf16.msra.mxu1 %v3471_v53  ;;  %vm2015_vm6 = vcmask 1043456   ;;  %vm1960_vm7 = vcmask 64512   ;;  %vm2270_vm8 = vcmask 1044480   ;;  %vm2441_vm9 = vcmask 257024   ;;  %s3026_s27 = sshll.u32 %s4861_s18, 7 }
  0x5d   : > { %vm2452_vm10 = vcmask 1042432   ;;  %vm2453_vm11 = vcmask 1046532   ;;  %s4580_s24 = scalar_lea.vmem %s4838_s5, %s3026_s27  ;;  %vm2492_vm12 = vcmask 1040384   ;;  %vm2493_vm14 = vcmask 1044484  }
  0x5e   : > { %s3804_s22 = scalar_lea.vmem %s4833_s0, %s3409_s25  ;;  %vm4590_vm13 = vmor %vm2452_vm10, %vm2453_vm11  ;;  %vm2472_vm15 = vcmask 1041408  }
  0x5f   : > { %v294_v0 = vld [vmem:[%s3804_s22] sm:$0xf]  ;;  %v295_v1 = vld [vmem:[%s3804_s22 + $0x4] sm:$0xf]  ;;  %v296_v2 = vld [vmem:[%s3804_s22 + $0x8] sm:$0xf]  ;;  %3205 = vmatpush3.bf16.msra.mxu0 %v3469_v38 }
  0x60   : > { %v297_v3 = vld [vmem:[%s3804_s22 + $0xc] sm:$0xf]  ;;  %v335_v5 = vmax.bf16 %v3642_v4, %v294_v0  ;;  %v336_v6 = vmax.bf16 %v3642_v4, %v295_v1  ;;  %v337_v7 = vmax.bf16 %v3642_v4, %v296_v2  ;;  %v298_v8 = vld [vmem:[%s3804_s22 + $0x10] sm:$0xf]  ;;  %v299_v9 = vld [vmem:[%s3804_s22 + $0x14] sm:$0xf]  ;;  %3206 = vmatprep.subr.bf16.mxu0 %v3470_v60 }
  0x61   : > { %v338_v10 = vmax.bf16 %v3642_v4, %v297_v3  ;;  %v339_v11 = vmax.bf16 %v3642_v4, %v298_v8  ;;  %v340_v12 = vmax.bf16 %v3642_v4, %v299_v9  ;;  %v300_v13 = vld [vmem:[%s3804_s22 + $0x18] sm:$0xf]  ;;  %v301_v14 = vld [vmem:[%s3804_s22 + $0x1c] sm:$0xf]  ;;  %v302_v15 = vld [vmem:[%s3804_s22 + $0x20] sm:$0xf] }
  0x62   : > { %v3821_v16 = vcombine.low %v335_v5, %v336_v6  ;;  %v303_v17 = vld [vmem:[%s3804_s22 + $0x24] sm:$0xf]  ;;  %v341_v18 = vmax.bf16 %v3642_v4, %v300_v13  ;;  %v342_v19 = vmax.bf16 %v3642_v4, %v301_v14  ;;  %v343_v20 = vmax.bf16 %v3642_v4, %v302_v15  ;;  %v304_v28 = vld [vmem:[%s3804_s22 + $0x28] sm:$0xf]  ;;  %v305_v42 = vld [vmem:[%s3804_s22 + $0x2c] sm:$0xf] }
  0x63   : > { %v3827_v21 = vcombine.low %v337_v7, %v338_v10  ;;  %v3829_v22 = vcombine.low %v339_v11, %v340_v12  ;;  %v344_v23 = vmax.bf16 %v3642_v4, %v303_v17  ;;  %v345_v43 = vmax.bf16 %v3642_v4, %v304_v28  ;;  %v306_v51 = vld [vmem:[%s3804_s22 + $0x30] sm:$0xf]  ;;  %v307_v52 = vld [vmem:[%s3804_s22 + $0x34] sm:$0xf]  ;;  %v308_v58 = vld [vmem:[%s3804_s22 + $0x38] sm:$0xf]  ;;  %3207 = vmatpush3.bf16.msra.mxu0 %v3470_v60 }
  0x64   : > { %v655_v24 = vrot.slane %v3821_v16, 1  ;;  %v471_v25 = vshrl.u32 %v3821_v16, 16  ;;  %v473_v26 = vshll.u32 %v3821_v16, 16  ;;  %v3835_v27 = vcombine.low %v341_v18, %v342_v19  ;;  %v309_v59 = vld [vmem:[%s3804_s22 + $0x3c] sm:$0xf]  ;;  %v3475_v28 = vld [vmem:[%s4834_s1 + $0x40] sm:$0xff]  }
  0x65   : > { %v656_v30 = vrot.slane %v3827_v21, 1  ;;  %v478_v31 = vshll.u32 %v3827_v21, 16  ;;  %v658_v32 = vrot.slane %v3829_v22, 1  ;;  %v482_v33 = vshrl.u32 %v3827_v21, 16  ;;  %v310_v3 = vld [vmem:[%s3804_s22 + $0x40] sm:$0xf] }
  0x66   : > { %v475_v34 = vrot.slane %v473_v26, 1  ;;  %v486_v35 = vshll.u32 %v3829_v22, 16  ;;  %v3846_v36 = vcombine.low %v343_v20, %v344_v23  ;;  %v494_v37 = vshll.u32 %v3835_v27, 16  ;;  %v311_v5 = vld [vmem:[%s3804_s22 + $0x44] sm:$0xf]  ;;  %v3473_v10 = vld [vmem:[%s4834_s1 + $0x38] sm:$0xff]  }
  0x67   : > { %v657_v39 = vsel %vm654_vm0, %v655_v24, %v656_v30  ;;  %v480_v40 = vrot.slane %v478_v31, 1  ;;  %v498_v41 = vshrl.u32 %v3835_v27, 16  ;;  %v659_v48 = vsel %vm654_vm0, %v656_v30, %v658_v32  ;;  %v3472_v14 = vld [vmem:[%s4834_s1 + $0x18] sm:$0xff]   ;;  %v312_v19 = vld [vmem:[%s3804_s22 + $0x48] sm:$0xf]  ;;  %3156 = vmatprep.subr.bf16.mxu1 %v3473_v10 }
  0x68   : > { %692 = vrot.lane.b32.xlu1 %v657_v39, %s3643_s12  ;;  %v476_v44 = vor.u32 %v475_v34, %v471_v25  ;;  %v488_v45 = vrot.slane %v486_v35, 1  ;;  %v496_v46 = vrot.slane %v494_v37, 1  ;;  %v502_v47 = vshll.u32 %v3846_v36, 16  ;;  %v313_v26 = vld [vmem:[%s3804_s22 + $0x4c] sm:$0xf]  ;;  %3208 = vmatprep.subr.bf16.mxu0 %v3472_v14 }
  0x69   : > { %v484_v49 = vor.u32 %v482_v33, %v480_v40  ;;  %v490_v50 = vshrl.u32 %v3829_v22, 16  ;;  %v346_v57 = vmax.bf16 %v3642_v4, %v305_v42  ;;  %v660_v62 = vrot.slane %v3835_v27, 1  ;;  %v314_v33 = vld [vmem:[%s3804_s22 + $0x50] sm:$0xf]  ;;  %v315_v34 = vld [vmem:[%s3804_s22 + $0x54] sm:$0xf]  ;;  %3157 = vmatpush3.bf16.msra.mxu1 %v3473_v10  ;;  %3209 = vmatpush3.bf16.msra.mxu0 %v3472_v14 }
  0x6a   : > { %v481_v54 = vsel %vm469_vm1, %v476_v44, %v480_v40  ;;  %v500_v55 = vor.u32 %v498_v41, %v496_v46  ;;  %v3868_v56 = vrot.slane %v502_v47, 1  ;;  %v347_v0 = vmax.bf16 %v3642_v4, %v306_v51  ;;  %v316_v38 = vld [vmem:[%s3804_s22 + $0x58] sm:$0xf]  ;;  %v317_v39 = vld [vmem:[%s3804_s22 + $0x5c] sm:$0xf]  ;;  %v3474_v40 = vld [vmem:[%s4834_s1 + $0x20] sm:$0xff]   ;;  %3158 = vmatprep.subr.bf16.mxu1 %v3475_v28 }
  0x6b   : > { %618 = vrot.lane.b32.xlu0 %v481_v54, %s3644_s17  ;;  %v489_v61 = vsel %vm469_vm1, %v484_v49, %v488_v45  ;;  %v492_v63 = vor.u32 %v490_v50, %v488_v45  ;;  %v348_v1 = vmax.bf16 %v3642_v4, %v307_v52  ;;  %v3882_v2 = vcombine.low %v345_v43, %v346_v57  ;;  %v3477_v44 = vld [vmem:[%s4834_s1 + $0x48] sm:$0xff]  }
  0x6c   : > { %694 = vrot.lane.b32.xlu1 %v659_v48, %s3643_s12  ;;  %v505_v6 = vsel %vm469_vm1, %v500_v55, %v3868_v56  ;;  %v662_v7 = vrot.slane %v3846_v36, 1  ;;  %v349_v8 = vmax.bf16 %v3642_v4, %v308_v58  ;;  %v350_v9 = vmax.bf16 %v3642_v4, %v309_v59  ;;  %3210 = vmatprep.subr.bf16.mxu0 %v3474_v40  ;;  %v318_v55 = vld [vmem:[%s3804_s22 + $0x60] sm:$0xf] }
  0x6d   : > { %v3894_v11 = vcombine.low %v347_v0, %v348_v1  ;;  %v510_v12 = vshll.u32 %v3882_v2, 16  ;;  %v514_v13 = vshrl.u32 %v3882_v2, 16  ;;  %v351_v15 = vmax.bf16 %v3642_v4, %v310_v3  ;;  %3159 = vmatpush3.bf16.msra.mxu1 %v3475_v28  ;;  %3211 = vmatpush3.bf16.msra.mxu0 %v3474_v40  ;;  %v323_v40 = vld [vmem:[%s3804_s22 + $0x74] sm:$0xf] }
  0x6e   : > { %v352_v17 = vmax.bf16 %v3642_v4, %v311_v5  ;;  %v3904_v18 = vcombine.low %v349_v8, %v350_v9  ;;  %v497_v20 = vsel %vm469_vm1, %v492_v63, %v496_v46  ;;  %v506_v25 = vshrl.u32 %v3846_v36, 16  ;;  %3160 = vmatprep.subr.bf16.mxu1 %v3477_v44  ;;  %v3971_v5 = vld [vmem:[%s4834_s1 + $0x60] sm:$0xff]  }
  0x6f   : > { %620 = vrot.lane.b32.xlu0 %v489_v61, %s3644_s17  ;;  %v512_v23 = vrot.slane %v510_v12, 1  ;;  %v518_v24 = vshll.u32 %v3894_v11, 16  ;;  %v663_v29 = vsel %vm654_vm0, %v660_v62, %v662_v7  ;;  %v664_v41 = vrot.slane %v3882_v2, 1  ;;  %v319_v61 = vld [vmem:[%s3804_s22 + $0x64] sm:$0xf] }
  0x70   : > { %624 = vrot.lane.b32.xlu1 %v505_v6, %s3644_s17  ;;  %v3918_v30 = vcombine.low %v351_v15, %v352_v17  ;;  %v526_v31 = vshll.u32 %v3904_v18, 16  ;;  %v666_v42 = vrot.slane %v3894_v11, 1  ;;  %v530_v43 = vshrl.u32 %v3904_v18, 16  ;;  %v320_v15 = vld [vmem:[%s3804_s22 + $0x68] sm:$0xf] }
  0x71   : > { %v516_v35 = vor.u32 %v514_v13, %v512_v23  ;;  %v520_v37 = vrot.slane %v518_v24, 1  ;;  %v661_v45 = vsel %vm654_vm0, %v658_v32, %v660_v62  ;;  %v508_v46 = vor.u32 %v506_v25, %v3868_v56  ;;  %v3476_v32 = vld [vmem:[%s4834_s1 + $0x28] sm:$0xff]   ;;  %v3479_v62 = vld [vmem:[%s4834_s1 + $0x50] sm:$0xff]   ;;  %3161 = vmatpush3.bf16.msra.mxu1 %v3477_v44  ;;  %v3480_v24 = vld [vmem:[%s4834_s1 + $0x58] sm:$0xff]  }
  0x72   : > { %v353_v47 = vmax.bf16 %v3642_v4, %v312_v19  ;;  %v354_v48 = vmax.bf16 %v3642_v4, %v313_v26  ;;  %v528_v50 = vrot.slane %v526_v31, 1  ;;  %v534_v51 = vshll.u32 %v3918_v30, 16  ;;  %3212 = vmatprep.subr.bf16.mxu0 %v3476_v32  ;;  %v321_v17 = vld [vmem:[%s3804_s22 + $0x6c] sm:$0xf]  ;;  %3162 = vmatprep.subr.bf16.mxu1 %v3479_v62 }
  0x73   : > { %622 = vrot.lane.b32.xlu0 %v497_v20, %s3644_s17  ;;  %v521_v49 = vsel %vm469_vm1, %v516_v35, %v520_v37  ;;  %v355_v52 = vmax.bf16 %v3642_v4, %v314_v33  ;;  %v356_v53 = vmax.bf16 %v3642_v4, %v315_v34  ;;  %v357_v56 = vmax.bf16 %v3642_v4, %v316_v38  ;;  %v322_v33 = vld [vmem:[%s3804_s22 + $0x70] sm:$0xf] }
  0x74   : > { %698 = vrot.lane.b32.xlu1 %v663_v29, %s3643_s12  ;;  %v3946_v54 = vcombine.low %v353_v47, %v354_v48  ;;  %v358_v57 = vmax.bf16 %v3642_v4, %v317_v39  ;;  %v513_v58 = vsel %vm469_vm1, %v508_v46, %v512_v23  ;;  %v667_v59 = vsel %vm654_vm0, %v664_v41, %v666_v42 }
  0x75   : > { %v522_v60 = vshrl.u32 %v3894_v11, 16  ;;  %v532_v63 = vor.u32 %v530_v43, %v528_v50  ;;  %v536_v0 = vrot.slane %v534_v51, 1  ;;  %v3965_v1 = vcombine.low %v355_v52, %v356_v53  ;;  %3213 = vmatpush3.bf16.msra.mxu0 %v3476_v32  ;;  %3163 = vmatpush3.bf16.msra.mxu1 %v3479_v62  ;;  %v324_v51 = vld [vmem:[%s3804_s22 + $0x78] sm:$0xf]  ;;  %v325_v52 = vld [vmem:[%s3804_s22 + $0x7c] sm:$0xf] }
  0x76   : > { %v542_v3 = vshll.u32 %v3946_v54, 16  ;;  %v665_v6 = vsel %vm654_vm0, %v662_v7, %v664_v41  ;;  %v668_v8 = vrot.slane %v3904_v18, 1  ;;  %v3978_v9 = vcombine.low %v357_v56, %v358_v57  ;;  %3250 = vmatprep.subr.bf16.mxu0 %v3971_v5  ;;  %3164 = vmatprep.subr.bf16.mxu1 %v3480_v24 }
  0x77   : > { %696 = vrot.lane.b32.xlu0 %v661_v45, %s3643_s12  ;;  %v524_v10 = vor.u32 %v522_v60, %v520_v37  ;;  %v670_v12 = vrot.slane %v3918_v30, 1  ;;  %v359_v13 = vmax.bf16 %v3642_v4, %v318_v55  ;;  %v360_v14 = vmax.bf16 %v3642_v4, %v319_v61  ;;  %v333_v60 = vld [vmem:[%s3804_s22 + $0x9c] sm:$0xf] }
  0x78   : > { %628 = vrot.lane.b32.xlu1 %v521_v49, %s3644_s17  ;;  %v537_v7 = vsel %vm469_vm1, %v532_v63, %v536_v0  ;;  %v544_v19 = vrot.slane %v542_v3, 1  ;;  %v546_v20 = vshrl.u32 %v3946_v54, 16  ;;  %v550_v23 = vshll.u32 %v3965_v1, 16  ;;  %v327_v3 = vld [vmem:[%s3804_s22 + $0x84] sm:$0xf] }
  0x79   : > { %v538_v25 = vshrl.u32 %v3918_v30, 16  ;;  %v558_v26 = vshll.u32 %v3978_v9, 16  ;;  %v529_v28 = vsel %vm469_vm1, %v524_v10, %v528_v50  ;;  %v671_v29 = vsel %vm654_vm0, %v668_v8, %v670_v12  ;;  %3165 = vmatpush3.bf16.msra.mxu1 %v3480_v24 }
  0x7a   : > { %v3999_v31 = vcombine.low %v359_v13, %v360_v14  ;;  %v548_v34 = vor.u32 %v546_v20, %v544_v19  ;;  %v552_v35 = vrot.slane %v550_v23, 1  ;;  %v361_v37 = vmax.bf16 %v3642_v4, %v320_v15 }
  0x7b   : > { %626 = vrot.lane.b32.xlu0 %v513_v58, %s3644_s17  ;;  %v362_v38 = vmax.bf16 %v3642_v4, %v321_v17  ;;  %v672_v39 = vrot.slane %v3946_v54, 1  ;;  %v669_v41 = vsel %vm654_vm0, %v666_v42, %v668_v8  ;;  %v540_v43 = vor.u32 %v538_v25, %v536_v0  ;;  %v326_v0 = vld [vmem:[%s3804_s22 + $0x80] sm:$0xf] }
  0x7c   : > { %702 = vrot.lane.b32.xlu1 %v667_v59, %s3643_s12  ;;  %v674_v44 = vrot.slane %v3965_v1, 1  ;;  %v560_v45 = vrot.slane %v558_v26, 1  ;;  %v562_v46 = vshrl.u32 %v3978_v9, 16  ;;  %v566_v47 = vshll.u32 %v3999_v31, 16  ;;  %v332_v59 = vld [vmem:[%s3804_s22 + $0x98] sm:$0xf] }
  0x7d   : > { %v553_v48 = vsel %vm469_vm1, %v548_v34, %v552_v35  ;;  %v363_v49 = vmax.bf16 %v3642_v4, %v322_v33  ;;  %v364_v50 = vmax.bf16 %v3642_v4, %v323_v40  ;;  %v4017_v42 = vcombine.low %v361_v37, %v362_v38  ;;  %v328_v26 = vld [vmem:[%s3804_s22 + $0x88] sm:$0xf]  ;;  %v334_v33 = vld [vmem:[%s3804_s22 + $0xa0] sm:$0x7] }
  0x7e   : > { %v545_v53 = vsel %vm469_vm1, %v540_v43, %v544_v19  ;;  %v554_v32 = vshrl.u32 %v3965_v1, 16  ;;  %v564_v55 = vor.u32 %v562_v46, %v560_v45  ;;  %v568_v56 = vrot.slane %v566_v47, 1  ;;  %v330_v46 = vld [vmem:[%s3804_s22 + $0x90] sm:$0xf] }
  0x7f   : > { %700 = vrot.lane.b32.xlu0 %v665_v6, %s3643_s12  ;;  %v365_v57 = vmax.bf16 %v3642_v4, %v324_v51  ;;  %v366_v58 = vmax.bf16 %v3642_v4, %v325_v52  ;;  %v675_v61 = vsel %vm654_vm0, %v672_v39, %v674_v44  ;;  %v4030_v62 = vcombine.low %v363_v49, %v364_v50 }
  0x80   : > { %632 = vrot.lane.b32.xlu1 %v537_v7, %s3644_s17  ;;  %v574_v63 = vshll.u32 %v4017_v42, 16  ;;  %v673_v6 = vsel %vm654_vm0, %v670_v12, %v672_v39  ;;  %v676_v8 = vrot.slane %v3978_v9, 1  ;;  %v556_v10 = vor.u32 %v554_v32, %v552_v35 }
  0x81   : > { %v678_v13 = vrot.slane %v3999_v31, 1  ;;  %v4040_v14 = vmax.bf16 %v3642_v4, %v332_v59  ;;  %v374_v15 = vmax.bf16 %v3642_v4, %v333_v60  ;;  %v569_v17 = vsel %vm469_vm1, %v564_v55, %v568_v56 }
  0x82   : > { %v367_v12 = vmax.bf16 %v3642_v4, %v326_v0  ;;  %v368_v7 = vmax.bf16 %v3642_v4, %v327_v3  ;;  %v4047_v19 = vcombine.low %v365_v57, %v366_v58  ;;  %v576_v20 = vrot.slane %v574_v63, 1 }
  0x83   : > { %630 = vrot.lane.b32.xlu0 %v529_v28, %s3644_s17  ;;  %v578_v23 = vshrl.u32 %v4017_v42, 16  ;;  %v582_v24 = vshll.u32 %v4030_v62, 16  ;;  %v4052_v25 = vcombine.low %v4040_v14, %v374_v15  ;;  %v329_v28 = vld [vmem:[%s3804_s22 + $0x8c] sm:$0xf]  ;;  %v561_v34 = vsel %vm469_vm1, %v556_v10, %v560_v45  ;;  %v331_v15 = vld [vmem:[%s3804_s22 + $0x94] sm:$0xf] }
  0x84   : > { %706 = vrot.lane.b32.xlu1 %v671_v29, %s3643_s12  ;;  %v679_v29 = vsel %vm654_vm0, %v676_v8, %v678_v13  ;;  %v570_v35 = vshrl.u32 %v3999_v31, 16  ;;  %v4062_v37 = vcombine.low %v367_v12, %v368_v7  ;;  %v590_v38 = vshll.u32 %v4047_v19, 16 }
  0x85   : > { %v580_v39 = vor.u32 %v578_v23, %v576_v20  ;;  %v584_v40 = vrot.slane %v582_v24, 1  ;;  %v370_v43 = vmax.bf16 %v3642_v4, %v329_v28  ;;  %v375_v47 = vmax.bf16 %v3642_v4, %v334_v33 }
  0x86   : > { %v680_v45 = vrot.slane %v4017_v42, 1  ;;  %v572_v49 = vor.u32 %v570_v35, %v568_v56  ;;  %v682_v50 = vrot.slane %v4030_v62, 1  ;;  %v592_v51 = vrot.slane %v590_v38, 1 }
  0x87   : > { %704 = vrot.lane.b32.xlu0 %v669_v41, %s3643_s12  ;;  %v369_v41 = vmax.bf16 %v3642_v4, %v328_v26  ;;  %v594_v52 = vshrl.u32 %v4047_v19, 16  ;;  %v598_v32 = vshll.u32 %v4062_v37, 16  ;;  %v371_v55 = vmax.bf16 %v3642_v4, %v330_v46 }
  0x88   : > { %636 = vrot.lane.b32.xlu1 %v553_v48, %s3644_s17  ;;  %v677_v48 = vsel %vm654_vm0, %v674_v44, %v676_v8  ;;  %v577_v44 = vsel %vm469_vm1, %v572_v49, %v576_v20  ;;  %v683_v56 = vsel %vm654_vm0, %v680_v45, %v682_v50  ;;  %v586_v58 = vshrl.u32 %v4030_v62, 16 }
  0x89   : > { %v4078_v57 = vcombine.low %v369_v41, %v370_v43  ;;  %v596_v59 = vor.u32 %v594_v52, %v592_v51  ;;  %v600_v60 = vrot.slane %v598_v32, 1  ;;  %v681_v0 = vsel %vm654_vm0, %v678_v13, %v680_v45 }
  0x8a   : > { %v588_v3 = vor.u32 %v586_v58, %v584_v40  ;;  %v686_v8 = vrot.slane %v4062_v37, 1  ;;  %v372_v13 = vmax.bf16 %v3642_v4, %v331_v15  ;;  %v602_v23 = vshrl.u32 %v4062_v37, 16 }
  0x8b   : > { %634 = vrot.lane.b32.xlu0 %v545_v53, %s3644_s17  ;;  %v585_v53 = vsel %vm469_vm1, %v580_v39, %v584_v40  ;;  %v606_v63 = vshll.u32 %v4078_v57, 16  ;;  %v601_v10 = vsel %vm469_vm1, %v596_v59, %v600_v60  ;;  %v610_v12 = vshrl.u32 %v4078_v57, 16 }
  0x8c   : > { %710 = vrot.lane.b32.xlu1 %v675_v61, %s3643_s12  ;;  %v2849_v61 = vcombine.low %v371_v55, %v371_v55  ;;  %v593_v20 = vsel %vm469_vm1, %v588_v3, %v592_v51  ;;  %v4103_v33 = vcombine.low %v371_v55, %v372_v13  ;;  %v688_v38 = vrot.slane %v4078_v57, 1 }
  0x8d   : > { %v4113_v46 = vcombine.low %v375_v47, %v375_v47  ;;  %v4122_v51 = vcombine.low %v4040_v14, %v4040_v14  ;;  %v1477_v47 = vrot.slane %v4052_v25, 1 }
  0x8e   : > { %v614_v7 = vshll.u32 %v2849_v61, 16  ;;  %v690_v4 = vrot.slane %v2849_v61, 1  ;;  %v821_v40 = vshll.u32 %v4103_v33, 16  ;;  %v842_v43 = vrot.slane %v4103_v33, 1 }
  0x8f   : > { %708 = vrot.lane.b32.xlu0 %v673_v6, %s3643_s12  ;;  %v684_v6 = vrot.slane %v4047_v19, 1  ;;  %v689_v45 = vsel %vm654_vm0, %v686_v8, %v688_v38  ;;  %v1464_v32 = vshll.u32 %v4113_v46, 16  ;;  %v829_v58 = vshll.u32 %v4122_v51, 16 }
  0x90   : > { %640 = vrot.lane.b32.xlu1 %v569_v17, %s3644_s17  ;;  %v608_v17 = vrot.slane %v606_v63, 1  ;;  %v616_v28 = vrot.slane %v614_v7, 1  ;;  %v691_v41 = vsel %vm654_vm0, %v688_v38, %v690_v4  ;;  %v823_v49 = vrot.slane %v821_v40, 1 }
  0x91   : > { %v687_v24 = vsel %vm654_vm0, %v684_v6, %v686_v8  ;;  %v843_v52 = vsel %vm654_vm0, %v688_v38, %v842_v43  ;;  %v1478_v14 = vsel %vm654_vm0, %v842_v43, %v1477_v47  ;;  %v831_v63 = vrot.slane %v829_v58, 1  ;;  %v3481_v38 = vld [vmem:[%s4834_s1 + $0x68] sm:$0xff]  }
  0x92   : > { %v612_v26 = vor.u32 %v610_v12, %v608_v17  ;;  %v844_v3 = vrot.slane %v4122_v51, 1  ;;  %v1479_v15 = vrot.slane %v4113_v46, 1  ;;  %v1468_v12 = vshrl.u32 %v4113_v46, 16 }
  0x93   : > { %638 = vrot.lane.b32.xlu0 %v561_v34, %s3644_s17  ;;  %v604_v34 = vor.u32 %v602_v23, %v600_v60  ;;  %v1466_v60 = vrot.slane %v1464_v32, 1 }
  0x94   : > { %714 = vrot.lane.b32.xlu1 %v679_v29, %s3643_s12  ;;  %v685_v29 = vsel %vm654_vm0, %v682_v50, %v684_v6  ;;  %v617_v35 = vsel %vm469_vm1, %v612_v26, %v616_v28  ;;  %v825_v50 = vshrl.u32 %v4103_v33, 16  ;;  %v833_v6 = vshrl.u32 %v4122_v51, 16 }
  0x95   : > { %v609_v39 = vsel %vm469_vm1, %v604_v34, %v608_v17  ;;  %v1480_v7 = vsel %vm654_vm0, %v1477_v47, %v1479_v15 }
  0x96   : > { %v835_v17 = vor.u32 %v833_v6, %v831_v63 }
  0x97   : > { %712 = vrot.lane.b32.xlu0 %v677_v48, %s3643_s12  ;;  %v1456_v48 = vshll.u32 %v4052_v25, 16 }
  0x98   : > { %644 = vrot.lane.b32.xlu1 %v585_v53, %s3644_s17  ;;  %v1460_v53 = vshrl.u32 %v4052_v25, 16 }
  0x99   : > { %v1458_v55 = vrot.slane %v1456_v48, 1 }
  0x9b   : > { %642 = vrot.lane.b32.xlu0 %v577_v44, %s3644_s17  ;;  %v824_v44 = vsel %vm469_vm1, %v612_v26, %v823_v49  ;;  %v1462_v59 = vor.u32 %v1460_v53, %v1458_v55 }
  0x9c   : > { %718 = vrot.lane.b32.xlu1 %v683_v56, %s3643_s12  ;;  %v827_v56 = vor.u32 %v825_v50, %v823_v49 }
  0x9e   : > { %v1459_v61 = vsel %vm469_vm1, %v827_v56, %v1458_v55  ;;  %v832_v8 = vsel %vm469_vm1, %v827_v56, %v831_v63 }
  0x9f   : > { %716 = vrot.lane.b32.xlu0 %v681_v0, %s3643_s12  ;;  %v1467_v0 = vsel %vm469_vm1, %v1462_v59, %v1466_v60  ;;  %vm4619_vm1 = vmor %vm2492_vm12, %vm2493_vm14 }
  0xa0   : > { %648 = vrot.lane.b32.xlu1 %v601_v10, %s3644_s17  ;;  %v845_v10 = vsel %vm654_vm0, %v842_v43, %v844_v3 }
  0xa3   : > { %646 = vrot.lane.b32.xlu0 %v593_v20, %s3644_s17  ;;  %v1470_v20 = vor.u32 %v1468_v12, %v1466_v60  ;;  %v3485_v60 = vld [vmem:[%s4834_s1 + $0x88] sm:$0xff]  }
  0xa4   : > { %722 = vrot.lane.b32.xlu1 %v687_v24, %s3643_s12 }
  0xa7   : > { %720 = vrot.lane.b32.xlu0 %v685_v29, %s3643_s12 }
  0xa8   : > { %652 = vrot.lane.b32.xlu1 %v617_v35, %s3644_s17 }
  0xab   : > { %650 = vrot.lane.b32.xlu0 %v609_v39, %s3644_s17 }
  0xac   : > { %726 = vrot.lane.b32.xlu1 %v691_v41, %s3643_s12 }
  0xaf   : > { %724 = vrot.lane.b32.xlu0 %v689_v45, %s3643_s12 }
  0xb0   : > { %846 = vrot.lane.b32.xlu1 %v843_v52, %s3643_s12 }
  0xb3   : > { %836 = vrot.lane.b32.xlu0 %v824_v44, %s3644_s17  ;;  %v3484_v44 = vld [vmem:[%s4834_s1 + $0x80] sm:$0xff]  }
  0xb4   : > { %1481 = vrot.lane.b32.xlu1 %v1478_v14, %s3643_s12 }
  0xb7   : > { %1471 = vrot.lane.b32.xlu0 %v1459_v61, %s3644_s17 }
  0xb8   : > { %1473 = vrot.lane.b32.xlu1 %v1467_v0, %s3644_s17 }
  0xbb   : > { %838 = vrot.lane.b32.xlu0 %v832_v8, %s3644_s17 }
  0xbc   : > { %848 = vrot.lane.b32.xlu1 %v845_v10, %s3643_s12 }
  0xbf   : > { %840 = vrot.lane.b32.xlu0 %v835_v17, %s3644_s17 }
  0xc0   : > { %1483 = vrot.lane.b32.xlu1 %v1480_v7, %s3643_s12 }
  0xc3   : > { %1475 = vrot.lane.b32.xlu0 %v1470_v20, %s3644_s17 }
  0xc4   : > { %1485 = vrot.lane.b32.xlu1 %v1479_v15, %s3643_s12 }
  0xc7   : > { %850 = vrot.lane.b32.xlu0 %v844_v3, %s3643_s12 }
  0xda   : > { %v693_v13 = vpop.permute.xlu1 %692 }
  0xdd   : > { %v619_v23 = vpop.permute.xlu0 %618 }
  0xde   : > { %v730_v24 = vsel %vm728_vm2, %v3821_v16, %v619_v23  ;;  %v695_v26 = vpop.permute.xlu1 %694 }
  0xdf   : > { %v767_v28 = vsel %vm765_vm3, %v730_v24, %v693_v13 }
  0xe0   : > { %3214 = vmatprep.mubr.msk.bf16.mxu0 %vm968_vm4, %v767_v28 }
  0xe1   : > { %v621_v29 = vpop.permute.xlu0 %620 }
  0xe2   : > { %v732_v34 = vsel %vm728_vm2, %v3827_v21, %v621_v29  ;;  %v625_v35 = vpop.permute.xlu1 %624  ;;  %v3482_v21 = vld [vmem:[%s4834_s1 + $0x70] sm:$0xff]  }
  0xe3   : > { %v769_v4 = vsel %vm765_vm3, %v732_v34, %v695_v26  ;;  %v736_v16 = vsel %vm728_vm2, %v3835_v27, %v625_v35 }
  0xe4   : > { %3215 = vmatmul.mubr.msk.bf16.vlgmr.msra.gmra.mrb[0].mxu0 %vm968_vm4, %v769_v4  ;;  %v895_v49 = vrot.slane %v769_v4, 1 }
  0xe5   : > { %3251 = vmatpush3.bf16.msra.mxu0 %v3971_v5  ;;  %v623_v39 = vpop.permute.xlu0 %622  ;;  %v3483_v5 = vld [vmem:[%s4834_s1 + $0x78] sm:$0xff]  }
  0xe6   : > { %v699_v40 = vpop.permute.xlu1 %698  ;;  %3252 = vmatprep.subr.bf16.mxu0 %v3481_v38  ;;  %v734_v43 = vsel %vm728_vm2, %v3829_v22, %v623_v39 }
  0xe7   : > { %v4171_v41 = vsel %vm765_vm3, %v736_v16, %v699_v40 }
  0xe8   : > { %v898_v50 = vrot.slane %v4171_v41, 1 }
  0xe9   : > { %v697_v48 = vpop.permute.xlu0 %696  ;;  %3253 = vmatpush3.bf16.msra.mxu0 %v3481_v38 }
  0xea   : > { %v4176_v45 = vsel %vm765_vm3, %v734_v43, %v697_v48  ;;  %v629_v27 = vpop.permute.xlu1 %628  ;;  %3254 = vmatprep.subr.bf16.mxu0 %v3482_v21 }
  0xeb   : > { %v896_v52 = vrot.slane %v4176_v45, 1  ;;  %3218 = vmatprep.mubr.msk.bf16.mxu0 %vm968_vm4, %v4176_v45  ;;  %v740_v22 = vsel %vm728_vm2, %v3882_v2, %v629_v27 }
  0xec   : > { %3219 = vmatmul.mubr.msk.bf16.gmra.mrb[4].mxu0 %vm968_vm4, %v4171_v41 }
  0xed   : > { %v627_v47 = vpop.permute.xlu0 %626  ;;  %v897_v53 = vsel %vm654_vm0, %v895_v49, %v896_v52  ;;  %v899_v32 = vsel %vm654_vm0, %v896_v52, %v898_v50  ;;  %3255 = vmatpush3.bf16.msra.mxu0 %v3482_v21 }
  0xee   : > { %3166 = vmatprep.mubr.msk.bf16.mxu1 %vm968_vm4, %v897_v53  ;;  %v703_v55 = vpop.permute.xlu1 %702  ;;  %3256 = vmatprep.subr.bf16.mxu0 %v3483_v5  ;;  %v738_v2 = vsel %vm728_vm2, %v3846_v36, %v627_v47 }
  0xef   : > { %3167 = vmatmul.mubr.msk.bf16.vlgmr.msra.gmra.mrb[0].mxu1 %vm968_vm4, %v899_v32  ;;  %v4197_v56 = vsel %vm765_vm3, %v740_v22, %v703_v55 }
  0xf0   : > { %v902_v61 = vrot.slane %v4197_v56, 1 }
  0xf1   : > { %v701_v58 = vpop.permute.xlu0 %700  ;;  %3257 = vmatpush3.bf16.msra.mxu0 %v3483_v5 }
  0xf2   : > { %v4202_v14 = vsel %vm765_vm3, %v738_v2, %v701_v58  ;;  %v633_v59 = vpop.permute.xlu1 %632  ;;  %3258 = vmatprep.subr.bf16.mxu0 %v3484_v44 }
  0xf3   : > { %v900_v63 = vrot.slane %v4202_v14, 1  ;;  %3222 = vmatprep.mubr.msk.bf16.mxu0 %vm968_vm4, %v4202_v14  ;;  %v744_v36 = vsel %vm728_vm2, %v3904_v18, %v633_v59 }
  0xf4   : > { %3223 = vmatmul.mubr.msk.bf16.gmra.mrb[8].mxu0 %vm968_vm4, %v4197_v56 }
  0xf5   : > { %v631_v0 = vpop.permute.xlu0 %630  ;;  %v901_v3 = vsel %vm654_vm0, %v898_v50, %v900_v63  ;;  %v903_v6 = vsel %vm654_vm0, %v900_v63, %v902_v61  ;;  %3259 = vmatpush3.bf16.msra.mxu0 %v3484_v44 }
  0xf6   : > { %3170 = vmatprep.mubr.msk.bf16.mxu1 %vm968_vm4, %v901_v3  ;;  %v707_v8 = vpop.permute.xlu1 %706  ;;  %3260 = vmatprep.subr.bf16.mxu0 %v3485_v60  ;;  %v742_v15 = vsel %vm728_vm2, %v3894_v11, %v631_v0 }
  0xf7   : > { %3171 = vmatmul.mubr.msk.bf16.gmra.mrb[4].mxu1 %vm968_vm4, %v903_v6  ;;  %v4220_v10 = vsel %vm765_vm3, %v744_v36, %v707_v8 }
  0xf8   : > { %v906_v7 = vrot.slane %v4220_v10, 1 }
  0xf9   : > { %v705_v17 = vpop.permute.xlu0 %704  ;;  %3261 = vmatpush3.bf16.msra.mxu0 %v3485_v60 }
  0xfa   : > { %v4225_v18 = vsel %vm765_vm3, %v742_v15, %v705_v17  ;;  %v637_v12 = vpop.permute.xlu1 %636 }
  0xfb   : > { %v904_v20 = vrot.slane %v4225_v18, 1  ;;  %3226 = vmatprep.mubr.msk.bf16.mxu0 %vm968_vm4, %v4225_v18  ;;  %v748_v13 = vsel %vm728_vm2, %v3946_v54, %v637_v12 }
  0xfc   : > { %3227 = vmatmul.mubr.msk.bf16.gmra.mrb[12].mxu0 %vm968_vm4, %v4220_v10 }
  0xfd   : > { %v635_v11 = vpop.permute.xlu0 %634  ;;  %v905_v23 = vsel %vm654_vm0, %v902_v61, %v904_v20  ;;  %v907_v24 = vsel %vm654_vm0, %v904_v20, %v906_v7 }
  0xfe   : > { %3174 = vmatprep.mubr.msk.bf16.mxu1 %vm968_vm4, %v905_v23  ;;  %v711_v26 = vpop.permute.xlu1 %710  ;;  %v746_v29 = vsel %vm728_vm2, %v3918_v30, %v635_v11 }
  0xff   : > { %3175 = vmatmul.mubr.msk.bf16.gmra.mrb[8].mxu1 %vm968_vm4, %v907_v24  ;;  %v4240_v28 = vsel %vm765_vm3, %v748_v13, %v711_v26  ;;  %v1515_v13 = vrot.slane %v4176_v45, 2  ;;  %v1516_v26 = vrot.slane %v4171_v41, 2 }
 0x100   : > { %v910_v38 = vrot.slane %v4240_v28, 1 }
 0x101   : > { %v709_v34 = vpop.permute.xlu0 %708  ;;  %v1517_v45 = vsel %vm1514_vm5, %v1515_v13, %v1516_v26 }
 0x102   : > { %v4245_v35 = vsel %vm765_vm3, %v746_v29, %v709_v34  ;;  %v641_v54 = vpop.permute.xlu1 %640 }
 0x103   : > { %v908_v4 = vrot.slane %v4245_v35, 1  ;;  %3230 = vmatprep.mubr.msk.bf16.mxu0 %vm968_vm4, %v4245_v35  ;;  %v752_v16 = vsel %vm728_vm2, %v3978_v9, %v641_v54 }
 0x104   : > { %3231 = vmatmul.mubr.msk.bf16.gmra.mrb[16].mxu0 %vm968_vm4, %v4240_v28 }
 0x105   : > { %v639_v39 = vpop.permute.xlu0 %638  ;;  %v909_v30 = vsel %vm654_vm0, %v906_v7, %v908_v4  ;;  %v911_v40 = vsel %vm654_vm0, %v908_v4, %v910_v38 }
 0x106   : > { %3178 = vmatprep.mubr.msk.bf16.mxu1 %vm968_vm4, %v909_v30  ;;  %v715_v21 = vpop.permute.xlu1 %714  ;;  %v750_v48 = vsel %vm728_vm2, %v3965_v1, %v639_v39  ;;  %v1518_v39 = vrot.slane %v4202_v14, 2 }
 0x107   : > { %3179 = vmatmul.mubr.msk.bf16.gmra.mrb[12].mxu1 %vm968_vm4, %v911_v40  ;;  %v4260_v43 = vsel %vm765_vm3, %v752_v16, %v715_v21 }
 0x108   : > { %v914_v49 = vrot.slane %v4260_v43, 1 }
 0x109   : > { %v713_v27 = vpop.permute.xlu0 %712 }
 0x10a   : > { %v4265_v5 = vsel %vm765_vm3, %v750_v48, %v713_v27  ;;  %v645_v9 = vpop.permute.xlu1 %644  ;;  %v1520_v48 = vrot.slane %v4197_v56, 2  ;;  %v1522_v56 = vrot.slane %v4225_v18, 2  ;;  %v1526_v18 = vrot.slane %v4245_v35, 2 }
 0x10b   : > { %v912_v50 = vrot.slane %v4265_v5, 1  ;;  %3234 = vmatprep.mubr.msk.bf16.mxu0 %vm968_vm4, %v4265_v5  ;;  %v756_v52 = vsel %vm728_vm2, %v4017_v42, %v645_v9  ;;  %v1532_v35 = vrot.slane %v4260_v43, 2 }
 0x10c   : > { %3235 = vmatmul.mubr.msk.bf16.gmra.mrb[20].mxu0 %vm968_vm4, %v4260_v43 }
 0x10d   : > { %v643_v22 = vpop.permute.xlu0 %642  ;;  %v913_v1 = vsel %vm654_vm0, %v910_v38, %v912_v50  ;;  %v915_v47 = vsel %vm654_vm0, %v912_v50, %v914_v49 }
 0x10e   : > { %3182 = vmatprep.mubr.msk.bf16.mxu1 %vm968_vm4, %v913_v1  ;;  %v719_v53 = vpop.permute.xlu1 %718  ;;  %v754_v55 = vsel %vm728_vm2, %v3999_v31, %v643_v22 }
 0x10f   : > { %3183 = vmatmul.mubr.msk.bf16.gmra.mrb[16].mxu1 %vm968_vm4, %v915_v47  ;;  %v4280_v32 = vsel %vm765_vm3, %v756_v52, %v719_v53  ;;  %v1524_v53 = vrot.slane %v4220_v10, 2  ;;  %v1528_v10 = vrot.slane %v4240_v28, 2 }
 0x110   : > { %v918_v58 = vrot.slane %v4280_v32, 1 }
 0x111   : > { %v717_v44 = vpop.permute.xlu0 %716 }
 0x112   : > { %v4285_v2 = vsel %vm765_vm3, %v754_v55, %v717_v44  ;;  %v649_v42 = vpop.permute.xlu1 %648  ;;  %v1523_v44 = vsel %vm1514_vm5, %v1520_v48, %v1522_v56 }
 0x113   : > { %v916_v59 = vrot.slane %v4285_v2, 1  ;;  %3238 = vmatprep.mubr.msk.bf16.mxu0 %vm968_vm4, %v4285_v2  ;;  %v760_v60 = vsel %vm728_vm2, %v4047_v19, %v649_v42  ;;  %v1525_v42 = vsel %vm1514_vm5, %v1522_v56, %v1524_v53 }
 0x114   : > { %3239 = vmatmul.mubr.msk.bf16.gmra.mrb[24].mxu0 %vm968_vm4, %v4280_v32 }
 0x115   : > { %v647_v61 = vpop.permute.xlu0 %646  ;;  %v917_v31 = vsel %vm654_vm0, %v914_v49, %v916_v59  ;;  %v919_v63 = vsel %vm654_vm0, %v916_v59, %v918_v58  ;;  %v1521_v49 = vsel %vm1514_vm5, %v1518_v39, %v1520_v48 }
 0x116   : > { %3186 = vmatprep.mubr.msk.bf16.mxu1 %vm968_vm4, %v917_v31  ;;  %v723_v36 = vpop.permute.xlu1 %722  ;;  %v758_v3 = vsel %vm728_vm2, %v4030_v62, %v647_v61  ;;  %v1527_v31 = vsel %vm1514_vm5, %v1524_v53, %v1526_v18 }
 0x117   : > { %3187 = vmatmul.mubr.msk.bf16.gmra.mrb[20].mxu1 %vm968_vm4, %v919_v63  ;;  %v4300_v0 = vsel %vm765_vm3, %v760_v60, %v723_v36  ;;  %v1529_v36 = vsel %vm1514_vm5, %v1526_v18, %v1528_v10 }
 0x118   : > { %v922_v15 = vrot.slane %v4300_v0, 1 }
 0x119   : > { %v721_v6 = vpop.permute.xlu0 %720 }
 0x11a   : > { %v4305_v8 = vsel %vm765_vm3, %v758_v3, %v721_v6  ;;  %v653_v19 = vpop.permute.xlu1 %652  ;;  %v1952_v6 = vld [vmem:[#allocation4] sm:$0xf] }
 0x11b   : > { %v920_v17 = vrot.slane %v4305_v8, 1  ;;  %3242 = vmatprep.mubr.msk.bf16.mxu0 %vm968_vm4, %v4305_v8  ;;  %v764_v11 = vsel %vm728_vm2, %v4078_v57, %v653_v19  ;;  %3408 = vmatprep.subr.msk.bf16.mxu1 %vm2015_vm6, %v1952_v6 }
 0x11c   : > { %3243 = vmatmul.mubr.msk.bf16.gmra.mrb[28].mxu0 %vm968_vm4, %v4300_v0 }
 0x11d   : > { %v651_v12 = vpop.permute.xlu0 %650  ;;  %v921_v7 = vsel %vm654_vm0, %v918_v58, %v920_v17  ;;  %v923_v62 = vsel %vm654_vm0, %v920_v17, %v922_v15  ;;  %v1534_v17 = vrot.slane %v4285_v2, 2 }
 0x11e   : > { %3190 = vmatprep.mubr.msk.bf16.mxu1 %vm968_vm4, %v921_v7  ;;  %v727_v20 = vpop.permute.xlu1 %726  ;;  %v762_v23 = vsel %vm728_vm2, %v4062_v37, %v651_v12  ;;  %v1536_v12 = vrot.slane %v4280_v32, 2  ;;  %v1538_v7 = vrot.slane %v4305_v8, 2 }
 0x11f   : > { %3191 = vmatmul.mubr.msk.bf16.gmra.mrb[24].mxu1 %vm968_vm4, %v923_v62  ;;  %v801_v54 = vsel %vm765_vm3, %v764_v11, %v727_v20  ;;  %v1540_v62 = vrot.slane %v4300_v0, 2 }
 0x120   : > { %v1537_v43 = vsel %vm1514_vm5, %v1534_v17, %v1536_v12  ;;  %v1539_v20 = vsel %vm1514_vm5, %v1536_v12, %v1538_v7 }
 0x121   : > { %v725_v24 = vpop.permute.xlu0 %724  ;;  %v1541_v2 = vsel %vm1514_vm5, %v1538_v7, %v1540_v62 }
 0x122   : > { %v4324_v29 = vsel %vm765_vm3, %v762_v23, %v725_v24  ;;  %v847_v34 = vpop.permute.xlu1 %846 }
 0x123   : > { %v924_v38 = vrot.slane %v4324_v29, 1  ;;  %3246 = vmatprep.mubr.msk.bf16.mxu0 %vm968_vm4, %v4324_v29  ;;  %v1542_v32 = vrot.slane %v4324_v29, 2 }
 0x124   : > { %3247 = vmatmul.mubr.msk.bf16.gmra.mrb[32].mxu0 %vm968_vm4, %v801_v54 }
 0x125   : > { %3262 = vmatprep.mubr.msk.bf16.mxu0 %vm968_vm4, %v1517_v45  ;;  %v837_v37 = vpop.permute.xlu0 %836  ;;  %v925_v41 = vsel %vm654_vm0, %v922_v15, %v924_v38  ;;  %v2017_v15 = vsel %vm2015_vm6, %v1952_v6, 0  ;;  %v1543_v0 = vsel %vm1514_vm5, %v1540_v62, %v1542_v32 }
 0x126   : > { %v853_v4 = vsel %vm728_vm2, %v4078_v57, %v837_v37  ;;  %3194 = vmatprep.mubr.msk.bf16.mxu1 %vm968_vm4, %v925_v41  ;;  %v4337_v16 = vpop.permute.xlu1 %1481  ;;  %v1519_v57 = vsel %vm1514_vm5, %v1516_v26, %v1518_v39  ;;  %3299 = vmatpush3.bf16.msra.mxu1 %v2017_v15 }
 0x127   : > { %v4341_v30 = vsel %vm765_vm3, %v853_v4, %v847_v34 }
 0x128   : > { %v926_v40 = vrot.slane %v4341_v30, 1  ;;  %v1544_v13 = vrot.slane %v4341_v30, 2 }
 0x129   : > { %v1472_v21 = vpop.permute.xlu0 %1471 }
 0x12a   : > { %v927_v27 = vsel %vm654_vm0, %v924_v38, %v926_v40  ;;  %v1474_v9 = vpop.permute.xlu1 %1473  ;;  %v1488_v11 = vsel %vm728_vm2, %v4103_v33, %v1472_v21  ;;  %v1545_v26 = vsel %vm1514_vm5, %v1542_v32, %v1544_v13 }
 0x12b   : > { %3195 = vmatmul.mubr.msk.bf16.gmra.mrb[28].mxu1 %vm968_vm4, %v927_v27  ;;  %v1490_v8 = vsel %vm728_vm2, %v4052_v25, %v1474_v9  ;;  %v1494_v24 = vsel %vm765_vm3, %v1488_v11, %v4337_v16 }
 0x12c   : > { %3263 = vmatmul.mubr.msk.bf16.vlgmr.msra.gmra.mrb[0].mxu0 %vm968_vm4, %v1519_v57  ;;  %v1546_v34 = vrot.slane %v1494_v24, 2 }
 0x12d   : > { %3266 = vmatprep.mubr.msk.bf16.mxu0 %vm968_vm4, %v1521_v49  ;;  %v839_v14 = vpop.permute.xlu0 %838 }
 0x12e   : > { %v855_v50 = vsel %vm728_vm2, %v4103_v33, %v839_v14  ;;  %v849_v52 = vpop.permute.xlu1 %848  ;;  %v1547_v38 = vsel %vm1514_vm5, %v1544_v13, %v1546_v34 }
 0x12f   : > { %v861_v22 = vsel %vm765_vm3, %v855_v50, %v849_v52 }
 0x130   : > { %v928_v1 = vrot.slane %v861_v22, 1 }
 0x131   : > { %v841_v47 = vpop.permute.xlu0 %840 }
 0x132   : > { %v929_v55 = vsel %vm654_vm0, %v926_v40, %v928_v1  ;;  %v857_v59 = vsel %vm728_vm2, %v4122_v51, %v841_v47  ;;  %v1530_v51 = vrot.slane %v4265_v5, 2  ;;  %v1535_v5 = vsel %vm1514_vm5, %v1532_v35, %v1534_v17  ;;  %v1484_v23 = vpop.permute.xlu1 %1483 }
 0x133   : > { %3198 = vmatprep.mubr.msk.bf16.mxu1 %vm968_vm4, %v929_v55  ;;  %v1496_v29 = vsel %vm765_vm3, %v1490_v8, %v1484_v23 }
 0x134   : > { %3267 = vmatmul.mubr.msk.bf16.gmra.mrb[4].mxu0 %vm968_vm4, %v1523_v44  ;;  %v1531_v28 = vsel %vm1514_vm5, %v1528_v10, %v1530_v51  ;;  %v1533_v19 = vsel %vm1514_vm5, %v1530_v51, %v1532_v35  ;;  %v1548_v54 = vrot.slane %v1496_v29, 2 }
 0x135   : > { %3270 = vmatprep.mubr.msk.bf16.mxu0 %vm968_vm4, %v1525_v42  ;;  %v1476_v58 = vpop.permute.xlu0 %1475 }
 0x136   : > { %v1492_v33 = vsel %vm728_vm2, %v4113_v46, %v1476_v58  ;;  %v1486_v25 = vpop.permute.xlu1 %1485  ;;  %v1549_v37 = vsel %vm1514_vm5, %v1546_v34, %v1548_v54 }
 0x137   : > { %v1498_v45 = vsel %vm765_vm3, %v1492_v33, %v1486_v25 }
 0x138   : > { %v1550_v41 = vrot.slane %v1498_v45, 2 }
 0x139   : > { %v851_v60 = vpop.permute.xlu0 %850 }
 0x13a   : > { %v863_v61 = vsel %vm765_vm3, %v857_v59, %v851_v60  ;;  %v1551_v4 = vsel %vm1514_vm5, %v1548_v54, %v1550_v41 }
 0x13b   : > { %v930_v63 = vrot.slane %v863_v61, 1 }
 0x13c   : > { %3271 = vmatmul.mubr.msk.bf16.gmra.mrb[8].mxu0 %vm968_vm4, %v1527_v31 }
 0x13d   : > { %3274 = vmatprep.mubr.msk.bf16.mxu0 %vm968_vm4, %v1529_v36  ;;  %v931_v3 = vsel %vm654_vm0, %v928_v1, %v930_v63  ;;  %vm2473_vm0 = vcmask 1045508  }
 0x13e   : > { %3199 = vmatmul.mubr.msk.bf16.gmra.mrb[32].mxu1 %vm968_vm4, %v931_v3  ;;  %v4457_v3 = vld [vmem:[#allocation2] ss:$0 sm:$0xff]  ;;  %vm4626_vm2 = vmor %vm2472_vm15, %vm2473_vm0 }
 0x144   : > { %3275 = vmatmul.mubr.msk.bf16.gmra.mrb[12].mxu0 %vm968_vm4, %v1531_v28 }
 0x145   : > { %3278 = vmatprep.mubr.msk.bf16.mxu0 %vm968_vm4, %v1533_v19 }
 0x14c   : > { %3279 = vmatmul.mubr.msk.bf16.gmra.mrb[16].mxu0 %vm968_vm4, %v1535_v5 }
 0x14d   : > { %3282 = vmatprep.mubr.msk.bf16.mxu0 %vm968_vm4, %v1537_v43 }
 0x154   : > { %3283 = vmatmul.mubr.msk.bf16.gmra.mrb[20].mxu0 %vm968_vm4, %v1539_v20 }
 0x155   : > { %3286 = vmatprep.mubr.msk.bf16.mxu0 %vm968_vm4, %v1541_v2 }
 0x15c   : > { %3287 = vmatmul.mubr.msk.bf16.gmra.mrb[24].mxu0 %vm968_vm4, %v1543_v0 }
 0x15d   : > { %3290 = vmatprep.mubr.msk.bf16.mxu0 %vm968_vm4, %v1545_v26 }
 0x164   : > { %3291 = vmatmul.mubr.msk.bf16.gmra.mrb[28].mxu0 %vm968_vm4, %v1547_v38 }
 0x165   : > { %3294 = vmatprep.mubr.msk.bf16.mxu0 %vm968_vm4, %v1549_v37 }
 0x16c   : > { %3295 = vmatmul.mubr.msk.bf16.gmra.mrb[32].mxu0 %vm968_vm4, %v1551_v4 }
 0x1c2   : > { %v3168_v16 = vpop.f32.mrb[0].mxu1 }
 0x1c3   : > { %v1057_v39 = vpop.f32.mrb[1].mxu1 }
 0x1c4   : > { %v3169_v30 = vpop.f32.mrb[2].mxu1 }
 0x1c5   : > { %v1060_v46 = vpop.f32.mrb[3].mxu1 }
 0x1ca   : > { %v3172_v40 = vpop.f32.mrb[4].mxu1 }
 0x1cb   : > { %v1073_v21 = vpop.f32.mrb[5].mxu1 }
 0x1cc   : > { %v3173_v48 = vpop.f32.mrb[6].mxu1 }
 0x1cd   : > { %v1076_v27 = vpop.f32.mrb[7].mxu1 }
 0x1d2   : > { %v4413_v9 = vpop.f32.mrb[8].mxu1 }
 0x1d3   : > { %v4415_v57 = vpop.f32.mrb[9].mxu1 }
 0x1d4   : > { %v4417_v49 = vpop.f32.mrb[10].mxu1 }
 0x1d5   : > { %v4419_v14 = vpop.f32.mrb[11].mxu1 }
 0x1da   : > { %v4421_v50 = vpop.f32.mrb[12].mxu1 }
 0x1db   : > { %v4423_v52 = vpop.f32.mrb[13].mxu1 }
 0x1dc   : > { %v4425_v56 = vpop.f32.mrb[14].mxu1 }
 0x1dd   : > { %v4427_v22 = vpop.f32.mrb[15].mxu1 }
 0x1e2   : > { %v4429_v1 = vpop.f32.mrb[16].mxu1 }
 0x1e3   : > { %v4431_v47 = vpop.f32.mrb[17].mxu1 }
 0x1e4   : > { %v4433_v53 = vpop.f32.mrb[18].mxu1 }
 0x1e5   : > { %v4435_v55 = vpop.f32.mrb[19].mxu1 }
 0x1ea   : > { %v4437_v44 = vpop.f32.mrb[20].mxu1 }
 0x1eb   : > { %v4439_v42 = vpop.f32.mrb[21].mxu1 }
 0x1ec   : > { %v4441_v58 = vpop.f32.mrb[22].mxu1 }
 0x1ed   : > { %v4443_v18 = vpop.f32.mrb[23].mxu1 }
 0x1f2   : > { %v4445_v59 = vpop.f32.mrb[24].mxu1 }
 0x1f3   : > { %v4447_v60 = vpop.f32.mrb[25].mxu1 }
 0x1f4   : > { %v4449_v10 = vpop.f32.mrb[26].mxu1 }
 0x1f5   : > { %v4451_v61 = vpop.f32.mrb[27].mxu1 }
 0x1fe   : > { %v4453_v31 = vpop.f32.mrb[28].mxu1 }
 0x1ff   : > { %v4455_v63 = vpop.f32.mrb[29].mxu1  ;;  %v3264_v36 = vpop.f32.mrb[0].mxu0 }
 0x200   : > { %v3336_v51 = vadd.f32 %v3264_v36, %v3168_v16  ;;  %v4459_v35 = vpop.f32.mrb[30].mxu1  ;;  %v1676_v28 = vpop.f32.mrb[1].mxu0 }
 0x201   : > { %v3337_v6 = vadd.f32 %v1676_v28, %v1057_v39  ;;  %v4461_v19 = vpop.f32.mrb[31].mxu1  ;;  %v3265_v15 = vpop.f32.mrb[2].mxu0 }
 0x202   : > { %v1864_v17 = vadd.f32 %v3336_v51, %v4457_v3  ;;  %v3338_v12 = vadd.f32 %v3265_v15, %v3169_v30  ;;  %v1679_v5 = vpop.f32.mrb[3].mxu0 }
 0x203   : > { %v1862_v43 = vadd.f32 %v3337_v6, %v4457_v3  ;;  %v3339_v7 = vadd.f32 %v1679_v5, %v1060_v46 }
 0x204   : > { %v1865_v62 = vadd.f32 %v3338_v12, %v4457_v3  ;;  %v1900_v2 = vmax.f32 %v1864_v17, 0.0 }
 0x205   : > { %v1863_v20 = vadd.f32 %v3339_v7, %v4457_v3  ;;  %v1898_v13 = vmax.f32 %v1862_v43, 0.0 }
 0x206   : > { %v1901_v32 = vmax.f32 %v1865_v62, 0.0 }
 0x207   : > { %v1899_v11 = vmax.f32 %v1863_v20, 0.0  ;;  %v3268_v8 = vpop.f32.mrb[4].mxu0 }
 0x208   : > { %v1935_v23 = vpack.c.bf16 %v1901_v32, %v1900_v2  ;;  %v3340_v0 = vadd.f32 %v3268_v8, %v3172_v40  ;;  %v1692_v24 = vpop.f32.mrb[5].mxu0 }
 0x209   : > { %v1934_v26 = vpack.c.bf16 %v1899_v11, %v1898_v13  ;;  %v3341_v29 = vadd.f32 %v1692_v24, %v1073_v21  ;;  %v3269_v34 = vpop.f32.mrb[6].mxu0 }
 0x20a   : > { %v1868_v54 = vadd.f32 %v3340_v0, %v4457_v3  ;;  %v3342_v33 = vadd.f32 %v3269_v34, %v3173_v48  ;;  %v1695_v25 = vpop.f32.mrb[7].mxu0 }
 0x20b   : > { %v1866_v38 = vadd.f32 %v3341_v29, %v4457_v3  ;;  %v3343_v45 = vadd.f32 %v1695_v25, %v1076_v27  ;;  %3300 = vmatprep.mubr.msk.bf16.mxu1 %vm1960_vm7, %v1934_v26 }
 0x20c   : > { %v1869_v37 = vadd.f32 %v3342_v33, %v4457_v3  ;;  %3301 = vmatmul.mubr.msk.bf16.vlgmr.msra.gmra.mrb[36].mxu1 %vm1960_vm7, %v1935_v23  ;;  %v1904_v4 = vmax.f32 %v1868_v54, 0.0 }
 0x20d   : > { %v1867_v41 = vadd.f32 %v3343_v45, %v4457_v3  ;;  %v1902_v39 = vmax.f32 %v1866_v38, 0.0 }
 0x20e   : > { %v1905_v16 = vmax.f32 %v1869_v37, 0.0 }
 0x20f   : > { %v1903_v30 = vmax.f32 %v1867_v41, 0.0  ;;  %v3272_v46 = vpop.f32.mrb[8].mxu0 }
 0x210   : > { %v1937_v40 = vpack.c.bf16 %v1905_v16, %v1904_v4  ;;  %v3344_v21 = vadd.f32 %v3272_v46, %v4413_v9  ;;  %v1708_v48 = vpop.f32.mrb[9].mxu0 }
 0x211   : > { %v1936_v36 = vpack.c.bf16 %v1903_v30, %v1902_v39  ;;  %v3345_v27 = vadd.f32 %v1708_v48, %v4415_v57  ;;  %v3273_v51 = vpop.f32.mrb[10].mxu0  ;;  %v4475_v28 = vpop.f32.mrb[32].mxu1 }
 0x212   : > { %v1872_v6 = vadd.f32 %v3344_v21, %v4457_v3  ;;  %v3346_v15 = vadd.f32 %v3273_v51, %v4417_v49  ;;  %v1711_v17 = vpop.f32.mrb[11].mxu0  ;;  %v4479_v12 = vpop.f32.mrb[33].mxu1 }
 0x213   : > { %v1870_v5 = vadd.f32 %v3345_v27, %v4457_v3  ;;  %v3347_v43 = vadd.f32 %v1711_v17, %v4419_v14  ;;  %3304 = vmatprep.mubr.msk.bf16.mxu1 %vm1960_vm7, %v1936_v36  ;;  %v4484_v9 = vpop.f32.mrb[34].mxu1 }
 0x214   : > { %v1873_v57 = vadd.f32 %v3346_v15, %v4457_v3  ;;  %3305 = vmatmul.mubr.msk.bf16.gmra.mrb[40].mxu1 %vm1960_vm7, %v1937_v40  ;;  %v4488_v7 = vpop.f32.mrb[35].mxu1  ;;  %v1908_v49 = vmax.f32 %v1872_v6, 0.0 }
 0x215   : > { %v1871_v62 = vadd.f32 %v3347_v43, %v4457_v3  ;;  %v1906_v2 = vmax.f32 %v1870_v5, 0.0 }
 0x216   : > { %v1909_v20 = vmax.f32 %v1873_v57, 0.0 }
 0x217   : > { %v1907_v32 = vmax.f32 %v1871_v62, 0.0  ;;  %v3276_v13 = vpop.f32.mrb[12].mxu0 }
 0x218   : > { %v1939_v11 = vpack.c.bf16 %v1909_v20, %v1908_v49  ;;  %v3348_v14 = vadd.f32 %v3276_v13, %v4421_v50  ;;  %v1724_v8 = vpop.f32.mrb[13].mxu0 }
 0x219   : > { %v1938_v23 = vpack.c.bf16 %v1907_v32, %v1906_v2  ;;  %v3349_v0 = vadd.f32 %v1724_v8, %v4423_v52  ;;  %v3277_v24 = vpop.f32.mrb[14].mxu0 }
 0x21a   : > { %v1876_v26 = vadd.f32 %v3348_v14, %v4457_v3  ;;  %v3350_v29 = vadd.f32 %v3277_v24, %v4425_v56  ;;  %v1727_v34 = vpop.f32.mrb[15].mxu0 }
 0x21b   : > { %v1874_v54 = vadd.f32 %v3349_v0, %v4457_v3  ;;  %v3351_v33 = vadd.f32 %v1727_v34, %v4427_v22  ;;  %3308 = vmatprep.mubr.msk.bf16.mxu1 %vm1960_vm7, %v1938_v23 }
 0x21c   : > { %v1877_v25 = vadd.f32 %v3350_v29, %v4457_v3  ;;  %3309 = vmatmul.mubr.msk.bf16.gmra.mrb[44].mxu1 %vm1960_vm7, %v1939_v11  ;;  %v1912_v38 = vmax.f32 %v1876_v26, 0.0 }
 0x21d   : > { %v1875_v50 = vadd.f32 %v3351_v33, %v4457_v3  ;;  %v1910_v45 = vmax.f32 %v1874_v54, 0.0 }
 0x21e   : > { %v1913_v52 = vmax.f32 %v1877_v25, 0.0 }
 0x21f   : > { %v1911_v37 = vmax.f32 %v1875_v50, 0.0  ;;  %v3280_v41 = vpop.f32.mrb[16].mxu0 }
 0x220   : > { %v1941_v4 = vpack.c.bf16 %v1913_v52, %v1912_v38  ;;  %v3352_v56 = vadd.f32 %v3280_v41, %v4429_v1  ;;  %v1740_v16 = vpop.f32.mrb[17].mxu0 }
 0x221   : > { %v1940_v39 = vpack.c.bf16 %v1911_v37, %v1910_v45  ;;  %v3353_v22 = vadd.f32 %v1740_v16, %v4431_v47  ;;  %v3281_v30 = vpop.f32.mrb[18].mxu0 }
 0x222   : > { %v1880_v46 = vadd.f32 %v3352_v56, %v4457_v3  ;;  %v3354_v40 = vadd.f32 %v3281_v30, %v4433_v53  ;;  %v1743_v21 = vpop.f32.mrb[19].mxu0 }
 0x223   : > { %v1878_v48 = vadd.f32 %v3353_v22, %v4457_v3  ;;  %v3355_v36 = vadd.f32 %v1743_v21, %v4435_v55  ;;  %3312 = vmatprep.mubr.msk.bf16.mxu1 %vm1960_vm7, %v1940_v39 }
 0x224   : > { %v1881_v27 = vadd.f32 %v3354_v40, %v4457_v3  ;;  %3313 = vmatmul.mubr.msk.bf16.gmra.mrb[48].mxu1 %vm1960_vm7, %v1941_v4  ;;  %v1916_v51 = vmax.f32 %v1880_v46, 0.0 }
 0x225   : > { %v1879_v1 = vadd.f32 %v3355_v36, %v4457_v3  ;;  %v1914_v6 = vmax.f32 %v1878_v48, 0.0 }
 0x226   : > { %v1917_v47 = vmax.f32 %v1881_v27, 0.0 }
 0x227   : > { %v1915_v15 = vmax.f32 %v1879_v1, 0.0  ;;  %v3284_v17 = vpop.f32.mrb[20].mxu0 }
 0x228   : > { %v1943_v5 = vpack.c.bf16 %v1917_v47, %v1916_v51  ;;  %v3356_v53 = vadd.f32 %v3284_v17, %v4437_v44  ;;  %v1756_v43 = vpop.f32.mrb[21].mxu0 }
 0x229   : > { %v1942_v57 = vpack.c.bf16 %v1915_v15, %v1914_v6  ;;  %v3357_v55 = vadd.f32 %v1756_v43, %v4439_v42  ;;  %v3285_v62 = vpop.f32.mrb[22].mxu0 }
 0x22a   : > { %v1884_v49 = vadd.f32 %v3356_v53, %v4457_v3  ;;  %v3358_v20 = vadd.f32 %v3285_v62, %v4441_v58  ;;  %v1759_v2 = vpop.f32.mrb[23].mxu0 }
 0x22b   : > { %v1882_v32 = vadd.f32 %v3357_v55, %v4457_v3  ;;  %v3359_v13 = vadd.f32 %v1759_v2, %v4443_v18  ;;  %3316 = vmatprep.mubr.msk.bf16.mxu1 %vm1960_vm7, %v1942_v57 }
 0x22c   : > { %v1885_v11 = vadd.f32 %v3358_v20, %v4457_v3  ;;  %3317 = vmatmul.mubr.msk.bf16.gmra.mrb[52].mxu1 %vm1960_vm7, %v1943_v5  ;;  %v1920_v14 = vmax.f32 %v1884_v49, 0.0 }
 0x22d   : > { %v1883_v44 = vadd.f32 %v3359_v13, %v4457_v3  ;;  %v1918_v8 = vmax.f32 %v1882_v32, 0.0 }
 0x22e   : > { %v1921_v42 = vmax.f32 %v1885_v11, 0.0 }
 0x22f   : > { %v1919_v23 = vmax.f32 %v1883_v44, 0.0  ;;  %v3288_v0 = vpop.f32.mrb[24].mxu0  ;;  %v3487_v44 = vld [vmem:[%s3804_s22 + $0x14] sm:$0xf] }
 0x230   : > { %v1945_v24 = vpack.c.bf16 %v1921_v42, %v1920_v14  ;;  %v3360_v58 = vadd.f32 %v3288_v0, %v4445_v59  ;;  %v1772_v26 = vpop.f32.mrb[25].mxu0  ;;  %v2199_v14 = vunpack.c.l.bf16 %v3487_v44  ;;  %v3488_v42 = vld [vmem:[%s3804_s22 + $0x8] sm:$0xf]  ;;  %v3490_v0 = vld [vmem:[%s3804_s22 + $0x18] sm:$0xf] }
 0x231   : > { %v1944_v29 = vpack.c.bf16 %v1919_v23, %v1918_v8  ;;  %v3361_v18 = vadd.f32 %v1772_v26, %v4447_v60  ;;  %v3289_v34 = vpop.f32.mrb[26].mxu0  ;;  %v3489_v8 = vld [vmem:[%s3804_s22 + $0xc] sm:$0xf] }
 0x232   : > { %v1888_v54 = vadd.f32 %v3360_v58, %v4457_v3  ;;  %v3362_v33 = vadd.f32 %v3289_v34, %v4449_v10  ;;  %v1775_v25 = vpop.f32.mrb[27].mxu0  ;;  %v2197_v23 = vunpack.c.l.bf16 %v3489_v8  ;;  %v2276_v26 = vrot.slane %v2199_v14, 3 }
 0x233   : > { %v1886_v50 = vadd.f32 %v3361_v18, %v4457_v3  ;;  %v3363_v38 = vadd.f32 %v1775_v25, %v4451_v61  ;;  %3320 = vmatprep.mubr.msk.bf16.mxu1 %vm1960_vm7, %v1944_v29  ;;  %v3492_v25 = vld [vmem:[%s3804_s22 + $0x24] sm:$0xf] }
 0x234   : > { %v1889_v52 = vadd.f32 %v3362_v33, %v4457_v3  ;;  %3321 = vmatmul.mubr.msk.bf16.gmra.mrb[56].mxu1 %vm1960_vm7, %v1945_v24  ;;  %v1924_v45 = vmax.f32 %v1888_v54, 0.0  ;;  %v2200_v24 = vunpack.c.l.bf16 %v3490_v0  ;;  %v2272_v18 = vrot.slane %v2197_v23, 3  ;;  %v3491_v54 = vld [vmem:[%s3804_s22 + $0x20] sm:$0xf] }
 0x235   : > { %v1887_v59 = vadd.f32 %v3363_v38, %v4457_v3  ;;  %v1922_v37 = vmax.f32 %v1886_v50, 0.0  ;;  %v2202_v33 = vunpack.c.l.bf16 %v3491_v54  ;;  %v2203_v50 = vunpack.c.l.bf16 %v3492_v25  ;;  %v3493_v38 = vld [vmem:[%s3804_s22 + $0x1c] sm:$0xf]  ;;  %v3499_v0 = vld [vmem:[%s3804_s22 + $0x40] sm:$0xf] }
 0x236   : > { %v1925_v60 = vmax.f32 %v1889_v52, 0.0  ;;  %v2278_v34 = vrot.slane %v2200_v24, 3  ;;  %v2201_v52 = vunpack.c.l.bf16 %v3493_v38  ;;  %v2210_v24 = vunpack.c.l.bf16 %v3499_v0 }
 0x237   : > { %v1923_v41 = vmax.f32 %v1887_v59, 0.0  ;;  %v3292_v4 = vpop.f32.mrb[28].mxu0  ;;  %v4561_v59 = vld [vmem:[#allocation6] ss:$0 sm:$0xff] }
 0x238   : > { %v1947_v56 = vpack.c.bf16 %v1925_v60, %v1924_v45  ;;  %v3364_v10 = vadd.f32 %v3292_v4, %v4453_v31  ;;  %v1788_v16 = vpop.f32.mrb[29].mxu0  ;;  %v3494_v45 = vld [vmem:[%s3804_s22 + $0x28] sm:$0xf] }
 0x239   : > { %v1946_v39 = vpack.c.bf16 %v1923_v41, %v1922_v37  ;;  %v3365_v61 = vadd.f32 %v1788_v16, %v4455_v63  ;;  %v3293_v22 = vpop.f32.mrb[30].mxu0  ;;  %v2204_v60 = vunpack.c.l.bf16 %v3494_v45  ;;  %v2284_v16 = vrot.slane %v2203_v50, 3  ;;  %v3502_v50 = vld [vmem:[%s3804_s22 + $0x48] sm:$0xf] }
 0x23a   : > { %v1892_v30 = vadd.f32 %v3364_v10, %v4457_v3  ;;  %v3366_v46 = vadd.f32 %v3293_v22, %v4459_v35  ;;  %v1791_v40 = vpop.f32.mrb[31].mxu0  ;;  %v2282_v10 = vrot.slane %v2202_v33, 3  ;;  %v2212_v38 = vunpack.c.l.bf16 %v3502_v50 }
 0x23b   : > { %v1890_v21 = vadd.f32 %v3365_v61, %v4457_v3  ;;  %v3367_v48 = vadd.f32 %v1791_v40, %v4461_v19  ;;  %3324 = vmatprep.mubr.msk.bf16.mxu1 %vm1960_vm7, %v1946_v39 }
 0x23c   : > { %v1893_v36 = vadd.f32 %v3366_v46, %v4457_v3  ;;  %3325 = vmatmul.mubr.msk.bf16.gmra.mrb[60].mxu1 %vm1960_vm7, %v1947_v56  ;;  %v1928_v27 = vmax.f32 %v1892_v30, 0.0  ;;  %v2279_v56 = vsel %vm2270_vm8, %v2276_v26, %v2278_v34  ;;  %v2280_v30 = vrot.slane %v2201_v52, 3 }
 0x23d   : > { %v1891_v31 = vadd.f32 %v3367_v48, %v4457_v3  ;;  %v1926_v1 = vmax.f32 %v1890_v21, 0.0  ;;  %v2286_v21 = vrot.slane %v2204_v60, 3 }
 0x23e   : > { %v1929_v63 = vmax.f32 %v1893_v36, 0.0 }
 0x23f   : > { %v1927_v51 = vmax.f32 %v1891_v31, 0.0  ;;  %v3296_v47 = vpop.f32.mrb[32].mxu0 }
 0x240   : > { %v1949_v6 = vpack.c.bf16 %v1929_v63, %v1928_v27  ;;  %v3368_v35 = vadd.f32 %v3296_v47, %v4475_v28  ;;  %v1804_v15 = vpop.f32.mrb[33].mxu0  ;;  %v3495_v27 = vld [vmem:[%s3804_s22 + $0x30] sm:$0xf] }
 0x241   : > { %v1948_v17 = vpack.c.bf16 %v1927_v51, %v1926_v1  ;;  %v3369_v19 = vadd.f32 %v1804_v15, %v4479_v12  ;;  %v3297_v5 = vpop.f32.mrb[34].mxu0  ;;  %v2206_v63 = vunpack.c.l.bf16 %v3495_v27  ;;  %v3496_v1 = vld [vmem:[%s3804_s22 + $0x34] sm:$0xf]  ;;  %v3497_v15 = vld [vmem:[%s3804_s22 + $0x2c] sm:$0xf] }
 0x242   : > { %v1896_v53 = vadd.f32 %v3368_v35, %v4457_v3  ;;  %v3370_v43 = vadd.f32 %v3297_v5, %v4484_v9  ;;  %v1807_v57 = vpop.f32.mrb[35].mxu0  ;;  %v2207_v51 = vunpack.c.l.bf16 %v3496_v1  ;;  %v2285_v35 = vsel %vm2270_vm8, %v2282_v10, %v2284_v16 }
 0x243   : > { %v1894_v55 = vadd.f32 %v3369_v19, %v4457_v3  ;;  %v3371_v62 = vadd.f32 %v1807_v57, %v4488_v7  ;;  %3328 = vmatprep.mubr.msk.bf16.mxu1 %vm1960_vm7, %v1948_v17  ;;  %v3486_v7 = vld [vmem:[%s3804_s22 + $0x10] sm:$0xf]  ;;  %v2205_v17 = vunpack.c.l.bf16 %v3497_v15 }
 0x244   : > { %v1897_v28 = vadd.f32 %v3370_v43, %v4457_v3  ;;  %3329 = vmatmul.mubr.msk.bf16.gmra.mrb[64].mxu1 %vm1960_vm7, %v1949_v6  ;;  %v1932_v49 = vmax.f32 %v1896_v53, 0.0  ;;  %v2198_v11 = vunpack.c.l.bf16 %v3486_v7  ;;  %v2281_v53 = vsel %vm2270_vm8, %v2278_v34, %v2280_v30  ;;  %v3498_v43 = vld [vmem:[%s3804_s22 + $0x38] sm:$0xf] }
 0x245   : > { %v1895_v12 = vadd.f32 %v3371_v62, %v4457_v3  ;;  %v1930_v20 = vmax.f32 %v1894_v55, 0.0  ;;  %v2196_v3 = vunpack.c.l.bf16 %v3488_v42  ;;  %v2208_v57 = vunpack.c.l.bf16 %v3498_v43 }
 0x246   : > { %v1933_v9 = vmax.f32 %v1897_v28, 0.0  ;;  %v2274_v58 = vrot.slane %v2198_v11, 3  ;;  %v2287_v28 = vsel %vm2270_vm8, %v2284_v16, %v2286_v21  ;;  %v2288_v7 = vrot.slane %v2205_v17, 3  ;;  %v3504_v17 = vld [vmem:[%s3804_s22 + $0x54] sm:$0xf] }
 0x247   : > { %v1931_v2 = vmax.f32 %v1895_v12, 0.0  ;;  %v2271_v29 = vrot.slane %v2196_v3, 3  ;;  %v2283_v12 = vsel %vm2270_vm8, %v2280_v30, %v2282_v10  ;;  %v4595_v3 = vrot.slane %v2208_v57, 3 }
 0x248   : > { %v1951_v32 = vpack.c.bf16 %v1933_v9, %v1932_v49  ;;  %v2277_v37 = vsel %vm2270_vm8, %v2274_v58, %v2276_v26  ;;  %v2275_v22 = vsel %vm2270_vm8, %v2272_v18, %v2274_v58  ;;  %v2290_v9 = vrot.slane %v2206_v63, 3  ;;  %v3500_v58 = vld [vmem:[%s3804_s22 + $0x44] sm:$0xf]  ;;  %v3503_v63 = vld [vmem:[%s3804_s22 + $0x50] sm:$0xf] }
 0x249   : > { %v1950_v13 = vpack.c.bf16 %v1931_v2, %v1930_v20  ;;  %v2273_v4 = vsel %vm2270_vm8, %v2271_v29, %v2272_v18  ;;  %v2292_v20 = vrot.slane %v2207_v51, 3  ;;  %v2211_v26 = vunpack.c.l.bf16 %v3500_v58  ;;  %v3501_v29 = vld [vmem:[%s3804_s22 + $0x3c] sm:$0xf]  ;;  %v3506_v58 = vld [vmem:[%s3804_s22 + $0x58] sm:$0xf] }
 0x24a   : > { %v2209_v18 = vunpack.c.l.bf16 %v3501_v29  ;;  %v2214_v1 = vunpack.c.l.bf16 %v3503_v63  ;;  %v3509_v63 = vld [vmem:[%s3804_s22 + $0x5c] sm:$0xf] }
 0x24b   : > { %3332 = vmatprep.mubr.msk.bf16.mxu1 %vm1960_vm7, %v1950_v13  ;;  %v2293_v60 = vsel %vm2270_vm8, %v2290_v9, %v2292_v20  ;;  %v2300_v30 = vrot.slane %v2211_v26, 3  ;;  %v2216_v26 = vunpack.c.l.bf16 %v3506_v58 }
 0x24c   : > { %3333 = vmatmul.mubr.msk.bf16.gmra.mrb[68].mxu1 %vm1960_vm7, %v1951_v32 }
 0x2df   : > { %v3302_v41 = vpop.f32.mrb[36].mxu1 }
 0x2e0   : > { %v2062_v39 = vadd.f32 %v3302_v41, %v4561_v59  ;;  %v2053_v61 = vpop.f32.mrb[37].mxu1 }
 0x2e1   : > { %v2054_v46 = vadd.f32 %v4561_v59, %v2053_v61  ;;  %v3303_v40 = vpop.f32.mrb[38].mxu1  ;;  %v2298_v61 = vrot.slane %v2210_v24, 3 }
 0x2e2   : > { %v2382_v48 = vadd.f32 %v2277_v37, %v2062_v39  ;;  %v2065_v36 = vadd.f32 %v3303_v40, %v4561_v59  ;;  %v2056_v31 = vpop.f32.mrb[39].mxu1  ;;  %v2291_v39 = vsel %vm2270_vm8, %v2288_v7, %v2290_v9  ;;  %v4615_v40 = vrot.slane %v2212_v38, 3 }
 0x2e3   : > { %v2380_v47 = vadd.f32 %v2273_v4, %v2054_v46  ;;  %v2057_v6 = vadd.f32 %v4561_v59, %v2056_v31  ;;  %v2289_v4 = vsel %vm2270_vm8, %v2286_v21, %v2288_v7  ;;  %v2296_v46 = vrot.slane %v2209_v18, 3 }
 0x2e4   : > { %v3029_v19 = vpack.c.bf16 %v2382_v48, %v2382_v48  ;;  %v2383_v5 = vadd.f32 %v2279_v56, %v2065_v36  ;;  %v2295_v56 = vsel %vm2270_vm8, %v2292_v20, %v4595_v3  ;;  %v2301_v29 = vsel %vm2270_vm8, %v2298_v61, %v2300_v30 }
 0x2e5   : > { %v3027_v55 = vpack.c.bf16 %v2380_v47, %v2380_v47  ;;  %v2381_v62 = vadd.f32 %v2275_v22, %v2057_v6  ;;  %v2297_v18 = vsel %vm2270_vm8, %v4595_v3, %v2296_v46 }
 0x2e6   : > { %v3030_v49 = vpack.c.bf16 %v2383_v5, %v2383_v5  ;;  %v2951_v11 = vrot.slane %v3029_v19, 9  ;;  %v2215_v19 = vunpack.c.l.bf16 %v3504_v17 }
 0x2e7   : > { %2442 = vst.msk [vmem:[%s4580_s24] sm:$0xf] %vm2441_vm9, %v3027_v55  ;;  %v3028_v32 = vpack.c.bf16 %v2381_v62, %v2381_v62  ;;  %v3306_v13 = vpop.f32.mrb[40].mxu1 }
 0x2e8   : > { %v2457_v44 = vrot.slane %v3030_v49, 5  ;;  %v2078_v14 = vadd.f32 %v3306_v13, %v4561_v59  ;;  %v2069_v42 = vpop.f32.mrb[41].mxu1 }
 0x2e9   : > { %2443 = vst.msk [vmem:[%s4580_s24 + $0x4] sm:$0xf] %vm2441_vm9, %v3028_v32  ;;  %v2070_v8 = vadd.f32 %v4561_v59, %v2069_v42  ;;  %v3307_v23 = vpop.f32.mrb[42].mxu1  ;;  %v3505_v42 = vld [vmem:[%s3804_s22 + $0x4c] sm:$0xf] }
 0x2ea   : > { %v2458_v34 = vsel %vm4590_vm13, %v2951_v11, %v2457_v44  ;;  %v2386_v54 = vadd.f32 %v2285_v35, %v2078_v14  ;;  %v2081_v33 = vadd.f32 %v3307_v23, %v4561_v59  ;;  %v2072_v25 = vpop.f32.mrb[43].mxu1  ;;  %v2459_v48 = vrot.slane %v2457_v44, 4 }
 0x2eb   : > { %2952 = vst.msk [vmem:[%s4580_s24 + $0x8] sm:$0xf] %vm2441_vm9, %v2458_v34  ;;  %v2384_v52 = vadd.f32 %v2281_v53, %v2070_v8  ;;  %v2073_v45 = vadd.f32 %v4561_v59, %v2072_v25  ;;  %v2306_v44 = vrot.slane %v2214_v1, 3  ;;  %v2308_v14 = vrot.slane %v2215_v19, 3 }
 0x2ec   : > { %v3033_v37 = vpack.c.bf16 %v2386_v54, %v2386_v54  ;;  %v2387_v41 = vadd.f32 %v2287_v28, %v2081_v33  ;;  %v2213_v8 = vunpack.c.l.bf16 %v3505_v42  ;;  %v2217_v1 = vunpack.c.l.bf16 %v3509_v63 }
 0x2ed   : > { %v3031_v10 = vpack.c.bf16 %v2384_v52, %v2384_v52  ;;  %v2385_v16 = vadd.f32 %v2283_v12, %v2073_v45  ;;  %v2303_v45 = vsel %vm2270_vm8, %v2300_v30, %v4615_v40 }
 0x2ee   : > { %v3034_v22 = vpack.c.bf16 %v2387_v41, %v2387_v41  ;;  %v2961_v51 = vrot.slane %v3033_v37, 11  ;;  %v2480_v62 = vrot.slane %v3033_v37, 6  ;;  %v2304_v37 = vrot.slane %v2213_v8, 3 }
 0x2ef   : > { %v2460_v36 = vrot.slane %v3031_v10, 5  ;;  %v3032_v31 = vpack.c.bf16 %v2385_v16, %v2385_v16  ;;  %v3310_v27 = vpop.f32.mrb[44].mxu1  ;;  %v2956_v53 = vrot.slane %v3031_v10, 10  ;;  %v4668_v10 = vrot.slane %v2216_v26, 3 }
 0x2f0   : > { %v2497_v47 = vrot.slane %v3034_v22, 7  ;;  %v2094_v35 = vadd.f32 %v3310_v27, %v4561_v59  ;;  %v2085_v15 = vpop.f32.mrb[45].mxu1  ;;  %v3507_v22 = vld [vmem:[%s3804_s22 + $0x60] sm:$0xf] }
 0x2f1   : > { %v2461_v5 = vsel %vm4590_vm13, %v2459_v48, %v2460_v36  ;;  %v2477_v43 = vrot.slane %v3032_v31, 6  ;;  %v2086_v57 = vadd.f32 %v4561_v59, %v2085_v15  ;;  %v3311_v55 = vpop.f32.mrb[46].mxu1  ;;  %v2218_v30 = vunpack.c.l.bf16 %v3507_v22  ;;  %v3510_v15 = vld [vmem:[%s3804_s22 + $0x68] sm:$0xf] }
 0x2f2   : > { %2953 = vst.msk [vmem:[%s4580_s24 + $0xc] sm:$0xf] %vm2441_vm9, %v2461_v5  ;;  %v2498_v28 = vsel %vm4619_vm1, %v2961_v51, %v2497_v47  ;;  %v2390_v12 = vadd.f32 %v2293_v60, %v2094_v35  ;;  %v2097_v49 = vadd.f32 %v3311_v55, %v4561_v59  ;;  %v2088_v9 = vpop.f32.mrb[47].mxu1  ;;  %v2499_v34 = vrot.slane %v2497_v47, 4 }
 0x2f3   : > { %2962 = vst.msk [vmem:[%s4580_s24 + $0x18] sm:$0xf] %vm2441_vm9, %v2498_v28  ;;  %v2478_v20 = vsel %vm4626_vm2, %v2956_v53, %v2477_v43  ;;  %v2479_v32 = vrot.slane %v2477_v43, 4  ;;  %v2388_v13 = vadd.f32 %v2289_v4, %v2086_v57  ;;  %v2089_v7 = vadd.f32 %v4561_v59, %v2088_v9 }
 0x2f4   : > { %2957 = vst.msk [vmem:[%s4580_s24 + $0x10] sm:$0xf] %vm2441_vm9, %v2478_v20  ;;  %v3037_v11 = vpack.c.bf16 %v2390_v12, %v2390_v12  ;;  %v2391_v33 = vadd.f32 %v2295_v56, %v2097_v49  ;;  %v2299_v60 = vsel %vm2270_vm8, %v2296_v46, %v2298_v61  ;;  %v2309_v56 = vsel %vm2270_vm8, %v2306_v44, %v2308_v14  ;;  %v3508_v46 = vld [vmem:[%s3804_s22 + $0x64] sm:$0xf] }
 0x2f5   : > { %v2481_v23 = vsel %vm4626_vm2, %v2479_v32, %v2480_v62  ;;  %v3035_v0 = vpack.c.bf16 %v2388_v13, %v2388_v13  ;;  %v2389_v24 = vadd.f32 %v2291_v39, %v2089_v7  ;;  %v2219_v48 = vunpack.c.l.bf16 %v3508_v46 }
 0x2f6   : > { %2958 = vst.msk [vmem:[%s4580_s24 + $0x14] sm:$0xf] %vm2441_vm9, %v2481_v23  ;;  %2967 = vst.msk [vmem:[%s4580_s24 + $0x24] sm:$0xf] %vm2441_vm9, %v3037_v11  ;;  %v3038_v36 = vpack.c.bf16 %v2391_v33, %v2391_v33  ;;  %v2305_v35 = vsel %vm2270_vm8, %v4615_v40, %v2304_v37  ;;  %v2220_v17 = vunpack.c.l.bf16 %v3510_v15  ;;  %v2311_v53 = vsel %vm2270_vm8, %v2308_v14, %v4668_v10 }
 0x2f7   : > { %v2500_v54 = vrot.slane %v3035_v0, 7  ;;  %v3036_v25 = vpack.c.bf16 %v2389_v24, %v2389_v24  ;;  %v3314_v50 = vpop.f32.mrb[48].mxu1  ;;  %v2307_v43 = vsel %vm2270_vm8, %v2304_v37, %v2306_v44  ;;  %v2314_v62 = vrot.slane %v2218_v30, 3 }
 0x2f8   : > { %v2110_v38 = vadd.f32 %v3314_v50, %v4561_v59  ;;  %v2101_v52 = vpop.f32.mrb[49].mxu1  ;;  %v2316_v28 = vrot.slane %v2219_v48, 3  ;;  %v2971_v12 = vrot.slane %v3038_v36, 9  ;;  %v2312_v40 = vrot.slane %v2217_v1, 3 }
 0x2f9   : > { %v2501_v3 = vsel %vm4619_vm1, %v2499_v34, %v2500_v54  ;;  %2966 = vst.msk [vmem:[%s4580_s24 + $0x20] sm:$0xf] %vm2441_vm9, %v3036_v25  ;;  %v2102_v41 = vadd.f32 %v4561_v59, %v2101_v52  ;;  %v3315_v4 = vpop.f32.mrb[50].mxu1  ;;  %v4687_v14 = vrot.slane %v2220_v17, 3  ;;  %v3511_v25 = vld [vmem:[%s3804_s22 + $0x70] sm:$0xf] }
 0x2fa   : > { %2963 = vst.msk [vmem:[%s4580_s24 + $0x1c] sm:$0xf] %vm2441_vm9, %v2501_v3  ;;  %v2394_v16 = vadd.f32 %v2301_v29, %v2110_v38  ;;  %v2113_v39 = vadd.f32 %v3315_v4, %v4561_v59  ;;  %v2104_v61 = vpop.f32.mrb[51].mxu1  ;;  %v2222_v50 = vunpack.c.l.bf16 %v3511_v25  ;;  %v2317_v22 = vsel %vm2270_vm8, %v2314_v62, %v2316_v28 }
 0x2fb   : > { %v2392_v31 = vadd.f32 %v2297_v18, %v2102_v41  ;;  %v2105_v27 = vadd.f32 %v4561_v59, %v2104_v61  ;;  %v3513_v41 = vld [vmem:[%s3804_s22 + $0x6c] sm:$0xf]  ;;  %v2313_v30 = vsel %vm2270_vm8, %v4668_v10, %v2312_v40  ;;  %v2319_v36 = vsel %vm2270_vm8, %v2316_v28, %v4687_v14 }
 0x2fc   : > { %v3041_v51 = vpack.c.bf16 %v2394_v16, %v2394_v16  ;;  %v2395_v47 = vadd.f32 %v2303_v45, %v2113_v39  ;;  %v2221_v4 = vunpack.c.l.bf16 %v3513_v41 }
 0x2fd   : > { %v3039_v19 = vpack.c.bf16 %v2392_v31, %v2392_v31  ;;  %v2393_v5 = vadd.f32 %v2299_v60, %v2105_v27  ;;  %v3512_v60 = vld [vmem:[%s3804_s22 + $0x74] sm:$0xf]  ;;  %v2315_v31 = vsel %vm2270_vm8, %v2312_v40, %v2314_v62  ;;  %v2322_v27 = vrot.slane %v2222_v50, 3 }
 0x2fe   : > { %v2543_v57 = vrot.slane %v3041_v51, 6  ;;  %v4683_v55 = vpack.c.bf16 %v2395_v47, %v2395_v47  ;;  %v2223_v37 = vunpack.c.l.bf16 %v3512_v60 }
 0x2ff   : > { %v2526_v49 = vrot.slane %v3039_v19, 5  ;;  %v3040_v9 = vpack.c.bf16 %v2393_v5, %v2393_v5  ;;  %v3318_v20 = vpop.f32.mrb[52].mxu1  ;;  %v2320_v19 = vrot.slane %v2221_v4, 3 }
 0x300   : > { %v2545_v32 = vrot.slane %v2543_v57, 4  ;;  %v2546_v13 = vrot.slane %v4683_v55, 6  ;;  %v2126_v7 = vadd.f32 %v3318_v20, %v4561_v59  ;;  %v2117_v11 = vpop.f32.mrb[53].mxu1  ;;  %v2981_v63 = vrot.slane %v4683_v55, 11  ;;  %v3516_v20 = vld [vmem:[%s3804_s22 + $0x84] sm:$0xf] }
 0x301   : > { %v2527_v44 = vsel %vm4590_vm13, %v2971_v12, %v2526_v49  ;;  %v2528_v42 = vrot.slane %v2526_v49, 4  ;;  %v2529_v8 = vrot.slane %v3040_v9, 5  ;;  %v2976_v23 = vrot.slane %v3040_v9, 10  ;;  %v3319_v0 = vpop.f32.mrb[54].mxu1  ;;  %v3515_v49 = vld [vmem:[%s3804_s22 + $0x80] sm:$0xf] }
 0x302   : > { %2972 = vst.msk [vmem:[%s4580_s24 + $0x28] sm:$0xf] %vm2441_vm9, %v2527_v44  ;;  %v2547_v24 = vsel %vm4626_vm2, %v2545_v32, %v2546_v13  ;;  %v2398_v58 = vadd.f32 %v2309_v56, %v2126_v7  ;;  %v2118_v26 = vadd.f32 %v4561_v59, %v2117_v11  ;;  %v2129_v29 = vadd.f32 %v3319_v0, %v4561_v59  ;;  %v2120_v18 = vpop.f32.mrb[55].mxu1  ;;  %v3514_v56 = vld [vmem:[%s3804_s22 + $0x78] sm:$0xf] }
 0x303   : > { %2978 = vst.msk [vmem:[%s4580_s24 + $0x34] sm:$0xf] %vm2441_vm9, %v2547_v24  ;;  %v2530_v34 = vsel %vm4590_vm13, %v2528_v42, %v2529_v8  ;;  %v2544_v54 = vsel %vm4626_vm2, %v2976_v23, %v2543_v57  ;;  %v2121_v33 = vadd.f32 %v4561_v59, %v2120_v18  ;;  %v2224_v16 = vunpack.c.l.bf16 %v3514_v56  ;;  %v3517_v11 = vld [vmem:[%s3804_s22 + $0x7c] sm:$0xf]  ;;  %v3518_v23 = vld [vmem:[%s3804_s22 + $0x88] sm:$0xf] }
 0x304   : > { %2973 = vst.msk [vmem:[%s4580_s24 + $0x2c] sm:$0xf] %vm2441_vm9, %v2530_v34  ;;  %2977 = vst.msk [vmem:[%s4580_s24 + $0x30] sm:$0xf] %vm2441_vm9, %v2544_v54  ;;  %v3045_v38 = vpack.c.bf16 %v2398_v58, %v2398_v58  ;;  %v2396_v52 = vadd.f32 %v2305_v35, %v2118_v26  ;;  %v2399_v45 = vadd.f32 %v2311_v53, %v2129_v29  ;;  %v2324_v35 = vrot.slane %v2223_v37, 3 }
 0x305   : > { %v2397_v3 = vadd.f32 %v2307_v43, %v2121_v33  ;;  %v2326_v5 = vrot.slane %v2224_v16, 3  ;;  %v2226_v9 = vunpack.c.l.bf16 %v3515_v49  ;;  %v2227_v40 = vunpack.c.l.bf16 %v3516_v20  ;;  %v3521_v20 = vld [vmem:[%s3804_s22 + $0x8c] sm:$0xf] }
 0x306   : > { %2986 = vst.msk [vmem:[%s4580_s24 + $0x40] sm:$0xf] %vm2441_vm9, %v3045_v38  ;;  %v3043_v39 = vpack.c.bf16 %v2396_v52, %v2396_v52  ;;  %v3046_v61 = vpack.c.bf16 %v2399_v45, %v2399_v45  ;;  %v2225_v44 = vunpack.c.l.bf16 %v3517_v11  ;;  %v2228_v0 = vunpack.c.l.bf16 %v3518_v23 }
 0x307   : > { %v3044_v46 = vpack.c.bf16 %v2397_v3, %v2397_v3  ;;  %v3322_v48 = vpop.f32.mrb[56].mxu1  ;;  %v2325_v58 = vsel %vm2270_vm8, %v2322_v27, %v2324_v35  ;;  %v2321_v26 = vsel %vm2270_vm8, %v4687_v14, %v2320_v19  ;;  %v2327_v29 = vsel %vm2270_vm8, %v2324_v35, %v2326_v5 }
 0x308   : > { %v2560_v1 = vrot.slane %v3043_v39, 7  ;;  %2987 = vst.msk [vmem:[%s4580_s24 + $0x44] sm:$0xf] %vm2441_vm9, %v3046_v61  ;;  %v2142_v51 = vadd.f32 %v3322_v48, %v4561_v59  ;;  %v2133_v47 = vpop.f32.mrb[57].mxu1  ;;  %v2323_v54 = vsel %vm2270_vm8, %v2320_v19, %v2322_v27  ;;  %v2330_v33 = vrot.slane %v2226_v9, 3 }
 0x309   : > { %v2563_v10 = vrot.slane %v3044_v46, 7  ;;  %v2134_v15 = vadd.f32 %v4561_v59, %v2133_v47  ;;  %v3323_v17 = vpop.f32.mrb[58].mxu1  ;;  %v2332_v25 = vrot.slane %v2227_v40, 3  ;;  %v2328_v60 = vrot.slane %v2225_v44, 3 }
 0x30a   : > { %v2561_v53 = vsel %vm4619_vm1, %v2981_v63, %v2560_v1  ;;  %v2562_v43 = vrot.slane %v2560_v1, 4  ;;  %v2402_v57 = vadd.f32 %v2317_v22, %v2142_v51  ;;  %v2145_v55 = vadd.f32 %v3323_v17, %v4561_v59  ;;  %v2136_v62 = vpop.f32.mrb[59].mxu1  ;;  %v3519_v63 = vld [vmem:[%s3804_s22 + $0x90] sm:$0xf] }
 0x30b   : > { %2982 = vst.msk [vmem:[%s4580_s24 + $0x38] sm:$0xf] %vm2441_vm9, %v2561_v53  ;;  %v2400_v28 = vadd.f32 %v2313_v30, %v2134_v15  ;;  %v2137_v12 = vadd.f32 %v4561_v59, %v2136_v62  ;;  %v4746_v4 = vrot.slane %v2228_v0, 3  ;;  %v2333_v27 = vsel %vm2270_vm8, %v2330_v33, %v2332_v25  ;;  %v3520_v53 = vld [vmem:[%s3804_s22 + $0x94] sm:$0xf] }
 0x30c   : > { %v2564_v32 = vsel %vm4619_vm1, %v2562_v43, %v2563_v10  ;;  %v3049_v13 = vpack.c.bf16 %v2402_v57, %v2402_v57  ;;  %v2403_v7 = vadd.f32 %v2319_v36, %v2145_v55  ;;  %v2230_v1 = vunpack.c.l.bf16 %v3519_v63 }
 0x30d   : > { %2983 = vst.msk [vmem:[%s4580_s24 + $0x3c] sm:$0xf] %vm2441_vm9, %v2564_v32  ;;  %v3047_v42 = vpack.c.bf16 %v2400_v28, %v2400_v28  ;;  %v2401_v8 = vadd.f32 %v2315_v31, %v2137_v12  ;;  %v2329_v10 = vsel %vm2270_vm8, %v2326_v5, %v2328_v60  ;;  %v2335_v19 = vsel %vm2270_vm8, %v2332_v25, %v4746_v4  ;;  %v3522_v32 = vld [vmem:[%s3804_s22 + $0x98] sm:$0xf] }
 0x30e   : > { %v3050_v24 = vpack.c.bf16 %v2403_v7, %v2403_v7  ;;  %v2996_v50 = vrot.slane %v3049_v13, 10  ;;  %v2593_v56 = vrot.slane %v3049_v13, 5  ;;  %v2231_v43 = vunpack.c.l.bf16 %v3520_v53 }
 0x30f   : > { %v3048_v18 = vpack.c.bf16 %v2401_v8, %v2401_v8  ;;  %v3326_v34 = vpop.f32.mrb[60].mxu1  ;;  %v2991_v37 = vrot.slane %v3047_v42, 9  ;;  %v2331_v12 = vsel %vm2270_vm8, %v2328_v60, %v2330_v33  ;;  %v2338_v9 = vrot.slane %v2230_v1, 3 }
 0x310   : > { %v2607_v38 = vrot.slane %v3050_v24, 6  ;;  %v2158_v52 = vadd.f32 %v3326_v34, %v4561_v59  ;;  %v2149_v45 = vpop.f32.mrb[61].mxu1  ;;  %v2229_v40 = vunpack.c.l.bf16 %v3521_v20  ;;  %v2232_v13 = vunpack.c.l.bf16 %v3522_v32 }
 0x311   : > { %v2590_v3 = vrot.slane %v3048_v18, 5  ;;  %v2150_v14 = vadd.f32 %v4561_v59, %v2149_v45  ;;  %v3327_v41 = vpop.f32.mrb[62].mxu1 }
 0x312   : > { %v2608_v16 = vsel %vm4626_vm2, %v2996_v50, %v2607_v38  ;;  %v2406_v39 = vadd.f32 %v2325_v58, %v2158_v52  ;;  %v2161_v61 = vadd.f32 %v3327_v41, %v4561_v59  ;;  %v2152_v22 = vpop.f32.mrb[63].mxu1  ;;  %v2609_v57 = vrot.slane %v2607_v38, 4 }
 0x313   : > { %2997 = vst.msk [vmem:[%s4580_s24 + $0x50] sm:$0xf] %vm2441_vm9, %v2608_v16  ;;  %v2591_v30 = vsel %vm4590_vm13, %v2991_v37, %v2590_v3  ;;  %v2592_v46 = vrot.slane %v2590_v3, 4  ;;  %v2404_v48 = vadd.f32 %v2321_v26, %v2150_v14  ;;  %v2153_v36 = vadd.f32 %v4561_v59, %v2152_v22 }
 0x314   : > { %2992 = vst.msk [vmem:[%s4580_s24 + $0x48] sm:$0xf] %vm2441_vm9, %v2591_v30  ;;  %v2407_v31 = vadd.f32 %v2327_v29, %v2161_v61  ;;  %v3053_v15 = vpack.c.bf16 %v2406_v39, %v2406_v39  ;;  %v2340_v26 = vrot.slane %v2231_v43, 3  ;;  %v2336_v50 = vrot.slane %v2229_v40, 3 }
 0x315   : > { %v2594_v51 = vsel %vm4590_vm13, %v2592_v46, %v2593_v56  ;;  %v3051_v47 = vpack.c.bf16 %v2404_v48, %v2404_v48  ;;  %v2405_v35 = vadd.f32 %v2323_v54, %v2153_v36  ;;  %v2342_v60 = vrot.slane %v2232_v13, 3 }
 0x316   : > { %2993 = vst.msk [vmem:[%s4580_s24 + $0x4c] sm:$0xf] %vm2441_vm9, %v2594_v51  ;;  %v3054_v17 = vpack.c.bf16 %v2407_v31, %v2407_v31  ;;  %v2627_v23 = vrot.slane %v3053_v15, 7  ;;  %v2341_v56 = vsel %vm2270_vm8, %v2338_v9, %v2340_v26  ;;  %v2337_v30 = vsel %vm2270_vm8, %v4746_v4, %v2336_v50 }
 0x317   : > { %v2610_v55 = vrot.slane %v3051_v47, 6  ;;  %v3052_v62 = vpack.c.bf16 %v2405_v35, %v2405_v35  ;;  %v3330_v28 = vpop.f32.mrb[64].mxu1  ;;  %v3001_v11 = vrot.slane %v3051_v47, 11  ;;  %v2343_v31 = vsel %vm2270_vm8, %v2340_v26, %v2342_v60 }
 0x318   : > { %3006 = vst.msk [vmem:[%s4580_s24 + $0x60] sm:$0xf] %vm2441_vm9, %v3054_v17  ;;  %v2174_v5 = vadd.f32 %v3330_v28, %v4561_v59  ;;  %v2165_v49 = vpop.f32.mrb[65].mxu1  ;;  %v2339_v47 = vsel %vm2270_vm8, %v2336_v50, %v2338_v9 }
 0x319   : > { %v2611_v7 = vsel %vm4626_vm2, %v2609_v57, %v2610_v55  ;;  %v2624_v44 = vrot.slane %v3052_v62, 7  ;;  %v2166_v42 = vadd.f32 %v4561_v59, %v2165_v49  ;;  %v3331_v8 = vpop.f32.mrb[66].mxu1 }
 0x31a   : > { %2998 = vst.msk [vmem:[%s4580_s24 + $0x54] sm:$0xf] %vm2441_vm9, %v2611_v7  ;;  %v2410_v0 = vadd.f32 %v2333_v27, %v2174_v5  ;;  %v2177_v24 = vadd.f32 %v3331_v8, %v4561_v59  ;;  %v2168_v58 = vpop.f32.mrb[67].mxu1 }
 0x31b   : > { %v2625_v29 = vsel %vm4619_vm1, %v3001_v11, %v2624_v44  ;;  %v2626_v18 = vrot.slane %v2624_v44, 4  ;;  %v2408_v34 = vadd.f32 %v2329_v10, %v2166_v42  ;;  %v2169_v54 = vadd.f32 %v4561_v59, %v2168_v58 }
 0x31c   : > { %3002 = vst.msk [vmem:[%s4580_s24 + $0x58] sm:$0xf] %vm2441_vm9, %v2625_v29  ;;  %v3057_v33 = vpack.c.bf16 %v2410_v0, %v2410_v0  ;;  %v2411_v25 = vadd.f32 %v2335_v19, %v2177_v24 }
 0x31d   : > { %v2628_v38 = vsel %vm4619_vm1, %v2626_v18, %v2627_v23  ;;  %v3055_v52 = vpack.c.bf16 %v2408_v34, %v2408_v34  ;;  %v2409_v45 = vadd.f32 %v2331_v12, %v2169_v54 }
 0x31e   : > { %3003 = vst.msk [vmem:[%s4580_s24 + $0x5c] sm:$0xf] %vm2441_vm9, %v2628_v38  ;;  %v2653_v37 = vrot.slane %v3057_v33, 5  ;;  %v3058_v3 = vpack.c.bf16 %v2411_v25, %v2411_v25 }
 0x31f   : > { %3007 = vst.msk [vmem:[%s4580_s24 + $0x64] sm:$0xf] %vm2441_vm9, %v3055_v52  ;;  %v3056_v14 = vpack.c.bf16 %v2409_v45, %v2409_v45  ;;  %v3334_v41 = vpop.f32.mrb[68].mxu1 }
 0x320   : > { %v2655_v16 = vrot.slane %v2653_v37, 4  ;;  %v2656_v39 = vrot.slane %v3058_v3, 5  ;;  %v2190_v61 = vadd.f32 %v3334_v41, %v4561_v59  ;;  %v2181_v22 = vpop.f32.mrb[69].mxu1  ;;  %v3016_v55 = vrot.slane %v3058_v3, 10 }
 0x321   : > { %v3011_v46 = vrot.slane %v3056_v14, 9  ;;  %v2182_v48 = vadd.f32 %v4561_v59, %v2181_v22  ;;  %v3335_v36 = vpop.f32.mrb[70].mxu1 }
 0x322   : > { %v2657_v27 = vsel %vm4590_vm13, %v2655_v16, %v2656_v39  ;;  %v2414_v63 = vadd.f32 %v2341_v56, %v2190_v61  ;;  %v2193_v1 = vadd.f32 %v3335_v36, %v4561_v59  ;;  %v2184_v51 = vpop.f32.mrb[71].mxu1 }
 0x323   : > { %3013 = vst.msk [vmem:[%s4580_s24 + $0x6c] sm:$0xf] %vm2441_vm9, %v2657_v27  ;;  %v2654_v4 = vsel %vm4590_vm13, %v3011_v46, %v2653_v37  ;;  %v2412_v35 = vadd.f32 %v2337_v30, %v2182_v48  ;;  %v2185_v10 = vadd.f32 %v4561_v59, %v2184_v51 }
 0x324   : > { %3012 = vst.msk [vmem:[%s4580_s24 + $0x68] sm:$0xf] %vm2441_vm9, %v2654_v4  ;;  %v3061_v15 = vpack.c.bf16 %v2414_v63, %v2414_v63  ;;  %v2415_v17 = vadd.f32 %v2343_v31, %v2193_v1 }
 0x325   : > { %v3059_v19 = vpack.c.bf16 %v2412_v35, %v2412_v35  ;;  %v2413_v53 = vadd.f32 %v2339_v47, %v2185_v10 }
 0x326   : > { %v2687_v43 = vrot.slane %v3061_v15, 7  ;;  %v3062_v57 = vpack.c.bf16 %v2415_v17, %v2415_v17 }
 0x327   : > { %v2670_v62 = vrot.slane %v3059_v19, 6  ;;  %v3060_v28 = vpack.c.bf16 %v2413_v53, %v2413_v53 }
 0x328   : > { %v2689_v2 = vrot.slane %v2687_v43, 4  ;;  %v2690_v12 = vrot.slane %v3062_v57, 7 }
 0x329   : > { %v2671_v59 = vsel %vm4626_vm2, %v3016_v55, %v2670_v62  ;;  %v2672_v5 = vrot.slane %v2670_v62, 4  ;;  %v2673_v49 = vrot.slane %v3060_v28, 6  ;;  %v3021_v9 = vrot.slane %v3060_v28, 11 }
 0x32a   : > { %3017 = vst.msk [vmem:[%s4580_s24 + $0x70] sm:$0xf] %vm2441_vm9, %v2671_v59  ;;  %v2691_v20 = vsel %vm4619_vm1, %v2689_v2, %v2690_v12 }
 0x32b   : > { %3023 = vst.msk [vmem:[%s4580_s24 + $0x7c] sm:$0xf] %vm2441_vm9, %v2691_v20  ;;  %v2674_v40 = vsel %vm4626_vm2, %v2672_v5, %v2673_v49  ;;  %v2688_v32 = vsel %vm4619_vm1, %v3021_v9, %v2687_v43 }
 0x32c   : > { %3018 = vst.msk [vmem:[%s4580_s24 + $0x74] sm:$0xf] %vm2441_vm9, %v2674_v40  ;;  %3022 = vst.msk [vmem:[%s4580_s24 + $0x78] sm:$0xf] %vm2441_vm9, %v2688_v32 }
 0x32d PF: > { %s17_s20 = sadd.s32 1, %s3637_s20   ;;  %s4856_s18 = smov %s3633_s19 }
 0x32e   : > { %p14_p5 = scmp.ge.s32.totalorder %s17_s20, 4   ;;  %s4857_s19 = smov %s4859_s26 }
 0x330   :  { %16 = sbr.rel (!%p14_p5) target bundleno = 3 (0x3), region = 99 }
 0x337   :  { %2729 = vsyncpa [#allocation3], 1 }
 0x338   :  { %2731 = vsyncpa [#allocation3 + $0x1], 1 }
 0x339   :  { %2732 = vsyncpa [#allocation5], 1 }

// kernel: bottom_decoder_forward.8
= control target key start
LH: loop header
LB: loop body
LE: loop exit
PB: predicated region body
PF: predicated region fallthrough
CT: control target
= control target key end

     0   :  { %8 = vsyncpa [#allocation3], 0  ;;  %s1968_s12 = smov 0   ;;  %s1970_s13 = smov 0   ;;  %s2645_s0 = inlined_call_operand.vmem [shape: bf16[2,342,32], index: 0, kind: input, shape index: {}]   ;;  %s2646_s1 = inlined_call_operand.vmem [shape: bf16[288,64], index: 1, kind: input, shape index: {}]   ;;  %s2647_s2 = inlined_call_operand.hbm [shape: f32[1,64], index: 2, kind: input, shape index: {}]   ;;  %s2648_s3 = inlined_call_operand.vmem [shape: bf16[2,16,16,64], index: 3, kind: output, shape index: {}]  }
   0x1   :  { %s1972_s14 = smov 0   ;;  %s1974_s15 = smov 0  }
   0x2   :  { %s1976_s16 = smov 0  }
   0x3 LB: > { %s1451_s17 = sadd.s32 4294967295, %s1941_s16   ;;  %s23_s18 = sadd.s32 1, %s1933_s14  ;;  %s1941_s16 = sphi %s1976_s16, %s14_s16   ;;  %s1937_s15 = sphi %s1974_s15, %s2666_s15   ;;  %s1933_s14 = sphi %s1972_s14, %s2665_s14   ;;  %s1929_s13 = sphi %s1970_s13, %s2664_s13   ;;  %s1925_s12 = sphi %s1968_s12, %s2663_s12  }
   0x4   : > { %p24_p0 = scmp.ge.s32.totalorder %s23_s18, 2  ;;  %s26_s19 = sadd.s32 1, %s1937_s15 }
   0x5   : > { %p1453_p1 = scmp.ge.s32.totalorder %s1941_s16, 1  ;;  %p127_p2 = scmp.lt.s32.totalorder %s1941_s16, 5 }
   0x6   : > { %s2668_s18 = smov (%p24_p0, %s23_s18), 0  ;;  %s2670_s19 = smov (!%p24_p0, %s26_s19), %s1937_s15 }
   0x7   : > { %p2001_p3 = pnand %p1453_p1, %p127_p2  ;;  %p28_p4 = scmp.ge.s32.totalorder %s2670_s19, 2 }
   0x8   : > { %p2005_p5 = scmp.eq.s32.totalorder %s1451_s17, 0  ;;  %s1943_s22 = smov [#allocation2]  }
   0x9   : > { %s2652_s20 = scalar_select %p2001_p3, 1, 0 }
   0xa   : > { %s2653_s21 = scalar_select %p2005_p5, 1, 0 }
   0xb   : > { %p1788_p6 = pneg %p2001_p3  ;;  %s2672_s19 = smov (%p28_p4, %s2670_s19), 0 }
   0xc   : > { %s143_s23 = sshll.u32 %s1943_s22, 4  ;;  %s1871_s27 = scalar_lea.hbm %s2647_s2, 16  ;;  %s144_s23 = int_to_ptr.vmem [resolvable:$true] %s143_s23 }
   0xd   : > { %p2015_p7 = pnand %p2005_p5, %p1788_p6  ;;  %p1872_p8 = scmp.ne.s32.totalorder %s2647_s2, %s1871_s27 }
   0xe   : > { %p1878_p12 = scmp.lt.u32.totalorder %s1871_s27, %s2647_s2 }
   0xf   : > { %p1873_p9 = pneg %p2015_p7 }
  0x11   : > { %p1874_p10 = pnand %p1873_p9, %p1872_p8 }
  0x13   : > { %p1875_p11 = pneg %p1874_p10 }
  0x15   : > { %p1880_p13 = pnand %p1878_p12, %p1875_p11 }
  0x17   : > { %1883 = shalt.err (!%p1880_p13)
}
  0x18   : > { %s1884_s5 = scalar_lea.vmem %s144_s23, 16  ;;  %s1891_s6 = scalar_lea.vmem %s144_s23, 32 }
  0x19   : > { %p1885_p0 = scmp.ne.s32.totalorder %s144_s23, %s1884_s5  ;;  %p1892_p4 = scmp.lt.s32.totalorder %s144_s23, %s144_s23 }
  0x1a   : > { %p1893_p6 = scmp.lt.s32.totalorder %s1891_s6, %s1884_s5 }
  0x1b   : > { %p1887_p1 = pnand %p1885_p0, %p1873_p9 }
  0x1c   : > { %p1894_p5 = por %p1893_p6, %p1892_p4 }
  0x1d   : > { %p1888_p2 = pneg %p1887_p1 }
  0x1f   : > { %p1895_p3 = pnand %p1894_p5, %p1888_p2 }
  0x21   : > { %1898 = shalt.err (!%p1895_p3)
}
  0x22   : > { %1791 = dma.hbm_to_vmem [thread:$0]  (!%p2015_p7), %s2647_s2, 16, %s144_s23, [#allocation3]  }
  0x23   : > { %p2655_p8 = scmp.ne.s32.totalorder %s2652_s20, 0 }
  0x24   : > { %p2656_p10 = scmp.ne.s32.totalorder (!%p2655_p8), %s2653_s21, 0 }
  0x25   : > { %164 = sbr.rel (%p2655_p8) target bundleno = 515 (0x203), region = 32 }
  0x2c   : > { %1920 = dma.done.wait (%p2656_p10), [#allocation3], 16  }
  0x2d   : > { %1922 = vsyncadd (%p2656_p10), [#allocation3], 4294967280  ;;  %p193_p5 = scmp.lt.s32.totalorder %s1929_s13, 1  ;;  %s210_s9 = smul.u32 144, %s1925_s12  ;;  %v1944_v0 = vmov 0.0   ;;  %vm381_vm0 = vcmask 1046528  }
  0x2e   : > { %1627 = vmatprep.subr.bf16.mxu0 %v1944_v0  ;;  %1771 = vmatprep.subr.bf16.mxu1 %v1944_v0  ;;  %v1852_v1 = vld [vmem:[%s2646_s1 + $0x30] sm:$0xff]   ;;  %vm286_vm1 = vsmask.f32 7424  ;;  %s1945_s26 = smov 64   ;;  %s1946_s27 = smov 32   ;;  %v1854_v41 = vld [vmem:[%s2646_s1 + $0x38] sm:$0xff]  }
  0x2f   : > { %s2674_s13 = smov (!%p193_p5, %s1929_s13), 1  ;;  %s211_s10 = sshra.s32 %s210_s9, 3  ;;  %1628 = vmatpush3.bf16.msra.mxu0 %v1852_v1  ;;  %1777 = vmatpush3.bf16.msra.mxu1 %v1852_v1  ;;  %v1855_v47 = vld [vmem:[%s2646_s1 + $0x40] sm:$0xff]   ;;  %v1856_v57 = vld [vmem:[%s2646_s1 + $0x48] sm:$0xff]   ;;  %vm1947_vm2 = vmmov 0   ;;  %vm419_vm3 = vcmask 261120  }
  0x30   : > { %s1783_s11 = smul.u32 172, %s2674_s13  ;;  %s1463_s17 = sshll.u32 %s211_s10, 2  ;;  %1629 = vmatprep.subr.bf16.mxu0 %v1944_v0  ;;  %1772 = vmatprep.subr.bf16.mxu1 %v1944_v0  ;;  %vm438_vm4 = vcmask 523264   ;;  %vm596_vm5 = vcmask 785408   ;;  %vm953_vm6 = vcmask 1045504   ;;  %vm1218_vm7 = vcmask 519168  }
  0x31   : > { %1639 = vmatprep.mubr.msk.bf16.mxu0 %vm1947_vm2, %v1944_v0  ;;  %1659 = vmatprep.mubr.msk.bf16.mxu1 %vm1947_vm2, %v1944_v0  ;;  %vm1229_vm8 = vcmask 1042432   ;;  %vm1230_vm9 = vcmask 1046532   ;;  %vm1249_vm11 = vcmask 1041408   ;;  %vm1250_vm12 = vcmask 1045508  }
  0x32   : > { %s197_s21 = scalar_lea.vmem %s2645_s0, %s1783_s11  ;;  %vm2538_vm10 = vmor %vm1229_vm8, %vm1230_vm9  ;;  %vm1269_vm14 = vcmask 1040384   ;;  %vm1270_vm15 = vcmask 1044484  }
  0x33   : > { %s2052_s23 = scalar_lea.vmem %s197_s21, %s1463_s17  ;;  %1630 = vmatpush3.bf16.msra.mxu0 %v1854_v41  ;;  %1778 = vmatpush3.bf16.msra.mxu1 %v1854_v41  ;;  %s1459_s21 = sshll.u32 %s1925_s12, 3  ;;  %vm2551_vm13 = vmor %vm1249_vm11, %vm1250_vm12 }
  0x34   : > { %v2058_v2 = vld [vmem:[%s2052_s23 + $0x30] sm:$0xff]   ;;  %v2061_v3 = vld [vmem:[%s2052_s23 + $0x38] sm:$0xff]   ;;  %v2068_v6 = vld [vmem:[%s2052_s23 + $0x8] sm:$0xff]   ;;  %1631 = vmatprep.subr.bf16.mxu0 %v1944_v0  ;;  %1773 = vmatprep.subr.bf16.mxu1 %v1944_v0  ;;  %p201_p3 = scmp.lt.s32.totalorder %s1459_s21, 15 }
  0x35   : > { %v393_v4 = vrot.slane %v2058_v2, 1  ;;  %v395_v5 = vrot.slane %v2061_v3, 1  ;;  %v2071_v7 = vld [vmem:[%s2052_s23 + $0x10] sm:$0xff]   ;;  %v2074_v8 = vld [vmem:[%s2052_s23 + $0x18] sm:$0xff]   ;;  %v343_v9 = vshll.u32 %v2061_v3, 16  ;;  %v383_v11 = vrot.slane %v2068_v6, 1 }
  0x36   : > { %v385_v12 = vrot.slane %v2071_v7, 1  ;;  %v295_v13 = vshll.u32 %v2068_v6, 16  ;;  %v2084_v14 = vld [vmem:[%s2052_s23 + $0x40] sm:$0xff]   ;;  %v387_v15 = vrot.slane %v2074_v8, 1  ;;  %v299_v16 = vshrl.u32 %v2068_v6, 16  ;;  %v2135_v48 = vld [vmem:[%s2052_s23 + $0x28] sm:$0xff]  }
  0x37   : > { %v396_v10 = vsel %vm381_vm0, %v393_v4, %v395_v5  ;;  %v303_v17 = vshll.u32 %v2071_v7, 16  ;;  %v307_v18 = vshrl.u32 %v2071_v7, 16  ;;  %v2097_v21 = vrot.slane %v2084_v14, 1  ;;  %v2103_v26 = vld [vmem:[%s2052_s23 + $0x20] sm:$0xff]   ;;  %v2109_v31 = vld [vmem:[%s2052_s23 + $0x48] sm:$0xf]  ;;  %1632 = vmatpush3.bf16.msra.mxu0 %v1855_v47  ;;  %1779 = vmatpush3.bf16.msra.mxu1 %v1855_v47 }
  0x38   : > { %413 = vrot.lane.b32.xlu0 %v396_v10, %s1945_s26  ;;  %v386_v19 = vsel %vm381_vm0, %v383_v11, %v385_v12  ;;  %v2094_v20 = vrot.slane %v295_v13, 1  ;;  %v311_v22 = vshll.u32 %v2074_v8, 16  ;;  %v345_v24 = vrot.slane %v343_v9, 1  ;;  %v234_v32 = vld [vmem:[%s2052_s23 + $0x4c] sm:$0xf]  ;;  %1633 = vmatprep.subr.bf16.mxu0 %v1944_v0  ;;  %v1857_v9 = vld [vmem:[%s2646_s1 + $0x50] sm:$0xff]  }
  0x39   : > { %403 = vrot.lane.b32.xlu1 %v386_v19, %s1945_s26  ;;  %v305_v23 = vrot.slane %v303_v17, 1  ;;  %v347_v25 = vshrl.u32 %v2061_v3, 16  ;;  %v388_v27 = vsel %vm381_vm0, %v385_v12, %v387_v15  ;;  %v351_v30 = vshll.u32 %v2084_v14, 16  ;;  %v2147_v56 = vld [vmem:[%s2052_s23 + $0x50] sm:$0xf]  ;;  %1774 = vmatprep.subr.bf16.mxu1 %v1944_v0  ;;  %v1858_v19 = vld [vmem:[%s2646_s1 + $0x58] sm:$0xff]  }
  0x3a   : > { %v301_v28 = vor.u32 %v299_v16, %v2094_v20  ;;  %v313_v29 = vrot.slane %v311_v22, 1  ;;  %v335_v34 = vshll.u32 %v2058_v2, 16  ;;  %v339_v35 = vshrl.u32 %v2058_v2, 16  ;;  %s2676_s21 = smov (!%p201_p3, %s1459_s21), 15 }
  0x3b   : > { %v309_v33 = vor.u32 %v307_v18, %v305_v23  ;;  %v398_v37 = vsel %vm381_vm0, %v395_v5, %v2097_v21  ;;  %v349_v38 = vor.u32 %v347_v25, %v345_v24  ;;  %v353_v39 = vrot.slane %v351_v30, 1  ;;  %1634 = vmatpush3.bf16.msra.mxu0 %v1856_v57  ;;  %1780 = vmatpush3.bf16.msra.mxu1 %v1856_v57  ;;  %s1460_s12 = sshll.u32 %s2676_s21, 1 }
  0x3c   : > { %v306_v36 = vsel %vm286_vm1, %v301_v28, %v305_v23  ;;  %v2119_v40 = vrot.slane %v335_v34, 1  ;;  %v315_v43 = vshrl.u32 %v2074_v8, 16  ;;  %v319_v44 = vshll.u32 %v2103_v26, 16  ;;  %1635 = vmatprep.subr.bf16.mxu0 %v1944_v0  ;;  %1775 = vmatprep.subr.bf16.mxu1 %v1944_v0 }
  0x3d   : > { %405 = vrot.lane.b32.xlu1 %v388_v27, %s1945_s26  ;;  %365 = vrot.lane.b32.xlu0 %v306_v36, %s1946_s27  ;;  %v314_v42 = vsel %vm286_vm1, %v309_v33, %v313_v29  ;;  %v2128_v45 = vcombine.low %v2109_v31, %v234_v32  ;;  %v354_v49 = vsel %vm286_vm1, %v349_v38, %v353_v39  ;;  %v389_v50 = vrot.slane %v2103_v26, 1 }
  0x3e   : > { %v341_v46 = vor.u32 %v339_v35, %v2119_v40  ;;  %v355_v51 = vshrl.u32 %v2084_v14, 16  ;;  %v317_v53 = vor.u32 %v315_v43, %v313_v29  ;;  %v321_v54 = vrot.slane %v319_v44, 1  ;;  %v236_v35 = vld [vmem:[%s2052_s23 + $0x54] sm:$0xf] }
  0x3f   : > { %v476_v55 = vshll.u32 %v2128_v45, 16  ;;  %v390_v58 = vsel %vm381_vm0, %v387_v15, %v389_v50  ;;  %v323_v60 = vshrl.u32 %v2103_v26, 16  ;;  %v327_v61 = vshll.u32 %v2135_v48, 16  ;;  %1636 = vmatpush3.bf16.msra.mxu0 %v1857_v9  ;;  %1781 = vmatpush3.bf16.msra.mxu1 %v1857_v9 }
  0x40   : > { %v346_v52 = vsel %vm286_vm1, %v341_v46, %v345_v24  ;;  %v2156_v59 = vor.u32 %v355_v51, %v353_v39  ;;  %v322_v62 = vsel %vm286_vm1, %v317_v53, %v321_v54  ;;  %v2162_v1 = vrot.slane %v2128_v45, 1  ;;  %1637 = vmatprep.subr.bf16.mxu0 %v1944_v0  ;;  %v2195_v24 = vld [vmem:[%s2052_s23] sm:$0xff]   ;;  %1776 = vmatprep.subr.bf16.mxu1 %v1944_v0  ;;  %v2227_v46 = vld [vmem:[%s2052_s23 + $0x58] ss:$0 sps:$4 sm:$0x77]   ;;  %s1461_s23 = sshll.u32 %s2674_s13, 5 }
  0x41   : > { %415 = vrot.lane.b32.xlu1 %v398_v37, %s1945_s26  ;;  %367 = vrot.lane.b32.xlu0 %v314_v42, %s1946_s27  ;;  %v478_v63 = vrot.slane %v476_v55, 1  ;;  %v2166_v5 = vcombine.low %v2147_v56, %v2147_v56  ;;  %v325_v10 = vor.u32 %v323_v60, %v321_v54  ;;  %v329_v12 = vrot.slane %v327_v61, 1  ;;  %s205_s24 = sadd.s32 %s1461_s23, %s1460_s12 }
  0x42   : > { %v391_v13 = vrot.slane %v2135_v48, 1  ;;  %v498_v16 = vsel %vm381_vm0, %v2097_v21, %v2162_v1  ;;  %v480_v17 = vshrl.u32 %v2128_v45, 16  ;;  %v331_v29 = vshrl.u32 %v2135_v48, 16  ;;  %s1462_s25 = sshll.u32 %s205_s24, 2 }
  0x43   : > { %v479_v15 = vsel %vm286_vm1, %v2156_v59, %v478_v63  ;;  %v484_v18 = vshll.u32 %v2166_v5, 16  ;;  %v499_v23 = vrot.slane %v2166_v5, 1  ;;  %v330_v25 = vsel %vm286_vm1, %v325_v10, %v329_v12  ;;  %1638 = vmatpush3.bf16.msra.mxu0 %v1858_v19  ;;  %1782 = vmatpush3.bf16.msra.mxu1 %v1858_v19 }
  0x44   : > { %v392_v22 = vsel %vm381_vm0, %v389_v50, %v391_v13  ;;  %v482_v27 = vor.u32 %v480_v17, %v478_v63  ;;  %1723 = vmatprep.subr.bf16.mxu0 %v1944_v0  ;;  %1675 = vmatprep.subr.bf16.mxu1 %v1944_v0  ;;  %v290_v30 = vshll.u32 %v2195_v24, 16  ;;  %v333_v34 = vor.u32 %v331_v29, %v329_v12 }
  0x45   : > { %377 = vrot.lane.b32.xlu1 %v354_v49, %s1946_s27  ;;  %375 = vrot.lane.b32.xlu0 %v346_v52, %s1946_s27  ;;  %v486_v28 = vrot.slane %v484_v18, 1  ;;  %v500_v33 = vsel %vm381_vm0, %v2162_v1, %v499_v23  ;;  %v394_v36 = vsel %vm381_vm0, %v391_v13, %v393_v4  ;;  %v488_v37 = vshrl.u32 %v2166_v5, 16 }
  0x46   : > { %v338_v38 = vsel %vm286_vm1, %v333_v34, %v2119_v40  ;;  %v288_v39 = vshrl.u32 %v2195_v24, 16  ;;  %v292_v41 = vrot.slane %v290_v30, 1  ;;  %v2221_v42 = vcombine.low %v2147_v56, %v236_v35 }
  0x47   : > { %v487_v32 = vsel %vm286_vm1, %v482_v27, %v486_v28  ;;  %v490_v43 = vor.u32 %v488_v37, %v486_v28  ;;  %v382_v44 = vrot.slane %v2195_v24, 1  ;;  %v903_v50 = vshll.u32 %v2227_v46, 16 }
  0x48   : > { %v293_v4 = vor.u32 %v292_v41, %v288_v39  ;;  %v895_v47 = vshll.u32 %v2221_v42, 16  ;;  %v916_v49 = vrot.slane %v2221_v42, 1  ;;  %v899_v53 = vshrl.u32 %v2221_v42, 16 }
  0x49   : > { %369 = vrot.lane.b32.xlu0 %v322_v62, %s1946_s27  ;;  %407 = vrot.lane.b32.xlu1 %v390_v58, %s1945_s26  ;;  %v384_v40 = vsel %vm381_vm0, %v382_v44, %v383_v11  ;;  %v1473_v54 = vcombine.low %v2109_v31, %v2109_v31  ;;  %v905_v55 = vrot.slane %v903_v50, 1  ;;  %v918_v11 = vrot.slane %v2227_v46, 1  ;;  %v1862_v44 = vld [vmem:[%s2646_s1 + $0x8] sm:$0xff]  }
  0x4a   : > { %v298_v51 = vsel %vm286_vm1, %v293_v4, %v2094_v20  ;;  %v897_v52 = vrot.slane %v895_v47, 1  ;;  %v917_v57 = vsel %vm381_vm0, %v2162_v1, %v916_v49  ;;  %v907_v31 = vshrl.u32 %v2227_v46, 16 }
  0x4b   : > { %v359_v20 = vshll.u32 %v1473_v54, 16  ;;  %v919_v61 = vsel %vm381_vm0, %v916_v49, %v918_v11  ;;  %v399_v9 = vrot.slane %v1473_v54, 1 }
  0x4c   : > { %v898_v56 = vsel %vm286_vm1, %v482_v27, %v897_v52  ;;  %v901_v58 = vor.u32 %v899_v53, %v897_v52  ;;  %v909_v63 = vor.u32 %v907_v31, %v905_v55  ;;  %v1864_v52 = vld [vmem:[%s2646_s1 + $0x10] sm:$0xff]  }
  0x4d   : > { %491 = vrot.lane.b32.xlu0 %v479_v15, %s1946_s27  ;;  %501 = vrot.lane.b32.xlu1 %v498_v16, %s1945_s26  ;;  %v361_v62 = vrot.slane %v359_v20, 1  ;;  %v400_v10 = vsel %vm381_vm0, %v2097_v21, %v399_v9  ;;  %v1866_v20 = vld [vmem:[%s2646_s1 + $0x18] sm:$0xff]   ;;  %v1868_v9 = vld [vmem:[%s2646_s1 + $0x20] sm:$0xff]  }
  0x4e   : > { %v906_v60 = vsel %vm286_vm1, %v901_v58, %v905_v55  ;;  %v1865_v55 = vld [vmem:[%s2646_s1 + $0x78] sm:$0xff]  }
  0x4f   : > { %v362_v1 = vsel %vm286_vm1, %v2156_v59, %v361_v62 }
  0x51   : > { %371 = vrot.lane.b32.xlu0 %v330_v25, %s1946_s27  ;;  %409 = vrot.lane.b32.xlu1 %v392_v22, %s1945_s26 }
  0x55   : > { %493 = vrot.lane.b32.xlu0 %v487_v32, %s1946_s27  ;;  %503 = vrot.lane.b32.xlu1 %v500_v33, %s1945_s26 }
  0x59   : > { %373 = vrot.lane.b32.xlu0 %v338_v38, %s1946_s27  ;;  %411 = vrot.lane.b32.xlu1 %v394_v36, %s1945_s26 }
  0x5d   : > { %495 = vrot.lane.b32.xlu0 %v490_v43, %s1946_s27  ;;  %505 = vrot.lane.b32.xlu1 %v499_v23, %s1945_s26 }
  0x61   : > { %363 = vrot.lane.b32.xlu0 %v298_v51, %s1946_s27  ;;  %401 = vrot.lane.b32.xlu1 %v384_v40, %s1945_s26 }
  0x65   : > { %910 = vrot.lane.b32.xlu0 %v898_v56, %s1946_s27  ;;  %920 = vrot.lane.b32.xlu1 %v917_v57, %s1945_s26 }
  0x69   : > { %912 = vrot.lane.b32.xlu0 %v906_v60, %s1946_s27  ;;  %922 = vrot.lane.b32.xlu1 %v919_v61, %s1945_s26  ;;  %v1867_v60 = vld [vmem:[%s2646_s1 + $0x80] sm:$0xff]  }
  0x6d   : > { %914 = vrot.lane.b32.xlu0 %v909_v63, %s1946_s27  ;;  %379 = vrot.lane.b32.xlu1 %v362_v1, %s1946_s27  ;;  %s2528_s27 = scalar_lea.vmem %s2648_s3, %s1462_s25 }
  0x71   : > { %924 = vrot.lane.b32.xlu0 %v918_v11, %s1945_s26  ;;  %417 = vrot.lane.b32.xlu1 %v400_v10, %s1945_s26 }
  0xaa   : > { %v414_v12 = vpop.permute.xlu0 %413 }
  0xab   : > { %v404_v13 = vpop.permute.xlu1 %403 }
  0xaf   : > { %v406_v15 = vpop.permute.xlu1 %405  ;;  %v366_v16 = vpop.permute.xlu0 %365 }
  0xb0   : > { %v423_v59 = vsel %vm419_vm3, %v2068_v6, %v366_v16  ;;  %v1859_v6 = vld [vmem:[%s2646_s1 + $0x60] sm:$0xff]  }
  0xb1   : > { %v2266_v17 = vsel %vm438_vm4, %v423_v59, %v404_v13  ;;  %v1870_v13 = vld [vmem:[%s2646_s1 + $0x88] sm:$0xff]  }
  0xb2   : > { %v541_v23 = vrot.slane %v2266_v17, 1 }
  0xb3   : > { %v416_v18 = vpop.permute.xlu1 %415  ;;  %v368_v19 = vpop.permute.xlu0 %367 }
  0xb4   : > { %v425_v21 = vsel %vm419_vm3, %v2071_v7, %v368_v19  ;;  %v1869_v19 = vld [vmem:[%s2646_s1 + $0x28] sm:$0xff]  }
  0xb5   : > { %v2271_v22 = vsel %vm438_vm4, %v425_v21, %v406_v15 }
  0xb6   : > { %v542_v25 = vrot.slane %v2271_v22, 1 }
  0xb7   : > { %v378_v27 = vpop.permute.xlu1 %377  ;;  %v376_v28 = vpop.permute.xlu0 %375 }
  0xb8   : > { %v435_v29 = vsel %vm419_vm3, %v2061_v3, %v378_v27  ;;  %v433_v7 = vsel %vm419_vm3, %v2058_v2, %v376_v28  ;;  %v543_v30 = vsel %vm381_vm0, %v541_v23, %v542_v25  ;;  %v1860_v3 = vld [vmem:[%s2646_s1] sm:$0xff]   ;;  %v1861_v2 = vld [vmem:[%s2646_s1 + $0x68] sm:$0xff]  }
  0xb9   : > { %v2284_v32 = vsel %vm438_vm4, %v435_v29, %v416_v18  ;;  %v2287_v33 = vsel %vm438_vm4, %v433_v7, %v414_v12  ;;  %1640 = vmatmul.mubr.msk.bf16.vlgmr.msra.gmra.mrb[0].mxu0 %vm596_vm5, %v543_v30 }
  0xba   : > { %v552_v34 = vrot.slane %v2284_v32, 1  ;;  %v550_v35 = vrot.slane %v2287_v33, 1  ;;  %1724 = vmatpush3.bf16.msra.mxu0 %v1859_v6  ;;  %1643 = vmatprep.mubr.msk.bf16.mxu0 %vm1947_vm2, %v1944_v0 }
  0xbb   : > { %v370_v36 = vpop.permute.xlu0 %369  ;;  %v408_v37 = vpop.permute.xlu1 %407  ;;  %1725 = vmatprep.subr.bf16.mxu0 %v1944_v0 }
  0xbc   : > { %v427_v38 = vsel %vm419_vm3, %v2074_v8, %v370_v36  ;;  %v553_v39 = vsel %vm381_vm0, %v550_v35, %v552_v34  ;;  %v1863_v8 = vld [vmem:[%s2646_s1 + $0x70] sm:$0xff]  }
  0xbd   : > { %v2307_v41 = vsel %vm438_vm4, %v427_v38, %v408_v37  ;;  %1660 = vmatmul.mubr.msk.bf16.vlgmr.msra.gmra.mrb[0].mxu1 %vm596_vm5, %v553_v39 }
  0xbe   : > { %v544_v43 = vrot.slane %v2307_v41, 1  ;;  %1676 = vmatpush3.bf16.msra.mxu1 %v1860_v3  ;;  %1726 = vmatpush3.bf16.msra.mxu0 %v1861_v2 }
  0xbf   : > { %v492_v4 = vpop.permute.xlu0 %491  ;;  %v502_v47 = vpop.permute.xlu1 %501  ;;  %1663 = vmatprep.mubr.msk.bf16.mxu1 %vm1947_vm2, %v1944_v0  ;;  %1677 = vmatprep.subr.bf16.mxu1 %v1944_v0 }
  0xc0   : > { %v508_v40 = vsel %vm419_vm3, %v2084_v14, %v492_v4  ;;  %v545_v49 = vsel %vm381_vm0, %v542_v25, %v544_v43  ;;  %1727 = vmatprep.subr.bf16.mxu0 %v1944_v0  ;;  %v954_v4 = vrot.slane %v2271_v22, 2 }
  0xc1   : > { %v2325_v50 = vsel %vm438_vm4, %v508_v40, %v502_v47  ;;  %1644 = vmatmul.mubr.msk.bf16.gmra.mrb[4].mxu0 %vm596_vm5, %v545_v49 }
  0xc2   : > { %v554_v51 = vrot.slane %v2325_v50, 1  ;;  %1678 = vmatpush3.bf16.msra.mxu1 %v1862_v44  ;;  %1728 = vmatpush3.bf16.msra.mxu0 %v1863_v8  ;;  %v965_v37 = vrot.slane %v2325_v50, 2 }
  0xc3   : > { %v372_v53 = vpop.permute.xlu0 %371  ;;  %v410_v54 = vpop.permute.xlu1 %409  ;;  %1647 = vmatprep.mubr.msk.bf16.mxu0 %vm1947_vm2, %v1944_v0  ;;  %1679 = vmatprep.subr.bf16.mxu1 %v1944_v0 }
  0xc4   : > { %v429_v11 = vsel %vm419_vm3, %v2103_v26, %v372_v53  ;;  %v555_v56 = vsel %vm381_vm0, %v552_v34, %v554_v51  ;;  %1729 = vmatprep.subr.bf16.mxu0 %v1944_v0 }
  0xc5   : > { %v2343_v57 = vsel %vm438_vm4, %v429_v11, %v410_v54  ;;  %1664 = vmatmul.mubr.msk.bf16.gmra.mrb[4].mxu1 %vm596_vm5, %v555_v56 }
  0xc6   : > { %v546_v58 = vrot.slane %v2343_v57, 1  ;;  %1680 = vmatpush3.bf16.msra.mxu1 %v1864_v52  ;;  %1667 = vmatprep.mubr.msk.bf16.mxu1 %vm1947_vm2, %v1944_v0 }
  0xc7   : > { %v494_v26 = vpop.permute.xlu0 %493  ;;  %v504_v31 = vpop.permute.xlu1 %503  ;;  %1730 = vmatpush3.bf16.msra.mxu0 %v1865_v55  ;;  %1681 = vmatprep.subr.bf16.mxu1 %v1944_v0  ;;  %v957_v55 = vrot.slane %v2343_v57, 2 }
  0xc8   : > { %v510_v61 = vsel %vm419_vm3, %v2128_v45, %v494_v26  ;;  %v547_v62 = vsel %vm381_vm0, %v544_v43, %v546_v58  ;;  %1731 = vmatprep.subr.bf16.mxu0 %v1944_v0  ;;  %v961_v26 = vrot.slane %v2287_v33, 2 }
  0xc9   : > { %v516_v63 = vsel %vm438_vm4, %v510_v61, %v504_v31  ;;  %1648 = vmatmul.mubr.msk.bf16.gmra.mrb[8].mxu0 %vm596_vm5, %v547_v62  ;;  %v963_v31 = vrot.slane %v2284_v32, 2 }
  0xca   : > { %v556_v1 = vrot.slane %v516_v63, 1  ;;  %1682 = vmatpush3.bf16.msra.mxu1 %v1866_v20  ;;  %1651 = vmatprep.mubr.msk.bf16.mxu0 %vm1947_vm2, %v1944_v0 }
  0xcb   : > { %v374_v10 = vpop.permute.xlu0 %373  ;;  %v412_v12 = vpop.permute.xlu1 %411  ;;  %1683 = vmatprep.subr.bf16.mxu1 %v1944_v0  ;;  %1732 = vmatpush3.bf16.msra.mxu0 %v1867_v60  ;;  %v966_v60 = vsel %vm953_vm6, %v963_v31, %v965_v37 }
  0xcc   : > { %v431_v15 = vsel %vm419_vm3, %v2135_v48, %v374_v10  ;;  %v557_v16 = vsel %vm381_vm0, %v554_v51, %v556_v1  ;;  %1733 = vmatprep.subr.bf16.mxu0 %v1944_v0 }
  0xcd   : > { %v2376_v59 = vsel %vm438_vm4, %v431_v15, %v412_v12  ;;  %1668 = vmatmul.mubr.msk.bf16.gmra.mrb[8].mxu1 %vm596_vm5, %v557_v16 }
  0xce   : > { %v548_v18 = vrot.slane %v2376_v59, 1  ;;  %1671 = vmatprep.mubr.msk.bf16.mxu1 %vm1947_vm2, %v1944_v0  ;;  %1684 = vmatpush3.bf16.msra.mxu1 %v1868_v9  ;;  %v959_v20 = vrot.slane %v2376_v59, 2 }
  0xcf   : > { %v496_v48 = vpop.permute.xlu0 %495  ;;  %v506_v21 = vpop.permute.xlu1 %505  ;;  %1685 = vmatprep.subr.bf16.mxu1 %v1944_v0  ;;  %1734 = vmatpush3.bf16.msra.mxu0 %v1870_v13 }
  0xd0   : > { %v512_v23 = vsel %vm419_vm3, %v2166_v5, %v496_v48  ;;  %v549_v25 = vsel %vm381_vm0, %v546_v58, %v548_v18  ;;  %v551_v2 = vsel %vm381_vm0, %v548_v18, %v550_v35 }
  0xd1   : > { %v518_v6 = vsel %vm438_vm4, %v512_v23, %v506_v21  ;;  %1652 = vmatmul.mubr.msk.bf16.gmra.mrb[12].mxu0 %vm596_vm5, %v549_v25 }
  0xd2   : > { %v558_v27 = vrot.slane %v518_v6, 1  ;;  %1655 = vmatprep.mubr.msk.bf16.mxu0 %vm1947_vm2, %v1944_v0  ;;  %1686 = vmatpush3.bf16.msra.mxu1 %v1869_v19 }
  0xd3   : > { %v364_v28 = vpop.permute.xlu0 %363  ;;  %v402_v29 = vpop.permute.xlu1 %401 }
  0xd4   : > { %v559_v7 = vsel %vm381_vm0, %v556_v1, %v558_v27  ;;  %v421_v5 = vsel %vm419_vm3, %v2195_v24, %v364_v28  ;;  %vm2568_vm0 = vmor %vm1269_vm14, %vm1270_vm15 }
  0xd5   : > { %1672 = vmatmul.mubr.msk.bf16.gmra.mrb[12].mxu1 %vm596_vm5, %v559_v7  ;;  %v440_v38 = vsel %vm438_vm4, %v421_v5, %v402_v29 }
  0xd6   : > { %1687 = vmatprep.mubr.msk.bf16.mxu1 %vm1947_vm2, %v1944_v0 }
  0xd7   : > { %v911_v30 = vpop.permute.xlu0 %910  ;;  %v921_v34 = vpop.permute.xlu1 %920 }
  0xd8   : > { %v927_v3 = vsel %vm419_vm3, %v2128_v45, %v911_v30  ;;  %v955_v45 = vrot.slane %v2307_v41, 2 }
  0xd9   : > { %v933_v36 = vsel %vm438_vm4, %v927_v3, %v921_v34  ;;  %1656 = vmatmul.mubr.msk.bf16.gmra.mrb[16].mxu0 %vm596_vm5, %v551_v2 }
  0xda   : > { %v967_v39 = vrot.slane %v933_v36, 2  ;;  %1735 = vmatprep.mubr.msk.bf16.mxu0 %vm1947_vm2, %v1944_v0  ;;  %v956_v50 = vsel %vm953_vm6, %v954_v4, %v955_v45 }
  0xdb   : > { %v913_v24 = vpop.permute.xlu0 %912  ;;  %v923_v43 = vpop.permute.xlu1 %922 }
  0xdc   : > { %v929_v35 = vsel %vm419_vm3, %v2221_v42, %v913_v24  ;;  %v968_v44 = vsel %vm953_vm6, %v965_v37, %v967_v39 }
  0xdd   : > { %1688 = vmatmul.mubr.msk.bf16.vlgmr.msra.gmra.mrb[16].mxu1 %vm596_vm5, %v440_v38  ;;  %v935_v8 = vsel %vm438_vm4, %v929_v35, %v923_v43 }
  0xde   : > { %1691 = vmatprep.mubr.msk.bf16.mxu1 %vm1947_vm2, %v1944_v0  ;;  %v969_v47 = vrot.slane %v935_v8, 2 }
  0xdf   : > { %v915_v40 = vpop.permute.xlu0 %914  ;;  %v380_v49 = vpop.permute.xlu1 %379 }
  0xe0   : > { %v970_v51 = vsel %vm953_vm6, %v967_v39, %v969_v47  ;;  %v931_v42 = vsel %vm419_vm3, %v2227_v46, %v915_v40  ;;  %v437_v52 = vsel %vm419_vm3, %v2084_v14, %v380_v49  ;;  %v958_v46 = vsel %vm953_vm6, %v955_v45, %v957_v55  ;;  %v2521_v40 = vld [vmem:[#allocation2] ss:$0 sm:$0xff] }
  0xe1   : > { %1736 = vmatmul.mubr.msk.bf16.vlgmr.msra.gmra.mrb[20].mxu0 %vm596_vm5, %v956_v50 }
  0xe2   : > { %1739 = vmatprep.mubr.msk.bf16.mxu0 %vm1947_vm2, %v1944_v0 }
  0xe3   : > { %v925_v53 = vpop.permute.xlu0 %924  ;;  %v418_v54 = vpop.permute.xlu1 %417 }
  0xe4   : > { %v937_v11 = vsel %vm438_vm4, %v931_v42, %v925_v53  ;;  %v456_v56 = vsel %vm438_vm4, %v437_v52, %v418_v54 }
  0xe5   : > { %1692 = vmatmul.mubr.msk.bf16.gmra.mrb[20].mxu1 %vm596_vm5, %v2266_v17  ;;  %v971_v58 = vrot.slane %v937_v11, 2  ;;  %v960_v17 = vsel %vm953_vm6, %v957_v55, %v959_v20 }
  0xe6   : > { %1695 = vmatprep.mubr.msk.bf16.mxu1 %vm1947_vm2, %v1944_v0 }
  0xe7   : > { %v972_v14 = vsel %vm953_vm6, %v969_v47, %v971_v58 }
  0xe9   : > { %1740 = vmatmul.mubr.msk.bf16.gmra.mrb[24].mxu0 %vm596_vm5, %v958_v46 }
  0xea   : > { %1743 = vmatprep.mubr.msk.bf16.mxu0 %vm1947_vm2, %v1944_v0 }
  0xed   : > { %1696 = vmatmul.mubr.msk.bf16.gmra.mrb[24].mxu1 %vm596_vm5, %v2271_v22  ;;  %v962_v22 = vsel %vm953_vm6, %v959_v20, %v961_v26 }
  0xee   : > { %1699 = vmatprep.mubr.msk.bf16.mxu1 %vm1947_vm2, %v1944_v0 }
  0xf1   : > { %1744 = vmatmul.mubr.msk.bf16.gmra.mrb[28].mxu0 %vm596_vm5, %v960_v17 }
  0xf2   : > { %1747 = vmatprep.mubr.msk.bf16.mxu0 %vm1947_vm2, %v1944_v0 }
  0xf5   : > { %1700 = vmatmul.mubr.msk.bf16.gmra.mrb[28].mxu1 %vm596_vm5, %v2307_v41  ;;  %v964_v41 = vsel %vm953_vm6, %v961_v26, %v963_v31 }
  0xf6   : > { %1703 = vmatprep.mubr.msk.bf16.mxu1 %vm1947_vm2, %v1944_v0 }
  0xf9   : > { %1748 = vmatmul.mubr.msk.bf16.gmra.mrb[32].mxu0 %vm596_vm5, %v962_v22 }
  0xfa   : > { %1751 = vmatprep.mubr.msk.bf16.mxu0 %vm1947_vm2, %v1944_v0 }
  0xfd   : > { %1704 = vmatmul.mubr.msk.bf16.gmra.mrb[32].mxu1 %vm596_vm5, %v2343_v57 }
  0xfe   : > { %1707 = vmatprep.mubr.msk.bf16.mxu1 %vm1947_vm2, %v1944_v0 }
 0x101   : > { %1752 = vmatmul.mubr.msk.bf16.gmra.mrb[36].mxu0 %vm596_vm5, %v964_v41 }
 0x102   : > { %1755 = vmatprep.mubr.msk.bf16.mxu0 %vm1947_vm2, %v1944_v0 }
 0x105   : > { %1708 = vmatmul.mubr.msk.bf16.gmra.mrb[36].mxu1 %vm596_vm5, %v2376_v59 }
 0x106   : > { %1711 = vmatprep.mubr.msk.bf16.mxu1 %vm1947_vm2, %v1944_v0 }
 0x109   : > { %1756 = vmatmul.mubr.msk.bf16.gmra.mrb[40].mxu0 %vm596_vm5, %v966_v60 }
 0x10a   : > { %1759 = vmatprep.mubr.msk.bf16.mxu0 %vm1947_vm2, %v1944_v0 }
 0x10d   : > { %1712 = vmatmul.mubr.msk.bf16.gmra.mrb[40].mxu1 %vm596_vm5, %v2287_v33 }
 0x10e   : > { %1715 = vmatprep.mubr.msk.bf16.mxu1 %vm1947_vm2, %v1944_v0 }
 0x111   : > { %1760 = vmatmul.mubr.msk.bf16.gmra.mrb[44].mxu0 %vm596_vm5, %v968_v44 }
 0x112   : > { %1763 = vmatprep.mubr.msk.bf16.mxu0 %vm1947_vm2, %v1944_v0 }
 0x115   : > { %1716 = vmatmul.mubr.msk.bf16.gmra.mrb[44].mxu1 %vm596_vm5, %v2284_v32 }
 0x116   : > { %1719 = vmatprep.mubr.msk.bf16.mxu1 %vm1947_vm2, %v1944_v0 }
 0x119   : > { %1764 = vmatmul.mubr.msk.bf16.gmra.mrb[48].mxu0 %vm596_vm5, %v970_v51 }
 0x11a   : > { %1767 = vmatprep.mubr.msk.bf16.mxu0 %vm1947_vm2, %v1944_v0 }
 0x11d   : > { %1720 = vmatmul.mubr.msk.bf16.gmra.mrb[48].mxu1 %vm596_vm5, %v456_v56 }
 0x121   : > { %1768 = vmatmul.mubr.msk.bf16.gmra.mrb[52].mxu0 %vm596_vm5, %v972_v14 }
 0x18c   : > { %v658_v33 = vpop.f32.mrb[0].mxu0 }
 0x18d   : > { %v1641_v57 = vpop.f32.mrb[1].mxu0 }
 0x18e   : > { %v661_v61 = vpop.f32.mrb[2].mxu0 }
 0x18f   : > { %v1642_v62 = vpop.f32.mrb[3].mxu0 }
 0x190   : > { %v2491_v63 = vpop.f32.mrb[0].mxu1 }
 0x191   : > { %v1661_v1 = vpop.f32.mrb[1].mxu1 }
 0x192   : > { %v2493_v32 = vpop.f32.mrb[2].mxu1 }
 0x193   : > { %v1662_v9 = vpop.f32.mrb[3].mxu1 }
 0x194   : > { %v666_v10 = vpop.f32.mrb[4].mxu0 }
 0x195   : > { %v1645_v12 = vpop.f32.mrb[5].mxu0 }
 0x196   : > { %v669_v13 = vpop.f32.mrb[6].mxu0 }
 0x197   : > { %v1646_v15 = vpop.f32.mrb[7].mxu0 }
 0x198   : > { %v2495_v0 = vpop.f32.mrb[4].mxu1 }
 0x199   : > { %v1665_v16 = vpop.f32.mrb[5].mxu1 }
 0x19a   : > { %v2497_v59 = vpop.f32.mrb[6].mxu1 }
 0x19b   : > { %v1666_v18 = vpop.f32.mrb[7].mxu1 }
 0x19c   : > { %v2499_v19 = vpop.f32.mrb[8].mxu0 }
 0x19d   : > { %v1649_v48 = vpop.f32.mrb[9].mxu0 }
 0x19e   : > { %v2501_v21 = vpop.f32.mrb[10].mxu0 }
 0x19f   : > { %v1650_v23 = vpop.f32.mrb[11].mxu0 }
 0x1a0   : > { %v2503_v25 = vpop.f32.mrb[8].mxu1 }
 0x1a1   : > { %v1669_v6 = vpop.f32.mrb[9].mxu1 }
 0x1a2   : > { %v2505_v27 = vpop.f32.mrb[10].mxu1 }
 0x1a3   : > { %v1670_v28 = vpop.f32.mrb[11].mxu1 }
 0x1a4   : > { %v2507_v29 = vpop.f32.mrb[12].mxu0 }
 0x1a5   : > { %v1653_v7 = vpop.f32.mrb[13].mxu0 }
 0x1a6   : > { %v2509_v5 = vpop.f32.mrb[14].mxu0 }
 0x1a7   : > { %v1654_v30 = vpop.f32.mrb[15].mxu0 }
 0x1a8   : > { %v2512_v34 = vpop.f32.mrb[12].mxu1 }
 0x1a9   : > { %v1673_v3 = vpop.f32.mrb[13].mxu1 }
 0x1aa   : > { %v2514_v2 = vpop.f32.mrb[14].mxu1 }
 0x1ab   : > { %v1674_v36 = vpop.f32.mrb[15].mxu1 }
 0x1ac   : > { %v2516_v37 = vpop.f32.mrb[16].mxu0 }
 0x1ad   : > { %v1657_v38 = vpop.f32.mrb[17].mxu0 }
 0x1ae   : > { %v2518_v39 = vpop.f32.mrb[18].mxu0 }
 0x1af   : > { %v1658_v24 = vpop.f32.mrb[19].mxu0 }
 0x1b0   : > { %v817_v43 = vpop.f32.mrb[16].mxu1 }
 0x1b1   : > { %v818_v45 = vadd.f32 %v817_v43, %v658_v33  ;;  %v1689_v35 = vpop.f32.mrb[17].mxu1 }
 0x1b2   : > { %v820_v44 = vpop.f32.mrb[18].mxu1 }
 0x1b3   : > { %v821_v8 = vadd.f32 %v820_v44, %v661_v61  ;;  %v1690_v4 = vpop.f32.mrb[19].mxu1 }
 0x1b4   : > { %v1070_v47 = vpop.f32.mrb[20].mxu0 }
 0x1b5   : > { %v1141_v49 = vadd.f32 %v1070_v47, %v818_v45  ;;  %v1737_v50 = vpop.f32.mrb[21].mxu0 }
 0x1b6   : > { %v1073_v51 = vpop.f32.mrb[22].mxu0 }
 0x1b7   : > { %v1166_v42 = vadd.f32 %v2521_v40, %v1141_v49  ;;  %v1142_v52 = vadd.f32 %v1073_v51, %v821_v8  ;;  %v1738_v53 = vpop.f32.mrb[23].mxu0 }
 0x1b8   : > { %v825_v54 = vpop.f32.mrb[20].mxu1 }
 0x1b9   : > { %v1184_v55 = vmax.f32 %v1166_v42, 0.0  ;;  %v1167_v11 = vadd.f32 %v2521_v40, %v1142_v52  ;;  %v826_v56 = vadd.f32 %v825_v54, %v666_v10  ;;  %v1693_v58 = vpop.f32.mrb[21].mxu1 }
 0x1ba   : > { %v828_v14 = vpop.f32.mrb[22].mxu1 }
 0x1bb   : > { %v1564_v46 = vpack.c.bf16 %v1184_v55, %v1184_v55  ;;  %v1185_v20 = vmax.f32 %v1167_v11, 0.0  ;;  %v829_v17 = vadd.f32 %v828_v14, %v669_v13  ;;  %v1694_v26 = vpop.f32.mrb[23].mxu1 }
 0x1bc   : > { %v1078_v22 = vpop.f32.mrb[24].mxu0 }
 0x1bd   : > { %1219 = vst.msk [vmem:[%s2528_s27] sm:$0xf] %vm1218_vm7, %v1564_v46  ;;  %v1565_v31 = vpack.c.bf16 %v1185_v20, %v1185_v20  ;;  %v1143_v41 = vadd.f32 %v1078_v22, %v826_v56  ;;  %v1741_v60 = vpop.f32.mrb[25].mxu0 }
 0x1be   : > { %v1081_v33 = vpop.f32.mrb[26].mxu0 }
 0x1bf   : > { %1220 = vst.msk [vmem:[%s2528_s27 + $0x4] sm:$0xf] %vm1218_vm7, %v1565_v31  ;;  %v1168_v57 = vadd.f32 %v2521_v40, %v1143_v41  ;;  %v1144_v61 = vadd.f32 %v1081_v33, %v829_v17  ;;  %v1742_v62 = vpop.f32.mrb[27].mxu0 }
 0x1c0   : > { %v833_v1 = vpop.f32.mrb[24].mxu1 }
 0x1c1   : > { %v1186_v9 = vmax.f32 %v1168_v57, 0.0  ;;  %v1169_v10 = vadd.f32 %v2521_v40, %v1144_v61  ;;  %v834_v12 = vadd.f32 %v833_v1, %v2499_v19  ;;  %v1697_v13 = vpop.f32.mrb[25].mxu1 }
 0x1c2   : > { %v836_v15 = vpop.f32.mrb[26].mxu1 }
 0x1c3   : > { %v1566_v16 = vpack.c.bf16 %v1186_v9, %v1186_v9  ;;  %v1187_v18 = vmax.f32 %v1169_v10, 0.0  ;;  %v837_v48 = vadd.f32 %v836_v15, %v2501_v21  ;;  %v1698_v23 = vpop.f32.mrb[27].mxu1 }
 0x1c4   : > { %v1086_v6 = vpop.f32.mrb[28].mxu0 }
 0x1c5   : > { %v1567_v28 = vpack.c.bf16 %v1187_v18, %v1187_v18  ;;  %v1145_v7 = vadd.f32 %v1086_v6, %v834_v12  ;;  %v1745_v30 = vpop.f32.mrb[29].mxu0  ;;  %v1529_v19 = vrot.slane %v1566_v16, 9 }
 0x1c6   : > { %v1089_v36 = vpop.f32.mrb[30].mxu0 }
 0x1c7   : > { %v1234_v38 = vrot.slane %v1567_v28, 5  ;;  %v1170_v24 = vadd.f32 %v2521_v40, %v1145_v7  ;;  %v1146_v43 = vadd.f32 %v1089_v36, %v837_v48  ;;  %v1746_v45 = vpop.f32.mrb[31].mxu0 }
 0x1c8   : > { %v841_v35 = vpop.f32.mrb[28].mxu1 }
 0x1c9   : > { %v1235_v21 = vsel %vm2538_vm10, %v1529_v19, %v1234_v38  ;;  %v1188_v44 = vmax.f32 %v1170_v24, 0.0  ;;  %v1171_v8 = vadd.f32 %v2521_v40, %v1146_v43  ;;  %v1701_v4 = vpop.f32.mrb[29].mxu1  ;;  %v842_v47 = vadd.f32 %v841_v35, %v2507_v29 }
 0x1ca   : > { %1530 = vst.msk [vmem:[%s2528_s27 + $0x8] sm:$0xf] %vm1218_vm7, %v1235_v21  ;;  %v844_v49 = vpop.f32.mrb[30].mxu1  ;;  %v1236_v54 = vrot.slane %v1234_v38, 4 }
 0x1cb   : > { %v1568_v50 = vpack.c.bf16 %v1188_v44, %v1188_v44  ;;  %v1189_v51 = vmax.f32 %v1171_v8, 0.0  ;;  %v845_v42 = vadd.f32 %v844_v49, %v2509_v5  ;;  %v1702_v52 = vpop.f32.mrb[31].mxu1 }
 0x1cc   : > { %v1094_v53 = vpop.f32.mrb[32].mxu0 }
 0x1cd   : > { %v1237_v55 = vrot.slane %v1568_v50, 5  ;;  %v1569_v11 = vpack.c.bf16 %v1189_v51, %v1189_v51  ;;  %v1147_v56 = vadd.f32 %v1094_v53, %v842_v47  ;;  %v1749_v58 = vpop.f32.mrb[33].mxu0  ;;  %v1534_v14 = vrot.slane %v1568_v50, 10 }
 0x1ce   : > { %v1097_v29 = vpop.f32.mrb[34].mxu0 }
 0x1cf   : > { %v1238_v20 = vsel %vm2538_vm10, %v1236_v54, %v1237_v55  ;;  %v1254_v5 = vrot.slane %v1569_v11, 6  ;;  %v1172_v17 = vadd.f32 %v2521_v40, %v1147_v56  ;;  %v1148_v26 = vadd.f32 %v1097_v29, %v845_v42  ;;  %v1750_v22 = vpop.f32.mrb[35].mxu0 }
 0x1d0   : > { %1531 = vst.msk [vmem:[%s2528_s27 + $0xc] sm:$0xf] %vm1218_vm7, %v1238_v20  ;;  %v849_v31 = vpop.f32.mrb[32].mxu1 }
 0x1d1   : > { %v1255_v41 = vsel %vm2551_vm13, %v1534_v14, %v1254_v5  ;;  %v1190_v60 = vmax.f32 %v1172_v17, 0.0  ;;  %v1173_v33 = vadd.f32 %v2521_v40, %v1148_v26  ;;  %v1705_v57 = vpop.f32.mrb[33].mxu1  ;;  %v850_v61 = vadd.f32 %v849_v31, %v2516_v37 }
 0x1d2   : > { %1535 = vst.msk [vmem:[%s2528_s27 + $0x10] sm:$0xf] %vm1218_vm7, %v1255_v41  ;;  %v852_v62 = vpop.f32.mrb[34].mxu1  ;;  %v1256_v15 = vrot.slane %v1254_v5, 4 }
 0x1d3   : > { %v1570_v1 = vpack.c.bf16 %v1190_v60, %v1190_v60  ;;  %v1191_v9 = vmax.f32 %v1173_v33, 0.0  ;;  %v853_v10 = vadd.f32 %v852_v62, %v2518_v39  ;;  %v1706_v12 = vpop.f32.mrb[35].mxu1 }
 0x1d4   : > { %v1102_v13 = vpop.f32.mrb[36].mxu0 }
 0x1d5   : > { %v1257_v16 = vrot.slane %v1570_v1, 6  ;;  %v1571_v18 = vpack.c.bf16 %v1191_v9, %v1191_v9  ;;  %v1149_v48 = vadd.f32 %v1102_v13, %v850_v61  ;;  %v1753_v23 = vpop.f32.mrb[37].mxu0  ;;  %v1539_v6 = vrot.slane %v1570_v1, 11 }
 0x1d6   : > { %v1105_v37 = vpop.f32.mrb[38].mxu0 }
 0x1d7   : > { %v1258_v7 = vsel %vm2551_vm13, %v1256_v15, %v1257_v16  ;;  %v1274_v39 = vrot.slane %v1571_v18, 7  ;;  %v1174_v30 = vadd.f32 %v2521_v40, %v1149_v48  ;;  %v1150_v36 = vadd.f32 %v1105_v37, %v853_v10  ;;  %v1754_v19 = vpop.f32.mrb[39].mxu0 }
 0x1d8   : > { %1536 = vst.msk [vmem:[%s2528_s27 + $0x14] sm:$0xf] %vm1218_vm7, %v1258_v7  ;;  %v857_v38 = vpop.f32.mrb[36].mxu1 }
 0x1d9   : > { %v1275_v24 = vsel %vm2568_vm0, %v1539_v6, %v1274_v39  ;;  %v1192_v43 = vmax.f32 %v1174_v30, 0.0  ;;  %v1175_v45 = vadd.f32 %v2521_v40, %v1150_v36  ;;  %v1709_v35 = vpop.f32.mrb[37].mxu1  ;;  %v858_v21 = vadd.f32 %v857_v38, %v2491_v63 }
 0x1da   : > { %1540 = vst.msk [vmem:[%s2528_s27 + $0x18] sm:$0xf] %vm1218_vm7, %v1275_v24  ;;  %v860_v44 = vpop.f32.mrb[38].mxu1  ;;  %v1276_v51 = vrot.slane %v1274_v39, 4 }
 0x1db   : > { %v1572_v8 = vpack.c.bf16 %v1192_v43, %v1192_v43  ;;  %v1193_v4 = vmax.f32 %v1175_v45, 0.0  ;;  %v861_v47 = vadd.f32 %v860_v44, %v2493_v32  ;;  %v1710_v49 = vpop.f32.mrb[39].mxu1 }
 0x1dc   : > { %v1110_v50 = vpop.f32.mrb[40].mxu0 }
 0x1dd   : > { %v1277_v42 = vrot.slane %v1572_v8, 7  ;;  %v1573_v52 = vpack.c.bf16 %v1193_v4, %v1193_v4  ;;  %v1151_v53 = vadd.f32 %v1110_v50, %v858_v21  ;;  %v1757_v54 = vpop.f32.mrb[41].mxu0 }
 0x1de   : > { %v1113_v55 = vpop.f32.mrb[42].mxu0 }
 0x1df   : > { %v1278_v11 = vsel %vm2568_vm0, %v1276_v51, %v1277_v42  ;;  %1544 = vst.msk [vmem:[%s2528_s27 + $0x20] sm:$0xf] %vm1218_vm7, %v1573_v52  ;;  %v1176_v63 = vadd.f32 %v2521_v40, %v1151_v53  ;;  %v1152_v56 = vadd.f32 %v1113_v55, %v861_v47  ;;  %v1758_v58 = vpop.f32.mrb[43].mxu0 }
 0x1e0   : > { %1541 = vst.msk [vmem:[%s2528_s27 + $0x1c] sm:$0xf] %vm1218_vm7, %v1278_v11  ;;  %v865_v32 = vpop.f32.mrb[40].mxu1 }
 0x1e1   : > { %v1194_v14 = vmax.f32 %v1176_v63, 0.0  ;;  %v1177_v29 = vadd.f32 %v2521_v40, %v1152_v56  ;;  %v866_v20 = vadd.f32 %v865_v32, %v2495_v0  ;;  %v1713_v5 = vpop.f32.mrb[41].mxu1 }
 0x1e2   : > { %v868_v17 = vpop.f32.mrb[42].mxu1 }
 0x1e3   : > { %v1574_v26 = vpack.c.bf16 %v1194_v14, %v1194_v14  ;;  %v869_v22 = vadd.f32 %v868_v17, %v2497_v59  ;;  %v1714_v31 = vpop.f32.mrb[43].mxu1  ;;  %v1195_v60 = vmax.f32 %v1177_v29, 0.0 }
 0x1e4   : > { %v1118_v41 = vpop.f32.mrb[44].mxu0 }
 0x1e5   : > { %1545 = vst.msk [vmem:[%s2528_s27 + $0x24] sm:$0xf] %vm1218_vm7, %v1574_v26  ;;  %v1153_v33 = vadd.f32 %v1118_v41, %v866_v20  ;;  %v1761_v57 = vpop.f32.mrb[45].mxu0  ;;  %v1575_v12 = vpack.c.bf16 %v1195_v60, %v1195_v60 }
 0x1e6   : > { %v1121_v61 = vpop.f32.mrb[46].mxu0 }
 0x1e7   : > { %v1178_v62 = vadd.f32 %v2521_v40, %v1153_v33  ;;  %v1154_v1 = vadd.f32 %v1121_v61, %v869_v22  ;;  %v1762_v9 = vpop.f32.mrb[47].mxu0  ;;  %v1549_v7 = vrot.slane %v1575_v12, 9 }
 0x1e8   : > { %v873_v10 = vpop.f32.mrb[44].mxu1 }
 0x1e9   : > { %v1196_v0 = vmax.f32 %v1178_v62, 0.0  ;;  %v1179_v13 = vadd.f32 %v2521_v40, %v1154_v1  ;;  %v874_v15 = vadd.f32 %v873_v10, %v2503_v25  ;;  %v1717_v59 = vpop.f32.mrb[45].mxu1 }
 0x1ea   : > { %v876_v16 = vpop.f32.mrb[46].mxu1 }
 0x1eb   : > { %v1576_v18 = vpack.c.bf16 %v1196_v0, %v1196_v0  ;;  %v1197_v48 = vmax.f32 %v1179_v13, 0.0  ;;  %v877_v23 = vadd.f32 %v876_v16, %v2505_v27  ;;  %v1718_v6 = vpop.f32.mrb[47].mxu1 }
 0x1ec   : > { %v1126_v37 = vpop.f32.mrb[48].mxu0 }
 0x1ed   : > { %v1303_v39 = vrot.slane %v1576_v18, 5  ;;  %v1577_v30 = vpack.c.bf16 %v1197_v48, %v1197_v48  ;;  %v1155_v36 = vadd.f32 %v1126_v37, %v874_v15  ;;  %v1765_v19 = vpop.f32.mrb[49].mxu0 }
 0x1ee   : > { %v1129_v38 = vpop.f32.mrb[50].mxu0 }
 0x1ef   : > { %v1304_v24 = vsel %vm2538_vm10, %v1549_v7, %v1303_v39  ;;  %v1305_v25 = vrot.slane %v1303_v39, 4  ;;  %v1306_v43 = vrot.slane %v1577_v30, 5  ;;  %v1766_v45 = vpop.f32.mrb[51].mxu0  ;;  %v1180_v35 = vadd.f32 %v2521_v40, %v1155_v36 }
 0x1f0   : > { %1550 = vst.msk [vmem:[%s2528_s27 + $0x28] sm:$0xf] %vm1218_vm7, %v1304_v24  ;;  %v1156_v27 = vadd.f32 %v1129_v38, %v877_v23  ;;  %v881_v21 = vpop.f32.mrb[48].mxu1  ;;  %v1554_v11 = vrot.slane %v1577_v30, 10 }
 0x1f1   : > { %v1307_v44 = vsel %vm2538_vm10, %v1305_v25, %v1306_v43  ;;  %v882_v8 = vadd.f32 %v881_v21, %v2512_v34  ;;  %v1721_v4 = vpop.f32.mrb[49].mxu1  ;;  %v1198_v47 = vmax.f32 %v1180_v35, 0.0 }
 0x1f2   : > { %1551 = vst.msk [vmem:[%s2528_s27 + $0x2c] sm:$0xf] %vm1218_vm7, %v1307_v44  ;;  %v1181_v49 = vadd.f32 %v2521_v40, %v1156_v27  ;;  %v884_v50 = vpop.f32.mrb[50].mxu1 }
 0x1f3   : > { %v885_v51 = vadd.f32 %v884_v50, %v2514_v2  ;;  %v1722_v42 = vpop.f32.mrb[51].mxu1  ;;  %v1578_v52 = vpack.c.bf16 %v1198_v47, %v1198_v47 }
 0x1f4   : > { %v1199_v53 = vmax.f32 %v1181_v49, 0.0  ;;  %v1134_v54 = vpop.f32.mrb[52].mxu0 }
 0x1f5   : > { %v1157_v55 = vadd.f32 %v1134_v54, %v882_v8  ;;  %v1769_v3 = vpop.f32.mrb[53].mxu0  ;;  %v1320_v63 = vrot.slane %v1578_v52, 6 }
 0x1f6   : > { %v1579_v34 = vpack.c.bf16 %v1199_v53, %v1199_v53  ;;  %v1137_v56 = vpop.f32.mrb[54].mxu0 }
 0x1f7   : > { %v1182_v58 = vadd.f32 %v2521_v40, %v1157_v55  ;;  %v1158_v32 = vadd.f32 %v1137_v56, %v885_v51  ;;  %v1770_v14 = vpop.f32.mrb[55].mxu0  ;;  %v1321_v29 = vsel %vm2551_vm13, %v1554_v11, %v1320_v63  ;;  %v1322_v2 = vrot.slane %v1320_v63, 4 }
 0x1f8   : > { %v1323_v20 = vrot.slane %v1579_v34, 6  ;;  %1555 = vst.msk [vmem:[%s2528_s27 + $0x30] sm:$0xf] %vm1218_vm7, %v1321_v29  ;;  %v1559_v41 = vrot.slane %v1579_v34, 11 }
 0x1f9   : > { %v1200_v5 = vmax.f32 %v1182_v58, 0.0  ;;  %v1183_v17 = vadd.f32 %v2521_v40, %v1158_v32 }
 0x1fa   : > { %v1324_v26 = vsel %vm2551_vm13, %v1322_v2, %v1323_v20 }
 0x1fb   : > { %1556 = vst.msk [vmem:[%s2528_s27 + $0x34] sm:$0xf] %vm1218_vm7, %v1324_v26  ;;  %v1580_v22 = vpack.c.bf16 %v1200_v5, %v1200_v5  ;;  %v1201_v31 = vmax.f32 %v1183_v17, 0.0 }
 0x1fd   : > { %v1337_v60 = vrot.slane %v1580_v22, 7  ;;  %v1581_v33 = vpack.c.bf16 %v1201_v31, %v1201_v31 }
 0x1ff   : > { %v1338_v57 = vsel %vm2568_vm0, %v1559_v41, %v1337_v60  ;;  %v1339_v61 = vrot.slane %v1337_v60, 4  ;;  %v1340_v62 = vrot.slane %v1581_v33, 7 }
 0x200   : > { %1560 = vst.msk [vmem:[%s2528_s27 + $0x38] sm:$0xf] %vm1218_vm7, %v1338_v57 }
 0x201   : > { %v1341_v40 = vsel %vm2568_vm0, %v1339_v61, %v1340_v62 }
 0x202   : > { %1561 = vst.msk [vmem:[%s2528_s27 + $0x3c] sm:$0xf] %vm1218_vm7, %v1341_v40 }
 0x203 PF: > { %s14_s16 = sadd.s32 1, %s1941_s16   ;;  %s2663_s12 = smov %s1933_s14 }
 0x204   : > { %p11_p7 = scmp.ge.s32.totalorder %s14_s16, 6   ;;  %s2664_s13 = smov %s1937_s15 }
 0x205   : > { %s2665_s14 = smov %s2668_s18  ;;  %s2666_s15 = smov %s2672_s19 }
 0x206   :  { %13 = sbr.rel (!%p11_p7) target bundleno = 3 (0x3), region = 75 }
 0x20d   :  { %1379 = vsyncpa [#allocation3], 1 }
 0x20e   :  { %1381 = vsyncpa [#allocation3 + $0x1], 1 }

// kernel: bottom_decoder_forward.7
= control target key start
LH: loop header
LB: loop body
LE: loop exit
PB: predicated region body
PF: predicated region fallthrough
CT: control target
= control target key end

     0   :  { %10 = vsyncpa [#allocation3], 0  ;;  %s4962_s0 = inlined_call_operand.vmem [shape: bf16[2,342,32], index: 0, kind: input, shape index: {}]   ;;  %s4963_s1 = inlined_call_operand.vmem [shape: bf16[288,8], index: 1, kind: input, shape index: {}]   ;;  %s4964_s2 = inlined_call_operand.hbm [shape: f32[1,8], index: 2, kind: input, shape index: {}]   ;;  %s4965_s3 = inlined_call_operand.hbm [shape: bf16[8,32], index: 3, kind: input, shape index: {}]   ;;  %s4966_s4 = inlined_call_operand.hbm [shape: f32[1,32], index: 4, kind: input, shape index: {}]   ;;  %s4967_s5 = inlined_call_operand.vmem [shape: bf16[2,16,16,32], index: 5, kind: output, shape index: {}]  }
   0x1   :  { %11 = vsyncpa [#allocation5], 0  ;;  %s3711_s18 = smov 0   ;;  %s3713_s19 = smov 0  }
   0x2   :  { %s3715_s20 = smov 0  }
   0x3 LB: > { %s3675_s21 = smov [#allocation4]   ;;  %s2853_s23 = sadd.s32 4294967295, %s3673_s20   ;;  %s3673_s20 = sphi %s3715_s20, %s17_s20   ;;  %s3669_s19 = sphi %s3713_s19, %s4986_s19   ;;  %s3665_s18 = sphi %s3711_s18, %s4985_s18  }
   0x4   : > { %s199_s22 = sshll.u32 %s3675_s21, 4  ;;  %p2855_p0 = scmp.ge.s32.totalorder %s3673_s20, 1  ;;  %s200_s22 = int_to_ptr.vmem [resolvable:$true] %s199_s22 }
   0x5   : > { %p172_p1 = scmp.lt.s32.totalorder %s3673_s20, 3  ;;  %p3729_p2 = scmp.eq.s32.totalorder %s2853_s23, 0 }
   0x6   : > { %s29_s26 = sadd.s32 1, %s3669_s19  ;;  %s3676_s29 = smov [#allocation2]  }
   0x7   : > { %s4971_s24 = scalar_select %p3729_p2, 1, 0 }
   0x8   : > { %p3733_p3 = pnand %p2855_p0, %p172_p1  ;;  %p3746_p6 = scmp.ge.s32.totalorder %s29_s26, 2 }
   0x9   : > { %s188_s30 = sshll.u32 %s3676_s29, 4  ;;  %s3559_s8 = scalar_lea.hbm %s4965_s3, 64  ;;  %s3750_s30 = int_to_ptr.vmem [resolvable:$true] %s188_s30 }
   0xa   : > { %s4972_s25 = scalar_select %p3733_p3, 1, 0 }
   0xb   : > { %p3458_p4 = pneg %p3733_p3  ;;  %p3560_p7 = scmp.ne.s32.totalorder %s4965_s3, %s3559_s8 }
   0xc   : > { %s4974_s28 = scalar_select %p3746_p6, 1, 0 }
   0xd   : > { %p3742_p5 = pnand %p3729_p2, %p3458_p4  ;;  %p3566_p11 = scmp.lt.u32.totalorder %s3559_s8, %s4965_s3 }
   0xf   : > { %p3760_p8 = pneg %p3742_p5 }
  0x11   : > { %p3562_p9 = pnand %p3760_p8, %p3560_p7 }
  0x13   : > { %p3563_p10 = pneg %p3562_p9 }
  0x15   : > { %p3568_p12 = pnand %p3566_p11, %p3563_p10 }
  0x17   : > { %3571 = shalt.err (!%p3568_p12)
}
  0x18   : > { %s3572_s14 = scalar_lea.vmem %s200_s22, 64  ;;  %p3580_p4 = scmp.lt.s32.totalorder %s200_s22, %s200_s22 }
  0x19   : > { %p3573_p13 = scmp.ne.s32.totalorder %s200_s22, %s3572_s14  ;;  %p3581_p2 = scmp.lt.s32.totalorder %s3572_s14, %s3572_s14 }
  0x1b   : > { %p3575_p0 = pnand %p3573_p13, %p3760_p8  ;;  %p3582_p3 = por %p3581_p2, %p3580_p4 }
  0x1d   : > { %p3576_p1 = pneg %p3575_p0 }
  0x1f   : > { %p3583_p6 = pnand %p3582_p3, %p3576_p1 }
  0x21   : > { %3586 = shalt.err (!%p3583_p6)
}
  0x22   : > { %3464 = dma.hbm_to_vmem [thread:$0]  (!%p3742_p5), %s4965_s3, 64, %s200_s22, [#allocation5]  }
  0x23   : > { %p4976_p7 = scmp.ne.s32.totalorder %s4974_s28, 0  ;;  %s3587_s23 = scalar_lea.hbm %s4964_s2, 16 }
  0x24   : > { %p3588_p2 = scmp.ne.s32.totalorder %s4964_s2, %s3587_s23  ;;  %p3594_p9 = scmp.lt.u32.totalorder %s3587_s23, %s4964_s2 }
  0x25   : > { %s4988_s26 = smov (%p4976_p7, %s29_s26), 0 }
  0x26   : > { %p3590_p3 = pnand %p3588_p2, %p3760_p8 }
  0x28   : > { %p3591_p6 = pneg %p3590_p3 }
  0x2a   : > { %p3596_p10 = pnand %p3594_p9, %p3591_p6 }
  0x2c   : > { %3599 = shalt.err (!%p3596_p10)
}
  0x2d   : > { %s3600_s22 = scalar_lea.vmem %s3750_s30, 16  ;;  %s3607_s28 = scalar_lea.vmem %s3750_s30, 32 }
  0x2e   : > { %p3601_p11 = scmp.ne.s32.totalorder %s3750_s30, %s3600_s22  ;;  %p3608_p0 = scmp.lt.s32.totalorder %s3750_s30, %s3750_s30 }
  0x2f   : > { %p3609_p1 = scmp.lt.s32.totalorder %s3607_s28, %s3600_s22 }
  0x30   : > { %p3603_p12 = pnand %p3601_p11, %p3760_p8 }
  0x31   : > { %p3610_p4 = por %p3609_p1, %p3608_p0 }
  0x32   : > { %p3604_p13 = pneg %p3603_p12 }
  0x34   : > { %p3611_p7 = pnand %p3610_p4, %p3604_p13 }
  0x36   : > { %3614 = shalt.err (!%p3611_p7)
}
  0x37   : > { %3461 = dma.hbm_to_vmem [thread:$0]  (!%p3742_p5), %s4964_s2, 16, %s3750_s30, [#allocation3]  }
  0x38   : > { %s3677_s12 = smov [#allocation6]   ;;  %s3615_s16 = scalar_lea.hbm %s4966_s4, 16 }
  0x39   : > { %s210_s13 = sshll.u32 %s3677_s12, 4  ;;  %p3616_p2 = scmp.ne.s32.totalorder %s4966_s4, %s3615_s16  ;;  %s211_s13 = int_to_ptr.vmem [resolvable:$true] %s210_s13 }
  0x3a   : > { %p3622_p9 = scmp.lt.u32.totalorder %s3615_s16, %s4966_s4 }
  0x3b   : > { %p3618_p3 = pnand %p3616_p2, %p3760_p8 }
  0x3d   : > { %p3619_p6 = pneg %p3618_p3 }
  0x3f   : > { %p3624_p10 = pnand %p3622_p9, %p3619_p6 }
  0x41   : > { %3627 = shalt.err (!%p3624_p10)
}
  0x42   : > { %s3628_s30 = scalar_lea.vmem %s211_s13, 16  ;;  %s3635_s6 = scalar_lea.vmem %s211_s13, 32 }
  0x43   : > { %p3629_p11 = scmp.ne.s32.totalorder %s211_s13, %s3628_s30  ;;  %p3636_p0 = scmp.lt.s32.totalorder %s211_s13, %s211_s13 }
  0x44   : > { %p3637_p1 = scmp.lt.s32.totalorder %s3635_s6, %s3628_s30 }
  0x45   : > { %p3631_p12 = pnand %p3629_p11, %p3760_p8 }
  0x46   : > { %p3638_p4 = por %p3637_p1, %p3636_p0 }
  0x47   : > { %p3632_p13 = pneg %p3631_p12 }
  0x49   : > { %p3639_p7 = pnand %p3638_p4, %p3632_p13 }
  0x4b   : > { %3642 = shalt.err (!%p3639_p7)
}
  0x4c   : > { %3467 = dma.hbm_to_vmem [thread:$0]  (!%p3742_p5), %s4966_s4, 16, %s211_s13, [#allocation5]  }
  0x4d   : > { %p4977_p2 = scmp.ne.s32.totalorder %s4972_s25, 0 }
  0x4e   : > { %p4978_p3 = scmp.ne.s32.totalorder (!%p4977_p2), %s4971_s24, 0 }
  0x4f   : > { %231 = sbr.rel (%p4977_p2) target bundleno = 815 (0x32f), region = 40 }
  0x56   : > { %3656 = dma.done.wait (%p4978_p3), [#allocation3], 16  }
  0x57   : > { %3658 = vsyncadd (%p4978_p3), [#allocation3], 4294967280 }
  0x58   : > { %3660 = dma.done.wait (%p4978_p3), [#allocation5], 80  }
  0x59   : > { %3662 = vsyncadd (%p4978_p3), [#allocation5], 4294967216  ;;  %p272_p8 = scmp.lt.s32.totalorder %s3665_s18, 1  ;;  %vm654_vm0 = vcmask 1046528   ;;  %v3678_v4 = vmov 0   ;;  %v3504_v29 = vld [vmem:[%s4963_s1] sm:$0xff]  }
  0x5a   : > { %vm469_vm1 = vsmask.f32 7424  ;;  %3238 = vmatprep.subr.bf16.mxu0 %v3504_v29  ;;  %v3505_v38 = vld [vmem:[%s4963_s1 + $0x8] sm:$0xff]   ;;  %s3679_s12 = smov 64   ;;  %v3507_v53 = vld [vmem:[%s4963_s1 + $0x30] sm:$0xff]   ;;  %s3680_s17 = smov 32  }
  0x5b   : > { %s4990_s18 = smov (!%p272_p8, %s3665_s18), 1  ;;  %3239 = vmatpush3.bf16.msra.mxu0 %v3504_v29  ;;  %v3506_v60 = vld [vmem:[%s4963_s1 + $0x10] sm:$0xff]   ;;  %3190 = vmatprep.subr.bf16.mxu1 %v3507_v53  ;;  %vm728_vm2 = vcmask 261120   ;;  %vm765_vm3 = vcmask 523264   ;;  %vm968_vm4 = vcmask 785408   ;;  %vm1514_vm5 = vcmask 1045504  }
  0x5c   : > { %s3445_s25 = smul.u32 172, %s4990_s18  ;;  %3240 = vmatprep.subr.bf16.mxu0 %v3505_v38  ;;  %3191 = vmatpush3.bf16.msra.mxu1 %v3507_v53  ;;  %vm2015_vm6 = vcmask 1043456   ;;  %vm1960_vm7 = vcmask 64512   ;;  %vm2270_vm8 = vcmask 1044480   ;;  %vm2477_vm9 = vcmask 257024   ;;  %s3062_s27 = sshll.u32 %s4990_s18, 7 }
  0x5d   : > { %vm2488_vm10 = vcmask 1042432   ;;  %vm2489_vm11 = vcmask 1046532   ;;  %s4643_s24 = scalar_lea.vmem %s4967_s5, %s3062_s27  ;;  %vm2528_vm12 = vcmask 1040384   ;;  %vm2529_vm13 = vcmask 1044484  }
  0x5e   : > { %s3840_s22 = scalar_lea.vmem %s4962_s0, %s3445_s25  ;;  %vm2508_vm14 = vcmask 1041408   ;;  %vm2509_vm15 = vcmask 1045508  }
  0x5f   : > { %v294_v0 = vld [vmem:[%s3840_s22] sm:$0xf]  ;;  %v295_v1 = vld [vmem:[%s3840_s22 + $0x4] sm:$0xf]  ;;  %v296_v2 = vld [vmem:[%s3840_s22 + $0x8] sm:$0xf]  ;;  %3241 = vmatpush3.bf16.msra.mxu0 %v3505_v38 }
  0x60   : > { %v297_v3 = vld [vmem:[%s3840_s22 + $0xc] sm:$0xf]  ;;  %v335_v5 = vmax.bf16 %v3678_v4, %v294_v0  ;;  %v336_v6 = vmax.bf16 %v3678_v4, %v295_v1  ;;  %v337_v7 = vmax.bf16 %v3678_v4, %v296_v2  ;;  %v298_v8 = vld [vmem:[%s3840_s22 + $0x10] sm:$0xf]  ;;  %v299_v9 = vld [vmem:[%s3840_s22 + $0x14] sm:$0xf]  ;;  %3242 = vmatprep.subr.bf16.mxu0 %v3506_v60 }
  0x61   : > { %v338_v10 = vmax.bf16 %v3678_v4, %v297_v3  ;;  %v339_v11 = vmax.bf16 %v3678_v4, %v298_v8  ;;  %v340_v12 = vmax.bf16 %v3678_v4, %v299_v9  ;;  %v300_v13 = vld [vmem:[%s3840_s22 + $0x18] sm:$0xf]  ;;  %v301_v14 = vld [vmem:[%s3840_s22 + $0x1c] sm:$0xf]  ;;  %v302_v15 = vld [vmem:[%s3840_s22 + $0x20] sm:$0xf] }
  0x62   : > { %v3857_v16 = vcombine.low %v335_v5, %v336_v6  ;;  %v303_v17 = vld [vmem:[%s3840_s22 + $0x24] sm:$0xf]  ;;  %v341_v18 = vmax.bf16 %v3678_v4, %v300_v13  ;;  %v342_v19 = vmax.bf16 %v3678_v4, %v301_v14  ;;  %v343_v20 = vmax.bf16 %v3678_v4, %v302_v15  ;;  %v304_v28 = vld [vmem:[%s3840_s22 + $0x28] sm:$0xf]  ;;  %v305_v42 = vld [vmem:[%s3840_s22 + $0x2c] sm:$0xf] }
  0x63   : > { %v3863_v21 = vcombine.low %v337_v7, %v338_v10  ;;  %v3865_v22 = vcombine.low %v339_v11, %v340_v12  ;;  %v344_v23 = vmax.bf16 %v3678_v4, %v303_v17  ;;  %v345_v43 = vmax.bf16 %v3678_v4, %v304_v28  ;;  %v306_v51 = vld [vmem:[%s3840_s22 + $0x30] sm:$0xf]  ;;  %v307_v52 = vld [vmem:[%s3840_s22 + $0x34] sm:$0xf]  ;;  %v308_v58 = vld [vmem:[%s3840_s22 + $0x38] sm:$0xf]  ;;  %3243 = vmatpush3.bf16.msra.mxu0 %v3506_v60 }
  0x64   : > { %v655_v24 = vrot.slane %v3857_v16, 1  ;;  %v471_v25 = vshrl.u32 %v3857_v16, 16  ;;  %v473_v26 = vshll.u32 %v3857_v16, 16  ;;  %v3871_v27 = vcombine.low %v341_v18, %v342_v19  ;;  %v309_v59 = vld [vmem:[%s3840_s22 + $0x3c] sm:$0xf]  ;;  %v3511_v28 = vld [vmem:[%s4963_s1 + $0x40] sm:$0xff]  }
  0x65   : > { %v656_v30 = vrot.slane %v3863_v21, 1  ;;  %v478_v31 = vshll.u32 %v3863_v21, 16  ;;  %v658_v32 = vrot.slane %v3865_v22, 1  ;;  %v482_v33 = vshrl.u32 %v3863_v21, 16  ;;  %v310_v3 = vld [vmem:[%s3840_s22 + $0x40] sm:$0xf] }
  0x66   : > { %v475_v34 = vrot.slane %v473_v26, 1  ;;  %v486_v35 = vshll.u32 %v3865_v22, 16  ;;  %v3882_v36 = vcombine.low %v343_v20, %v344_v23  ;;  %v494_v37 = vshll.u32 %v3871_v27, 16  ;;  %v311_v5 = vld [vmem:[%s3840_s22 + $0x44] sm:$0xf]  ;;  %v3509_v10 = vld [vmem:[%s4963_s1 + $0x38] sm:$0xff]  }
  0x67   : > { %v657_v39 = vsel %vm654_vm0, %v655_v24, %v656_v30  ;;  %v480_v40 = vrot.slane %v478_v31, 1  ;;  %v498_v41 = vshrl.u32 %v3871_v27, 16  ;;  %v659_v48 = vsel %vm654_vm0, %v656_v30, %v658_v32  ;;  %v3508_v14 = vld [vmem:[%s4963_s1 + $0x18] sm:$0xff]   ;;  %v312_v19 = vld [vmem:[%s3840_s22 + $0x48] sm:$0xf]  ;;  %3192 = vmatprep.subr.bf16.mxu1 %v3509_v10 }
  0x68   : > { %692 = vrot.lane.b32.xlu1 %v657_v39, %s3679_s12  ;;  %v476_v44 = vor.u32 %v475_v34, %v471_v25  ;;  %v488_v45 = vrot.slane %v486_v35, 1  ;;  %v496_v46 = vrot.slane %v494_v37, 1  ;;  %v502_v47 = vshll.u32 %v3882_v36, 16  ;;  %v313_v26 = vld [vmem:[%s3840_s22 + $0x4c] sm:$0xf]  ;;  %3244 = vmatprep.subr.bf16.mxu0 %v3508_v14 }
  0x69   : > { %v484_v49 = vor.u32 %v482_v33, %v480_v40  ;;  %v490_v50 = vshrl.u32 %v3865_v22, 16  ;;  %v346_v57 = vmax.bf16 %v3678_v4, %v305_v42  ;;  %v660_v62 = vrot.slane %v3871_v27, 1  ;;  %v314_v33 = vld [vmem:[%s3840_s22 + $0x50] sm:$0xf]  ;;  %v315_v34 = vld [vmem:[%s3840_s22 + $0x54] sm:$0xf]  ;;  %3193 = vmatpush3.bf16.msra.mxu1 %v3509_v10  ;;  %3245 = vmatpush3.bf16.msra.mxu0 %v3508_v14 }
  0x6a   : > { %v481_v54 = vsel %vm469_vm1, %v476_v44, %v480_v40  ;;  %v500_v55 = vor.u32 %v498_v41, %v496_v46  ;;  %v3904_v56 = vrot.slane %v502_v47, 1  ;;  %v347_v0 = vmax.bf16 %v3678_v4, %v306_v51  ;;  %v316_v38 = vld [vmem:[%s3840_s22 + $0x58] sm:$0xf]  ;;  %v317_v39 = vld [vmem:[%s3840_s22 + $0x5c] sm:$0xf]  ;;  %v3510_v40 = vld [vmem:[%s4963_s1 + $0x20] sm:$0xff]   ;;  %3194 = vmatprep.subr.bf16.mxu1 %v3511_v28 }
  0x6b   : > { %618 = vrot.lane.b32.xlu0 %v481_v54, %s3680_s17  ;;  %v489_v61 = vsel %vm469_vm1, %v484_v49, %v488_v45  ;;  %v492_v63 = vor.u32 %v490_v50, %v488_v45  ;;  %v348_v1 = vmax.bf16 %v3678_v4, %v307_v52  ;;  %v3918_v2 = vcombine.low %v345_v43, %v346_v57  ;;  %v3513_v44 = vld [vmem:[%s4963_s1 + $0x48] sm:$0xff]  }
  0x6c   : > { %694 = vrot.lane.b32.xlu1 %v659_v48, %s3679_s12  ;;  %v505_v6 = vsel %vm469_vm1, %v500_v55, %v3904_v56  ;;  %v662_v7 = vrot.slane %v3882_v36, 1  ;;  %v349_v8 = vmax.bf16 %v3678_v4, %v308_v58  ;;  %v350_v9 = vmax.bf16 %v3678_v4, %v309_v59  ;;  %3246 = vmatprep.subr.bf16.mxu0 %v3510_v40  ;;  %v318_v55 = vld [vmem:[%s3840_s22 + $0x60] sm:$0xf] }
  0x6d   : > { %v3930_v11 = vcombine.low %v347_v0, %v348_v1  ;;  %v510_v12 = vshll.u32 %v3918_v2, 16  ;;  %v514_v13 = vshrl.u32 %v3918_v2, 16  ;;  %v351_v15 = vmax.bf16 %v3678_v4, %v310_v3  ;;  %3195 = vmatpush3.bf16.msra.mxu1 %v3511_v28  ;;  %3247 = vmatpush3.bf16.msra.mxu0 %v3510_v40  ;;  %v323_v40 = vld [vmem:[%s3840_s22 + $0x74] sm:$0xf] }
  0x6e   : > { %v352_v17 = vmax.bf16 %v3678_v4, %v311_v5  ;;  %v3940_v18 = vcombine.low %v349_v8, %v350_v9  ;;  %v497_v20 = vsel %vm469_vm1, %v492_v63, %v496_v46  ;;  %v506_v25 = vshrl.u32 %v3882_v36, 16  ;;  %3196 = vmatprep.subr.bf16.mxu1 %v3513_v44  ;;  %v4007_v5 = vld [vmem:[%s4963_s1 + $0x60] sm:$0xff]  }
  0x6f   : > { %620 = vrot.lane.b32.xlu0 %v489_v61, %s3680_s17  ;;  %v512_v23 = vrot.slane %v510_v12, 1  ;;  %v518_v24 = vshll.u32 %v3930_v11, 16  ;;  %v663_v29 = vsel %vm654_vm0, %v660_v62, %v662_v7  ;;  %v664_v41 = vrot.slane %v3918_v2, 1  ;;  %v319_v61 = vld [vmem:[%s3840_s22 + $0x64] sm:$0xf] }
  0x70   : > { %624 = vrot.lane.b32.xlu1 %v505_v6, %s3680_s17  ;;  %v3954_v30 = vcombine.low %v351_v15, %v352_v17  ;;  %v526_v31 = vshll.u32 %v3940_v18, 16  ;;  %v666_v42 = vrot.slane %v3930_v11, 1  ;;  %v530_v43 = vshrl.u32 %v3940_v18, 16  ;;  %v320_v15 = vld [vmem:[%s3840_s22 + $0x68] sm:$0xf] }
  0x71   : > { %v516_v35 = vor.u32 %v514_v13, %v512_v23  ;;  %v520_v37 = vrot.slane %v518_v24, 1  ;;  %v661_v45 = vsel %vm654_vm0, %v658_v32, %v660_v62  ;;  %v508_v46 = vor.u32 %v506_v25, %v3904_v56  ;;  %v3512_v32 = vld [vmem:[%s4963_s1 + $0x28] sm:$0xff]   ;;  %v3515_v62 = vld [vmem:[%s4963_s1 + $0x50] sm:$0xff]   ;;  %3197 = vmatpush3.bf16.msra.mxu1 %v3513_v44  ;;  %v3516_v24 = vld [vmem:[%s4963_s1 + $0x58] sm:$0xff]  }
  0x72   : > { %v353_v47 = vmax.bf16 %v3678_v4, %v312_v19  ;;  %v354_v48 = vmax.bf16 %v3678_v4, %v313_v26  ;;  %v528_v50 = vrot.slane %v526_v31, 1  ;;  %v534_v51 = vshll.u32 %v3954_v30, 16  ;;  %3248 = vmatprep.subr.bf16.mxu0 %v3512_v32  ;;  %v321_v17 = vld [vmem:[%s3840_s22 + $0x6c] sm:$0xf]  ;;  %3198 = vmatprep.subr.bf16.mxu1 %v3515_v62 }
  0x73   : > { %622 = vrot.lane.b32.xlu0 %v497_v20, %s3680_s17  ;;  %v521_v49 = vsel %vm469_vm1, %v516_v35, %v520_v37  ;;  %v355_v52 = vmax.bf16 %v3678_v4, %v314_v33  ;;  %v356_v53 = vmax.bf16 %v3678_v4, %v315_v34  ;;  %v357_v56 = vmax.bf16 %v3678_v4, %v316_v38  ;;  %v322_v33 = vld [vmem:[%s3840_s22 + $0x70] sm:$0xf] }
  0x74   : > { %698 = vrot.lane.b32.xlu1 %v663_v29, %s3679_s12  ;;  %v3982_v54 = vcombine.low %v353_v47, %v354_v48  ;;  %v358_v57 = vmax.bf16 %v3678_v4, %v317_v39  ;;  %v513_v58 = vsel %vm469_vm1, %v508_v46, %v512_v23  ;;  %v667_v59 = vsel %vm654_vm0, %v664_v41, %v666_v42 }
  0x75   : > { %v522_v60 = vshrl.u32 %v3930_v11, 16  ;;  %v532_v63 = vor.u32 %v530_v43, %v528_v50  ;;  %v536_v0 = vrot.slane %v534_v51, 1  ;;  %v4001_v1 = vcombine.low %v355_v52, %v356_v53  ;;  %3249 = vmatpush3.bf16.msra.mxu0 %v3512_v32  ;;  %3199 = vmatpush3.bf16.msra.mxu1 %v3515_v62  ;;  %v324_v51 = vld [vmem:[%s3840_s22 + $0x78] sm:$0xf]  ;;  %v325_v52 = vld [vmem:[%s3840_s22 + $0x7c] sm:$0xf] }
  0x76   : > { %v542_v3 = vshll.u32 %v3982_v54, 16  ;;  %v665_v6 = vsel %vm654_vm0, %v662_v7, %v664_v41  ;;  %v668_v8 = vrot.slane %v3940_v18, 1  ;;  %v4014_v9 = vcombine.low %v357_v56, %v358_v57  ;;  %3286 = vmatprep.subr.bf16.mxu0 %v4007_v5  ;;  %3200 = vmatprep.subr.bf16.mxu1 %v3516_v24 }
  0x77   : > { %696 = vrot.lane.b32.xlu0 %v661_v45, %s3679_s12  ;;  %v524_v10 = vor.u32 %v522_v60, %v520_v37  ;;  %v670_v12 = vrot.slane %v3954_v30, 1  ;;  %v359_v13 = vmax.bf16 %v3678_v4, %v318_v55  ;;  %v360_v14 = vmax.bf16 %v3678_v4, %v319_v61  ;;  %v333_v60 = vld [vmem:[%s3840_s22 + $0x9c] sm:$0xf] }
  0x78   : > { %628 = vrot.lane.b32.xlu1 %v521_v49, %s3680_s17  ;;  %v537_v7 = vsel %vm469_vm1, %v532_v63, %v536_v0  ;;  %v544_v19 = vrot.slane %v542_v3, 1  ;;  %v546_v20 = vshrl.u32 %v3982_v54, 16  ;;  %v550_v23 = vshll.u32 %v4001_v1, 16  ;;  %v327_v3 = vld [vmem:[%s3840_s22 + $0x84] sm:$0xf] }
  0x79   : > { %v538_v25 = vshrl.u32 %v3954_v30, 16  ;;  %v558_v26 = vshll.u32 %v4014_v9, 16  ;;  %v529_v28 = vsel %vm469_vm1, %v524_v10, %v528_v50  ;;  %v671_v29 = vsel %vm654_vm0, %v668_v8, %v670_v12  ;;  %3201 = vmatpush3.bf16.msra.mxu1 %v3516_v24 }
  0x7a   : > { %v4035_v31 = vcombine.low %v359_v13, %v360_v14  ;;  %v548_v34 = vor.u32 %v546_v20, %v544_v19  ;;  %v552_v35 = vrot.slane %v550_v23, 1  ;;  %v361_v37 = vmax.bf16 %v3678_v4, %v320_v15 }
  0x7b   : > { %626 = vrot.lane.b32.xlu0 %v513_v58, %s3680_s17  ;;  %v362_v38 = vmax.bf16 %v3678_v4, %v321_v17  ;;  %v672_v39 = vrot.slane %v3982_v54, 1  ;;  %v669_v41 = vsel %vm654_vm0, %v666_v42, %v668_v8  ;;  %v540_v43 = vor.u32 %v538_v25, %v536_v0  ;;  %v326_v0 = vld [vmem:[%s3840_s22 + $0x80] sm:$0xf] }
  0x7c   : > { %702 = vrot.lane.b32.xlu1 %v667_v59, %s3679_s12  ;;  %v674_v44 = vrot.slane %v4001_v1, 1  ;;  %v560_v45 = vrot.slane %v558_v26, 1  ;;  %v562_v46 = vshrl.u32 %v4014_v9, 16  ;;  %v566_v47 = vshll.u32 %v4035_v31, 16  ;;  %v332_v59 = vld [vmem:[%s3840_s22 + $0x98] sm:$0xf] }
  0x7d   : > { %v553_v48 = vsel %vm469_vm1, %v548_v34, %v552_v35  ;;  %v363_v49 = vmax.bf16 %v3678_v4, %v322_v33  ;;  %v364_v50 = vmax.bf16 %v3678_v4, %v323_v40  ;;  %v4053_v42 = vcombine.low %v361_v37, %v362_v38  ;;  %v328_v26 = vld [vmem:[%s3840_s22 + $0x88] sm:$0xf]  ;;  %v334_v33 = vld [vmem:[%s3840_s22 + $0xa0] sm:$0x7] }
  0x7e   : > { %v545_v53 = vsel %vm469_vm1, %v540_v43, %v544_v19  ;;  %v554_v32 = vshrl.u32 %v4001_v1, 16  ;;  %v564_v55 = vor.u32 %v562_v46, %v560_v45  ;;  %v568_v56 = vrot.slane %v566_v47, 1  ;;  %v330_v46 = vld [vmem:[%s3840_s22 + $0x90] sm:$0xf] }
  0x7f   : > { %700 = vrot.lane.b32.xlu0 %v665_v6, %s3679_s12  ;;  %v365_v57 = vmax.bf16 %v3678_v4, %v324_v51  ;;  %v366_v58 = vmax.bf16 %v3678_v4, %v325_v52  ;;  %v675_v61 = vsel %vm654_vm0, %v672_v39, %v674_v44  ;;  %v4066_v62 = vcombine.low %v363_v49, %v364_v50 }
  0x80   : > { %632 = vrot.lane.b32.xlu1 %v537_v7, %s3680_s17  ;;  %v574_v63 = vshll.u32 %v4053_v42, 16  ;;  %v673_v6 = vsel %vm654_vm0, %v670_v12, %v672_v39  ;;  %v676_v8 = vrot.slane %v4014_v9, 1  ;;  %v556_v10 = vor.u32 %v554_v32, %v552_v35 }
  0x81   : > { %v678_v13 = vrot.slane %v4035_v31, 1  ;;  %v4076_v14 = vmax.bf16 %v3678_v4, %v332_v59  ;;  %v374_v15 = vmax.bf16 %v3678_v4, %v333_v60  ;;  %v569_v17 = vsel %vm469_vm1, %v564_v55, %v568_v56 }
  0x82   : > { %v367_v12 = vmax.bf16 %v3678_v4, %v326_v0  ;;  %v368_v7 = vmax.bf16 %v3678_v4, %v327_v3  ;;  %v4083_v19 = vcombine.low %v365_v57, %v366_v58  ;;  %v576_v20 = vrot.slane %v574_v63, 1 }
  0x83   : > { %630 = vrot.lane.b32.xlu0 %v529_v28, %s3680_s17  ;;  %v578_v23 = vshrl.u32 %v4053_v42, 16  ;;  %v582_v24 = vshll.u32 %v4066_v62, 16  ;;  %v4088_v25 = vcombine.low %v4076_v14, %v374_v15  ;;  %v329_v28 = vld [vmem:[%s3840_s22 + $0x8c] sm:$0xf]  ;;  %v561_v34 = vsel %vm469_vm1, %v556_v10, %v560_v45  ;;  %v331_v15 = vld [vmem:[%s3840_s22 + $0x94] sm:$0xf] }
  0x84   : > { %706 = vrot.lane.b32.xlu1 %v671_v29, %s3679_s12  ;;  %v679_v29 = vsel %vm654_vm0, %v676_v8, %v678_v13  ;;  %v570_v35 = vshrl.u32 %v4035_v31, 16  ;;  %v4098_v37 = vcombine.low %v367_v12, %v368_v7  ;;  %v590_v38 = vshll.u32 %v4083_v19, 16 }
  0x85   : > { %v580_v39 = vor.u32 %v578_v23, %v576_v20  ;;  %v584_v40 = vrot.slane %v582_v24, 1  ;;  %v370_v43 = vmax.bf16 %v3678_v4, %v329_v28  ;;  %v375_v47 = vmax.bf16 %v3678_v4, %v334_v33 }
  0x86   : > { %v680_v45 = vrot.slane %v4053_v42, 1  ;;  %v572_v49 = vor.u32 %v570_v35, %v568_v56  ;;  %v682_v50 = vrot.slane %v4066_v62, 1  ;;  %v592_v51 = vrot.slane %v590_v38, 1 }
  0x87   : > { %704 = vrot.lane.b32.xlu0 %v669_v41, %s3679_s12  ;;  %v369_v41 = vmax.bf16 %v3678_v4, %v328_v26  ;;  %v594_v52 = vshrl.u32 %v4083_v19, 16  ;;  %v598_v32 = vshll.u32 %v4098_v37, 16  ;;  %v371_v55 = vmax.bf16 %v3678_v4, %v330_v46 }
  0x88   : > { %636 = vrot.lane.b32.xlu1 %v553_v48, %s3680_s17  ;;  %v677_v48 = vsel %vm654_vm0, %v674_v44, %v676_v8  ;;  %v577_v44 = vsel %vm469_vm1, %v572_v49, %v576_v20  ;;  %v683_v56 = vsel %vm654_vm0, %v680_v45, %v682_v50  ;;  %v586_v58 = vshrl.u32 %v4066_v62, 16 }
  0x89   : > { %v4114_v57 = vcombine.low %v369_v41, %v370_v43  ;;  %v596_v59 = vor.u32 %v594_v52, %v592_v51  ;;  %v600_v60 = vrot.slane %v598_v32, 1  ;;  %v681_v0 = vsel %vm654_vm0, %v678_v13, %v680_v45 }
  0x8a   : > { %v588_v3 = vor.u32 %v586_v58, %v584_v40  ;;  %v686_v8 = vrot.slane %v4098_v37, 1  ;;  %v372_v13 = vmax.bf16 %v3678_v4, %v331_v15  ;;  %v602_v23 = vshrl.u32 %v4098_v37, 16 }
  0x8b   : > { %634 = vrot.lane.b32.xlu0 %v545_v53, %s3680_s17  ;;  %v585_v53 = vsel %vm469_vm1, %v580_v39, %v584_v40  ;;  %v606_v63 = vshll.u32 %v4114_v57, 16  ;;  %v601_v10 = vsel %vm469_vm1, %v596_v59, %v600_v60  ;;  %v610_v12 = vshrl.u32 %v4114_v57, 16 }
  0x8c   : > { %710 = vrot.lane.b32.xlu1 %v675_v61, %s3679_s12  ;;  %v2885_v61 = vcombine.low %v371_v55, %v371_v55  ;;  %v593_v20 = vsel %vm469_vm1, %v588_v3, %v592_v51  ;;  %v4139_v33 = vcombine.low %v371_v55, %v372_v13  ;;  %v688_v38 = vrot.slane %v4114_v57, 1 }
  0x8d   : > { %v4149_v46 = vcombine.low %v375_v47, %v375_v47  ;;  %v4158_v51 = vcombine.low %v4076_v14, %v4076_v14  ;;  %v1477_v47 = vrot.slane %v4088_v25, 1 }
  0x8e   : > { %v614_v7 = vshll.u32 %v2885_v61, 16  ;;  %v690_v4 = vrot.slane %v2885_v61, 1  ;;  %v821_v40 = vshll.u32 %v4139_v33, 16  ;;  %v842_v43 = vrot.slane %v4139_v33, 1 }
  0x8f   : > { %708 = vrot.lane.b32.xlu0 %v673_v6, %s3679_s12  ;;  %v684_v6 = vrot.slane %v4083_v19, 1  ;;  %v689_v45 = vsel %vm654_vm0, %v686_v8, %v688_v38  ;;  %v1464_v32 = vshll.u32 %v4149_v46, 16  ;;  %v829_v58 = vshll.u32 %v4158_v51, 16 }
  0x90   : > { %640 = vrot.lane.b32.xlu1 %v569_v17, %s3680_s17  ;;  %v608_v17 = vrot.slane %v606_v63, 1  ;;  %v616_v28 = vrot.slane %v614_v7, 1  ;;  %v691_v41 = vsel %vm654_vm0, %v688_v38, %v690_v4  ;;  %v823_v49 = vrot.slane %v821_v40, 1 }
  0x91   : > { %v687_v24 = vsel %vm654_vm0, %v684_v6, %v686_v8  ;;  %v843_v52 = vsel %vm654_vm0, %v688_v38, %v842_v43  ;;  %v1478_v14 = vsel %vm654_vm0, %v842_v43, %v1477_v47  ;;  %v831_v63 = vrot.slane %v829_v58, 1  ;;  %v3517_v38 = vld [vmem:[%s4963_s1 + $0x68] sm:$0xff]  }
  0x92   : > { %v612_v26 = vor.u32 %v610_v12, %v608_v17  ;;  %v844_v3 = vrot.slane %v4158_v51, 1  ;;  %v1479_v15 = vrot.slane %v4149_v46, 1  ;;  %v1468_v12 = vshrl.u32 %v4149_v46, 16 }
  0x93   : > { %638 = vrot.lane.b32.xlu0 %v561_v34, %s3680_s17  ;;  %v604_v34 = vor.u32 %v602_v23, %v600_v60  ;;  %v1466_v60 = vrot.slane %v1464_v32, 1 }
  0x94   : > { %714 = vrot.lane.b32.xlu1 %v679_v29, %s3679_s12  ;;  %v685_v29 = vsel %vm654_vm0, %v682_v50, %v684_v6  ;;  %v617_v35 = vsel %vm469_vm1, %v612_v26, %v616_v28  ;;  %v825_v50 = vshrl.u32 %v4139_v33, 16  ;;  %v833_v6 = vshrl.u32 %v4158_v51, 16 }
  0x95   : > { %v609_v39 = vsel %vm469_vm1, %v604_v34, %v608_v17  ;;  %v1480_v7 = vsel %vm654_vm0, %v1477_v47, %v1479_v15 }
  0x96   : > { %v835_v17 = vor.u32 %v833_v6, %v831_v63 }
  0x97   : > { %712 = vrot.lane.b32.xlu0 %v677_v48, %s3679_s12  ;;  %v1456_v48 = vshll.u32 %v4088_v25, 16 }
  0x98   : > { %644 = vrot.lane.b32.xlu1 %v585_v53, %s3680_s17  ;;  %v1460_v53 = vshrl.u32 %v4088_v25, 16 }
  0x99   : > { %v1458_v55 = vrot.slane %v1456_v48, 1 }
  0x9b   : > { %642 = vrot.lane.b32.xlu0 %v577_v44, %s3680_s17  ;;  %v824_v44 = vsel %vm469_vm1, %v612_v26, %v823_v49  ;;  %v1462_v59 = vor.u32 %v1460_v53, %v1458_v55 }
  0x9c   : > { %718 = vrot.lane.b32.xlu1 %v683_v56, %s3679_s12  ;;  %v827_v56 = vor.u32 %v825_v50, %v823_v49 }
  0x9e   : > { %v1459_v61 = vsel %vm469_vm1, %v827_v56, %v1458_v55  ;;  %v832_v8 = vsel %vm469_vm1, %v827_v56, %v831_v63 }
  0x9f   : > { %716 = vrot.lane.b32.xlu0 %v681_v0, %s3679_s12  ;;  %v1467_v0 = vsel %vm469_vm1, %v1462_v59, %v1466_v60  ;;  %vm4706_vm1 = vmor %vm2528_vm12, %vm2529_vm13 }
  0xa0   : > { %648 = vrot.lane.b32.xlu1 %v601_v10, %s3680_s17  ;;  %v845_v10 = vsel %vm654_vm0, %v842_v43, %v844_v3 }
  0xa3   : > { %646 = vrot.lane.b32.xlu0 %v593_v20, %s3680_s17  ;;  %v1470_v20 = vor.u32 %v1468_v12, %v1466_v60  ;;  %v3521_v60 = vld [vmem:[%s4963_s1 + $0x88] sm:$0xff]  }
  0xa4   : > { %722 = vrot.lane.b32.xlu1 %v687_v24, %s3679_s12 }
  0xa7   : > { %720 = vrot.lane.b32.xlu0 %v685_v29, %s3679_s12 }
  0xa8   : > { %652 = vrot.lane.b32.xlu1 %v617_v35, %s3680_s17 }
  0xab   : > { %650 = vrot.lane.b32.xlu0 %v609_v39, %s3680_s17 }
  0xac   : > { %726 = vrot.lane.b32.xlu1 %v691_v41, %s3679_s12 }
  0xaf   : > { %724 = vrot.lane.b32.xlu0 %v689_v45, %s3679_s12 }
  0xb0   : > { %846 = vrot.lane.b32.xlu1 %v843_v52, %s3679_s12 }
  0xb3   : > { %836 = vrot.lane.b32.xlu0 %v824_v44, %s3680_s17  ;;  %v3520_v44 = vld [vmem:[%s4963_s1 + $0x80] sm:$0xff]  }
  0xb4   : > { %1481 = vrot.lane.b32.xlu1 %v1478_v14, %s3679_s12 }
  0xb7   : > { %1471 = vrot.lane.b32.xlu0 %v1459_v61, %s3680_s17 }
  0xb8   : > { %1473 = vrot.lane.b32.xlu1 %v1467_v0, %s3680_s17 }
  0xbb   : > { %838 = vrot.lane.b32.xlu0 %v832_v8, %s3680_s17 }
  0xbc   : > { %848 = vrot.lane.b32.xlu1 %v845_v10, %s3679_s12 }
  0xbf   : > { %840 = vrot.lane.b32.xlu0 %v835_v17, %s3680_s17 }
  0xc0   : > { %1483 = vrot.lane.b32.xlu1 %v1480_v7, %s3679_s12 }
  0xc3   : > { %1475 = vrot.lane.b32.xlu0 %v1470_v20, %s3680_s17 }
  0xc4   : > { %1485 = vrot.lane.b32.xlu1 %v1479_v15, %s3679_s12 }
  0xc7   : > { %850 = vrot.lane.b32.xlu0 %v844_v3, %s3679_s12 }
  0xda   : > { %v693_v13 = vpop.permute.xlu1 %692 }
  0xdd   : > { %v619_v23 = vpop.permute.xlu0 %618 }
  0xde   : > { %v730_v24 = vsel %vm728_vm2, %v3857_v16, %v619_v23  ;;  %v695_v26 = vpop.permute.xlu1 %694 }
  0xdf   : > { %v767_v28 = vsel %vm765_vm3, %v730_v24, %v693_v13 }
  0xe0   : > { %3250 = vmatprep.mubr.msk.bf16.mxu0 %vm968_vm4, %v767_v28 }
  0xe1   : > { %v621_v29 = vpop.permute.xlu0 %620 }
  0xe2   : > { %v732_v34 = vsel %vm728_vm2, %v3863_v21, %v621_v29  ;;  %v625_v35 = vpop.permute.xlu1 %624  ;;  %v3518_v21 = vld [vmem:[%s4963_s1 + $0x70] sm:$0xff]  }
  0xe3   : > { %v769_v4 = vsel %vm765_vm3, %v732_v34, %v695_v26  ;;  %v736_v16 = vsel %vm728_vm2, %v3871_v27, %v625_v35 }
  0xe4   : > { %3251 = vmatmul.mubr.msk.bf16.vlgmr.msra.gmra.mrb[0].mxu0 %vm968_vm4, %v769_v4  ;;  %v895_v49 = vrot.slane %v769_v4, 1 }
  0xe5   : > { %3287 = vmatpush3.bf16.msra.mxu0 %v4007_v5  ;;  %v623_v39 = vpop.permute.xlu0 %622  ;;  %v3519_v5 = vld [vmem:[%s4963_s1 + $0x78] sm:$0xff]  }
  0xe6   : > { %v699_v40 = vpop.permute.xlu1 %698  ;;  %3288 = vmatprep.subr.bf16.mxu0 %v3517_v38  ;;  %v734_v43 = vsel %vm728_vm2, %v3865_v22, %v623_v39 }
  0xe7   : > { %v4207_v41 = vsel %vm765_vm3, %v736_v16, %v699_v40 }
  0xe8   : > { %v898_v50 = vrot.slane %v4207_v41, 1 }
  0xe9   : > { %v697_v48 = vpop.permute.xlu0 %696  ;;  %3289 = vmatpush3.bf16.msra.mxu0 %v3517_v38 }
  0xea   : > { %v4212_v45 = vsel %vm765_vm3, %v734_v43, %v697_v48  ;;  %v629_v27 = vpop.permute.xlu1 %628  ;;  %3290 = vmatprep.subr.bf16.mxu0 %v3518_v21 }
  0xeb   : > { %v896_v52 = vrot.slane %v4212_v45, 1  ;;  %3254 = vmatprep.mubr.msk.bf16.mxu0 %vm968_vm4, %v4212_v45  ;;  %v740_v22 = vsel %vm728_vm2, %v3918_v2, %v629_v27 }
  0xec   : > { %3255 = vmatmul.mubr.msk.bf16.gmra.mrb[4].mxu0 %vm968_vm4, %v4207_v41 }
  0xed   : > { %v627_v47 = vpop.permute.xlu0 %626  ;;  %v897_v53 = vsel %vm654_vm0, %v895_v49, %v896_v52  ;;  %v899_v32 = vsel %vm654_vm0, %v896_v52, %v898_v50  ;;  %3291 = vmatpush3.bf16.msra.mxu0 %v3518_v21 }
  0xee   : > { %3202 = vmatprep.mubr.msk.bf16.mxu1 %vm968_vm4, %v897_v53  ;;  %v703_v55 = vpop.permute.xlu1 %702  ;;  %3292 = vmatprep.subr.bf16.mxu0 %v3519_v5  ;;  %v738_v2 = vsel %vm728_vm2, %v3882_v36, %v627_v47 }
  0xef   : > { %3203 = vmatmul.mubr.msk.bf16.vlgmr.msra.gmra.mrb[0].mxu1 %vm968_vm4, %v899_v32  ;;  %v4233_v56 = vsel %vm765_vm3, %v740_v22, %v703_v55 }
  0xf0   : > { %v902_v61 = vrot.slane %v4233_v56, 1 }
  0xf1   : > { %v701_v58 = vpop.permute.xlu0 %700  ;;  %3293 = vmatpush3.bf16.msra.mxu0 %v3519_v5 }
  0xf2   : > { %v4238_v14 = vsel %vm765_vm3, %v738_v2, %v701_v58  ;;  %v633_v59 = vpop.permute.xlu1 %632  ;;  %3294 = vmatprep.subr.bf16.mxu0 %v3520_v44 }
  0xf3   : > { %v900_v63 = vrot.slane %v4238_v14, 1  ;;  %3258 = vmatprep.mubr.msk.bf16.mxu0 %vm968_vm4, %v4238_v14  ;;  %v744_v36 = vsel %vm728_vm2, %v3940_v18, %v633_v59 }
  0xf4   : > { %3259 = vmatmul.mubr.msk.bf16.gmra.mrb[8].mxu0 %vm968_vm4, %v4233_v56 }
  0xf5   : > { %v631_v0 = vpop.permute.xlu0 %630  ;;  %v901_v3 = vsel %vm654_vm0, %v898_v50, %v900_v63  ;;  %v903_v6 = vsel %vm654_vm0, %v900_v63, %v902_v61  ;;  %3295 = vmatpush3.bf16.msra.mxu0 %v3520_v44 }
  0xf6   : > { %3206 = vmatprep.mubr.msk.bf16.mxu1 %vm968_vm4, %v901_v3  ;;  %v707_v8 = vpop.permute.xlu1 %706  ;;  %3296 = vmatprep.subr.bf16.mxu0 %v3521_v60  ;;  %v742_v15 = vsel %vm728_vm2, %v3930_v11, %v631_v0 }
  0xf7   : > { %3207 = vmatmul.mubr.msk.bf16.gmra.mrb[4].mxu1 %vm968_vm4, %v903_v6  ;;  %v4256_v10 = vsel %vm765_vm3, %v744_v36, %v707_v8 }
  0xf8   : > { %v906_v7 = vrot.slane %v4256_v10, 1 }
  0xf9   : > { %v705_v17 = vpop.permute.xlu0 %704  ;;  %3297 = vmatpush3.bf16.msra.mxu0 %v3521_v60 }
  0xfa   : > { %v4261_v18 = vsel %vm765_vm3, %v742_v15, %v705_v17  ;;  %v637_v12 = vpop.permute.xlu1 %636 }
  0xfb   : > { %v904_v20 = vrot.slane %v4261_v18, 1  ;;  %3262 = vmatprep.mubr.msk.bf16.mxu0 %vm968_vm4, %v4261_v18  ;;  %v748_v13 = vsel %vm728_vm2, %v3982_v54, %v637_v12 }
  0xfc   : > { %3263 = vmatmul.mubr.msk.bf16.gmra.mrb[12].mxu0 %vm968_vm4, %v4256_v10 }
  0xfd   : > { %v635_v11 = vpop.permute.xlu0 %634  ;;  %v905_v23 = vsel %vm654_vm0, %v902_v61, %v904_v20  ;;  %v907_v24 = vsel %vm654_vm0, %v904_v20, %v906_v7 }
  0xfe   : > { %3210 = vmatprep.mubr.msk.bf16.mxu1 %vm968_vm4, %v905_v23  ;;  %v711_v26 = vpop.permute.xlu1 %710  ;;  %v746_v29 = vsel %vm728_vm2, %v3954_v30, %v635_v11 }
  0xff   : > { %3211 = vmatmul.mubr.msk.bf16.gmra.mrb[8].mxu1 %vm968_vm4, %v907_v24  ;;  %v4276_v28 = vsel %vm765_vm3, %v748_v13, %v711_v26  ;;  %v1515_v13 = vrot.slane %v4212_v45, 2  ;;  %v1516_v26 = vrot.slane %v4207_v41, 2 }
 0x100   : > { %v910_v38 = vrot.slane %v4276_v28, 1 }
 0x101   : > { %v709_v34 = vpop.permute.xlu0 %708  ;;  %v1517_v45 = vsel %vm1514_vm5, %v1515_v13, %v1516_v26 }
 0x102   : > { %v4281_v35 = vsel %vm765_vm3, %v746_v29, %v709_v34  ;;  %v641_v54 = vpop.permute.xlu1 %640 }
 0x103   : > { %v908_v4 = vrot.slane %v4281_v35, 1  ;;  %3266 = vmatprep.mubr.msk.bf16.mxu0 %vm968_vm4, %v4281_v35  ;;  %v752_v16 = vsel %vm728_vm2, %v4014_v9, %v641_v54 }
 0x104   : > { %3267 = vmatmul.mubr.msk.bf16.gmra.mrb[16].mxu0 %vm968_vm4, %v4276_v28 }
 0x105   : > { %v639_v39 = vpop.permute.xlu0 %638  ;;  %v909_v30 = vsel %vm654_vm0, %v906_v7, %v908_v4  ;;  %v911_v40 = vsel %vm654_vm0, %v908_v4, %v910_v38 }
 0x106   : > { %3214 = vmatprep.mubr.msk.bf16.mxu1 %vm968_vm4, %v909_v30  ;;  %v715_v21 = vpop.permute.xlu1 %714  ;;  %v750_v48 = vsel %vm728_vm2, %v4001_v1, %v639_v39  ;;  %v1518_v39 = vrot.slane %v4238_v14, 2 }
 0x107   : > { %3215 = vmatmul.mubr.msk.bf16.gmra.mrb[12].mxu1 %vm968_vm4, %v911_v40  ;;  %v4296_v43 = vsel %vm765_vm3, %v752_v16, %v715_v21 }
 0x108   : > { %v914_v49 = vrot.slane %v4296_v43, 1 }
 0x109   : > { %v713_v27 = vpop.permute.xlu0 %712 }
 0x10a   : > { %v4301_v5 = vsel %vm765_vm3, %v750_v48, %v713_v27  ;;  %v645_v9 = vpop.permute.xlu1 %644  ;;  %v1520_v48 = vrot.slane %v4233_v56, 2  ;;  %v1522_v56 = vrot.slane %v4261_v18, 2  ;;  %v1526_v18 = vrot.slane %v4281_v35, 2 }
 0x10b   : > { %v912_v50 = vrot.slane %v4301_v5, 1  ;;  %3270 = vmatprep.mubr.msk.bf16.mxu0 %vm968_vm4, %v4301_v5  ;;  %v756_v52 = vsel %vm728_vm2, %v4053_v42, %v645_v9  ;;  %v1532_v35 = vrot.slane %v4296_v43, 2 }
 0x10c   : > { %3271 = vmatmul.mubr.msk.bf16.gmra.mrb[20].mxu0 %vm968_vm4, %v4296_v43 }
 0x10d   : > { %v643_v22 = vpop.permute.xlu0 %642  ;;  %v913_v1 = vsel %vm654_vm0, %v910_v38, %v912_v50  ;;  %v915_v47 = vsel %vm654_vm0, %v912_v50, %v914_v49 }
 0x10e   : > { %3218 = vmatprep.mubr.msk.bf16.mxu1 %vm968_vm4, %v913_v1  ;;  %v719_v53 = vpop.permute.xlu1 %718  ;;  %v754_v55 = vsel %vm728_vm2, %v4035_v31, %v643_v22 }
 0x10f   : > { %3219 = vmatmul.mubr.msk.bf16.gmra.mrb[16].mxu1 %vm968_vm4, %v915_v47  ;;  %v4316_v32 = vsel %vm765_vm3, %v756_v52, %v719_v53  ;;  %v1524_v53 = vrot.slane %v4256_v10, 2  ;;  %v1528_v10 = vrot.slane %v4276_v28, 2 }
 0x110   : > { %v918_v58 = vrot.slane %v4316_v32, 1 }
 0x111   : > { %v717_v44 = vpop.permute.xlu0 %716 }
 0x112   : > { %v4321_v2 = vsel %vm765_vm3, %v754_v55, %v717_v44  ;;  %v649_v42 = vpop.permute.xlu1 %648  ;;  %v1523_v44 = vsel %vm1514_vm5, %v1520_v48, %v1522_v56 }
 0x113   : > { %v916_v59 = vrot.slane %v4321_v2, 1  ;;  %3274 = vmatprep.mubr.msk.bf16.mxu0 %vm968_vm4, %v4321_v2  ;;  %v760_v60 = vsel %vm728_vm2, %v4083_v19, %v649_v42  ;;  %v1525_v42 = vsel %vm1514_vm5, %v1522_v56, %v1524_v53 }
 0x114   : > { %3275 = vmatmul.mubr.msk.bf16.gmra.mrb[24].mxu0 %vm968_vm4, %v4316_v32 }
 0x115   : > { %v647_v61 = vpop.permute.xlu0 %646  ;;  %v917_v31 = vsel %vm654_vm0, %v914_v49, %v916_v59  ;;  %v919_v63 = vsel %vm654_vm0, %v916_v59, %v918_v58  ;;  %v1521_v49 = vsel %vm1514_vm5, %v1518_v39, %v1520_v48 }
 0x116   : > { %3222 = vmatprep.mubr.msk.bf16.mxu1 %vm968_vm4, %v917_v31  ;;  %v723_v36 = vpop.permute.xlu1 %722  ;;  %v758_v3 = vsel %vm728_vm2, %v4066_v62, %v647_v61  ;;  %v1527_v31 = vsel %vm1514_vm5, %v1524_v53, %v1526_v18 }
 0x117   : > { %3223 = vmatmul.mubr.msk.bf16.gmra.mrb[20].mxu1 %vm968_vm4, %v919_v63  ;;  %v4336_v0 = vsel %vm765_vm3, %v760_v60, %v723_v36  ;;  %v1529_v36 = vsel %vm1514_vm5, %v1526_v18, %v1528_v10 }
 0x118   : > { %v922_v15 = vrot.slane %v4336_v0, 1 }
 0x119   : > { %v721_v6 = vpop.permute.xlu0 %720 }
 0x11a   : > { %v4341_v8 = vsel %vm765_vm3, %v758_v3, %v721_v6  ;;  %v653_v19 = vpop.permute.xlu1 %652  ;;  %v1952_v6 = vld [vmem:[#allocation4] sm:$0xf] }
 0x11b   : > { %v920_v17 = vrot.slane %v4341_v8, 1  ;;  %3278 = vmatprep.mubr.msk.bf16.mxu0 %vm968_vm4, %v4341_v8  ;;  %v764_v11 = vsel %vm728_vm2, %v4114_v57, %v653_v19  ;;  %3444 = vmatprep.subr.msk.bf16.mxu1 %vm2015_vm6, %v1952_v6 }
 0x11c   : > { %3279 = vmatmul.mubr.msk.bf16.gmra.mrb[28].mxu0 %vm968_vm4, %v4336_v0 }
 0x11d   : > { %v651_v12 = vpop.permute.xlu0 %650  ;;  %v921_v7 = vsel %vm654_vm0, %v918_v58, %v920_v17  ;;  %v923_v62 = vsel %vm654_vm0, %v920_v17, %v922_v15  ;;  %v1534_v17 = vrot.slane %v4321_v2, 2 }
 0x11e   : > { %3226 = vmatprep.mubr.msk.bf16.mxu1 %vm968_vm4, %v921_v7  ;;  %v727_v20 = vpop.permute.xlu1 %726  ;;  %v762_v23 = vsel %vm728_vm2, %v4098_v37, %v651_v12  ;;  %v1536_v12 = vrot.slane %v4316_v32, 2  ;;  %v1538_v7 = vrot.slane %v4341_v8, 2 }
 0x11f   : > { %3227 = vmatmul.mubr.msk.bf16.gmra.mrb[24].mxu1 %vm968_vm4, %v923_v62  ;;  %v801_v54 = vsel %vm765_vm3, %v764_v11, %v727_v20  ;;  %v1540_v62 = vrot.slane %v4336_v0, 2 }
 0x120   : > { %v1537_v43 = vsel %vm1514_vm5, %v1534_v17, %v1536_v12  ;;  %v1539_v20 = vsel %vm1514_vm5, %v1536_v12, %v1538_v7 }
 0x121   : > { %v725_v24 = vpop.permute.xlu0 %724  ;;  %v1541_v2 = vsel %vm1514_vm5, %v1538_v7, %v1540_v62 }
 0x122   : > { %v4360_v29 = vsel %vm765_vm3, %v762_v23, %v725_v24  ;;  %v847_v34 = vpop.permute.xlu1 %846 }
 0x123   : > { %v924_v38 = vrot.slane %v4360_v29, 1  ;;  %3282 = vmatprep.mubr.msk.bf16.mxu0 %vm968_vm4, %v4360_v29  ;;  %v1542_v32 = vrot.slane %v4360_v29, 2 }
 0x124   : > { %3283 = vmatmul.mubr.msk.bf16.gmra.mrb[32].mxu0 %vm968_vm4, %v801_v54 }
 0x125   : > { %3298 = vmatprep.mubr.msk.bf16.mxu0 %vm968_vm4, %v1517_v45  ;;  %v837_v37 = vpop.permute.xlu0 %836  ;;  %v925_v41 = vsel %vm654_vm0, %v922_v15, %v924_v38  ;;  %v2017_v15 = vsel %vm2015_vm6, %v1952_v6, 0  ;;  %v1543_v0 = vsel %vm1514_vm5, %v1540_v62, %v1542_v32 }
 0x126   : > { %v853_v4 = vsel %vm728_vm2, %v4114_v57, %v837_v37  ;;  %3230 = vmatprep.mubr.msk.bf16.mxu1 %vm968_vm4, %v925_v41  ;;  %v4373_v16 = vpop.permute.xlu1 %1481  ;;  %v1519_v57 = vsel %vm1514_vm5, %v1516_v26, %v1518_v39  ;;  %3335 = vmatpush3.bf16.msra.mxu1 %v2017_v15 }
 0x127   : > { %v4377_v30 = vsel %vm765_vm3, %v853_v4, %v847_v34 }
 0x128   : > { %v926_v40 = vrot.slane %v4377_v30, 1  ;;  %v1544_v13 = vrot.slane %v4377_v30, 2 }
 0x129   : > { %v1472_v21 = vpop.permute.xlu0 %1471 }
 0x12a   : > { %v927_v27 = vsel %vm654_vm0, %v924_v38, %v926_v40  ;;  %v1474_v9 = vpop.permute.xlu1 %1473  ;;  %v1488_v11 = vsel %vm728_vm2, %v4139_v33, %v1472_v21  ;;  %v1545_v26 = vsel %vm1514_vm5, %v1542_v32, %v1544_v13 }
 0x12b   : > { %3231 = vmatmul.mubr.msk.bf16.gmra.mrb[28].mxu1 %vm968_vm4, %v927_v27  ;;  %v1490_v8 = vsel %vm728_vm2, %v4088_v25, %v1474_v9  ;;  %v1494_v24 = vsel %vm765_vm3, %v1488_v11, %v4373_v16 }
 0x12c   : > { %3299 = vmatmul.mubr.msk.bf16.vlgmr.msra.gmra.mrb[0].mxu0 %vm968_vm4, %v1519_v57  ;;  %v1546_v34 = vrot.slane %v1494_v24, 2 }
 0x12d   : > { %3302 = vmatprep.mubr.msk.bf16.mxu0 %vm968_vm4, %v1521_v49  ;;  %v839_v14 = vpop.permute.xlu0 %838 }
 0x12e   : > { %v855_v50 = vsel %vm728_vm2, %v4139_v33, %v839_v14  ;;  %v849_v52 = vpop.permute.xlu1 %848  ;;  %v1547_v38 = vsel %vm1514_vm5, %v1544_v13, %v1546_v34 }
 0x12f   : > { %v861_v22 = vsel %vm765_vm3, %v855_v50, %v849_v52 }
 0x130   : > { %v928_v1 = vrot.slane %v861_v22, 1 }
 0x131   : > { %v841_v47 = vpop.permute.xlu0 %840 }
 0x132   : > { %v929_v55 = vsel %vm654_vm0, %v926_v40, %v928_v1  ;;  %v857_v59 = vsel %vm728_vm2, %v4158_v51, %v841_v47  ;;  %v1530_v51 = vrot.slane %v4301_v5, 2  ;;  %v1535_v5 = vsel %vm1514_vm5, %v1532_v35, %v1534_v17  ;;  %v1484_v23 = vpop.permute.xlu1 %1483 }
 0x133   : > { %3234 = vmatprep.mubr.msk.bf16.mxu1 %vm968_vm4, %v929_v55  ;;  %v1496_v29 = vsel %vm765_vm3, %v1490_v8, %v1484_v23 }
 0x134   : > { %3303 = vmatmul.mubr.msk.bf16.gmra.mrb[4].mxu0 %vm968_vm4, %v1523_v44  ;;  %v1531_v28 = vsel %vm1514_vm5, %v1528_v10, %v1530_v51  ;;  %v1533_v19 = vsel %vm1514_vm5, %v1530_v51, %v1532_v35  ;;  %v1548_v54 = vrot.slane %v1496_v29, 2 }
 0x135   : > { %3306 = vmatprep.mubr.msk.bf16.mxu0 %vm968_vm4, %v1525_v42  ;;  %v1476_v58 = vpop.permute.xlu0 %1475 }
 0x136   : > { %v1492_v33 = vsel %vm728_vm2, %v4149_v46, %v1476_v58  ;;  %v1486_v25 = vpop.permute.xlu1 %1485  ;;  %v1549_v37 = vsel %vm1514_vm5, %v1546_v34, %v1548_v54  ;;  %vm4713_vm2 = vmor %vm2508_vm14, %vm2509_vm15 }
 0x137   : > { %v1498_v45 = vsel %vm765_vm3, %v1492_v33, %v1486_v25 }
 0x138   : > { %v1550_v41 = vrot.slane %v1498_v45, 2 }
 0x139   : > { %v851_v60 = vpop.permute.xlu0 %850 }
 0x13a   : > { %v863_v61 = vsel %vm765_vm3, %v857_v59, %v851_v60  ;;  %v1551_v4 = vsel %vm1514_vm5, %v1548_v54, %v1550_v41 }
 0x13b   : > { %v930_v63 = vrot.slane %v863_v61, 1 }
 0x13c   : > { %3307 = vmatmul.mubr.msk.bf16.gmra.mrb[8].mxu0 %vm968_vm4, %v1527_v31 }
 0x13d   : > { %3310 = vmatprep.mubr.msk.bf16.mxu0 %vm968_vm4, %v1529_v36  ;;  %v931_v3 = vsel %vm654_vm0, %v928_v1, %v930_v63  ;;  %vm4666_vm0 = vmor %vm2488_vm10, %vm2489_vm11 }
 0x13e   : > { %3235 = vmatmul.mubr.msk.bf16.gmra.mrb[32].mxu1 %vm968_vm4, %v931_v3  ;;  %v4493_v3 = vld [vmem:[#allocation2] ss:$0 sm:$0xff] }
 0x144   : > { %3311 = vmatmul.mubr.msk.bf16.gmra.mrb[12].mxu0 %vm968_vm4, %v1531_v28 }
 0x145   : > { %3314 = vmatprep.mubr.msk.bf16.mxu0 %vm968_vm4, %v1533_v19 }
 0x14c   : > { %3315 = vmatmul.mubr.msk.bf16.gmra.mrb[16].mxu0 %vm968_vm4, %v1535_v5 }
 0x14d   : > { %3318 = vmatprep.mubr.msk.bf16.mxu0 %vm968_vm4, %v1537_v43 }
 0x154   : > { %3319 = vmatmul.mubr.msk.bf16.gmra.mrb[20].mxu0 %vm968_vm4, %v1539_v20 }
 0x155   : > { %3322 = vmatprep.mubr.msk.bf16.mxu0 %vm968_vm4, %v1541_v2 }
 0x15c   : > { %3323 = vmatmul.mubr.msk.bf16.gmra.mrb[24].mxu0 %vm968_vm4, %v1543_v0 }
 0x15d   : > { %3326 = vmatprep.mubr.msk.bf16.mxu0 %vm968_vm4, %v1545_v26 }
 0x164   : > { %3327 = vmatmul.mubr.msk.bf16.gmra.mrb[28].mxu0 %vm968_vm4, %v1547_v38 }
 0x165   : > { %3330 = vmatprep.mubr.msk.bf16.mxu0 %vm968_vm4, %v1549_v37 }
 0x16c   : > { %3331 = vmatmul.mubr.msk.bf16.gmra.mrb[32].mxu0 %vm968_vm4, %v1551_v4 }
 0x1c2   : > { %v3204_v16 = vpop.f32.mrb[0].mxu1 }
 0x1c3   : > { %v1057_v39 = vpop.f32.mrb[1].mxu1 }
 0x1c4   : > { %v3205_v30 = vpop.f32.mrb[2].mxu1 }
 0x1c5   : > { %v1060_v46 = vpop.f32.mrb[3].mxu1 }
 0x1ca   : > { %v3208_v40 = vpop.f32.mrb[4].mxu1 }
 0x1cb   : > { %v1073_v21 = vpop.f32.mrb[5].mxu1 }
 0x1cc   : > { %v3209_v48 = vpop.f32.mrb[6].mxu1 }
 0x1cd   : > { %v1076_v27 = vpop.f32.mrb[7].mxu1 }
 0x1d2   : > { %v4449_v9 = vpop.f32.mrb[8].mxu1 }
 0x1d3   : > { %v4451_v57 = vpop.f32.mrb[9].mxu1 }
 0x1d4   : > { %v4453_v49 = vpop.f32.mrb[10].mxu1 }
 0x1d5   : > { %v4455_v14 = vpop.f32.mrb[11].mxu1 }
 0x1da   : > { %v4457_v50 = vpop.f32.mrb[12].mxu1 }
 0x1db   : > { %v4459_v52 = vpop.f32.mrb[13].mxu1 }
 0x1dc   : > { %v4461_v56 = vpop.f32.mrb[14].mxu1 }
 0x1dd   : > { %v4463_v22 = vpop.f32.mrb[15].mxu1 }
 0x1e2   : > { %v4465_v1 = vpop.f32.mrb[16].mxu1 }
 0x1e3   : > { %v4467_v47 = vpop.f32.mrb[17].mxu1 }
 0x1e4   : > { %v4469_v53 = vpop.f32.mrb[18].mxu1 }
 0x1e5   : > { %v4471_v55 = vpop.f32.mrb[19].mxu1 }
 0x1ea   : > { %v4473_v44 = vpop.f32.mrb[20].mxu1 }
 0x1eb   : > { %v4475_v42 = vpop.f32.mrb[21].mxu1 }
 0x1ec   : > { %v4477_v58 = vpop.f32.mrb[22].mxu1 }
 0x1ed   : > { %v4479_v18 = vpop.f32.mrb[23].mxu1 }
 0x1f2   : > { %v4481_v59 = vpop.f32.mrb[24].mxu1 }
 0x1f3   : > { %v4483_v60 = vpop.f32.mrb[25].mxu1 }
 0x1f4   : > { %v4485_v10 = vpop.f32.mrb[26].mxu1 }
 0x1f5   : > { %v4487_v61 = vpop.f32.mrb[27].mxu1 }
 0x1fe   : > { %v4489_v31 = vpop.f32.mrb[28].mxu1 }
 0x1ff   : > { %v4491_v63 = vpop.f32.mrb[29].mxu1  ;;  %v3300_v36 = vpop.f32.mrb[0].mxu0 }
 0x200   : > { %v3372_v51 = vadd.f32 %v3300_v36, %v3204_v16  ;;  %v4495_v35 = vpop.f32.mrb[30].mxu1  ;;  %v1676_v28 = vpop.f32.mrb[1].mxu0 }
 0x201   : > { %v3373_v6 = vadd.f32 %v1676_v28, %v1057_v39  ;;  %v4497_v19 = vpop.f32.mrb[31].mxu1  ;;  %v3301_v15 = vpop.f32.mrb[2].mxu0 }
 0x202   : > { %v1864_v17 = vadd.f32 %v3372_v51, %v4493_v3  ;;  %v3374_v12 = vadd.f32 %v3301_v15, %v3205_v30  ;;  %v1679_v5 = vpop.f32.mrb[3].mxu0 }
 0x203   : > { %v1862_v43 = vadd.f32 %v3373_v6, %v4493_v3  ;;  %v3375_v7 = vadd.f32 %v1679_v5, %v1060_v46 }
 0x204   : > { %v1865_v62 = vadd.f32 %v3374_v12, %v4493_v3  ;;  %v1900_v2 = vmax.f32 %v1864_v17, 0.0 }
 0x205   : > { %v1863_v20 = vadd.f32 %v3375_v7, %v4493_v3  ;;  %v1898_v13 = vmax.f32 %v1862_v43, 0.0 }
 0x206   : > { %v1901_v32 = vmax.f32 %v1865_v62, 0.0 }
 0x207   : > { %v1899_v11 = vmax.f32 %v1863_v20, 0.0  ;;  %v3304_v8 = vpop.f32.mrb[4].mxu0 }
 0x208   : > { %v1935_v23 = vpack.c.bf16 %v1901_v32, %v1900_v2  ;;  %v3376_v0 = vadd.f32 %v3304_v8, %v3208_v40  ;;  %v1692_v24 = vpop.f32.mrb[5].mxu0 }
 0x209   : > { %v1934_v26 = vpack.c.bf16 %v1899_v11, %v1898_v13  ;;  %v3377_v29 = vadd.f32 %v1692_v24, %v1073_v21  ;;  %v3305_v34 = vpop.f32.mrb[6].mxu0 }
 0x20a   : > { %v1868_v54 = vadd.f32 %v3376_v0, %v4493_v3  ;;  %v3378_v33 = vadd.f32 %v3305_v34, %v3209_v48  ;;  %v1695_v25 = vpop.f32.mrb[7].mxu0 }
 0x20b   : > { %v1866_v38 = vadd.f32 %v3377_v29, %v4493_v3  ;;  %v3379_v45 = vadd.f32 %v1695_v25, %v1076_v27  ;;  %3336 = vmatprep.mubr.msk.bf16.mxu1 %vm1960_vm7, %v1934_v26 }
 0x20c   : > { %v1869_v37 = vadd.f32 %v3378_v33, %v4493_v3  ;;  %3337 = vmatmul.mubr.msk.bf16.vlgmr.msra.gmra.mrb[36].mxu1 %vm1960_vm7, %v1935_v23  ;;  %v1904_v4 = vmax.f32 %v1868_v54, 0.0 }
 0x20d   : > { %v1867_v41 = vadd.f32 %v3379_v45, %v4493_v3  ;;  %v1902_v39 = vmax.f32 %v1866_v38, 0.0 }
 0x20e   : > { %v1905_v16 = vmax.f32 %v1869_v37, 0.0 }
 0x20f   : > { %v1903_v30 = vmax.f32 %v1867_v41, 0.0  ;;  %v3308_v46 = vpop.f32.mrb[8].mxu0 }
 0x210   : > { %v1937_v40 = vpack.c.bf16 %v1905_v16, %v1904_v4  ;;  %v3380_v21 = vadd.f32 %v3308_v46, %v4449_v9  ;;  %v1708_v48 = vpop.f32.mrb[9].mxu0 }
 0x211   : > { %v1936_v36 = vpack.c.bf16 %v1903_v30, %v1902_v39  ;;  %v3381_v27 = vadd.f32 %v1708_v48, %v4451_v57  ;;  %v3309_v51 = vpop.f32.mrb[10].mxu0  ;;  %v4511_v28 = vpop.f32.mrb[32].mxu1 }
 0x212   : > { %v1872_v6 = vadd.f32 %v3380_v21, %v4493_v3  ;;  %v3382_v15 = vadd.f32 %v3309_v51, %v4453_v49  ;;  %v1711_v17 = vpop.f32.mrb[11].mxu0  ;;  %v4515_v12 = vpop.f32.mrb[33].mxu1 }
 0x213   : > { %v1870_v5 = vadd.f32 %v3381_v27, %v4493_v3  ;;  %v3383_v43 = vadd.f32 %v1711_v17, %v4455_v14  ;;  %3340 = vmatprep.mubr.msk.bf16.mxu1 %vm1960_vm7, %v1936_v36  ;;  %v4520_v9 = vpop.f32.mrb[34].mxu1 }
 0x214   : > { %v1873_v57 = vadd.f32 %v3382_v15, %v4493_v3  ;;  %3341 = vmatmul.mubr.msk.bf16.gmra.mrb[40].mxu1 %vm1960_vm7, %v1937_v40  ;;  %v4524_v7 = vpop.f32.mrb[35].mxu1  ;;  %v1908_v49 = vmax.f32 %v1872_v6, 0.0 }
 0x215   : > { %v1871_v62 = vadd.f32 %v3383_v43, %v4493_v3  ;;  %v1906_v2 = vmax.f32 %v1870_v5, 0.0 }
 0x216   : > { %v1909_v20 = vmax.f32 %v1873_v57, 0.0 }
 0x217   : > { %v1907_v32 = vmax.f32 %v1871_v62, 0.0  ;;  %v3312_v13 = vpop.f32.mrb[12].mxu0 }
 0x218   : > { %v1939_v11 = vpack.c.bf16 %v1909_v20, %v1908_v49  ;;  %v3384_v14 = vadd.f32 %v3312_v13, %v4457_v50  ;;  %v1724_v8 = vpop.f32.mrb[13].mxu0 }
 0x219   : > { %v1938_v23 = vpack.c.bf16 %v1907_v32, %v1906_v2  ;;  %v3385_v0 = vadd.f32 %v1724_v8, %v4459_v52  ;;  %v3313_v24 = vpop.f32.mrb[14].mxu0 }
 0x21a   : > { %v1876_v26 = vadd.f32 %v3384_v14, %v4493_v3  ;;  %v3386_v29 = vadd.f32 %v3313_v24, %v4461_v56  ;;  %v1727_v34 = vpop.f32.mrb[15].mxu0 }
 0x21b   : > { %v1874_v54 = vadd.f32 %v3385_v0, %v4493_v3  ;;  %v3387_v33 = vadd.f32 %v1727_v34, %v4463_v22  ;;  %3344 = vmatprep.mubr.msk.bf16.mxu1 %vm1960_vm7, %v1938_v23 }
 0x21c   : > { %v1877_v25 = vadd.f32 %v3386_v29, %v4493_v3  ;;  %3345 = vmatmul.mubr.msk.bf16.gmra.mrb[44].mxu1 %vm1960_vm7, %v1939_v11  ;;  %v1912_v38 = vmax.f32 %v1876_v26, 0.0 }
 0x21d   : > { %v1875_v50 = vadd.f32 %v3387_v33, %v4493_v3  ;;  %v1910_v45 = vmax.f32 %v1874_v54, 0.0 }
 0x21e   : > { %v1913_v52 = vmax.f32 %v1877_v25, 0.0 }
 0x21f   : > { %v1911_v37 = vmax.f32 %v1875_v50, 0.0  ;;  %v3316_v41 = vpop.f32.mrb[16].mxu0 }
 0x220   : > { %v1941_v4 = vpack.c.bf16 %v1913_v52, %v1912_v38  ;;  %v3388_v56 = vadd.f32 %v3316_v41, %v4465_v1  ;;  %v1740_v16 = vpop.f32.mrb[17].mxu0 }
 0x221   : > { %v1940_v39 = vpack.c.bf16 %v1911_v37, %v1910_v45  ;;  %v3389_v22 = vadd.f32 %v1740_v16, %v4467_v47  ;;  %v3317_v30 = vpop.f32.mrb[18].mxu0 }
 0x222   : > { %v1880_v46 = vadd.f32 %v3388_v56, %v4493_v3  ;;  %v3390_v40 = vadd.f32 %v3317_v30, %v4469_v53  ;;  %v1743_v21 = vpop.f32.mrb[19].mxu0 }
 0x223   : > { %v1878_v48 = vadd.f32 %v3389_v22, %v4493_v3  ;;  %v3391_v36 = vadd.f32 %v1743_v21, %v4471_v55  ;;  %3348 = vmatprep.mubr.msk.bf16.mxu1 %vm1960_vm7, %v1940_v39 }
 0x224   : > { %v1881_v27 = vadd.f32 %v3390_v40, %v4493_v3  ;;  %3349 = vmatmul.mubr.msk.bf16.gmra.mrb[48].mxu1 %vm1960_vm7, %v1941_v4  ;;  %v1916_v51 = vmax.f32 %v1880_v46, 0.0 }
 0x225   : > { %v1879_v1 = vadd.f32 %v3391_v36, %v4493_v3  ;;  %v1914_v6 = vmax.f32 %v1878_v48, 0.0 }
 0x226   : > { %v1917_v47 = vmax.f32 %v1881_v27, 0.0 }
 0x227   : > { %v1915_v15 = vmax.f32 %v1879_v1, 0.0  ;;  %v3320_v17 = vpop.f32.mrb[20].mxu0 }
 0x228   : > { %v1943_v5 = vpack.c.bf16 %v1917_v47, %v1916_v51  ;;  %v3392_v53 = vadd.f32 %v3320_v17, %v4473_v44  ;;  %v1756_v43 = vpop.f32.mrb[21].mxu0 }
 0x229   : > { %v1942_v57 = vpack.c.bf16 %v1915_v15, %v1914_v6  ;;  %v3393_v55 = vadd.f32 %v1756_v43, %v4475_v42  ;;  %v3321_v62 = vpop.f32.mrb[22].mxu0 }
 0x22a   : > { %v1884_v49 = vadd.f32 %v3392_v53, %v4493_v3  ;;  %v3394_v20 = vadd.f32 %v3321_v62, %v4477_v58  ;;  %v1759_v2 = vpop.f32.mrb[23].mxu0 }
 0x22b   : > { %v1882_v32 = vadd.f32 %v3393_v55, %v4493_v3  ;;  %v3395_v13 = vadd.f32 %v1759_v2, %v4479_v18  ;;  %3352 = vmatprep.mubr.msk.bf16.mxu1 %vm1960_vm7, %v1942_v57 }
 0x22c   : > { %v1885_v11 = vadd.f32 %v3394_v20, %v4493_v3  ;;  %3353 = vmatmul.mubr.msk.bf16.gmra.mrb[52].mxu1 %vm1960_vm7, %v1943_v5  ;;  %v1920_v14 = vmax.f32 %v1884_v49, 0.0 }
 0x22d   : > { %v1883_v44 = vadd.f32 %v3395_v13, %v4493_v3  ;;  %v1918_v8 = vmax.f32 %v1882_v32, 0.0 }
 0x22e   : > { %v1921_v42 = vmax.f32 %v1885_v11, 0.0 }
 0x22f   : > { %v1919_v23 = vmax.f32 %v1883_v44, 0.0  ;;  %v3324_v0 = vpop.f32.mrb[24].mxu0  ;;  %v3523_v44 = vld [vmem:[%s3840_s22 + $0x14] sm:$0xf] }
 0x230   : > { %v1945_v24 = vpack.c.bf16 %v1921_v42, %v1920_v14  ;;  %v3396_v58 = vadd.f32 %v3324_v0, %v4481_v59  ;;  %v1772_v26 = vpop.f32.mrb[25].mxu0  ;;  %v2199_v14 = vunpack.c.l.bf16 %v3523_v44  ;;  %v3524_v42 = vld [vmem:[%s3840_s22 + $0x8] sm:$0xf]  ;;  %v3526_v0 = vld [vmem:[%s3840_s22 + $0x18] sm:$0xf] }
 0x231   : > { %v1944_v29 = vpack.c.bf16 %v1919_v23, %v1918_v8  ;;  %v3397_v18 = vadd.f32 %v1772_v26, %v4483_v60  ;;  %v3325_v34 = vpop.f32.mrb[26].mxu0  ;;  %v3525_v8 = vld [vmem:[%s3840_s22 + $0xc] sm:$0xf] }
 0x232   : > { %v1888_v54 = vadd.f32 %v3396_v58, %v4493_v3  ;;  %v3398_v33 = vadd.f32 %v3325_v34, %v4485_v10  ;;  %v1775_v25 = vpop.f32.mrb[27].mxu0  ;;  %v2197_v23 = vunpack.c.l.bf16 %v3525_v8  ;;  %v2276_v26 = vrot.slane %v2199_v14, 3  ;;  %v3527_v34 = vld [vmem:[%s3840_s22 + $0x20] sm:$0xf] }
 0x233   : > { %v1886_v50 = vadd.f32 %v3397_v18, %v4493_v3  ;;  %v3399_v38 = vadd.f32 %v1775_v25, %v4487_v61  ;;  %3356 = vmatprep.mubr.msk.bf16.mxu1 %vm1960_vm7, %v1944_v29 }
 0x234   : > { %v1889_v52 = vadd.f32 %v3398_v33, %v4493_v3  ;;  %3357 = vmatmul.mubr.msk.bf16.gmra.mrb[56].mxu1 %vm1960_vm7, %v1945_v24  ;;  %v1924_v45 = vmax.f32 %v1888_v54, 0.0  ;;  %v2200_v24 = vunpack.c.l.bf16 %v3526_v0  ;;  %v2272_v18 = vrot.slane %v2197_v23, 3  ;;  %v3528_v33 = vld [vmem:[%s3840_s22 + $0x24] sm:$0xf] }
 0x235   : > { %v1887_v59 = vadd.f32 %v3399_v38, %v4493_v3  ;;  %v1922_v37 = vmax.f32 %v1886_v50, 0.0  ;;  %v2202_v54 = vunpack.c.l.bf16 %v3527_v34  ;;  %v2203_v25 = vunpack.c.l.bf16 %v3528_v33  ;;  %v3529_v38 = vld [vmem:[%s3840_s22 + $0x1c] sm:$0xf] }
 0x236   : > { %v1925_v60 = vmax.f32 %v1889_v52, 0.0  ;;  %v2278_v50 = vrot.slane %v2200_v24, 3  ;;  %v2201_v52 = vunpack.c.l.bf16 %v3529_v38 }
 0x237   : > { %v1923_v41 = vmax.f32 %v1887_v59, 0.0  ;;  %v3328_v4 = vpop.f32.mrb[28].mxu0  ;;  %v3530_v59 = vld [vmem:[%s3840_s22 + $0x28] sm:$0xf] }
 0x238   : > { %v1947_v56 = vpack.c.bf16 %v1925_v60, %v1924_v45  ;;  %v3400_v10 = vadd.f32 %v3328_v4, %v4489_v31  ;;  %v1788_v16 = vpop.f32.mrb[29].mxu0  ;;  %v2204_v45 = vunpack.c.l.bf16 %v3530_v59  ;;  %v3531_v60 = vld [vmem:[%s3840_s22 + $0x30] sm:$0xf] }
 0x239   : > { %v1946_v39 = vpack.c.bf16 %v1923_v41, %v1922_v37  ;;  %v3401_v61 = vadd.f32 %v1788_v16, %v4491_v63  ;;  %v3329_v22 = vpop.f32.mrb[30].mxu0  ;;  %v2206_v37 = vunpack.c.l.bf16 %v3531_v60  ;;  %v3532_v41 = vld [vmem:[%s3840_s22 + $0x34] sm:$0xf]  ;;  %v2282_v16 = vrot.slane %v2202_v54, 3 }
 0x23a   : > { %v1892_v30 = vadd.f32 %v3400_v10, %v4493_v3  ;;  %v3402_v46 = vadd.f32 %v3329_v22, %v4495_v35  ;;  %v1791_v40 = vpop.f32.mrb[31].mxu0  ;;  %v2207_v4 = vunpack.c.l.bf16 %v3532_v41  ;;  %v2280_v22 = vrot.slane %v2201_v52, 3  ;;  %v3540_v54 = vld [vmem:[%s3840_s22 + $0x54] sm:$0xf] }
 0x23b   : > { %v1890_v21 = vadd.f32 %v3401_v61, %v4493_v3  ;;  %v3403_v48 = vadd.f32 %v1791_v40, %v4497_v19  ;;  %3360 = vmatprep.mubr.msk.bf16.mxu1 %vm1960_vm7, %v1946_v39  ;;  %v2284_v39 = vrot.slane %v2203_v25, 3  ;;  %v2279_v61 = vsel %vm2270_vm8, %v2276_v26, %v2278_v50 }
 0x23c   : > { %v1893_v36 = vadd.f32 %v3402_v46, %v4493_v3  ;;  %3361 = vmatmul.mubr.msk.bf16.gmra.mrb[60].mxu1 %vm1960_vm7, %v1947_v56  ;;  %v1928_v27 = vmax.f32 %v1892_v30, 0.0  ;;  %v2286_v30 = vrot.slane %v2204_v45, 3  ;;  %v3533_v46 = vld [vmem:[%s3840_s22 + $0x2c] sm:$0xf]  ;;  %v2215_v33 = vunpack.c.l.bf16 %v3540_v54 }
 0x23d   : > { %v1891_v31 = vadd.f32 %v3403_v48, %v4493_v3  ;;  %v1926_v1 = vmax.f32 %v1890_v21, 0.0  ;;  %v2205_v40 = vunpack.c.l.bf16 %v3533_v46  ;;  %v4604_v21 = vld [vmem:[#allocation6] ss:$0 sm:$0xff] }
 0x23e   : > { %v1929_v63 = vmax.f32 %v1893_v36, 0.0  ;;  %v2290_v36 = vrot.slane %v2206_v37, 3 }
 0x23f   : > { %v1927_v51 = vmax.f32 %v1891_v31, 0.0  ;;  %v3332_v47 = vpop.f32.mrb[32].mxu0  ;;  %v2292_v31 = vrot.slane %v2207_v4, 3 }
 0x240   : > { %v1949_v6 = vpack.c.bf16 %v1929_v63, %v1928_v27  ;;  %v3404_v35 = vadd.f32 %v3332_v47, %v4511_v28  ;;  %v1804_v15 = vpop.f32.mrb[33].mxu0  ;;  %v3534_v27 = vld [vmem:[%s3840_s22 + $0x38] sm:$0xf]  ;;  %v3536_v47 = vld [vmem:[%s3840_s22 + $0x44] sm:$0xf] }
 0x241   : > { %v1948_v17 = vpack.c.bf16 %v1927_v51, %v1926_v1  ;;  %v3405_v19 = vadd.f32 %v1804_v15, %v4515_v12  ;;  %v3333_v5 = vpop.f32.mrb[34].mxu0  ;;  %v2208_v63 = vunpack.c.l.bf16 %v3534_v27  ;;  %v3535_v1 = vld [vmem:[%s3840_s22 + $0x40] sm:$0xf]  ;;  %v4611_v15 = vsel %vm2270_vm8, %v2282_v16, %v2284_v39 }
 0x242   : > { %v1896_v53 = vadd.f32 %v3404_v35, %v4493_v3  ;;  %v3406_v43 = vadd.f32 %v3333_v5, %v4520_v9  ;;  %v1807_v57 = vpop.f32.mrb[35].mxu0  ;;  %v2210_v51 = vunpack.c.l.bf16 %v3535_v1  ;;  %v3538_v5 = vld [vmem:[%s3840_s22 + $0x48] sm:$0xf] }
 0x243   : > { %v1894_v55 = vadd.f32 %v3405_v19, %v4493_v3  ;;  %v3407_v62 = vadd.f32 %v1807_v57, %v4524_v7  ;;  %3364 = vmatprep.mubr.msk.bf16.mxu1 %vm1960_vm7, %v1948_v17  ;;  %v3522_v7 = vld [vmem:[%s3840_s22 + $0x10] sm:$0xf]  ;;  %v3537_v17 = vld [vmem:[%s3840_s22 + $0x3c] sm:$0xf] }
 0x244   : > { %v1897_v28 = vadd.f32 %v3406_v43, %v4493_v3  ;;  %3365 = vmatmul.mubr.msk.bf16.gmra.mrb[64].mxu1 %vm1960_vm7, %v1949_v6  ;;  %v1932_v49 = vmax.f32 %v1896_v53, 0.0  ;;  %v2198_v11 = vunpack.c.l.bf16 %v3522_v7  ;;  %v2211_v6 = vunpack.c.l.bf16 %v3536_v47 }
 0x245   : > { %v1895_v12 = vadd.f32 %v3407_v62, %v4493_v3  ;;  %v1930_v20 = vmax.f32 %v1894_v55, 0.0  ;;  %v2196_v3 = vunpack.c.l.bf16 %v3524_v42  ;;  %v2209_v19 = vunpack.c.l.bf16 %v3537_v17  ;;  %v3543_v17 = vld [vmem:[%s3840_s22 + $0x60] sm:$0xf] }
 0x246   : > { %v1933_v9 = vmax.f32 %v1897_v28, 0.0  ;;  %v2274_v58 = vrot.slane %v2198_v11, 3  ;;  %v2212_v53 = vunpack.c.l.bf16 %v3538_v5  ;;  %v2281_v55 = vsel %vm2270_vm8, %v2278_v50, %v2280_v22  ;;  %v3544_v5 = vld [vmem:[%s3840_s22 + $0x64] sm:$0xf] }
 0x247   : > { %v1931_v2 = vmax.f32 %v1895_v12, 0.0  ;;  %v2271_v29 = vrot.slane %v2196_v3, 3  ;;  %v4618_v62 = vsel %vm2270_vm8, %v2284_v39, %v2286_v30  ;;  %v2288_v28 = vrot.slane %v2205_v40, 3  ;;  %v3541_v39 = vld [vmem:[%s3840_s22 + $0x4c] sm:$0xf] }
 0x248   : > { %v1951_v32 = vpack.c.bf16 %v1933_v9, %v1932_v49  ;;  %v2277_v56 = vsel %vm2270_vm8, %v2274_v58, %v2276_v26  ;;  %v2275_v48 = vsel %vm2270_vm8, %v2272_v18, %v2274_v58  ;;  %v4622_v9 = vsel %vm2270_vm8, %v2280_v22, %v2282_v16  ;;  %v3539_v58 = vld [vmem:[%s3840_s22 + $0x50] sm:$0xf] }
 0x249   : > { %v1950_v13 = vpack.c.bf16 %v1931_v2, %v1930_v20  ;;  %v2273_v10 = vsel %vm2270_vm8, %v2271_v29, %v2272_v18  ;;  %v4625_v20 = vsel %vm2270_vm8, %v2290_v36, %v2292_v31  ;;  %v2294_v2 = vrot.slane %v2208_v63, 3 }
 0x24a   : > { %v2298_v11 = vrot.slane %v2210_v51, 3  ;;  %v2300_v44 = vrot.slane %v2211_v6, 3  ;;  %v2296_v3 = vrot.slane %v2209_v19, 3  ;;  %v4630_v8 = vrot.slane %v2212_v53, 3 }
 0x24b   : > { %3368 = vmatprep.mubr.msk.bf16.mxu1 %vm1960_vm7, %v1950_v13  ;;  %v4633_v24 = vsel %vm2270_vm8, %v2286_v30, %v2288_v28  ;;  %v2214_v26 = vunpack.c.l.bf16 %v3539_v58  ;;  %v4637_v34 = vsel %vm2270_vm8, %v2292_v31, %v2294_v2  ;;  %v4646_v38 = vsel %vm2270_vm8, %v2288_v28, %v2290_v36  ;;  %v3542_v36 = vld [vmem:[%s3840_s22 + $0x58] sm:$0xf] }
 0x24c   : > { %3369 = vmatmul.mubr.msk.bf16.gmra.mrb[68].mxu1 %vm1960_vm7, %v1951_v32  ;;  %v4649_v52 = vsel %vm2270_vm8, %v2298_v11, %v2300_v44  ;;  %v4652_v37 = vsel %vm2270_vm8, %v2294_v2, %v2296_v3  ;;  %v4656_v41 = vsel %vm2270_vm8, %v2300_v44, %v4630_v8  ;;  %v2216_v31 = vunpack.c.l.bf16 %v3542_v36 }
 0x24d   : > { %v4659_v16 = vrot.slane %v2214_v26, 3  ;;  %v2218_v19 = vunpack.c.l.bf16 %v3543_v17  ;;  %v2219_v53 = vunpack.c.l.bf16 %v3544_v5 }
 0x2df   : > { %v3338_v35 = vpop.f32.mrb[36].mxu1 }
 0x2e0   : > { %v2062_v43 = vadd.f32 %v3338_v35, %v4604_v21  ;;  %v2053_v57 = vpop.f32.mrb[37].mxu1 }
 0x2e1   : > { %v2054_v12 = vadd.f32 %v4604_v21, %v2053_v57  ;;  %v3339_v49 = vpop.f32.mrb[38].mxu1 }
 0x2e2   : > { %v2382_v32 = vadd.f32 %v2277_v56, %v2062_v43  ;;  %v2065_v13 = vadd.f32 %v3339_v49, %v4604_v21  ;;  %v2056_v7 = vpop.f32.mrb[39].mxu1 }
 0x2e3   : > { %v2380_v14 = vadd.f32 %v2273_v10, %v2054_v12  ;;  %v2057_v42 = vadd.f32 %v4604_v21, %v2056_v7  ;;  %v4695_v7 = vrot.slane %v2216_v31, 3 }
 0x2e4   : > { %v2418_v23 = vmax.f32 %v2382_v32, 0.0  ;;  %v2383_v0 = vadd.f32 %v2279_v61, %v2065_v13  ;;  %v2213_v61 = vunpack.c.l.bf16 %v3541_v39 }
 0x2e5   : > { %v2416_v29 = vmax.f32 %v2380_v14, 0.0  ;;  %v2381_v18 = vadd.f32 %v2275_v48, %v2057_v42  ;;  %v4671_v48 = vrot.slane %v2215_v33, 3 }
 0x2e6   : > { %v3065_v25 = vpack.c.bf16 %v2418_v23, %v2418_v23  ;;  %v2419_v50 = vmax.f32 %v2383_v0, 0.0  ;;  %v2304_v2 = vrot.slane %v2213_v61, 3  ;;  %v4700_v23 = vrot.slane %v2219_v53, 3 }
 0x2e7   : > { %v3063_v59 = vpack.c.bf16 %v2416_v29, %v2416_v29  ;;  %v2417_v45 = vmax.f32 %v2381_v18, 0.0  ;;  %v3342_v60 = vpop.f32.mrb[40].mxu1  ;;  %v4693_v49 = vsel %vm2270_vm8, %v4659_v16, %v4671_v48  ;;  %v3546_v29 = vld [vmem:[%s3840_s22 + $0x68] sm:$0xf] }
 0x2e8   : > { %v3066_v4 = vpack.c.bf16 %v2419_v50, %v2419_v50  ;;  %v2078_v56 = vadd.f32 %v3342_v60, %v4604_v21  ;;  %v2069_v10 = vpop.f32.mrb[41].mxu1  ;;  %v2987_v27 = vrot.slane %v3065_v25, 9  ;;  %v2220_v18 = vunpack.c.l.bf16 %v3546_v29 }
 0x2e9   : > { %2478 = vst.msk [vmem:[%s4643_s24] sm:$0xf] %vm2477_vm9, %v3063_v59  ;;  %v3064_v30 = vpack.c.bf16 %v2417_v45, %v2417_v45  ;;  %v2070_v46 = vadd.f32 %v4604_v21, %v2069_v10  ;;  %v3343_v40 = vpop.f32.mrb[42].mxu1  ;;  %v4746_v17 = vsel %vm2270_vm8, %v2304_v2, %v4659_v16 }
 0x2ea   : > { %v2493_v63 = vrot.slane %v3066_v4, 5  ;;  %v2386_v1 = vadd.f32 %v4611_v15, %v2078_v56  ;;  %v2081_v51 = vadd.f32 %v3343_v40, %v4604_v21  ;;  %v2072_v47 = vpop.f32.mrb[43].mxu1  ;;  %v4685_v15 = vsel %vm2270_vm8, %v2296_v3, %v2298_v11 }
 0x2eb   : > { %2479 = vst.msk [vmem:[%s4643_s24 + $0x4] sm:$0xf] %vm2477_vm9, %v3064_v30  ;;  %v2384_v6 = vadd.f32 %v2281_v55, %v2070_v46  ;;  %v2073_v35 = vadd.f32 %v4604_v21, %v2072_v47  ;;  %v4698_v3 = vrot.slane %v2218_v19, 3 }
 0x2ec   : > { %v2494_v43 = vsel %vm4666_vm0, %v2987_v27, %v2493_v63  ;;  %v2422_v57 = vmax.f32 %v2386_v1, 0.0  ;;  %v2387_v28 = vadd.f32 %v4618_v62, %v2081_v51  ;;  %v3545_v62 = vld [vmem:[%s3840_s22 + $0x5c] sm:$0xf] }
 0x2ed   : > { %2988 = vst.msk [vmem:[%s4643_s24 + $0x8] sm:$0xf] %vm2477_vm9, %v2494_v43  ;;  %v2420_v12 = vmax.f32 %v2384_v6, 0.0  ;;  %v2385_v55 = vadd.f32 %v4622_v9, %v2073_v35  ;;  %v2217_v44 = vunpack.c.l.bf16 %v3545_v62  ;;  %v2495_v9 = vrot.slane %v2493_v63, 4 }
 0x2ee   : > { %v3069_v32 = vpack.c.bf16 %v2422_v57, %v2422_v57  ;;  %v2423_v13 = vmax.f32 %v2387_v28, 0.0  ;;  %v4737_v35 = vsel %vm2270_vm8, %v4630_v8, %v2304_v2  ;;  %v4758_v16 = vsel %vm2270_vm8, %v4698_v3, %v4700_v23 }
 0x2ef   : > { %v3067_v11 = vpack.c.bf16 %v2420_v12, %v2420_v12  ;;  %v2421_v14 = vmax.f32 %v2385_v55, 0.0  ;;  %v3346_v42 = vpop.f32.mrb[44].mxu1  ;;  %v2312_v43 = vrot.slane %v2217_v44, 3  ;;  %v4760_v28 = vrot.slane %v2220_v18, 3  ;;  %v3549_v18 = vld [vmem:[%s3840_s22 + $0x6c] sm:$0xf] }
 0x2f0   : > { %v3070_v0 = vpack.c.bf16 %v2423_v13, %v2423_v13  ;;  %v2094_v58 = vadd.f32 %v3346_v42, %v4604_v21  ;;  %v2085_v26 = vpop.f32.mrb[45].mxu1  ;;  %v2997_v54 = vrot.slane %v3069_v32, 11  ;;  %v2516_v31 = vrot.slane %v3069_v32, 6 }
 0x2f1   : > { %v2496_v33 = vrot.slane %v3067_v11, 5  ;;  %v3068_v50 = vpack.c.bf16 %v2421_v14, %v2421_v14  ;;  %v2086_v59 = vadd.f32 %v4604_v21, %v2085_v26  ;;  %v3347_v45 = vpop.f32.mrb[46].mxu1  ;;  %v2992_v60 = vrot.slane %v3067_v11, 10  ;;  %v3547_v14 = vld [vmem:[%s3840_s22 + $0x70] sm:$0xf] }
 0x2f2   : > { %v2533_v4 = vrot.slane %v3070_v0, 7  ;;  %v2390_v10 = vadd.f32 %v4625_v20, %v2094_v58  ;;  %v2097_v39 = vadd.f32 %v3347_v45, %v4604_v21  ;;  %v2088_v61 = vpop.f32.mrb[47].mxu1  ;;  %v2222_v42 = vunpack.c.l.bf16 %v3547_v14  ;;  %v3553_v14 = vld [vmem:[%s3840_s22 + $0x7c] sm:$0xf] }
 0x2f3   : > { %v2497_v30 = vsel %vm4666_vm0, %v2495_v9, %v2496_v33  ;;  %v2513_v46 = vrot.slane %v3068_v50, 6  ;;  %v2388_v40 = vadd.f32 %v4633_v24, %v2086_v59  ;;  %v2089_v36 = vadd.f32 %v4604_v21, %v2088_v61  ;;  %v3548_v9 = vld [vmem:[%s3840_s22 + $0x74] sm:$0xf] }
 0x2f4   : > { %2989 = vst.msk [vmem:[%s4643_s24 + $0xc] sm:$0xf] %vm2477_vm9, %v2497_v30  ;;  %v2534_v27 = vsel %vm4706_vm1, %v2997_v54, %v2533_v4  ;;  %v2426_v63 = vmax.f32 %v2390_v10, 0.0  ;;  %v2391_v20 = vadd.f32 %v4637_v34, %v2097_v39  ;;  %v4742_v34 = vsel %vm2270_vm8, %v4671_v48, %v4695_v7 }
 0x2f5   : > { %2998 = vst.msk [vmem:[%s4643_s24 + $0x18] sm:$0xf] %vm2477_vm9, %v2534_v27  ;;  %v2514_v1 = vsel %vm4713_vm2, %v2992_v60, %v2513_v46  ;;  %v2515_v51 = vrot.slane %v2513_v46, 4  ;;  %v2424_v24 = vmax.f32 %v2388_v40, 0.0  ;;  %v2389_v47 = vadd.f32 %v4646_v38, %v2089_v36  ;;  %v3550_v40 = vld [vmem:[%s3840_s22 + $0x78] sm:$0xf] }
 0x2f6   : > { %2993 = vst.msk [vmem:[%s4643_s24 + $0x10] sm:$0xf] %vm2477_vm9, %v2514_v1  ;;  %v3073_v6 = vpack.c.bf16 %v2426_v63, %v2426_v63  ;;  %v2535_v57 = vrot.slane %v2533_v4, 4  ;;  %v2427_v55 = vmax.f32 %v2391_v20, 0.0  ;;  %v2223_v0 = vunpack.c.l.bf16 %v3548_v9  ;;  %v3551_v63 = vld [vmem:[%s3840_s22 + $0x80] sm:$0xf] }
 0x2f7   : > { %v2517_v19 = vsel %vm4713_vm2, %v2515_v51, %v2516_v31  ;;  %v3071_v38 = vpack.c.bf16 %v2424_v24, %v2424_v24  ;;  %v2425_v5 = vmax.f32 %v2389_v47, 0.0  ;;  %v3350_v53 = vpop.f32.mrb[48].mxu1  ;;  %v2221_v54 = vunpack.c.l.bf16 %v3549_v18 }
 0x2f8   : > { %2994 = vst.msk [vmem:[%s4643_s24 + $0x14] sm:$0xf] %vm2477_vm9, %v2517_v19  ;;  %3003 = vst.msk [vmem:[%s4643_s24 + $0x24] sm:$0xf] %vm2477_vm9, %v3073_v6  ;;  %v2110_v8 = vadd.f32 %v3350_v53, %v4604_v21  ;;  %v2101_v48 = vpop.f32.mrb[49].mxu1  ;;  %v4779_v50 = vsel %vm2270_vm8, %v4695_v7, %v2312_v43  ;;  %v4784_v59 = vsel %vm2270_vm8, %v4700_v23, %v4760_v28  ;;  %v4791_v39 = vrot.slane %v2222_v42, 3 }
 0x2f9   : > { %v2536_v12 = vrot.slane %v3071_v38, 7  ;;  %v3072_v2 = vpack.c.bf16 %v2425_v5, %v2425_v5  ;;  %v2102_v32 = vadd.f32 %v4604_v21, %v2101_v48  ;;  %v3351_v13 = vpop.f32.mrb[50].mxu1  ;;  %v4789_v4 = vsel %vm2270_vm8, %v2312_v43, %v4698_v3  ;;  %v3552_v43 = vld [vmem:[%s3840_s22 + $0x84] sm:$0xf] }
 0x2fa   : > { %v2394_v62 = vadd.f32 %v4649_v52, %v2110_v8  ;;  %v2113_v44 = vadd.f32 %v3351_v13, %v4604_v21  ;;  %v2104_v11 = vpop.f32.mrb[51].mxu1  ;;  %v4793_v7 = vrot.slane %v2223_v0, 3  ;;  %v4795_v23 = vrot.slane %v2221_v54, 3 }
 0x2fb   : > { %v2537_v58 = vsel %vm4706_vm1, %v2535_v57, %v2536_v12  ;;  %3002 = vst.msk [vmem:[%s4643_s24 + $0x20] sm:$0xf] %vm2477_vm9, %v3072_v2  ;;  %v2392_v26 = vadd.f32 %v4652_v37, %v2102_v32  ;;  %v2105_v29 = vadd.f32 %v4604_v21, %v2104_v11  ;;  %v3074_v37 = vpack.c.bf16 %v2427_v55, %v2427_v55 }
 0x2fc   : > { %2999 = vst.msk [vmem:[%s4643_s24 + $0x1c] sm:$0xf] %vm2477_vm9, %v2537_v58  ;;  %v2430_v52 = vmax.f32 %v2394_v62, 0.0  ;;  %v2395_v33 = vadd.f32 %v4656_v41, %v2113_v44  ;;  %v2224_v36 = vunpack.c.l.bf16 %v3550_v40  ;;  %v2226_v20 = vunpack.c.l.bf16 %v3551_v63 }
 0x2fd   : > { %v2428_v45 = vmax.f32 %v2392_v26, 0.0  ;;  %v2393_v60 = vadd.f32 %v4685_v15, %v2105_v29  ;;  %v3007_v1 = vrot.slane %v3074_v37, 9  ;;  %v2227_v57 = vunpack.c.l.bf16 %v3552_v43 }
 0x2fe   : > { %v3077_v10 = vpack.c.bf16 %v2430_v52, %v2430_v52  ;;  %v2431_v41 = vmax.f32 %v2395_v33, 0.0  ;;  %v2225_v42 = vunpack.c.l.bf16 %v3553_v14  ;;  %v2325_v58 = vsel %vm2270_vm8, %v4791_v39, %v4793_v7  ;;  %v3554_v52 = vld [vmem:[%s3840_s22 + $0x88] sm:$0xf] }
 0x2ff   : > { %v3075_v61 = vpack.c.bf16 %v2428_v45, %v2428_v45  ;;  %v2429_v30 = vmax.f32 %v2393_v60, 0.0  ;;  %v3354_v46 = vpop.f32.mrb[52].mxu1  ;;  %v2326_v18 = vrot.slane %v2224_v36, 3  ;;  %v4831_v54 = vrot.slane %v2226_v20, 3 }
 0x300   : > { %v2579_v15 = vrot.slane %v3077_v10, 6  ;;  %v4798_v31 = vpack.c.bf16 %v2431_v41, %v2431_v41  ;;  %v2126_v3 = vadd.f32 %v3354_v46, %v4604_v21  ;;  %v2117_v27 = vpop.f32.mrb[53].mxu1  ;;  %v2228_v33 = vunpack.c.l.bf16 %v3554_v52 }
 0x301   : > { %v2562_v51 = vrot.slane %v3075_v61, 5  ;;  %v3076_v24 = vpack.c.bf16 %v2429_v30, %v2429_v30  ;;  %v2118_v47 = vadd.f32 %v4604_v21, %v2117_v27  ;;  %v3355_v6 = vpop.f32.mrb[54].mxu1  ;;  %v4839_v46 = vrot.slane %v2225_v42, 3 }
 0x302   : > { %v2581_v19 = vrot.slane %v2579_v15, 4  ;;  %v2582_v38 = vrot.slane %v4798_v31, 6  ;;  %v2398_v5 = vadd.f32 %v4693_v49, %v2126_v3  ;;  %v2120_v53 = vpop.f32.mrb[55].mxu1  ;;  %v2129_v13 = vadd.f32 %v3355_v6, %v4604_v21 }
 0x303   : > { %v2563_v8 = vsel %vm4666_vm0, %v3007_v1, %v2562_v51  ;;  %v2564_v48 = vrot.slane %v2562_v51, 4  ;;  %v2565_v12 = vrot.slane %v3076_v24, 5  ;;  %v3012_v55 = vrot.slane %v3076_v24, 10 }
 0x304   : > { %3008 = vst.msk [vmem:[%s4643_s24 + $0x28] sm:$0xf] %vm2477_vm9, %v2563_v8  ;;  %v2583_v2 = vsel %vm4713_vm2, %v2581_v19, %v2582_v38  ;;  %v2434_v32 = vmax.f32 %v2398_v5, 0.0  ;;  %v2396_v49 = vadd.f32 %v4737_v35, %v2118_v47  ;;  %v2121_v11 = vadd.f32 %v4604_v21, %v2120_v53 }
 0x305   : > { %3014 = vst.msk [vmem:[%s4643_s24 + $0x34] sm:$0xf] %vm2477_vm9, %v2583_v2  ;;  %v2566_v62 = vsel %vm4666_vm0, %v2564_v48, %v2565_v12  ;;  %v2580_v44 = vsel %vm4713_vm2, %v3012_v55, %v2579_v15  ;;  %v2399_v0 = vadd.f32 %v4742_v34, %v2129_v13  ;;  %v2332_v34 = vrot.slane %v2227_v57, 3  ;;  %v3555_v13 = vld [vmem:[%s3840_s22 + $0x90] sm:$0xf] }
 0x306   : > { %3009 = vst.msk [vmem:[%s4643_s24 + $0x2c] sm:$0xf] %vm2477_vm9, %v2566_v62  ;;  %3013 = vst.msk [vmem:[%s4643_s24 + $0x30] sm:$0xf] %vm2477_vm9, %v2580_v44  ;;  %v3081_v35 = vpack.c.bf16 %v2434_v32, %v2434_v32  ;;  %v2432_v9 = vmax.f32 %v2396_v49, 0.0  ;;  %v2397_v26 = vadd.f32 %v4746_v17, %v2121_v11  ;;  %v3017_v41 = vrot.slane %v4798_v31, 11 }
 0x307   : > { %v3358_v29 = vpop.f32.mrb[56].mxu1  ;;  %v2435_v45 = vmax.f32 %v2399_v0, 0.0  ;;  %v4845_v1 = vrot.slane %v2228_v33, 3  ;;  %v2321_v38 = vsel %vm2270_vm8, %v4760_v28, %v4795_v23  ;;  %v2327_v43 = vsel %vm2270_vm8, %v4793_v7, %v2326_v18  ;;  %v3556_v44 = vld [vmem:[%s3840_s22 + $0x94] sm:$0xf] }
 0x308   : > { %3022 = vst.msk [vmem:[%s4643_s24 + $0x40] sm:$0xf] %vm2477_vm9, %v3081_v35  ;;  %v3079_v37 = vpack.c.bf16 %v2432_v9, %v2432_v9  ;;  %v2142_v60 = vadd.f32 %v3358_v29, %v4604_v21  ;;  %v2133_v10 = vpop.f32.mrb[57].mxu1  ;;  %v2433_v61 = vmax.f32 %v2397_v26, 0.0  ;;  %v2333_v28 = vsel %vm2270_vm8, %v4831_v54, %v2332_v34 }
 0x309   : > { %v2134_v17 = vadd.f32 %v4604_v21, %v2133_v10  ;;  %v3359_v30 = vpop.f32.mrb[58].mxu1  ;;  %v3082_v36 = vpack.c.bf16 %v2435_v45, %v2435_v45  ;;  %v2329_v2 = vsel %vm2270_vm8, %v2326_v18, %v4839_v46  ;;  %v2230_v62 = vunpack.c.l.bf16 %v3555_v13 }
 0x30a   : > { %v2596_v40 = vrot.slane %v3079_v37, 7  ;;  %v2402_v15 = vadd.f32 %v4758_v16, %v2142_v60  ;;  %v2145_v3 = vadd.f32 %v3359_v30, %v4604_v21  ;;  %v2136_v27 = vpop.f32.mrb[59].mxu1  ;;  %v3080_v63 = vpack.c.bf16 %v2433_v61, %v2433_v61 }
 0x30b   : > { %v2400_v20 = vadd.f32 %v4779_v50, %v2134_v17  ;;  %v2137_v31 = vadd.f32 %v4604_v21, %v2136_v27  ;;  %3023 = vst.msk [vmem:[%s4643_s24 + $0x44] sm:$0xf] %vm2477_vm9, %v3082_v36  ;;  %v2231_v11 = vunpack.c.l.bf16 %v3556_v44  ;;  %v2331_v17 = vsel %vm2270_vm8, %v4839_v46, %v4831_v54  ;;  %v3558_v54 = vld [vmem:[%s3840_s22 + $0x98] sm:$0xf] }
 0x30c   : > { %v2597_v51 = vsel %vm4706_vm1, %v3017_v41, %v2596_v40  ;;  %v2598_v24 = vrot.slane %v2596_v40, 4  ;;  %v2438_v47 = vmax.f32 %v2402_v15, 0.0  ;;  %v2403_v16 = vadd.f32 %v4784_v59, %v2145_v3  ;;  %v3557_v40 = vld [vmem:[%s3840_s22 + $0x8c] sm:$0xf] }
 0x30d   : > { %3018 = vst.msk [vmem:[%s4643_s24 + $0x38] sm:$0xf] %vm2477_vm9, %v2597_v51  ;;  %v2599_v6 = vrot.slane %v3080_v63, 7  ;;  %v2436_v19 = vmax.f32 %v2400_v20, 0.0  ;;  %v2401_v50 = vadd.f32 %v4789_v4, %v2137_v31  ;;  %v2323_v59 = vsel %vm2270_vm8, %v4795_v23, %v4791_v39 }
 0x30e   : > { %v3085_v5 = vpack.c.bf16 %v2438_v47, %v2438_v47  ;;  %v2439_v53 = vmax.f32 %v2403_v16, 0.0  ;;  %v2335_v39 = vsel %vm2270_vm8, %v2332_v34, %v4845_v1  ;;  %v4890_v30 = vrot.slane %v2230_v62, 3 }
 0x30f   : > { %v2600_v57 = vsel %vm4706_vm1, %v2598_v24, %v2599_v6  ;;  %v3083_v8 = vpack.c.bf16 %v2436_v19, %v2436_v19  ;;  %v2437_v4 = vmax.f32 %v2401_v50, 0.0  ;;  %v3362_v48 = vpop.f32.mrb[60].mxu1  ;;  %v2229_v36 = vunpack.c.l.bf16 %v3557_v40 }
 0x310   : > { %3019 = vst.msk [vmem:[%s4643_s24 + $0x3c] sm:$0xf] %vm2477_vm9, %v2600_v57  ;;  %v3086_v12 = vpack.c.bf16 %v2439_v53, %v2439_v53  ;;  %v2158_v7 = vadd.f32 %v3362_v48, %v4604_v21  ;;  %v2149_v55 = vpop.f32.mrb[61].mxu1  ;;  %v3032_v14 = vrot.slane %v3085_v5, 10  ;;  %v2629_v33 = vrot.slane %v3085_v5, 5 }
 0x311   : > { %v3084_v23 = vpack.c.bf16 %v2437_v4, %v2437_v4  ;;  %v2150_v32 = vadd.f32 %v4604_v21, %v2149_v55  ;;  %v3363_v49 = vpop.f32.mrb[62].mxu1  ;;  %v3027_v26 = vrot.slane %v3083_v8, 9  ;;  %v2340_v20 = vrot.slane %v2231_v11, 3 }
 0x312   : > { %v2643_v42 = vrot.slane %v3086_v12, 6  ;;  %v2406_v35 = vadd.f32 %v2325_v58, %v2158_v7  ;;  %v2161_v9 = vadd.f32 %v3363_v49, %v4604_v21  ;;  %v2152_v0 = vpop.f32.mrb[63].mxu1  ;;  %v2232_v46 = vunpack.c.l.bf16 %v3558_v54 }
 0x313   : > { %v2626_v29 = vrot.slane %v3084_v23, 5  ;;  %v2404_v18 = vadd.f32 %v2321_v38, %v2150_v32  ;;  %v2153_v52 = vadd.f32 %v4604_v21, %v2152_v0  ;;  %v2336_v57 = vrot.slane %v2229_v36, 3 }
 0x314   : > { %v2644_v37 = vsel %vm4713_vm2, %v3032_v14, %v2643_v42  ;;  %v2442_v45 = vmax.f32 %v2406_v35, 0.0  ;;  %v2407_v60 = vadd.f32 %v2327_v43, %v2161_v9  ;;  %v2645_v16 = vrot.slane %v2643_v42, 4 }
 0x315   : > { %3033 = vst.msk [vmem:[%s4643_s24 + $0x50] sm:$0xf] %vm2477_vm9, %v2644_v37  ;;  %v2627_v58 = vsel %vm4666_vm0, %v3027_v26, %v2626_v29  ;;  %v2628_v10 = vrot.slane %v2626_v29, 4  ;;  %v2440_v34 = vmax.f32 %v2404_v18, 0.0  ;;  %v2405_v41 = vadd.f32 %v2323_v59, %v2153_v52 }
 0x316   : > { %3028 = vst.msk [vmem:[%s4643_s24 + $0x48] sm:$0xf] %vm2477_vm9, %v2627_v58  ;;  %v2443_v61 = vmax.f32 %v2407_v60, 0.0  ;;  %v3089_v31 = vpack.c.bf16 %v2442_v45, %v2442_v45  ;;  %v2342_v32 = vrot.slane %v2232_v46, 3  ;;  %v2337_v18 = vsel %vm2270_vm8, %v4845_v1, %v2336_v57 }
 0x317   : > { %v2630_v15 = vsel %vm4666_vm0, %v2628_v10, %v2629_v33  ;;  %v3087_v3 = vpack.c.bf16 %v2440_v34, %v2440_v34  ;;  %v2441_v27 = vmax.f32 %v2405_v41, 0.0  ;;  %v3366_v63 = vpop.f32.mrb[64].mxu1  ;;  %v2339_v41 = vsel %vm2270_vm8, %v2336_v57, %v4890_v30 }
 0x318   : > { %3029 = vst.msk [vmem:[%s4643_s24 + $0x4c] sm:$0xf] %vm2477_vm9, %v2630_v15  ;;  %v3090_v51 = vpack.c.bf16 %v2443_v61, %v2443_v61  ;;  %v2174_v24 = vadd.f32 %v3366_v63, %v4604_v21  ;;  %v2165_v47 = vpop.f32.mrb[65].mxu1  ;;  %v2663_v7 = vrot.slane %v3089_v31, 7  ;;  %v2343_v45 = vsel %vm2270_vm8, %v2340_v20, %v2342_v32 }
 0x319   : > { %v2646_v6 = vrot.slane %v3087_v3, 6  ;;  %v3088_v19 = vpack.c.bf16 %v2441_v27, %v2441_v27  ;;  %v2166_v50 = vadd.f32 %v4604_v21, %v2165_v47  ;;  %v3367_v38 = vpop.f32.mrb[66].mxu1  ;;  %v3037_v5 = vrot.slane %v3087_v3, 11 }
 0x31a   : > { %3042 = vst.msk [vmem:[%s4643_s24 + $0x60] sm:$0xf] %vm2477_vm9, %v3090_v51  ;;  %v2410_v53 = vadd.f32 %v2333_v28, %v2174_v24  ;;  %v2177_v43 = vadd.f32 %v3367_v38, %v4604_v21  ;;  %v2168_v59 = vpop.f32.mrb[67].mxu1 }
 0x31b   : > { %v2647_v8 = vsel %vm4713_vm2, %v2645_v16, %v2646_v6  ;;  %v2660_v4 = vrot.slane %v3088_v19, 7  ;;  %v2408_v48 = vadd.f32 %v2329_v2, %v2166_v50  ;;  %v2169_v12 = vadd.f32 %v4604_v21, %v2168_v59 }
 0x31c   : > { %3034 = vst.msk [vmem:[%s4643_s24 + $0x54] sm:$0xf] %vm2477_vm9, %v2647_v8  ;;  %v2446_v55 = vmax.f32 %v2410_v53, 0.0  ;;  %v2411_v23 = vadd.f32 %v2335_v39, %v2177_v43  ;;  %v2341_v39 = vsel %vm2270_vm8, %v4890_v30, %v2340_v20 }
 0x31d   : > { %v2661_v28 = vsel %vm4706_vm1, %v3037_v5, %v2660_v4  ;;  %v2662_v49 = vrot.slane %v2660_v4, 4  ;;  %v2444_v13 = vmax.f32 %v2408_v48, 0.0  ;;  %v2409_v62 = vadd.f32 %v2331_v17, %v2169_v12 }
 0x31e   : > { %3038 = vst.msk [vmem:[%s4643_s24 + $0x58] sm:$0xf] %vm2477_vm9, %v2661_v28  ;;  %v3093_v44 = vpack.c.bf16 %v2446_v55, %v2446_v55  ;;  %v2447_v2 = vmax.f32 %v2411_v23, 0.0 }
 0x31f   : > { %v2664_v11 = vsel %vm4706_vm1, %v2662_v49, %v2663_v7  ;;  %v3091_v14 = vpack.c.bf16 %v2444_v13, %v2444_v13  ;;  %v2445_v42 = vmax.f32 %v2409_v62, 0.0  ;;  %v3370_v35 = vpop.f32.mrb[68].mxu1 }
 0x320   : > { %3039 = vst.msk [vmem:[%s4643_s24 + $0x5c] sm:$0xf] %vm2477_vm9, %v2664_v11  ;;  %v2689_v9 = vrot.slane %v3093_v44, 5  ;;  %v3094_v0 = vpack.c.bf16 %v2447_v2, %v2447_v2  ;;  %v2190_v26 = vadd.f32 %v3370_v35, %v4604_v21  ;;  %v2181_v29 = vpop.f32.mrb[69].mxu1 }
 0x321   : > { %3043 = vst.msk [vmem:[%s4643_s24 + $0x64] sm:$0xf] %vm2477_vm9, %v3091_v14  ;;  %v3092_v52 = vpack.c.bf16 %v2445_v42, %v2445_v42  ;;  %v2182_v33 = vadd.f32 %v4604_v21, %v2181_v29  ;;  %v3371_v37 = vpop.f32.mrb[70].mxu1 }
 0x322   : > { %v2691_v60 = vrot.slane %v2689_v9, 4  ;;  %v2692_v58 = vrot.slane %v3094_v0, 5  ;;  %v2414_v10 = vadd.f32 %v2341_v39, %v2190_v26  ;;  %v2184_v34 = vpop.f32.mrb[71].mxu1  ;;  %v2193_v1 = vadd.f32 %v3371_v37, %v4604_v21 }
 0x323   : > { %v3047_v61 = vrot.slane %v3092_v52, 9  ;;  %v2412_v17 = vadd.f32 %v2337_v18, %v2182_v33  ;;  %v2185_v40 = vadd.f32 %v4604_v21, %v2184_v34  ;;  %v3052_v47 = vrot.slane %v3094_v0, 10 }
 0x324   : > { %v2693_v36 = vsel %vm4666_vm0, %v2691_v60, %v2692_v58  ;;  %v2450_v15 = vmax.f32 %v2414_v10, 0.0  ;;  %v2415_v63 = vadd.f32 %v2343_v45, %v2193_v1 }
 0x325   : > { %3049 = vst.msk [vmem:[%s4643_s24 + $0x6c] sm:$0xf] %vm2477_vm9, %v2693_v36  ;;  %v2690_v3 = vsel %vm4666_vm0, %v3047_v61, %v2689_v9  ;;  %v2448_v27 = vmax.f32 %v2412_v17, 0.0  ;;  %v2413_v20 = vadd.f32 %v2339_v41, %v2185_v40 }
 0x326   : > { %3048 = vst.msk [vmem:[%s4643_s24 + $0x68] sm:$0xf] %vm2477_vm9, %v2690_v3  ;;  %v3097_v30 = vpack.c.bf16 %v2450_v15, %v2450_v15  ;;  %v2451_v51 = vmax.f32 %v2415_v63, 0.0 }
 0x327   : > { %v3095_v31 = vpack.c.bf16 %v2448_v27, %v2448_v27  ;;  %v2449_v21 = vmax.f32 %v2413_v20, 0.0 }
 0x328   : > { %v2723_v24 = vrot.slane %v3097_v30, 7  ;;  %v3098_v46 = vpack.c.bf16 %v2451_v51, %v2451_v51 }
 0x329   : > { %v2706_v54 = vrot.slane %v3095_v31, 6  ;;  %v3096_v16 = vpack.c.bf16 %v2449_v21, %v2449_v21 }
 0x32a   : > { %v2725_v22 = vrot.slane %v2723_v24, 4  ;;  %v2726_v50 = vrot.slane %v3098_v46, 7 }
 0x32b   : > { %v2707_v6 = vsel %vm4713_vm2, %v3052_v47, %v2706_v54  ;;  %v2708_v19 = vrot.slane %v2706_v54, 4  ;;  %v2709_v38 = vrot.slane %v3096_v16, 6  ;;  %v3057_v5 = vrot.slane %v3096_v16, 11 }
 0x32c   : > { %3053 = vst.msk [vmem:[%s4643_s24 + $0x70] sm:$0xf] %vm2477_vm9, %v2707_v6  ;;  %v2727_v53 = vsel %vm4706_vm1, %v2725_v22, %v2726_v50 }
 0x32d   : > { %v2710_v43 = vsel %vm4713_vm2, %v2708_v19, %v2709_v38  ;;  %3059 = vst.msk [vmem:[%s4643_s24 + $0x7c] sm:$0xf] %vm2477_vm9, %v2727_v53  ;;  %v2724_v59 = vsel %vm4706_vm1, %v3057_v5, %v2723_v24 }
 0x32e   : > { %3054 = vst.msk [vmem:[%s4643_s24 + $0x74] sm:$0xf] %vm2477_vm9, %v2710_v43  ;;  %3058 = vst.msk [vmem:[%s4643_s24 + $0x78] sm:$0xf] %vm2477_vm9, %v2724_v59 }
 0x32f PF: > { %s17_s20 = sadd.s32 1, %s3673_s20   ;;  %s4985_s18 = smov %s3669_s19 }
 0x330   : > { %p14_p5 = scmp.ge.s32.totalorder %s17_s20, 4   ;;  %s4986_s19 = smov %s4988_s26 }
 0x332   :  { %16 = sbr.rel (!%p14_p5) target bundleno = 3 (0x3), region = 99 }
 0x339   :  { %2765 = vsyncpa [#allocation3], 1 }
 0x33a   :  { %2767 = vsyncpa [#allocation3 + $0x1], 1 }
 0x33b   :  { %2768 = vsyncpa [#allocation5], 1 }

// kernel: bottom_decoder_forward.9
= control target key start
LH: loop header
LB: loop body
LE: loop exit
PB: predicated region body
PF: predicated region fallthrough
CT: control target
= control target key end

     0   :  { %s2384_s12 = smov 0   ;;  %s2386_s13 = smov 0   ;;  %s3326_s0 = inlined_call_operand.vmem [shape: bf16[2,1190,16], index: 0, kind: input, shape index: {}]   ;;  %s3327_s1 = inlined_call_operand.vmem [shape: bf16[144,12], index: 1, kind: input, shape index: {}]   ;;  %s3328_s2 = inlined_call_operand.vmem [shape: f32[1,12], index: 2, kind: input, shape index: {}]   ;;  %s3329_s3 = inlined_call_operand.vmem [shape: f32[2,32,32,12], index: 3, kind: output, shape index: {}]  }
   0x1   :  { %s2388_s14 = smov 0   ;;  %s2390_s15 = smov 0  }
   0x2   :  { %s2392_s16 = smov 0  }
   0x3 LB: > { %s22_s17 = sadd.s32 1, %s2350_s14  ;;  %s25_s18 = sadd.s32 1, %s2354_s15  ;;  %s2358_s16 = sphi %s2392_s16, %s13_s16   ;;  %s2354_s15 = sphi %s2390_s15, %s3333_s15   ;;  %s2350_s14 = sphi %s2388_s14, %s3332_s14   ;;  %s2346_s13 = sphi %s2386_s13, %s3331_s13   ;;  %s2342_s12 = sphi %s2384_s12, %s3330_s12  }
   0x4   : > { %p23_p0 = scmp.ge.s32.totalorder %s22_s17, 4  ;;  %p1826_p1 = scmp.ge.s32.totalorder %s2358_s16, 1 }
   0x5   : > { %p151_p2 = scmp.lt.s32.totalorder %s2358_s16, 9 }
   0x6   : > { %s3335_s17 = smov (%p23_p0, %s22_s17), 0  ;;  %s3337_s18 = smov (!%p23_p0, %s25_s18), %s2354_s15 }
   0x7   : > { %p152_p3 = pnand %p1826_p1, %p151_p2  ;;  %p27_p4 = scmp.ge.s32.totalorder %s3337_s18, 2 }
   0x8   : > { %p180_p5 = scmp.lt.s32.totalorder (!%p152_p3), %s2346_s13, 1  ;;  %s197_s19 = smul.u32 (!%p152_p3), 272, %s2342_s12  ;;  %v2308_v0 = vld [vmem:[%s3327_s1 + $0x18] sm:$0xff] (!%p152_p3)   ;;  %v2360_v1 = vmov (!%p152_p3), 0.0   ;;  %v2309_v2 = vld [vmem:[%s3327_s1 + $0x20] sm:$0xff] (!%p152_p3)   ;;  %vm508_vm1 = vcmask (!%p152_p3), 1046528  }
   0x9   : > { %s3339_s18 = smov (%p27_p4, %s3337_s18), 0  ;;  %155 = sbr.rel (%p152_p3) target bundleno = 573 (0x23d), region = 32 }
   0xa   : > { %s198_s22 = sshra.s32 (!%p152_p3), %s197_s19, 3  ;;  %2014 = vmatprep.subr.bf16.mxu0 (!%p152_p3), %v2360_v1  ;;  %2236 = vmatprep.subr.bf16.mxu1 (!%p152_p3), %v2360_v1  ;;  %vm333_vm0 = vsmask.f32 (!%p152_p3), 7424  ;;  %s2361_s4 = smov (!%p152_p3), 32   ;;  %vm2363_vm2 = vmmov (!%p152_p3), 0   ;;  %vm578_vm3 = vcmask (!%p152_p3), 130048  }
   0xb   : > { %s1832_s24 = sshll.u32 (!%p152_p3), %s198_s22, 2  ;;  %2015 = vmatpush3.bf16.msra.mxu0 (!%p152_p3), %v2308_v0  ;;  %2239 = vmatpush3.bf16.msra.mxu1 (!%p152_p3), %v2308_v0  ;;  %s2362_s5 = smov (!%p152_p3), 16   ;;  %vm613_vm4 = vcmask (!%p152_p3), 261120   ;;  %vm804_vm5 = vcmask (!%p152_p3), 392192   ;;  %vm1329_vm6 = vcmask (!%p152_p3), 1045504   ;;  %vm1678_vm7 = vcmask (!%p152_p3), 97280  }
   0xc   : > { %2016 = vmatprep.subr.bf16.mxu0 (!%p152_p3), %v2360_v1  ;;  %2237 = vmatprep.subr.bf16.mxu1 (!%p152_p3), %v2360_v1  ;;  %vm1684_vm8 = vcmask (!%p152_p3), 97282   ;;  %vm1689_vm9 = vcmask (!%p152_p3), 91136   ;;  %vm1692_vm10 = vcmask (!%p152_p3), 97284   ;;  %vm1697_vm11 = vcmask (!%p152_p3), 93184  }
   0xd   : > { %2020 = vmatprep.mubr.msk.bf16.mxu0 (!%p152_p3), %vm2363_vm2, %v2360_v1  ;;  %2056 = vmatprep.mubr.msk.bf16.mxu1 (!%p152_p3), %vm2363_vm2, %v2360_v1  ;;  %vm1700_vm12 = vcmask (!%p152_p3), 97286   ;;  %vm1705_vm13 = vcmask (!%p152_p3), 95232  }
   0xf   : > { %2017 = vmatpush3.bf16.msra.mxu0 (!%p152_p3), %v2309_v2  ;;  %2240 = vmatpush3.bf16.msra.mxu1 (!%p152_p3), %v2309_v2 }
  0x10   : > { %s3341_s13 = smov (!%p180_p5, %s2346_s13), 1  ;;  %2018 = vmatprep.subr.bf16.mxu0 %v2360_v1  ;;  %2238 = vmatprep.subr.bf16.mxu1 %v2360_v1 }
  0x11   : > { %s2242_s23 = smul.u32 596, %s3341_s13 }
  0x13   : > { %s184_s27 = scalar_lea.vmem %s3326_s0, %s2242_s23 }
  0x14   : > { %s2430_s28 = scalar_lea.vmem %s184_s27, %s1832_s24  ;;  %s1828_s27 = sshll.u32 %s2342_s12, 3 }
  0x15   : > { %v2436_v3 = vld [vmem:[%s2430_s28 + $0x58] sm:$0xff]   ;;  %v2439_v4 = vld [vmem:[%s2430_s28 + $0x60] sm:$0xff]   ;;  %v2446_v7 = vld [vmem:[%s2430_s28 + $0x10] sm:$0xff]   ;;  %p188_p6 = scmp.lt.s32.totalorder %s1828_s27, 31  ;;  %s1830_s12 = sshll.u32 %s3341_s13, 7 }
  0x16   : > { %v530_v5 = vrot.slane %v2436_v3, 1  ;;  %v532_v6 = vrot.slane %v2439_v4, 1  ;;  %v2449_v8 = vld [vmem:[%s2430_s28 + $0x18] sm:$0xff]   ;;  %v2452_v9 = vld [vmem:[%s2430_s28 + $0x20] sm:$0xff]   ;;  %v430_v10 = vshll.u32 %v2439_v4, 16  ;;  %v512_v12 = vrot.slane %v2446_v7, 1 }
  0x17   : > { %v514_v13 = vrot.slane %v2449_v8, 1  ;;  %v350_v14 = vshll.u32 %v2446_v7, 16  ;;  %v2462_v15 = vld [vmem:[%s2430_s28 + $0x68] sm:$0xff]   ;;  %v516_v16 = vrot.slane %v2452_v9, 1  ;;  %v354_v17 = vshrl.u32 %v2446_v7, 16  ;;  %v2493_v39 = vld [vmem:[%s2430_s28 + $0x70] sm:$0xff]  }
  0x18   : > { %v533_v11 = vsel %vm508_vm1, %v530_v5, %v532_v6  ;;  %v358_v18 = vshll.u32 %v2449_v8, 16  ;;  %v362_v19 = vshrl.u32 %v2449_v8, 16  ;;  %v534_v22 = vrot.slane %v2462_v15, 1  ;;  %v2479_v27 = vld [vmem:[%s2430_s28 + $0x28] sm:$0xff]   ;;  %v2507_v52 = vld [vmem:[%s2430_s28 + $0x30] sm:$0xff]   ;;  %v2514_v56 = vld [vmem:[%s2430_s28 + $0x78] sm:$0xff]  }
  0x19   : > { %566 = vrot.lane.b32.xlu0 %v533_v11, %s2361_s4  ;;  %v515_v20 = vsel %vm508_vm1, %v512_v12, %v514_v13  ;;  %v2472_v21 = vrot.slane %v350_v14, 1  ;;  %v366_v23 = vshll.u32 %v2452_v9, 16  ;;  %v432_v25 = vrot.slane %v430_v10, 1  ;;  %v2527_v11 = vld [vmem:[%s2430_s28 + $0x38] sm:$0xff]   ;;  %v2533_v14 = vld [vmem:[%s2430_s28 + $0x80] sm:$0xff]   ;;  %s3343_s27 = smov (!%p188_p6, %s1828_s27), 31 }
  0x1a   : > { %548 = vrot.lane.b32.xlu1 %v515_v20, %s2361_s4  ;;  %v360_v24 = vrot.slane %v358_v18, 1  ;;  %v434_v26 = vshrl.u32 %v2439_v4, 16  ;;  %v517_v28 = vsel %vm508_vm1, %v514_v13, %v516_v16  ;;  %v438_v31 = vshll.u32 %v2462_v15, 16  ;;  %v2310_v13 = vld [vmem:[%s3327_s1 + $0x28] sm:$0xff]  }
  0x1b   : > { %v356_v29 = vor.u32 %v354_v17, %v2472_v21  ;;  %v368_v30 = vrot.slane %v366_v23, 1  ;;  %v422_v33 = vshll.u32 %v2436_v3, 16  ;;  %v426_v34 = vshrl.u32 %v2436_v3, 16  ;;  %2019 = vmatpush3.bf16.msra.mxu0 %v2310_v13  ;;  %2241 = vmatpush3.bf16.msra.mxu1 %v2310_v13 }
  0x1c   : > { %v364_v32 = vor.u32 %v362_v19, %v360_v24  ;;  %v535_v36 = vsel %vm508_vm1, %v532_v6, %v534_v22  ;;  %v440_v37 = vrot.slane %v438_v31, 1  ;;  %v436_v41 = vor.u32 %v434_v26, %v432_v25  ;;  %2162 = vmatprep.subr.bf16.mxu0 %v2360_v1  ;;  %2088 = vmatprep.subr.bf16.mxu1 %v2360_v1 }
  0x1d   : > { %v361_v35 = vsel %vm333_vm0, %v356_v29, %v360_v24  ;;  %v2490_v38 = vrot.slane %v422_v33, 1  ;;  %v370_v42 = vshrl.u32 %v2452_v9, 16  ;;  %v374_v43 = vshll.u32 %v2479_v27, 16  ;;  %v2555_v33 = vld [vmem:[%s2430_s28 + $0x88] sm:$0xf] }
  0x1e   : > { %550 = vrot.lane.b32.xlu1 %v517_v28, %s2361_s4  ;;  %478 = vrot.lane.b32.xlu0 %v361_v35, %s2362_s5  ;;  %v369_v40 = vsel %vm333_vm0, %v364_v32, %v368_v30  ;;  %v518_v45 = vrot.slane %v2479_v27, 1  ;;  %v442_v46 = vshrl.u32 %v2462_v15, 16  ;;  %v446_v47 = vshll.u32 %v2493_v39, 16  ;;  %v2552_v32 = vld [vmem:[%s2430_s28 + $0x40] sm:$0xff]  }
  0x1f   : > { %v428_v44 = vor.u32 %v426_v34, %v2490_v38  ;;  %v441_v48 = vsel %vm333_vm0, %v436_v41, %v440_v37  ;;  %v372_v50 = vor.u32 %v370_v42, %v368_v30  ;;  %v376_v51 = vrot.slane %v374_v43, 1  ;;  %v237_v34 = vld [vmem:[%s2430_s28 + $0x8c] sm:$0xf] }
  0x20   : > { %v519_v53 = vsel %vm508_vm1, %v516_v16, %v518_v45  ;;  %v448_v54 = vrot.slane %v446_v47, 1  ;;  %v536_v55 = vrot.slane %v2493_v39, 1  ;;  %v444_v58 = vor.u32 %v442_v46, %v440_v37 }
  0x21   : > { %v433_v49 = vsel %vm333_vm0, %v428_v44, %v432_v25  ;;  %v377_v57 = vsel %vm333_vm0, %v372_v50, %v376_v51  ;;  %v378_v59 = vshrl.u32 %v2479_v27, 16  ;;  %v382_v60 = vshll.u32 %v2507_v52, 16 }
  0x22   : > { %568 = vrot.lane.b32.xlu1 %v535_v36, %s2361_s4  ;;  %480 = vrot.lane.b32.xlu0 %v369_v40, %s2362_s5  ;;  %v537_v61 = vsel %vm508_vm1, %v534_v22, %v536_v55  ;;  %v520_v62 = vrot.slane %v2507_v52, 1  ;;  %v450_v63 = vshrl.u32 %v2493_v39, 16  ;;  %v449_v0 = vsel %vm333_vm0, %v444_v58, %v448_v54 }
  0x23   : > { %v380_v2 = vor.u32 %v378_v59, %v376_v51  ;;  %v384_v6 = vrot.slane %v382_v60, 1  ;;  %v454_v10 = vshll.u32 %v2514_v56, 16  ;;  %v538_v18 = vrot.slane %v2514_v56, 1 }
  0x24   : > { %v521_v16 = vsel %vm508_vm1, %v518_v45, %v520_v62  ;;  %v452_v17 = vor.u32 %v450_v63, %v448_v54  ;;  %v386_v22 = vshrl.u32 %v2507_v52, 16  ;;  %v390_v23 = vshll.u32 %v2527_v11, 16 }
  0x25   : > { %v385_v19 = vsel %vm333_vm0, %v380_v2, %v384_v6  ;;  %v456_v20 = vrot.slane %v454_v10, 1  ;;  %v522_v24 = vrot.slane %v2527_v11, 1  ;;  %v458_v25 = vshrl.u32 %v2514_v56, 16 }
  0x26   : > { %498 = vrot.lane.b32.xlu1 %v441_v48, %s2362_s5  ;;  %496 = vrot.lane.b32.xlu0 %v433_v49, %s2362_s5  ;;  %v462_v26 = vshll.u32 %v2533_v14, 16  ;;  %v539_v29 = vsel %vm508_vm1, %v536_v55, %v538_v18  ;;  %v388_v30 = vor.u32 %v386_v22, %v384_v6  ;;  %v392_v31 = vrot.slane %v390_v23, 1  ;;  %v2581_v48 = vld [vmem:[%s2430_s28 + $0x48] sm:$0xff]  }
  0x27   : > { %v457_v28 = vsel %vm333_vm0, %v452_v17, %v456_v20  ;;  %v523_v35 = vsel %vm508_vm1, %v520_v62, %v522_v24  ;;  %v460_v36 = vor.u32 %v458_v25, %v456_v20  ;;  %v2562_v40 = vrot.slane %v2533_v14, 1  ;;  %v2595_v62 = vld [vmem:[%s2430_s28 + $0x90] sm:$0xff]  }
  0x28   : > { %v464_v37 = vrot.slane %v462_v26, 1  ;;  %v393_v41 = vsel %vm333_vm0, %v388_v30, %v392_v31  ;;  %v394_v42 = vshrl.u32 %v2527_v11, 16  ;;  %v398_v43 = vshll.u32 %v2552_v32, 16  ;;  %v2607_v17 = vld [vmem:[%s2430_s28 + $0x50] sm:$0xff]  }
  0x29   : > { %v2568_v44 = vcombine.low %v2555_v33, %v237_v34  ;;  %v541_v45 = vsel %vm508_vm1, %v538_v18, %v2562_v40  ;;  %v524_v46 = vrot.slane %v2552_v32, 1  ;;  %v466_v47 = vshrl.u32 %v2533_v14, 16  ;;  %v240_v18 = vld [vmem:[%s2430_s28 + $0x98] sm:$0xf] }
  0x2a   : > { %482 = vrot.lane.b32.xlu0 %v377_v57, %s2362_s5  ;;  %552 = vrot.lane.b32.xlu1 %v519_v53, %s2361_s4  ;;  %v465_v49 = vsel %vm333_vm0, %v460_v36, %v464_v37  ;;  %v396_v50 = vor.u32 %v394_v42, %v392_v31  ;;  %v400_v51 = vrot.slane %v398_v43, 1  ;;  %v402_v55 = vshrl.u32 %v2552_v32, 16 }
  0x2b   : > { %v666_v53 = vshll.u32 %v2568_v44, 16  ;;  %v525_v54 = vsel %vm508_vm1, %v522_v24, %v524_v46  ;;  %v406_v57 = vshll.u32 %v2581_v48, 16  ;;  %v2591_v59 = vor.u32 %v466_v47, %v464_v37 }
  0x2c   : > { %v401_v58 = vsel %vm333_vm0, %v396_v50, %v400_v51  ;;  %v404_v63 = vor.u32 %v402_v55, %v400_v51  ;;  %v526_v2 = vrot.slane %v2581_v48, 1  ;;  %v670_v13 = vshrl.u32 %v2568_v44, 16 }
  0x2d   : > { %v668_v60 = vrot.slane %v666_v53, 1  ;;  %v2615_v22 = vrot.slane %v2595_v62, 1  ;;  %v410_v23 = vshrl.u32 %v2581_v48, 16  ;;  %v414_v26 = vshll.u32 %v2607_v17, 16 }
  0x2e   : > { %500 = vrot.lane.b32.xlu0 %v449_v0, %s2362_s5  ;;  %570 = vrot.lane.b32.xlu1 %v537_v61, %s2361_s4  ;;  %v697_v61 = vrot.slane %v2568_v44, 1  ;;  %v408_v0 = vrot.slane %v406_v57, 1  ;;  %v527_v20 = vsel %vm508_vm1, %v524_v46, %v526_v2  ;;  %v528_v31 = vrot.slane %v2607_v17, 1 }
  0x2f   : > { %v669_v6 = vsel %vm333_vm0, %v2591_v59, %v668_v60  ;;  %v672_v24 = vor.u32 %v670_v13, %v668_v60  ;;  %v678_v36 = vshrl.u32 %v2595_v62, 16  ;;  %v418_v42 = vshrl.u32 %v2607_v17, 16 }
  0x30   : > { %v698_v10 = vsel %vm508_vm1, %v2562_v40, %v697_v61  ;;  %v412_v30 = vor.u32 %v410_v23, %v408_v0  ;;  %v531_v57 = vsel %vm508_vm1, %v528_v31, %v530_v5 }
  0x32   : > { %484 = vrot.lane.b32.xlu0 %v385_v19, %s2362_s5  ;;  %554 = vrot.lane.b32.xlu1 %v521_v16, %s2361_s4  ;;  %v674_v16 = vshll.u32 %v2595_v62, 16  ;;  %v409_v19 = vsel %vm333_vm0, %v404_v63, %v408_v0 }
  0x34   : > { %v676_v25 = vrot.slane %v674_v16, 1 }
  0x36   : > { %502 = vrot.lane.b32.xlu0 %v457_v28, %s2362_s5  ;;  %572 = vrot.lane.b32.xlu1 %v539_v29, %s2361_s4  ;;  %v2619_v28 = vcombine.low %v240_v18, %v240_v18  ;;  %v700_v29 = vsel %vm508_vm1, %v697_v61, %v2615_v22  ;;  %v677_v34 = vsel %vm333_vm0, %v672_v24, %v676_v25 }
  0x38   : > { %v682_v37 = vshll.u32 %v2619_v28, 16  ;;  %v701_v47 = vrot.slane %v2619_v28, 1 }
  0x3a   : > { %486 = vrot.lane.b32.xlu0 %v393_v41, %s2362_s5  ;;  %556 = vrot.lane.b32.xlu1 %v523_v35, %s2361_s4  ;;  %v416_v35 = vrot.slane %v414_v26, 1  ;;  %v529_v41 = vsel %vm508_vm1, %v526_v2, %v528_v31  ;;  %v684_v46 = vrot.slane %v682_v37, 1  ;;  %v702_v51 = vsel %vm508_vm1, %v2615_v22, %v701_v47  ;;  %v241_v2 = vld [vmem:[%s2430_s28 + $0x9c] sm:$0xf] }
  0x3c   : > { %v417_v43 = vsel %vm333_vm0, %v412_v30, %v416_v35  ;;  %v420_v53 = vor.u32 %v418_v42, %v416_v35 }
  0x3e   : > { %504 = vrot.lane.b32.xlu0 %v465_v49, %s2362_s5  ;;  %574 = vrot.lane.b32.xlu1 %v541_v45, %s2361_s4  ;;  %v680_v45 = vor.u32 %v678_v36, %v676_v25  ;;  %v2636_v49 = vld [vmem:[%s2430_s28] sm:$0xff]   ;;  %v425_v60 = vsel %vm333_vm0, %v420_v53, %v2490_v38  ;;  %v2684_v36 = vld [vmem:[%s2430_s28 + $0xa8] ss:$0 sps:$4 sm:$0x77]  }
  0x3f   : > { %v337_v55 = vshll.u32 %v2636_v49, 16  ;;  %v335_v61 = vshrl.u32 %v2636_v49, 16 }
  0x40   : > { %v685_v50 = vsel %vm333_vm0, %v680_v45, %v684_v46 }
  0x41   : > { %v339_v63 = vrot.slane %v337_v55, 1  ;;  %v1293_v55 = vrot.slane %v2684_v36, 1 }
  0x42   : > { %488 = vrot.lane.b32.xlu0 %v401_v58, %s2362_s5  ;;  %558 = vrot.lane.b32.xlu1 %v525_v54, %s2361_s4  ;;  %v2644_v54 = vld [vmem:[%s2430_s28 + $0x8] sm:$0xff]   ;;  %v686_v58 = vshrl.u32 %v2619_v28, 16 }
  0x43   : > { %v342_v0 = vshll.u32 %v2644_v54, 16  ;;  %v510_v5 = vrot.slane %v2644_v54, 1  ;;  %v340_v13 = vor.u32 %v339_v63, %v335_v61  ;;  %v346_v38 = vshrl.u32 %v2644_v54, 16 }
  0x45   : > { %v344_v16 = vrot.slane %v342_v0, 1 }
  0x46   : > { %689 = vrot.lane.b32.xlu0 %v669_v6, %s2362_s5  ;;  %703 = vrot.lane.b32.xlu1 %v698_v10, %s2361_s4  ;;  %v688_v6 = vor.u32 %v686_v58, %v684_v46  ;;  %v509_v10 = vrot.slane %v2636_v49, 1 }
  0x47   : > { %v345_v23 = vsel %vm333_vm0, %v340_v13, %v344_v16  ;;  %v348_v25 = vor.u32 %v346_v38, %v344_v16 }
  0x48   : > { %v511_v24 = vsel %vm508_vm1, %v509_v10, %v510_v5 }
  0x49   : > { %v353_v31 = vsel %vm333_vm0, %v348_v25, %v2472_v21 }
  0x4a   : > { %490 = vrot.lane.b32.xlu0 %v409_v19, %s2362_s5  ;;  %560 = vrot.lane.b32.xlu1 %v527_v20, %s2361_s4  ;;  %v2663_v19 = vcombine.low %v240_v18, %v241_v2  ;;  %v2668_v20 = vld [vmem:[%s2430_s28 + $0xa0] sm:$0xff]   ;;  %s1829_s28 = sshll.u32 %s3343_s27, 2 }
  0x4b   : > { %v1266_v30 = vshll.u32 %v2668_v20, 16  ;;  %v1270_v46 = vshrl.u32 %v2668_v20, 16  ;;  %s192_s29 = sadd.s32 %s1830_s12, %s1829_s28 }
  0x4c   : > { %v1258_v26 = vshll.u32 %v2663_v19, 16  ;;  %v1289_v18 = vrot.slane %v2663_v19, 1  ;;  %s1831_s30 = sshll.u32 %s192_s29, 3 }
  0x4d   : > { %v1268_v42 = vrot.slane %v1266_v30, 1  ;;  %s3167_s7 = scalar_lea.vmem %s3329_s3, %s1831_s30 }
  0x4e   : > { %691 = vrot.lane.b32.xlu0 %v677_v34, %s2362_s5  ;;  %705 = vrot.lane.b32.xlu1 %v700_v29, %s2361_s4  ;;  %v1262_v29 = vshrl.u32 %v2663_v19, 16  ;;  %v513_v34 = vsel %vm508_vm1, %v510_v5, %v512_v12  ;;  %v1260_v35 = vrot.slane %v1258_v26, 1  ;;  %v1290_v37 = vsel %vm508_vm1, %v2615_v22, %v1289_v18 }
  0x4f   : > { %v1274_v12 = vshll.u32 %v2684_v36, 16 }
  0x50   : > { %v1261_v21 = vsel %vm333_vm0, %v680_v45, %v1260_v35 }
  0x51   : > { %v1276_v53 = vrot.slane %v1274_v12, 1 }
  0x52   : > { %492 = vrot.lane.b32.xlu0 %v417_v43, %s2362_s5  ;;  %562 = vrot.lane.b32.xlu1 %v529_v41, %s2361_s4  ;;  %v1264_v41 = vor.u32 %v1262_v29, %v1260_v35  ;;  %v1291_v43 = vrot.slane %v2668_v20, 1 }
  0x54   : > { %v1292_v22 = vsel %vm508_vm1, %v1289_v18, %v1291_v43  ;;  %v1294_v58 = vsel %vm508_vm1, %v1291_v43, %v1293_v55  ;;  %v2313_v43 = vld [vmem:[%s3327_s1 + $0x38] sm:$0xff]  }
  0x56   : > { %693 = vrot.lane.b32.xlu0 %v685_v50, %s2362_s5  ;;  %707 = vrot.lane.b32.xlu1 %v702_v51, %s2361_s4  ;;  %v1269_v50 = vsel %vm333_vm0, %v1264_v41, %v1268_v42  ;;  %v1272_v51 = vor.u32 %v1270_v46, %v1268_v42 }
  0x5a   : > { %494 = vrot.lane.b32.xlu0 %v425_v60, %s2362_s5  ;;  %564 = vrot.lane.b32.xlu1 %v531_v57, %s2361_s4  ;;  %v1278_v57 = vshrl.u32 %v2684_v36, 16 }
  0x5c   : > { %v1280_v61 = vor.u32 %v1278_v57, %v1276_v53 }
  0x5e   : > { %695 = vrot.lane.b32.xlu0 %v688_v6, %s2362_s5  ;;  %709 = vrot.lane.b32.xlu1 %v701_v47, %s2361_s4  ;;  %v1850_v47 = vcombine.low %v2555_v33, %v2555_v33  ;;  %v1277_v33 = vsel %vm333_vm0, %v1272_v51, %v1276_v53  ;;  %v2315_v51 = vld [vmem:[%s3327_s1 + $0x40] sm:$0xff]  }
  0x60   : > { %v470_v45 = vshll.u32 %v1850_v47, 16  ;;  %v542_v0 = vrot.slane %v1850_v47, 1 }
  0x62   : > { %474 = vrot.lane.b32.xlu0 %v345_v23, %s2362_s5  ;;  %544 = vrot.lane.b32.xlu1 %v511_v24, %s2361_s4  ;;  %v472_v60 = vrot.slane %v470_v45, 1  ;;  %v543_v2 = vsel %vm508_vm1, %v2562_v40, %v542_v0 }
  0x64   : > { %v473_v63 = vsel %vm333_vm0, %v2591_v59, %v472_v60 }
  0x66   : > { %476 = vrot.lane.b32.xlu0 %v353_v31, %s2362_s5  ;;  %546 = vrot.lane.b32.xlu1 %v513_v34, %s2361_s4 }
  0x6a   : > { %1281 = vrot.lane.b32.xlu0 %v1261_v21, %s2362_s5  ;;  %1295 = vrot.lane.b32.xlu1 %v1290_v37, %s2361_s4 }
  0x6e   : > { %1283 = vrot.lane.b32.xlu0 %v1269_v50, %s2362_s5  ;;  %1297 = vrot.lane.b32.xlu1 %v1292_v22, %s2361_s4  ;;  %v2314_v50 = vld [vmem:[%s3327_s1 + $0x8] sm:$0xff]  }
  0x72   : > { %1285 = vrot.lane.b32.xlu0 %v1277_v33, %s2362_s5  ;;  %1299 = vrot.lane.b32.xlu1 %v1294_v58, %s2361_s4  ;;  %v2316_v33 = vld [vmem:[%s3327_s1 + $0x10] sm:$0xff]  }
  0x76   : > { %1287 = vrot.lane.b32.xlu0 %v1280_v61, %s2362_s5  ;;  %506 = vrot.lane.b32.xlu1 %v473_v63, %s2362_s5 }
  0x7a   : > { %1301 = vrot.lane.b32.xlu0 %v1293_v55, %s2361_s4  ;;  %576 = vrot.lane.b32.xlu1 %v543_v2, %s2361_s4 }
  0x8b   : > { %v567_v6 = vpop.permute.xlu0 %566 }
  0x8c   : > { %v549_v10 = vpop.permute.xlu1 %548 }
  0x90   : > { %v551_v5 = vpop.permute.xlu1 %550  ;;  %v479_v13 = vpop.permute.xlu0 %478 }
  0x91   : > { %v584_v59 = vsel %vm578_vm3, %v2446_v7, %v479_v13  ;;  %v2311_v7 = vld [vmem:[%s3327_s1 + $0x30] sm:$0xff]  }
  0x92   : > { %v2719_v16 = vsel %vm613_vm4, %v584_v59, %v549_v10 }
  0x93   : > { %v751_v25 = vrot.slane %v2719_v16, 1 }
  0x94   : > { %v569_v38 = vpop.permute.xlu1 %568  ;;  %v481_v23 = vpop.permute.xlu0 %480 }
  0x95   : > { %v586_v40 = vsel %vm578_vm3, %v2449_v8, %v481_v23 }
  0x96   : > { %v2724_v24 = vsel %vm613_vm4, %v586_v40, %v551_v5 }
  0x97   : > { %v752_v26 = vrot.slane %v2724_v24, 1 }
  0x98   : > { %v499_v18 = vpop.permute.xlu1 %498  ;;  %v497_v29 = vpop.permute.xlu0 %496 }
  0x99   : > { %v604_v30 = vsel %vm578_vm3, %v2439_v4, %v499_v18  ;;  %v602_v8 = vsel %vm578_vm3, %v2436_v3, %v497_v29  ;;  %v753_v31 = vsel %vm508_vm1, %v751_v25, %v752_v26  ;;  %v2312_v4 = vld [vmem:[%s3327_s1] sm:$0xff]  }
  0x9a   : > { %v2737_v34 = vsel %vm613_vm4, %v604_v30, %v569_v38  ;;  %v2740_v35 = vsel %vm613_vm4, %v602_v8, %v567_v6  ;;  %2021 = vmatmul.mubr.msk.bf16.vlgmr.msra.gmra.mrb[0].mxu0 %vm804_vm5, %v753_v31 }
  0x9b   : > { %v770_v37 = vrot.slane %v2737_v34, 1  ;;  %v768_v41 = vrot.slane %v2740_v35, 1  ;;  %2163 = vmatpush3.bf16.msra.mxu0 %v2311_v7  ;;  %2024 = vmatprep.mubr.msk.bf16.mxu0 %vm2363_vm2, %v2360_v1 }
  0x9c   : > { %v483_v3 = vpop.permute.xlu0 %482  ;;  %v553_v42 = vpop.permute.xlu1 %552  ;;  %2164 = vmatprep.subr.bf16.mxu0 %v2360_v1 }
  0x9d   : > { %v588_v21 = vsel %vm578_vm3, %v2452_v9, %v483_v3  ;;  %v771_v46 = vsel %vm508_vm1, %v768_v41, %v770_v37 }
  0x9e   : > { %v2760_v12 = vsel %vm613_vm4, %v588_v21, %v553_v42  ;;  %2057 = vmatmul.mubr.msk.bf16.vlgmr.msra.gmra.mrb[0].mxu1 %vm804_vm5, %v771_v46 }
  0x9f   : > { %v754_v47 = vrot.slane %v2760_v12, 1  ;;  %2089 = vmatpush3.bf16.msra.mxu1 %v2312_v4  ;;  %2060 = vmatprep.mubr.msk.bf16.mxu1 %vm2363_vm2, %v2360_v1 }
  0xa0   : > { %v501_v9 = vpop.permute.xlu0 %500  ;;  %v571_v22 = vpop.permute.xlu1 %570  ;;  %2165 = vmatpush3.bf16.msra.mxu0 %v2313_v43  ;;  %2090 = vmatprep.subr.bf16.mxu1 %v2360_v1 }
  0xa1   : > { %v606_v53 = vsel %vm578_vm3, %v2462_v15, %v501_v9  ;;  %v755_v55 = vsel %vm508_vm1, %v752_v26, %v754_v47  ;;  %2166 = vmatprep.subr.bf16.mxu0 %v2360_v1 }
  0xa2   : > { %v2778_v45 = vsel %vm613_vm4, %v606_v53, %v571_v22  ;;  %2025 = vmatmul.mubr.msk.bf16.gmra.mrb[4].mxu0 %vm804_vm5, %v755_v55 }
  0xa3   : > { %v772_v57 = vrot.slane %v2778_v45, 1  ;;  %2028 = vmatprep.mubr.msk.bf16.mxu0 %vm2363_vm2, %v2360_v1  ;;  %2091 = vmatpush3.bf16.msra.mxu1 %v2314_v50 }
  0xa4   : > { %v485_v15 = vpop.permute.xlu0 %484  ;;  %v555_v58 = vpop.permute.xlu1 %554  ;;  %2092 = vmatprep.subr.bf16.mxu1 %v2360_v1  ;;  %2167 = vmatpush3.bf16.msra.mxu0 %v2315_v51 }
  0xa5   : > { %v590_v60 = vsel %vm578_vm3, %v2479_v27, %v485_v15  ;;  %v773_v61 = vsel %vm508_vm1, %v770_v37, %v772_v57 }
  0xa6   : > { %v2792_v63 = vsel %vm613_vm4, %v590_v60, %v555_v58  ;;  %2061 = vmatmul.mubr.msk.bf16.gmra.mrb[4].mxu1 %vm804_vm5, %v773_v61 }
  0xa7   : > { %v756_v0 = vrot.slane %v2792_v63, 1  ;;  %2064 = vmatprep.mubr.msk.bf16.mxu1 %vm2363_vm2, %v2360_v1  ;;  %2093 = vmatpush3.bf16.msra.mxu1 %v2316_v33 }
  0xa8   : > { %v503_v2 = vpop.permute.xlu0 %502  ;;  %v573_v6 = vpop.permute.xlu1 %572 }
  0xa9   : > { %v608_v10 = vsel %vm578_vm3, %v2493_v39, %v503_v2  ;;  %v757_v27 = vsel %vm508_vm1, %v754_v47, %v756_v0 }
  0xaa   : > { %v2802_v5 = vsel %vm613_vm4, %v608_v10, %v573_v6  ;;  %2029 = vmatmul.mubr.msk.bf16.gmra.mrb[8].mxu0 %vm804_vm5, %v757_v27 }
  0xab   : > { %v774_v13 = vrot.slane %v2802_v5, 1  ;;  %2032 = vmatprep.mubr.msk.bf16.mxu0 %vm2363_vm2, %v2360_v1 }
  0xac   : > { %v487_v59 = vpop.permute.xlu0 %486  ;;  %v557_v38 = vpop.permute.xlu1 %556 }
  0xad   : > { %v592_v23 = vsel %vm578_vm3, %v2507_v52, %v487_v59  ;;  %v775_v40 = vsel %vm508_vm1, %v772_v57, %v774_v13 }
  0xae   : > { %v2812_v39 = vsel %vm613_vm4, %v592_v23, %v557_v38  ;;  %2065 = vmatmul.mubr.msk.bf16.gmra.mrb[8].mxu1 %vm804_vm5, %v775_v40 }
  0xaf   : > { %v758_v25 = vrot.slane %v2812_v39, 1  ;;  %2068 = vmatprep.mubr.msk.bf16.mxu1 %vm2363_vm2, %v2360_v1 }
  0xb0   : > { %v505_v26 = vpop.permute.xlu0 %504  ;;  %v575_v7 = vpop.permute.xlu1 %574 }
  0xb1   : > { %v610_v18 = vsel %vm578_vm3, %v2514_v56, %v505_v26  ;;  %v759_v29 = vsel %vm508_vm1, %v756_v0, %v758_v25 }
  0xb2   : > { %v2822_v52 = vsel %vm613_vm4, %v610_v18, %v575_v7  ;;  %2033 = vmatmul.mubr.msk.bf16.gmra.mrb[12].mxu0 %vm804_vm5, %v759_v29 }
  0xb3   : > { %v776_v30 = vrot.slane %v2822_v52, 1  ;;  %2036 = vmatprep.mubr.msk.bf16.mxu0 %vm2363_vm2, %v2360_v1 }
  0xb4   : > { %v489_v8 = vpop.permute.xlu0 %488  ;;  %v559_v31 = vpop.permute.xlu1 %558 }
  0xb5   : > { %v594_v37 = vsel %vm578_vm3, %v2527_v11, %v489_v8  ;;  %v777_v4 = vsel %vm508_vm1, %v774_v13, %v776_v30 }
  0xb6   : > { %v2832_v56 = vsel %vm613_vm4, %v594_v37, %v559_v31  ;;  %2069 = vmatmul.mubr.msk.bf16.gmra.mrb[12].mxu1 %vm804_vm5, %v777_v4 }
  0xb7   : > { %v760_v3 = vrot.slane %v2832_v56, 1  ;;  %2072 = vmatprep.mubr.msk.bf16.mxu1 %vm2363_vm2, %v2360_v1 }
  0xb8   : > { %v690_v42 = vpop.permute.xlu0 %689  ;;  %v704_v43 = vpop.permute.xlu1 %703 }
  0xb9   : > { %v712_v21 = vsel %vm578_vm3, %v2533_v14, %v690_v42  ;;  %v761_v46 = vsel %vm508_vm1, %v758_v25, %v760_v3 }
  0xba   : > { %v2842_v11 = vsel %vm613_vm4, %v712_v21, %v704_v43  ;;  %2037 = vmatmul.mubr.msk.bf16.gmra.mrb[16].mxu0 %vm804_vm5, %v761_v46 }
  0xbb   : > { %v778_v47 = vrot.slane %v2842_v11, 1  ;;  %2040 = vmatprep.mubr.msk.bf16.mxu0 %vm2363_vm2, %v2360_v1  ;;  %v1353_v60 = vrot.slane %v2842_v11, 2 }
  0xbc   : > { %v491_v50 = vpop.permute.xlu0 %490  ;;  %v561_v9 = vpop.permute.xlu1 %560 }
  0xbd   : > { %v596_v22 = vsel %vm578_vm3, %v2552_v32, %v491_v50  ;;  %v779_v51 = vsel %vm508_vm1, %v776_v30, %v778_v47 }
  0xbe   : > { %v2852_v53 = vsel %vm613_vm4, %v596_v22, %v561_v9  ;;  %2073 = vmatmul.mubr.msk.bf16.gmra.mrb[16].mxu1 %vm804_vm5, %v779_v51  ;;  %v1331_v22 = vrot.slane %v2792_v63, 2  ;;  %v1330_v51 = vrot.slane %v2760_v12, 2 }
  0xbf   : > { %v762_v55 = vrot.slane %v2852_v53, 1  ;;  %2076 = vmatprep.mubr.msk.bf16.mxu1 %vm2363_vm2, %v2360_v1 }
  0xc0   : > { %v692_v57 = vpop.permute.xlu0 %691  ;;  %v706_v33 = vpop.permute.xlu1 %705 }
  0xc1   : > { %v714_v15 = vsel %vm578_vm3, %v2568_v44, %v692_v57  ;;  %v763_v58 = vsel %vm508_vm1, %v760_v3, %v762_v55 }
  0xc2   : > { %v2862_v32 = vsel %vm613_vm4, %v714_v15, %v706_v33  ;;  %2041 = vmatmul.mubr.msk.bf16.gmra.mrb[20].mxu0 %vm804_vm5, %v763_v58  ;;  %v1333_v15 = vrot.slane %v2812_v39, 2 }
  0xc3   : > { %v780_v61 = vrot.slane %v2862_v32, 1  ;;  %v1355_v0 = vrot.slane %v2862_v32, 2  ;;  %2044 = vmatprep.mubr.msk.bf16.mxu0 %vm2363_vm2, %v2360_v1 }
  0xc4   : > { %v493_v2 = vpop.permute.xlu0 %492  ;;  %v563_v6 = vpop.permute.xlu1 %562  ;;  %v1334_v58 = vsel %vm1329_vm6, %v1331_v22, %v1333_v15 }
  0xc5   : > { %v598_v44 = vsel %vm578_vm3, %v2581_v48, %v493_v2  ;;  %v781_v10 = vsel %vm508_vm1, %v778_v47, %v780_v61  ;;  %v2878_v27 = vsel %vm1329_vm6, %v1353_v60, %v1355_v0  ;;  %v1337_v2 = vrot.slane %v2852_v53, 2 }
  0xc6   : > { %v2881_v13 = vsel %vm613_vm4, %v598_v44, %v563_v6  ;;  %2077 = vmatmul.mubr.msk.bf16.gmra.mrb[20].mxu1 %vm804_vm5, %v781_v10  ;;  %v1343_v10 = vrot.slane %v2740_v35, 2 }
  0xc7   : > { %v764_v59 = vrot.slane %v2881_v13, 1  ;;  %2080 = vmatprep.mubr.msk.bf16.mxu1 %vm2363_vm2, %v2360_v1  ;;  %v1339_v6 = vrot.slane %v2881_v13, 2 }
  0xc8   : > { %v694_v48 = vpop.permute.xlu0 %693  ;;  %v708_v38 = vpop.permute.xlu1 %707 }
  0xc9   : > { %v716_v23 = vsel %vm578_vm3, %v2595_v62, %v694_v48  ;;  %v765_v40 = vsel %vm508_vm1, %v762_v55, %v764_v59  ;;  %v1347_v48 = vrot.slane %v2778_v45, 2 }
  0xca   : > { %v724_v25 = vsel %vm613_vm4, %v716_v23, %v708_v38  ;;  %2045 = vmatmul.mubr.msk.bf16.gmra.mrb[24].mxu0 %vm804_vm5, %v765_v40  ;;  %v1349_v38 = vrot.slane %v2802_v5, 2  ;;  %v1351_v23 = vrot.slane %v2822_v52, 2 }
  0xcb   : > { %v782_v26 = vrot.slane %v724_v25, 1  ;;  %2048 = vmatprep.mubr.msk.bf16.mxu0 %vm2363_vm2, %v2360_v1 }
  0xcc   : > { %v495_v7 = vpop.permute.xlu0 %494  ;;  %v565_v18 = vpop.permute.xlu1 %564  ;;  %v1354_v40 = vsel %vm1329_vm6, %v1351_v23, %v1353_v60 }
  0xcd   : > { %v600_v29 = vsel %vm578_vm3, %v2607_v17, %v495_v7  ;;  %v783_v30 = vsel %vm508_vm1, %v780_v61, %v782_v26 }
  0xce   : > { %v2898_v8 = vsel %vm613_vm4, %v600_v29, %v565_v18  ;;  %2081 = vmatmul.mubr.msk.bf16.gmra.mrb[24].mxu1 %vm804_vm5, %v783_v30 }
  0xcf   : > { %v766_v31 = vrot.slane %v2898_v8, 1  ;;  %2084 = vmatprep.mubr.msk.bf16.mxu1 %vm2363_vm2, %v2360_v1  ;;  %v1341_v44 = vrot.slane %v2898_v8, 2 }
  0xd0   : > { %v696_v37 = vpop.permute.xlu0 %695  ;;  %v710_v4 = vpop.permute.xlu1 %709 }
  0xd1   : > { %v718_v3 = vsel %vm578_vm3, %v2619_v28, %v696_v37  ;;  %v767_v42 = vsel %vm508_vm1, %v764_v59, %v766_v31  ;;  %v769_v47 = vsel %vm508_vm1, %v766_v31, %v768_v41  ;;  %v1332_v41 = vsel %vm1329_vm6, %v1330_v51, %v1331_v22 }
  0xd2   : > { %v726_v17 = vsel %vm613_vm4, %v718_v3, %v710_v4  ;;  %2049 = vmatmul.mubr.msk.bf16.gmra.mrb[28].mxu0 %vm804_vm5, %v767_v42  ;;  %v1345_v59 = vrot.slane %v2737_v34, 2 }
  0xd3   : > { %v784_v43 = vrot.slane %v726_v17, 1  ;;  %2052 = vmatprep.mubr.msk.bf16.mxu0 %vm2363_vm2, %v2360_v1 }
  0xd4   : > { %v475_v46 = vpop.permute.xlu0 %474  ;;  %v545_v50 = vpop.permute.xlu1 %544 }
  0xd5   : > { %v785_v21 = vsel %vm508_vm1, %v782_v26, %v784_v43  ;;  %v580_v28 = vsel %vm578_vm3, %v2636_v49, %v475_v46 }
  0xd6   : > { %2085 = vmatmul.mubr.msk.bf16.gmra.mrb[28].mxu1 %vm804_vm5, %v785_v21  ;;  %v615_v9 = vsel %vm613_vm4, %v580_v28, %v545_v50 }
  0xd7   : > { %2094 = vmatprep.mubr.msk.bf16.mxu1 %vm2363_vm2, %v2360_v1 }
  0xd8   : > { %v477_v55 = vpop.permute.xlu0 %476  ;;  %v547_v57 = vpop.permute.xlu1 %546 }
  0xd9   : > { %v582_v49 = vsel %vm578_vm3, %v2644_v54, %v477_v55  ;;  %v1335_v54 = vrot.slane %v2832_v56, 2 }
  0xda   : > { %2053 = vmatmul.mubr.msk.bf16.gmra.mrb[32].mxu0 %vm804_vm5, %v769_v47  ;;  %v617_v33 = vsel %vm613_vm4, %v582_v49, %v547_v57 }
  0xdb   : > { %2168 = vmatprep.mubr.msk.bf16.mxu0 %vm2363_vm2, %v2360_v1  ;;  %v1336_v61 = vsel %vm1329_vm6, %v1333_v15, %v1335_v54 }
  0xdc   : > { %v1282_v25 = vpop.permute.xlu0 %1281 }
  0xdd   : > { %v1304_v26 = vsel %vm578_vm3, %v2595_v62, %v1282_v25 }
  0xde   : > { %2095 = vmatmul.mubr.msk.bf16.vlgmr.msra.gmra.mrb[32].mxu1 %vm804_vm5, %v615_v9 }
  0xdf   : > { %2098 = vmatprep.mubr.msk.bf16.mxu1 %vm2363_vm2, %v2360_v1 }
  0xe0   : > { %v1284_v60 = vpop.permute.xlu0 %1283 }
  0xe1   : > { %v1306_v62 = vsel %vm578_vm3, %v2663_v19, %v1284_v60 }
  0xe2   : > { %2169 = vmatmul.mubr.msk.bf16.vlgmr.msra.gmra.mrb[36].mxu0 %vm804_vm5, %v1332_v41 }
  0xe3   : > { %2172 = vmatprep.mubr.msk.bf16.mxu0 %vm2363_vm2, %v2360_v1 }
  0xe4   : > { %v1286_v29 = vpop.permute.xlu0 %1285 }
  0xe5   : > { %v1308_v19 = vsel %vm578_vm3, %v2668_v20, %v1286_v29 }
  0xe6   : > { %2099 = vmatmul.mubr.msk.bf16.gmra.mrb[36].mxu1 %vm804_vm5, %v617_v33 }
  0xe7   : > { %2102 = vmatprep.mubr.msk.bf16.mxu1 %vm2363_vm2, %v2360_v1 }
  0xe8   : > { %v1288_v32 = vpop.permute.xlu0 %1287 }
  0xe9   : > { %v1310_v20 = vsel %vm578_vm3, %v2684_v36, %v1288_v32 }
  0xea   : > { %2173 = vmatmul.mubr.msk.bf16.gmra.mrb[40].mxu0 %vm804_vm5, %v1334_v58 }
  0xeb   : > { %2176 = vmatprep.mubr.msk.bf16.mxu0 %vm2363_vm2, %v2360_v1 }
  0xee   : > { %2103 = vmatmul.mubr.msk.bf16.gmra.mrb[40].mxu1 %vm804_vm5, %v2719_v16  ;;  %v1338_v16 = vsel %vm1329_vm6, %v1335_v54, %v1337_v2 }
  0xef   : > { %2106 = vmatprep.mubr.msk.bf16.mxu1 %vm2363_vm2, %v2360_v1 }
  0xf2   : > { %2177 = vmatmul.mubr.msk.bf16.gmra.mrb[44].mxu0 %vm804_vm5, %v1336_v61 }
  0xf3   : > { %2180 = vmatprep.mubr.msk.bf16.mxu0 %vm2363_vm2, %v2360_v1 }
  0xf6   : > { %2107 = vmatmul.mubr.msk.bf16.gmra.mrb[44].mxu1 %vm804_vm5, %v2724_v24  ;;  %v1340_v24 = vsel %vm1329_vm6, %v1337_v2, %v1339_v6 }
  0xf7   : > { %2110 = vmatprep.mubr.msk.bf16.mxu1 %vm2363_vm2, %v2360_v1 }
  0xfa   : > { %2181 = vmatmul.mubr.msk.bf16.gmra.mrb[48].mxu0 %vm804_vm5, %v1338_v16 }
  0xfb   : > { %2184 = vmatprep.mubr.msk.bf16.mxu0 %vm2363_vm2, %v2360_v1 }
  0xfe   : > { %2111 = vmatmul.mubr.msk.bf16.gmra.mrb[48].mxu1 %vm804_vm5, %v2760_v12  ;;  %v1342_v12 = vsel %vm1329_vm6, %v1339_v6, %v1341_v44 }
  0xff   : > { %2114 = vmatprep.mubr.msk.bf16.mxu1 %vm2363_vm2, %v2360_v1 }
 0x102   : > { %2185 = vmatmul.mubr.msk.bf16.gmra.mrb[52].mxu0 %vm804_vm5, %v1340_v24 }
 0x103   : > { %2188 = vmatprep.mubr.msk.bf16.mxu0 %vm2363_vm2, %v2360_v1 }
 0x106   : > { %2115 = vmatmul.mubr.msk.bf16.gmra.mrb[52].mxu1 %vm804_vm5, %v2792_v63  ;;  %v1344_v63 = vsel %vm1329_vm6, %v1341_v44, %v1343_v10 }
 0x107   : > { %2118 = vmatprep.mubr.msk.bf16.mxu1 %vm2363_vm2, %v2360_v1 }
 0x10a   : > { %2189 = vmatmul.mubr.msk.bf16.gmra.mrb[56].mxu0 %vm804_vm5, %v1342_v12 }
 0x10b   : > { %2192 = vmatprep.mubr.msk.bf16.mxu0 %vm2363_vm2, %v2360_v1 }
 0x10e   : > { %2119 = vmatmul.mubr.msk.bf16.gmra.mrb[56].mxu1 %vm804_vm5, %v2812_v39  ;;  %v1346_v39 = vsel %vm1329_vm6, %v1343_v10, %v1345_v59 }
 0x10f   : > { %2122 = vmatprep.mubr.msk.bf16.mxu1 %vm2363_vm2, %v2360_v1 }
 0x112   : > { %2193 = vmatmul.mubr.msk.bf16.gmra.mrb[60].mxu0 %vm804_vm5, %v1344_v63 }
 0x113   : > { %2196 = vmatprep.mubr.msk.bf16.mxu0 %vm2363_vm2, %v2360_v1 }
 0x116   : > { %2123 = vmatmul.mubr.msk.bf16.gmra.mrb[60].mxu1 %vm804_vm5, %v2832_v56  ;;  %v1348_v56 = vsel %vm1329_vm6, %v1345_v59, %v1347_v48 }
 0x117   : > { %2126 = vmatprep.mubr.msk.bf16.mxu1 %vm2363_vm2, %v2360_v1 }
 0x11a   : > { %2197 = vmatmul.mubr.msk.bf16.gmra.mrb[64].mxu0 %vm804_vm5, %v1346_v39 }
 0x11b   : > { %2200 = vmatprep.mubr.msk.bf16.mxu0 %vm2363_vm2, %v2360_v1 }
 0x11e   : > { %2127 = vmatmul.mubr.msk.bf16.gmra.mrb[64].mxu1 %vm804_vm5, %v2852_v53  ;;  %v1350_v53 = vsel %vm1329_vm6, %v1347_v48, %v1349_v38 }
 0x11f   : > { %2130 = vmatprep.mubr.msk.bf16.mxu1 %vm2363_vm2, %v2360_v1 }
 0x122   : > { %2201 = vmatmul.mubr.msk.bf16.gmra.mrb[68].mxu0 %vm804_vm5, %v1348_v56 }
 0x123   : > { %2204 = vmatprep.mubr.msk.bf16.mxu0 %vm2363_vm2, %v2360_v1 }
 0x126   : > { %2131 = vmatmul.mubr.msk.bf16.gmra.mrb[68].mxu1 %vm804_vm5, %v2881_v13  ;;  %v1352_v13 = vsel %vm1329_vm6, %v1349_v38, %v1351_v23 }
 0x127   : > { %2134 = vmatprep.mubr.msk.bf16.mxu1 %vm2363_vm2, %v2360_v1 }
 0x12a   : > { %2205 = vmatmul.mubr.msk.bf16.gmra.mrb[72].mxu0 %vm804_vm5, %v1350_v53 }
 0x12b   : > { %2208 = vmatprep.mubr.msk.bf16.mxu0 %vm2363_vm2, %v2360_v1 }
 0x12e   : > { %2135 = vmatmul.mubr.msk.bf16.gmra.mrb[72].mxu1 %vm804_vm5, %v2898_v8 }
 0x12f   : > { %2138 = vmatprep.mubr.msk.bf16.mxu1 %vm2363_vm2, %v2360_v1 }
 0x132   : > { %2209 = vmatmul.mubr.msk.bf16.gmra.mrb[76].mxu0 %vm804_vm5, %v1352_v13 }
 0x133   : > { %2212 = vmatprep.mubr.msk.bf16.mxu0 %vm2363_vm2, %v2360_v1 }
 0x136   : > { %2139 = vmatmul.mubr.msk.bf16.gmra.mrb[76].mxu1 %vm804_vm5, %v2740_v35  ;;  %v1296_v35 = vpop.permute.xlu1 %1295 }
 0x137   : > { %2142 = vmatprep.mubr.msk.bf16.mxu1 %vm2363_vm2, %v2360_v1  ;;  %v1312_v11 = vsel %vm613_vm4, %v1304_v26, %v1296_v35 }
 0x138   : > { %v1357_v7 = vrot.slane %v1312_v11, 2 }
 0x13a   : > { %2213 = vmatmul.mubr.msk.bf16.gmra.mrb[80].mxu0 %vm804_vm5, %v1354_v40  ;;  %v1358_v18 = vsel %vm1329_vm6, %v1355_v0, %v1357_v7 }
 0x13b   : > { %2216 = vmatprep.mubr.msk.bf16.mxu0 %vm2363_vm2, %v2360_v1 }
 0x13e   : > { %2143 = vmatmul.mubr.msk.bf16.gmra.mrb[80].mxu1 %vm804_vm5, %v2737_v34  ;;  %v1298_v34 = vpop.permute.xlu1 %1297 }
 0x13f   : > { %2146 = vmatprep.mubr.msk.bf16.mxu1 %vm2363_vm2, %v2360_v1 }
 0x142   : > { %2217 = vmatmul.mubr.msk.bf16.gmra.mrb[84].mxu0 %vm804_vm5, %v2878_v27  ;;  %v1314_v27 = vsel %vm613_vm4, %v1306_v62, %v1298_v34  ;;  %v1300_v30 = vpop.permute.xlu1 %1299 }
 0x143   : > { %2220 = vmatprep.mubr.msk.bf16.mxu0 %vm2363_vm2, %v2360_v1  ;;  %v1316_v8 = vsel %vm613_vm4, %v1308_v19, %v1300_v30 }
 0x144   : > { %v1361_v37 = vrot.slane %v1316_v8, 2 }
 0x146   : > { %2147 = vmatmul.mubr.msk.bf16.gmra.mrb[84].mxu1 %vm804_vm5, %v2778_v45  ;;  %v1359_v45 = vrot.slane %v1314_v27, 2  ;;  %v507_v31 = vpop.permute.xlu1 %506 }
 0x147   : > { %2150 = vmatprep.mubr.msk.bf16.mxu1 %vm2363_vm2, %v2360_v1  ;;  %v612_v4 = vsel %vm578_vm3, %v2533_v14, %v507_v31 }
 0x148   : > { %v1360_v0 = vsel %vm1329_vm6, %v1357_v7, %v1359_v45  ;;  %v1362_v42 = vsel %vm1329_vm6, %v1359_v45, %v1361_v37 }
 0x14a   : > { %2221 = vmatmul.mubr.msk.bf16.gmra.mrb[88].mxu0 %vm804_vm5, %v1358_v18  ;;  %v577_v3 = vpop.permute.xlu1 %576 }
 0x14b   : > { %2224 = vmatprep.mubr.msk.bf16.mxu0 %vm2363_vm2, %v2360_v1  ;;  %v647_v43 = vsel %vm613_vm4, %v612_v4, %v577_v3 }
 0x14e   : > { %2151 = vmatmul.mubr.msk.bf16.gmra.mrb[88].mxu1 %vm804_vm5, %v2802_v5  ;;  %v1302_v5 = vpop.permute.xlu0 %1301 }
 0x14f   : > { %2154 = vmatprep.mubr.msk.bf16.mxu1 %vm2363_vm2, %v2360_v1  ;;  %v1318_v17 = vsel %vm613_vm4, %v1310_v20, %v1302_v5 }
 0x150   : > { %v1363_v36 = vrot.slane %v1318_v17, 2 }
 0x152   : > { %2225 = vmatmul.mubr.msk.bf16.gmra.mrb[92].mxu0 %vm804_vm5, %v1360_v0 }
 0x153   : > { %2228 = vmatprep.mubr.msk.bf16.mxu0 %vm2363_vm2, %v2360_v1 }
 0x156   : > { %2155 = vmatmul.mubr.msk.bf16.gmra.mrb[92].mxu1 %vm804_vm5, %v2822_v52  ;;  %v1364_v52 = vsel %vm1329_vm6, %v1361_v37, %v1363_v36 }
 0x157   : > { %2158 = vmatprep.mubr.msk.bf16.mxu1 %vm2363_vm2, %v2360_v1 }
 0x15a   : > { %2229 = vmatmul.mubr.msk.bf16.gmra.mrb[96].mxu0 %vm804_vm5, %v1362_v42 }
 0x15b   : > { %2232 = vmatprep.mubr.msk.bf16.mxu0 %vm2363_vm2, %v2360_v1 }
 0x15e   : > { %2159 = vmatmul.mubr.msk.bf16.gmra.mrb[96].mxu1 %vm804_vm5, %v647_v43 }
 0x162   : > { %2233 = vmatmul.mubr.msk.bf16.gmra.mrb[100].mxu0 %vm804_vm5, %v1364_v52 }
 0x16d   : > { %v3087_v14 = vpop.f32.mrb[0].mxu0 }
 0x16e   : > { %v2022_v21 = vpop.f32.mrb[1].mxu0 }
 0x16f   : > { %v3089_v46 = vpop.f32.mrb[2].mxu0 }
 0x170   : > { %v2023_v28 = vpop.f32.mrb[3].mxu0 }
 0x171   : > { %v3091_v47 = vpop.f32.mrb[0].mxu1 }
 0x172   : > { %v2058_v50 = vpop.f32.mrb[1].mxu1 }
 0x173   : > { %v3093_v9 = vpop.f32.mrb[2].mxu1 }
 0x174   : > { %v2059_v22 = vpop.f32.mrb[3].mxu1 }
 0x175   : > { %v3095_v1 = vpop.f32.mrb[4].mxu0 }
 0x176   : > { %v2026_v51 = vpop.f32.mrb[5].mxu0 }
 0x177   : > { %v3097_v55 = vpop.f32.mrb[6].mxu0 }
 0x178   : > { %v2027_v49 = vpop.f32.mrb[7].mxu0 }
 0x179   : > { %v3099_v41 = vpop.f32.mrb[4].mxu1 }
 0x17a   : > { %v2062_v57 = vpop.f32.mrb[5].mxu1 }
 0x17b   : > { %v3101_v33 = vpop.f32.mrb[6].mxu1 }
 0x17c   : > { %v2063_v15 = vpop.f32.mrb[7].mxu1 }
 0x17d   : > { %v3103_v58 = vpop.f32.mrb[8].mxu0 }
 0x17e   : > { %v2030_v54 = vpop.f32.mrb[9].mxu0 }
 0x17f   : > { %v3105_v61 = vpop.f32.mrb[10].mxu0 }
 0x180   : > { %v2031_v2 = vpop.f32.mrb[11].mxu0 }
 0x181   : > { %v3107_v16 = vpop.f32.mrb[8].mxu1 }
 0x182   : > { %v2066_v6 = vpop.f32.mrb[9].mxu1 }
 0x183   : > { %v3109_v24 = vpop.f32.mrb[10].mxu1 }
 0x184   : > { %v2067_v44 = vpop.f32.mrb[11].mxu1 }
 0x185   : > { %v3111_v12 = vpop.f32.mrb[12].mxu0  ;;  %v3162_v44 = vld [vmem:[%s3328_s2] ss:$0 sm:$0xff] }
 0x186   : > { %v2034_v10 = vpop.f32.mrb[13].mxu0 }
 0x187   : > { %v3113_v63 = vpop.f32.mrb[14].mxu0 }
 0x188   : > { %v2035_v59 = vpop.f32.mrb[15].mxu0 }
 0x189   : > { %v3115_v39 = vpop.f32.mrb[12].mxu1 }
 0x18a   : > { %v2070_v48 = vpop.f32.mrb[13].mxu1 }
 0x18b   : > { %v3117_v56 = vpop.f32.mrb[14].mxu1 }
 0x18c   : > { %v2071_v38 = vpop.f32.mrb[15].mxu1 }
 0x18d   : > { %v3119_v53 = vpop.f32.mrb[16].mxu0 }
 0x18e   : > { %v2038_v23 = vpop.f32.mrb[17].mxu0 }
 0x18f   : > { %v3121_v13 = vpop.f32.mrb[18].mxu0 }
 0x190   : > { %v2039_v40 = vpop.f32.mrb[19].mxu0 }
 0x191   : > { %v3123_v25 = vpop.f32.mrb[16].mxu1 }
 0x192   : > { %v2074_v26 = vpop.f32.mrb[17].mxu1 }
 0x193   : > { %v3125_v35 = vpop.f32.mrb[18].mxu1 }
 0x194   : > { %v2075_v11 = vpop.f32.mrb[19].mxu1 }
 0x195   : > { %v3127_v60 = vpop.f32.mrb[20].mxu0 }
 0x196   : > { %v2042_v7 = vpop.f32.mrb[21].mxu0 }
 0x197   : > { %v3129_v62 = vpop.f32.mrb[22].mxu0 }
 0x198   : > { %v2043_v34 = vpop.f32.mrb[23].mxu0 }
 0x199   : > { %v3131_v18 = vpop.f32.mrb[20].mxu1 }
 0x19a   : > { %v2078_v27 = vpop.f32.mrb[21].mxu1 }
 0x19b   : > { %v3133_v29 = vpop.f32.mrb[22].mxu1 }
 0x19c   : > { %v2079_v45 = vpop.f32.mrb[23].mxu1 }
 0x19d   : > { %v3135_v30 = vpop.f32.mrb[24].mxu0 }
 0x19e   : > { %v2046_v19 = vpop.f32.mrb[25].mxu0 }
 0x19f   : > { %v3137_v32 = vpop.f32.mrb[26].mxu0 }
 0x1a0   : > { %v2047_v0 = vpop.f32.mrb[27].mxu0 }
 0x1a1   : > { %v3139_v8 = vpop.f32.mrb[24].mxu1 }
 0x1a2   : > { %v2082_v31 = vpop.f32.mrb[25].mxu1 }
 0x1a3   : > { %v3141_v37 = vpop.f32.mrb[26].mxu1 }
 0x1a4   : > { %v2083_v20 = vpop.f32.mrb[27].mxu1 }
 0x1a5   : > { %v3144_v5 = vpop.f32.mrb[28].mxu0 }
 0x1a6   : > { %v2050_v4 = vpop.f32.mrb[29].mxu0 }
 0x1a7   : > { %v3146_v3 = vpop.f32.mrb[30].mxu0 }
 0x1a8   : > { %v2051_v42 = vpop.f32.mrb[31].mxu0 }
 0x1a9   : > { %v3148_v17 = vpop.f32.mrb[28].mxu1 }
 0x1aa   : > { %v2086_v43 = vpop.f32.mrb[29].mxu1 }
 0x1ab   : > { %v3150_v36 = vpop.f32.mrb[30].mxu1 }
 0x1ac   : > { %v2087_v52 = vpop.f32.mrb[31].mxu1 }
 0x1ad   : > { %v3152_v21 = vpop.f32.mrb[32].mxu0 }
 0x1ae   : > { %v2054_v28 = vpop.f32.mrb[33].mxu0 }
 0x1af   : > { %v3155_v50 = vpop.f32.mrb[34].mxu0 }
 0x1b0   : > { %v2055_v22 = vpop.f32.mrb[35].mxu0 }
 0x1b1   : > { %v1111_v51 = vpop.f32.mrb[32].mxu1 }
 0x1b2   : > { %v1112_v49 = vadd.f32 %v1111_v51, %v3087_v14  ;;  %v2096_v57 = vpop.f32.mrb[33].mxu1 }
 0x1b3   : > { %v1114_v15 = vpop.f32.mrb[34].mxu1 }
 0x1b4   : > { %v1115_v54 = vadd.f32 %v1114_v15, %v3089_v46  ;;  %v2097_v2 = vpop.f32.mrb[35].mxu1 }
 0x1b5   : > { %v1468_v6 = vpop.f32.mrb[36].mxu0 }
 0x1b6   : > { %v1603_v10 = vadd.f32 %v1468_v6, %v1112_v49  ;;  %v2170_v59 = vpop.f32.mrb[37].mxu0 }
 0x1b7   : > { %v1471_v14 = vpop.f32.mrb[38].mxu0 }
 0x1b8   : > { %v1644_v46 = vadd.f32 %v3162_v44, %v1603_v10  ;;  %v1604_v48 = vadd.f32 %v1471_v14, %v1115_v54  ;;  %v2171_v38 = vpop.f32.mrb[39].mxu0 }
 0x1b9   : > { %v1119_v23 = vpop.f32.mrb[36].mxu1 }
 0x1ba   : > { %1679 = vst.msk [vmem:[%s3167_s7] sm:$0xff] %vm1678_vm7, %v1644_v46  ;;  %v1645_v40 = vadd.f32 %v3162_v44, %v1604_v48  ;;  %v1120_v26 = vadd.f32 %v1119_v23, %v3095_v1  ;;  %v2100_v11 = vpop.f32.mrb[37].mxu1 }
 0x1bb   : > { %v1122_v7 = vpop.f32.mrb[38].mxu1 }
 0x1bc   : > { %1680 = vst.msk [vmem:[%s3167_s7 + $0x8] sm:$0xff] %vm1678_vm7, %v1645_v40  ;;  %v1123_v34 = vadd.f32 %v1122_v7, %v3097_v55  ;;  %v2101_v27 = vpop.f32.mrb[39].mxu1 }
 0x1bd   : > { %v1476_v45 = vpop.f32.mrb[40].mxu0 }
 0x1be   : > { %v1605_v19 = vadd.f32 %v1476_v45, %v1120_v26  ;;  %v2174_v0 = vpop.f32.mrb[41].mxu0 }
 0x1bf   : > { %v1479_v31 = vpop.f32.mrb[42].mxu0 }
 0x1c0   : > { %v1646_v20 = vadd.f32 %v3162_v44, %v1605_v19  ;;  %v1606_v4 = vadd.f32 %v1479_v31, %v1123_v34  ;;  %v2175_v42 = vpop.f32.mrb[43].mxu0 }
 0x1c1   : > { %v1127_v43 = vpop.f32.mrb[40].mxu1 }
 0x1c2   : > { %1681 = vst.msk [vmem:[%s3167_s7 + $0x10] sm:$0xff] %vm1678_vm7, %v1646_v20  ;;  %v1647_v1 = vadd.f32 %v3162_v44, %v1606_v4  ;;  %v1128_v52 = vadd.f32 %v1127_v43, %v3103_v58  ;;  %v2104_v28 = vpop.f32.mrb[41].mxu1 }
 0x1c3   : > { %v1130_v22 = vpop.f32.mrb[42].mxu1 }
 0x1c4   : > { %1682 = vst.msk [vmem:[%s3167_s7 + $0x18] sm:$0xff] %vm1678_vm7, %v1647_v1  ;;  %v1131_v55 = vadd.f32 %v1130_v22, %v3105_v61  ;;  %v2105_v51 = vpop.f32.mrb[43].mxu1 }
 0x1c5   : > { %v1484_v49 = vpop.f32.mrb[44].mxu0 }
 0x1c6   : > { %v1607_v57 = vadd.f32 %v1484_v49, %v1128_v52  ;;  %v2178_v15 = vpop.f32.mrb[45].mxu0 }
 0x1c7   : > { %v1487_v54 = vpop.f32.mrb[46].mxu0 }
 0x1c8   : > { %v1648_v2 = vadd.f32 %v3162_v44, %v1607_v57  ;;  %v1608_v6 = vadd.f32 %v1487_v54, %v1131_v55  ;;  %v2179_v10 = vpop.f32.mrb[47].mxu0 }
 0x1c9   : > { %v1135_v59 = vpop.f32.mrb[44].mxu1 }
 0x1ca   : > { %1918 = vst.msk [vmem:[%s3167_s7 + $0x1e] sm:$0xfc] %vm1684_vm8, %v1648_v2  ;;  %v1649_v58 = vadd.f32 %v3162_v44, %v1608_v6  ;;  %v1136_v14 = vadd.f32 %v1135_v59, %v3111_v12  ;;  %v2108_v61 = vpop.f32.mrb[45].mxu1 }
 0x1cb   : > { %v1138_v46 = vpop.f32.mrb[46].mxu1 }
 0x1cc   : > { %1919 = vst.msk [vmem:[%s3167_s7 + $0x26] sm:$0xff] %vm1678_vm7, %v1649_v58  ;;  %v1139_v48 = vadd.f32 %v1138_v46, %v3113_v63  ;;  %v2109_v38 = vpop.f32.mrb[47].mxu1 }
 0x1cd   : > { %v1492_v23 = vpop.f32.mrb[48].mxu0 }
 0x1ce   : > { %v1609_v40 = vadd.f32 %v1492_v23, %v1136_v14  ;;  %v2182_v26 = vpop.f32.mrb[49].mxu0 }
 0x1cf   : > { %v1495_v11 = vpop.f32.mrb[50].mxu0 }
 0x1d0   : > { %v1650_v7 = vadd.f32 %v3162_v44, %v1609_v40  ;;  %v1610_v34 = vadd.f32 %v1495_v11, %v1139_v48  ;;  %v2183_v27 = vpop.f32.mrb[51].mxu0 }
 0x1d1   : > { %v1143_v45 = vpop.f32.mrb[48].mxu1 }
 0x1d2   : > { %1920 = vst.msk [vmem:[%s3167_s7 + $0x2e] sm:$0xff] %vm1678_vm7, %v1650_v7  ;;  %v1651_v12 = vadd.f32 %v3162_v44, %v1610_v34  ;;  %v1144_v19 = vadd.f32 %v1143_v45, %v3119_v53  ;;  %v2112_v0 = vpop.f32.mrb[49].mxu1 }
 0x1d3   : > { %v1146_v63 = vpop.f32.mrb[50].mxu1 }
 0x1d4   : > { %1921 = vst.msk [vmem:[%s3167_s7 + $0x36] sm:$0xff] %vm1678_vm7, %v1651_v12  ;;  %v1147_v31 = vadd.f32 %v1146_v63, %v3121_v13  ;;  %v2113_v20 = vpop.f32.mrb[51].mxu1 }
 0x1d5   : > { %v1500_v4 = vpop.f32.mrb[52].mxu0 }
 0x1d6   : > { %v1611_v42 = vadd.f32 %v1500_v4, %v1144_v19  ;;  %v2186_v43 = vpop.f32.mrb[53].mxu0 }
 0x1d7   : > { %v1503_v1 = vpop.f32.mrb[54].mxu0 }
 0x1d8   : > { %v1652_v52 = vadd.f32 %v3162_v44, %v1611_v42  ;;  %v1612_v28 = vadd.f32 %v1503_v1, %v1147_v31  ;;  %v2187_v53 = vpop.f32.mrb[55].mxu0 }
 0x1d9   : > { %v1151_v22 = vpop.f32.mrb[52].mxu1 }
 0x1da   : > { %1922 = vst.msk [vmem:[%s3167_s7 + $0x3e] sm:$0x3] %vm1689_vm9, %v1652_v52  ;;  %v1653_v13 = vadd.f32 %v3162_v44, %v1612_v28  ;;  %v1152_v55 = vadd.f32 %v1151_v22, %v3127_v60  ;;  %v2116_v51 = vpop.f32.mrb[53].mxu1 }
 0x1db   : > { %1923 = vst.msk [vmem:[%s3167_s7 + $0x3c] sm:$0xf0] %vm1692_vm10, %v1652_v52  ;;  %v1154_v49 = vpop.f32.mrb[54].mxu1 }
 0x1dc   : > { %1924 = vst.msk [vmem:[%s3167_s7 + $0x44] sm:$0xff] %vm1678_vm7, %v1653_v13  ;;  %v1155_v57 = vadd.f32 %v1154_v49, %v3129_v62  ;;  %v2117_v15 = vpop.f32.mrb[55].mxu1 }
 0x1dd   : > { %v1508_v54 = vpop.f32.mrb[56].mxu0 }
 0x1de   : > { %v1613_v2 = vadd.f32 %v1508_v54, %v1152_v55  ;;  %v2190_v6 = vpop.f32.mrb[57].mxu0 }
 0x1df   : > { %v1511_v10 = vpop.f32.mrb[58].mxu0 }
 0x1e0   : > { %v1654_v59 = vadd.f32 %v3162_v44, %v1613_v2  ;;  %v1614_v58 = vadd.f32 %v1511_v10, %v1155_v57  ;;  %v2191_v14 = vpop.f32.mrb[59].mxu0 }
 0x1e1   : > { %v1159_v61 = vpop.f32.mrb[56].mxu1 }
 0x1e2   : > { %1925 = vst.msk [vmem:[%s3167_s7 + $0x4c] sm:$0xff] %vm1678_vm7, %v1654_v59  ;;  %v1655_v60 = vadd.f32 %v3162_v44, %v1614_v58  ;;  %v1160_v46 = vadd.f32 %v1159_v61, %v3135_v30  ;;  %v2120_v48 = vpop.f32.mrb[57].mxu1 }
 0x1e3   : > { %v1162_v62 = vpop.f32.mrb[58].mxu1 }
 0x1e4   : > { %1926 = vst.msk [vmem:[%s3167_s7 + $0x54] sm:$0xff] %vm1678_vm7, %v1655_v60  ;;  %v1163_v38 = vadd.f32 %v1162_v62, %v3137_v32  ;;  %v2121_v23 = vpop.f32.mrb[59].mxu1 }
 0x1e5   : > { %v1516_v40 = vpop.f32.mrb[60].mxu0 }
 0x1e6   : > { %v1615_v26 = vadd.f32 %v1516_v40, %v1160_v46  ;;  %v2194_v11 = vpop.f32.mrb[61].mxu0 }
 0x1e7   : > { %v1519_v7 = vpop.f32.mrb[62].mxu0 }
 0x1e8   : > { %v1656_v34 = vadd.f32 %v3162_v44, %v1615_v26  ;;  %v1616_v27 = vadd.f32 %v1519_v7, %v1163_v38  ;;  %v2195_v30 = vpop.f32.mrb[63].mxu0 }
 0x1e9   : > { %v1167_v45 = vpop.f32.mrb[60].mxu1 }
 0x1ea   : > { %1927 = vst.msk [vmem:[%s3167_s7 + $0x5c] sm:$0xf] %vm1697_vm11, %v1656_v34  ;;  %v1657_v32 = vadd.f32 %v3162_v44, %v1616_v27  ;;  %v1168_v12 = vadd.f32 %v1167_v45, %v3144_v5  ;;  %v2124_v19 = vpop.f32.mrb[61].mxu1 }
 0x1eb   : > { %1928 = vst.msk [vmem:[%s3167_s7 + $0x5a] sm:$0xc0] %vm1700_vm12, %v1656_v34  ;;  %v1170_v0 = vpop.f32.mrb[62].mxu1 }
 0x1ec   : > { %1929 = vst.msk [vmem:[%s3167_s7 + $0x62] sm:$0xff] %vm1678_vm7, %v1657_v32  ;;  %v1171_v63 = vadd.f32 %v1170_v0, %v3146_v3  ;;  %v2125_v31 = vpop.f32.mrb[63].mxu1 }
 0x1ed   : > { %v1524_v20 = vpop.f32.mrb[64].mxu0 }
 0x1ee   : > { %v1617_v4 = vadd.f32 %v1524_v20, %v1168_v12  ;;  %v2198_v42 = vpop.f32.mrb[65].mxu0 }
 0x1ef   : > { %v1527_v43 = vpop.f32.mrb[66].mxu0 }
 0x1f0   : > { %v1658_v1 = vadd.f32 %v3162_v44, %v1617_v4  ;;  %v1618_v52 = vadd.f32 %v1527_v43, %v1171_v63  ;;  %v2199_v28 = vpop.f32.mrb[67].mxu0 }
 0x1f1   : > { %v1175_v53 = vpop.f32.mrb[64].mxu1 }
 0x1f2   : > { %1930 = vst.msk [vmem:[%s3167_s7 + $0x6a] sm:$0xff] %vm1678_vm7, %v1658_v1  ;;  %v1659_v5 = vadd.f32 %v3162_v44, %v1618_v52  ;;  %v1176_v22 = vadd.f32 %v1175_v53, %v3152_v21  ;;  %v2128_v13 = vpop.f32.mrb[65].mxu1 }
 0x1f3   : > { %v1178_v55 = vpop.f32.mrb[66].mxu1 }
 0x1f4   : > { %1931 = vst.msk [vmem:[%s3167_s7 + $0x72] sm:$0xff] %vm1678_vm7, %v1659_v5  ;;  %v1179_v3 = vadd.f32 %v1178_v55, %v3155_v50  ;;  %v2129_v51 = vpop.f32.mrb[67].mxu1 }
 0x1f5   : > { %v1532_v49 = vpop.f32.mrb[68].mxu0 }
 0x1f6   : > { %v1619_v57 = vadd.f32 %v1532_v49, %v1176_v22  ;;  %v2202_v15 = vpop.f32.mrb[69].mxu0 }
 0x1f7   : > { %v1535_v54 = vpop.f32.mrb[70].mxu0 }
 0x1f8   : > { %v1660_v2 = vadd.f32 %v3162_v44, %v1619_v57  ;;  %v1620_v6 = vadd.f32 %v1535_v54, %v1179_v3  ;;  %v2203_v10 = vpop.f32.mrb[71].mxu0 }
 0x1f9   : > { %v1183_v59 = vpop.f32.mrb[68].mxu1 }
 0x1fa   : > { %1932 = vst.msk [vmem:[%s3167_s7 + $0x7a] sm:$0x3f] %vm1705_vm13, %v1660_v2  ;;  %v1661_v21 = vadd.f32 %v3162_v44, %v1620_v6  ;;  %v1184_v58 = vadd.f32 %v1183_v59, %v3091_v47  ;;  %v2132_v50 = vpop.f32.mrb[69].mxu1 }
 0x1fb   : > { %v1186_v14 = vpop.f32.mrb[70].mxu1 }
 0x1fc   : > { %1933 = vst.msk [vmem:[%s3167_s7 + $0x80] sm:$0xff] %vm1678_vm7, %v1661_v21  ;;  %v1187_v61 = vadd.f32 %v1186_v14, %v3093_v9  ;;  %v2133_v60 = vpop.f32.mrb[71].mxu1 }
 0x1fd   : > { %v1540_v46 = vpop.f32.mrb[72].mxu0 }
 0x1fe   : > { %v1621_v48 = vadd.f32 %v1540_v46, %v1184_v58  ;;  %v2206_v62 = vpop.f32.mrb[73].mxu0 }
 0x1ff   : > { %v1543_v38 = vpop.f32.mrb[74].mxu0 }
 0x200   : > { %v1662_v23 = vadd.f32 %v3162_v44, %v1621_v48  ;;  %v1622_v40 = vadd.f32 %v1543_v38, %v1187_v61  ;;  %v2207_v26 = vpop.f32.mrb[75].mxu0 }
 0x201   : > { %v1191_v11 = vpop.f32.mrb[72].mxu1 }
 0x202   : > { %1934 = vst.msk [vmem:[%s3167_s7 + $0x88] sm:$0xff] %vm1678_vm7, %v1662_v23  ;;  %v1663_v47 = vadd.f32 %v3162_v44, %v1622_v40  ;;  %v1192_v7 = vadd.f32 %v1191_v11, %v3099_v41  ;;  %v2136_v34 = vpop.f32.mrb[73].mxu1 }
 0x203   : > { %v1194_v27 = vpop.f32.mrb[74].mxu1 }
 0x204   : > { %1935 = vst.msk [vmem:[%s3167_s7 + $0x90] sm:$0xff] %vm1678_vm7, %v1663_v47  ;;  %v1195_v9 = vadd.f32 %v1194_v27, %v3101_v33  ;;  %v2137_v30 = vpop.f32.mrb[75].mxu1 }
 0x205   : > { %v1548_v45 = vpop.f32.mrb[76].mxu0 }
 0x206   : > { %v1623_v32 = vadd.f32 %v1548_v45, %v1192_v7  ;;  %v2210_v12 = vpop.f32.mrb[77].mxu0 }
 0x207   : > { %v1551_v19 = vpop.f32.mrb[78].mxu0 }
 0x208   : > { %v1664_v0 = vadd.f32 %v3162_v44, %v1623_v32  ;;  %v1624_v63 = vadd.f32 %v1551_v19, %v1195_v9  ;;  %v2211_v31 = vpop.f32.mrb[79].mxu0 }
 0x209   : > { %v1199_v20 = vpop.f32.mrb[76].mxu1 }
 0x20a   : > { %1936 = vst.msk [vmem:[%s3167_s7 + $0x98] sm:$0xff] %vm1678_vm7, %v1664_v0  ;;  %v1665_v41 = vadd.f32 %v3162_v44, %v1624_v63  ;;  %v1200_v4 = vadd.f32 %v1199_v20, %v3107_v16  ;;  %v2140_v42 = vpop.f32.mrb[77].mxu1 }
 0x20b   : > { %v1202_v43 = vpop.f32.mrb[78].mxu1 }
 0x20c   : > { %1937 = vst.msk [vmem:[%s3167_s7 + $0x9e] sm:$0xfc] %vm1684_vm8, %v1665_v41  ;;  %v1203_v33 = vadd.f32 %v1202_v43, %v3109_v24  ;;  %v2141_v1 = vpop.f32.mrb[79].mxu1 }
 0x20d   : > { %v1556_v52 = vpop.f32.mrb[80].mxu0 }
 0x20e   : > { %v1625_v28 = vadd.f32 %v1556_v52, %v1200_v4  ;;  %v2214_v53 = vpop.f32.mrb[81].mxu0 }
 0x20f   : > { %v1559_v5 = vpop.f32.mrb[82].mxu0 }
 0x210   : > { %v1666_v22 = vadd.f32 %v3162_v44, %v1625_v28  ;;  %v1626_v13 = vadd.f32 %v1559_v5, %v1203_v33  ;;  %v2215_v55 = vpop.f32.mrb[83].mxu0 }
 0x211   : > { %v1207_v3 = vpop.f32.mrb[80].mxu1 }
 0x212   : > { %1938 = vst.msk [vmem:[%s3167_s7 + $0xa6] sm:$0xff] %vm1678_vm7, %v1666_v22  ;;  %v1667_v16 = vadd.f32 %v3162_v44, %v1626_v13  ;;  %v1208_v51 = vadd.f32 %v1207_v3, %v3115_v39  ;;  %v2144_v49 = vpop.f32.mrb[81].mxu1 }
 0x213   : > { %v1210_v57 = vpop.f32.mrb[82].mxu1 }
 0x214   : > { %1939 = vst.msk [vmem:[%s3167_s7 + $0xae] sm:$0xff] %vm1678_vm7, %v1667_v16  ;;  %v1211_v24 = vadd.f32 %v1210_v57, %v3117_v56  ;;  %v2145_v15 = vpop.f32.mrb[83].mxu1 }
 0x215   : > { %v1564_v54 = vpop.f32.mrb[84].mxu0 }
 0x216   : > { %v1627_v2 = vadd.f32 %v1564_v54, %v1208_v51  ;;  %v2218_v6 = vpop.f32.mrb[85].mxu0 }
 0x217   : > { %v1567_v10 = vpop.f32.mrb[86].mxu0 }
 0x218   : > { %v1668_v59 = vadd.f32 %v3162_v44, %v1627_v2  ;;  %v1628_v21 = vadd.f32 %v1567_v10, %v1211_v24  ;;  %v2219_v58 = vpop.f32.mrb[87].mxu0 }
 0x219   : > { %v1215_v50 = vpop.f32.mrb[84].mxu1 }
 0x21a   : > { %1940 = vst.msk [vmem:[%s3167_s7 + $0xb6] sm:$0xff] %vm1678_vm7, %v1668_v59  ;;  %v1669_v39 = vadd.f32 %v3162_v44, %v1628_v21  ;;  %v1216_v14 = vadd.f32 %v1215_v50, %v3123_v25  ;;  %v2148_v61 = vpop.f32.mrb[85].mxu1 }
 0x21b   : > { %v1218_v56 = vpop.f32.mrb[86].mxu1 }
 0x21c   : > { %1941 = vst.msk [vmem:[%s3167_s7 + $0xbe] sm:$0x3] %vm1689_vm9, %v1669_v39  ;;  %v1219_v60 = vadd.f32 %v1218_v56, %v3125_v35  ;;  %v2149_v46 = vpop.f32.mrb[87].mxu1 }
 0x21d   : > { %1942 = vst.msk [vmem:[%s3167_s7 + $0xbc] sm:$0xf0] %vm1692_vm10, %v1669_v39  ;;  %v1572_v48 = vpop.f32.mrb[88].mxu0 }
 0x21e   : > { %v1629_v62 = vadd.f32 %v1572_v48, %v1216_v14  ;;  %v2222_v38 = vpop.f32.mrb[89].mxu0 }
 0x21f   : > { %v1575_v23 = vpop.f32.mrb[90].mxu0 }
 0x220   : > { %v1670_v40 = vadd.f32 %v3162_v44, %v1629_v62  ;;  %v1630_v26 = vadd.f32 %v1575_v23, %v1219_v60  ;;  %v2223_v11 = vpop.f32.mrb[91].mxu0 }
 0x221   : > { %v1223_v47 = vpop.f32.mrb[88].mxu1 }
 0x222   : > { %1943 = vst.msk [vmem:[%s3167_s7 + $0xc4] sm:$0xff] %vm1678_vm7, %v1670_v40  ;;  %v1671_v25 = vadd.f32 %v3162_v44, %v1630_v26  ;;  %v1224_v7 = vadd.f32 %v1223_v47, %v3131_v18  ;;  %v2152_v34 = vpop.f32.mrb[89].mxu1 }
 0x223   : > { %v1226_v27 = vpop.f32.mrb[90].mxu1 }
 0x224   : > { %1944 = vst.msk [vmem:[%s3167_s7 + $0xcc] sm:$0xff] %vm1678_vm7, %v1671_v25  ;;  %v1227_v35 = vadd.f32 %v1226_v27, %v3133_v29  ;;  %v2153_v9 = vpop.f32.mrb[91].mxu1 }
 0x225   : > { %v1580_v30 = vpop.f32.mrb[92].mxu0 }
 0x226   : > { %v1631_v45 = vadd.f32 %v1580_v30, %v1224_v7  ;;  %v2226_v32 = vpop.f32.mrb[93].mxu0 }
 0x227   : > { %v1583_v12 = vpop.f32.mrb[94].mxu0 }
 0x228   : > { %v1672_v19 = vadd.f32 %v3162_v44, %v1631_v45  ;;  %v1632_v0 = vadd.f32 %v1583_v12, %v1227_v35  ;;  %v2227_v63 = vpop.f32.mrb[95].mxu0 }
 0x229   : > { %v1231_v31 = vpop.f32.mrb[92].mxu1 }
 0x22a   : > { %1945 = vst.msk [vmem:[%s3167_s7 + $0xd4] sm:$0xff] %vm1678_vm7, %v1672_v19  ;;  %v1673_v18 = vadd.f32 %v3162_v44, %v1632_v0  ;;  %v1232_v20 = vadd.f32 %v1231_v31, %v3139_v8  ;;  %v2156_v41 = vpop.f32.mrb[93].mxu1 }
 0x22b   : > { %v1234_v29 = vpop.f32.mrb[94].mxu1 }
 0x22c   : > { %1946 = vst.msk [vmem:[%s3167_s7 + $0xdc] sm:$0xf] %vm1697_vm11, %v1673_v18  ;;  %v1235_v4 = vadd.f32 %v1234_v29, %v3141_v37  ;;  %v2157_v42 = vpop.f32.mrb[95].mxu1 }
 0x22d   : > { %1947 = vst.msk [vmem:[%s3167_s7 + $0xda] sm:$0xc0] %vm1700_vm12, %v1673_v18  ;;  %v1588_v43 = vpop.f32.mrb[96].mxu0 }
 0x22e   : > { %v1633_v33 = vadd.f32 %v1588_v43, %v1232_v20  ;;  %v2230_v1 = vpop.f32.mrb[97].mxu0 }
 0x22f   : > { %v1591_v52 = vpop.f32.mrb[98].mxu0 }
 0x230   : > { %v1674_v28 = vadd.f32 %v3162_v44, %v1633_v33  ;;  %v1634_v53 = vadd.f32 %v1591_v52, %v1235_v4  ;;  %v2231_v5 = vpop.f32.mrb[99].mxu0 }
 0x231   : > { %v1239_v22 = vpop.f32.mrb[96].mxu1 }
 0x232   : > { %1948 = vst.msk [vmem:[%s3167_s7 + $0xe2] sm:$0xff] %vm1678_vm7, %v1674_v28  ;;  %v1675_v8 = vadd.f32 %v3162_v44, %v1634_v53  ;;  %v1240_v13 = vadd.f32 %v1239_v22, %v3148_v17  ;;  %v2160_v55 = vpop.f32.mrb[97].mxu1 }
 0x233   : > { %v1242_v37 = vpop.f32.mrb[98].mxu1 }
 0x234   : > { %1949 = vst.msk [vmem:[%s3167_s7 + $0xea] sm:$0xff] %vm1678_vm7, %v1675_v8  ;;  %v1243_v3 = vadd.f32 %v1242_v37, %v3150_v36  ;;  %v2161_v16 = vpop.f32.mrb[99].mxu1 }
 0x235   : > { %v1596_v51 = vpop.f32.mrb[100].mxu0 }
 0x236   : > { %v1635_v49 = vadd.f32 %v1596_v51, %v1240_v13  ;;  %v2234_v57 = vpop.f32.mrb[101].mxu0 }
 0x237   : > { %v1599_v24 = vpop.f32.mrb[102].mxu0 }
 0x238   : > { %v1676_v15 = vadd.f32 %v3162_v44, %v1635_v49  ;;  %v1636_v54 = vadd.f32 %v1599_v24, %v1243_v3  ;;  %v2235_v2 = vpop.f32.mrb[103].mxu0 }
 0x23a   : > { %1950 = vst.msk [vmem:[%s3167_s7 + $0xf2] sm:$0xff] %vm1678_vm7, %v1676_v15  ;;  %v1677_v6 = vadd.f32 %v3162_v44, %v1636_v54 }
 0x23c   : > { %1951 = vst.msk [vmem:[%s3167_s7 + $0xfa] sm:$0x3f] %vm1705_vm13, %v1677_v6 }
 0x23d PF: > { %s13_s16 = sadd.s32 1, %s2358_s16   ;;  %s3330_s12 = smov %s2350_s14 }
 0x23e   : > { %p10_p7 = scmp.ge.s32.totalorder %s13_s16, 10   ;;  %s3331_s13 = smov %s2354_s15 }
 0x23f   : > { %s3332_s14 = smov %s3335_s17  ;;  %s3333_s15 = smov %s3339_s18 }
 0x240   :  { %12 = sbr.rel (!%p10_p7) target bundleno = 3 (0x3), region = 70 }

</bundles_post_ra>
